<compile_context>
chip_gen: v5e
topology: v5e:2x2
jax: 0.10.0
libtpu: 0.0.40
codegen_flags: <defaults>
</compile_context>

<pallas_src>
import functools
import math

import jax
import jax.numpy as jnp
import numpy as np
from jax.experimental import pallas as pl
from jax.experimental.pallas import tpu as pltpu


def _bacon_kernel(coords_ref, wf_ref, bf_ref, wlo_ref, blo_ref, wlast_ref,
                  blast_ref, out_ref, *, n_filters, hidden, out_size, in_size,
                  out_layers):
    """Fused BACON forward for one tile of points (points on lanes).

    coords_ref : (in_size, tm)            -- points on lanes
    wf_ref     : (F, H, in_size)          -- Fourier weights
    bf_ref     : (F, H, 1)
    wlo_ref    : (F-1, R, H)              -- rows [0:H]=Wl[j], [H:H+out]=Wo[j]
    blo_ref    : (F-1, R, 1)                 (R = H+out rounded up to 8)
    wlast_ref  : (out_size, H)            -- last layer's head
    blast_ref  : (out_size, 1)
    out_ref    : (n_out, out_size, tm)    -- lane-dense store along points
    """
    x = coords_ref[...]                              # (in_size, tm) f32

    def fourier(i):
        # Per-layer Fourier sine (H, tm): contraction depth in_size is tiny,
        # so a VPU broadcast-FMA beats an MXU push; sine goes to the EUP.
        # The (H,1) weight-column lane-broadcasts happen once per layer per
        # grid step (F*in_size total) -- cheap, nothing to hoist further.
        w = wf_ref[i]                                # (H, in_size)
        pre = w[:, 0:1] * x[0:1, :]
        for d in range(1, in_size):
            pre = pre + w[:, d:d + 1] * x[d:d + 1, :]
        return jnp.sin(pre + bf_ref[i])              # (H, tm)

    out = fourier(0)                                 # layer-0 activation
    for i in range(1, n_filters):
        # One fused MXU dot per layer: rows [0:H] are layer i's hidden linear,
        # rows [H:H+out] are layer (i-1)'s output head (both consume out_{i-1}).
        fused = jnp.dot(wlo_ref[i - 1], out,
                        preferred_element_type=jnp.float32) + blo_ref[i - 1]
        if (i - 1) in out_layers:
            slot = out_layers.index(i - 1)
            out_ref[slot] = fused[hidden:hidden + out_size, :].astype(
                out_ref.dtype)
        out = fourier(i) * fused[:hidden, :]

    last = n_filters - 1
    if last in out_layers:
        slot = out_layers.index(last)
        y = jnp.dot(wlast_ref[...], out,
                    preferred_element_type=jnp.float32) + blast_ref[...]
        out_ref[slot] = y.astype(out_ref.dtype)


def _choose_tm(n, requested=None, max_tm=4096, min_grid=4):
    """Pick the point-tile size: big (amortize ~0.35us/step), but keep >=4
    grid steps when there is enough work so both v7x TCs stay busy."""
    if requested is not None:
        if requested % 128 != 0:
            raise ValueError("tm must be a multiple of 128")
        return requested
    n128 = -(-n // 128) * 128
    tm = min(max_tm, n128)
    if n128 // tm < min_grid and n128 >= min_grid * 128:
        tm = -(-(n128 // min_grid) // 128) * 128
    return tm


def multiscale_bacon_forward(coords, wf, bf, wl, bl, wo, bo, output_layers,
                             tm=None, return_stacked=False):
    """Fused MultiscaleBACON forward.

    coords : (N, in_size)
    wf     : (F, H, in_size)   (PyTorch Linear layout: (out, in))
    bf     : (F, H)
    wl     : (F-1, H, H)
    bl     : (F-1, H)
    wo     : (F, out_size, H)
    bo     : (F, out_size)

    Returns list of [N, out_size] arrays (module semantics), or the stacked
    lane-dense (n_out, out_size, N) array if return_stacked=True.
    """
    N, in_size = coords.shape
    n_filters, hidden, _ = wf.shape
    out_size = wo.shape[1]

    # Only layers 1..F-1 can produce outputs (matches the reference forward);
    # output order follows ascending layer index.
    layers = tuple(sorted({int(i) for i in output_layers}
                          & set(range(1, n_filters))))
    n_out = len(layers)
    if n_out == 0 or n_filters < 2:
        return (jnp.zeros((0, out_size, N), jnp.float32)
                if return_stacked else [])

    tm = _choose_tm(N, tm)
    n_pad = -(-N // tm) * tm
    grid_steps = n_pad // tm

    # ---- layout plumbing (outside the kernel, negligible cost) ----
    coords_t = jnp.asarray(coords, jnp.float32).T            # (in_size, N)
    if n_pad != N:
        coords_t = jnp.pad(coords_t, ((0, 0), (0, n_pad - N)))
    bf_r = bf[:, :, None]                                     # (F, H, 1)

    # Fused per-layer LHS: [Wl[j]; Wo[j] (if layer j's head exists)], rows
    # zero-padded up to a multiple of 8 for clean sublane alignment.
    fused_rows = -(-(hidden + out_size) // 8) * 8
    wlo = jnp.zeros((n_filters - 1, fused_rows, hidden), jnp.float32)
    wlo = wlo.at[:, :hidden, :].set(wl)
    blo = jnp.zeros((n_filters - 1, fused_rows, 1), jnp.float32)
    blo = blo.at[:, :hidden, 0].set(bl)
    fused_heads = np.asarray([l for l in layers if l < n_filters - 1],
                             dtype=np.int32)
    if fused_heads.size:
        wlo = wlo.at[fused_heads, hidden:hidden + out_size, :].set(
            wo[fused_heads])
        blo = blo.at[fused_heads, hidden:hidden + out_size, 0].set(
            bo[fused_heads])
    wlast = wo[n_filters - 1]                                 # (out, H)
    blast = bo[n_filters - 1][:, None]                        # (out, 1)

    kernel = functools.partial(
        _bacon_kernel, n_filters=n_filters, hidden=hidden, out_size=out_size,
        in_size=in_size, out_layers=layers)

    def _full_spec(shape):
        nd = len(shape)
        return pl.BlockSpec(shape, lambda i, _nd=nd: (0,) * _nd)

    # Advisory cost estimate (per call, summed over the grid).
    last_head = (n_filters - 1) in layers
    flops_tile = (n_filters * 2 * in_size * hidden * tm            # Fourier FMA
                  + (n_filters - 1) * 2 * fused_rows * hidden * tm  # fused dots
                  + (2 * out_size * hidden * tm if last_head else 0)
                  + (n_filters - 1) * hidden * tm)                  # elementwise
    transc_tile = n_filters * hidden * tm
    weight_bytes = 4 * int(wf.size + bf.size + wlo.size + blo.size
                           + wlast.size + blast.size)
    cost = pl.CostEstimate(
        flops=int(flops_tile * grid_steps),
        transcendentals=int(transc_tile * grid_steps),
        bytes_accessed=int((in_size + n_out * out_size) * 4 * n_pad
                           + weight_bytes))

    stacked = pl.pallas_call(
        kernel,
        out_shape=jax.ShapeDtypeStruct((n_out, out_size, n_pad), jnp.float32),
        grid_spec=pltpu.PrefetchScalarGridSpec(
            num_scalar_prefetch=0,
            grid=(grid_steps,),
            in_specs=[
                pl.BlockSpec((in_size, tm), lambda i: (0, i)),   # coords tile
                _full_spec(wf.shape),     # weights: constant maps -> resident
                _full_spec(bf_r.shape),
                _full_spec(wlo.shape),
                _full_spec(blo.shape),
                _full_spec(wlast.shape),
                _full_spec(blast.shape),
            ],
            out_specs=pl.BlockSpec((n_out, out_size, tm),
                                   lambda i: (0, 0, i)),         # lane-dense
        ),
        compiler_params=pltpu.CompilerParams(
            dimension_semantics=("parallel",),
            vmem_limit_bytes=32 * 1024 * 1024),
        cost_estimate=cost,
    )(coords_t, wf, bf_r, wlo, blo, wlast, blast)

    if return_stacked:
        return stacked[:, :, :N]
    # (n_out, out_size, N) -> list of (N, out_size), matching the module.
    return [stacked[k, :, :N].T for k in range(n_out)]


def init_params(key, in_size, hidden_size, out_size, hidden_layers,
                frequency=(128, 128), quantization_interval=2 * np.pi):
    """Deterministic parameter init mirroring MultiscaleBACON.__init__."""
    n_filters = hidden_layers + 1
    # input_scales=None path of MultiscaleBACON.__init__
    input_scale = [
        round(np.pi * freq / (hidden_layers + 1) / quantization_interval)
        * quantization_interval for freq in frequency
    ]

    keys = jax.random.split(key, 6)

    # FourierLayer weights (F, H, in_size): per-input-column quantized
    # integer frequencies.
    wf_cols = []
    for d in range(in_size):
        ws = input_scale[d]
        n_levels = int(round(2 * ws / quantization_interval)) + 1
        kcol = jax.random.fold_in(keys[0], d)
        init = jax.random.randint(kcol, (n_filters, hidden_size, 1), 0,
                                  n_levels).astype(jnp.float32)
        wf_cols.append(init * quantization_interval - ws)
    wf = jnp.concatenate(wf_cols, axis=2)                        # (F, H, in)
    bf = jax.random.uniform(keys[1], (n_filters, hidden_size),
                            minval=-np.pi, maxval=np.pi)

    # Hidden linear layers: mfn_weights_init on weights, default-style bias.
    lim = math.sqrt(6.0 / hidden_size)
    wl = jax.random.uniform(keys[2], (hidden_layers, hidden_size, hidden_size),
                            minval=-lim, maxval=lim)
    blim = 1.0 / math.sqrt(hidden_size)
    bl = jax.random.uniform(keys[3], (hidden_layers, hidden_size),
                            minval=-blim, maxval=blim)

    # Output linears (one per filter; only indices in output_layers are used).
    wo = jax.random.uniform(keys[4], (n_filters, out_size, hidden_size),
                            minval=-lim, maxval=lim)
    bo = jax.random.uniform(keys[5], (n_filters, out_size),
                            minval=-blim, maxval=blim)

    return tuple(a.astype(jnp.float32) for a in (wf, bf, wl, bl, wo, bo))


def reference_forward(coords, wf, bf, wl, bl, wo, bo, output_layers):
    """Plain-JAX reference mirroring the PyTorch forward."""
    n_filters = wf.shape[0]
    out = jnp.sin(coords @ wf[0].T + bf[0])
    outputs = []
    for i in range(1, n_filters):
        out = jnp.sin(coords @ wf[i].T + bf[i]) * (out @ wl[i - 1].T + bl[i - 1])
        if i in output_layers:
            outputs.append(out @ wo[i].T + bo[i])
    return outputs


if __name__ == "__main__":
    # Small shapes consistent with BACON usage: 2-D coordinates, 1024 points,
    # hidden=32, out=3, hidden_layers=3 (-> 4 Fourier filters).
    N, in_size, hidden_size, out_size, hidden_layers = 1024, 2, 32, 3, 3
    output_layers = [1, 2, 3]          # default: arange(1, n_filters)

    key = jax.random.PRNGKey(0)
    kc, kp = jax.random.split(key)
    coords = jax.random.uniform(kc, (N, in_size), minval=-0.5, maxval=0.5,
                                dtype=jnp.float32)
    wf, bf, wl, bl, wo, bo = init_params(kp, in_size, hidden_size, out_size,
                                         hidden_layers)

    # f32 reference with full-precision matmuls for a meaningful comparison.
    with jax.default_matmul_precision("highest"):
        refs = reference_forward(coords, wf, bf, wl, bl, wo, bo, output_layers)
        refs = [jax.block_until_ready(r) for r in refs]

    outs = multiscale_bacon_forward(coords, wf, bf, wl, bl, wo, bo,
                                    output_layers)
    outs = [jax.block_until_ready(o) for o in outs]
    assert len(outs) == len(refs)
    # Tolerance covers f32 MXU-pass / transcendental implementation deltas
    # while still catching structural errors (which are O(1)).
    for o, r in zip(outs, refs):
        np.testing.assert_allclose(np.asarray(o), np.asarray(r),
                                   rtol=1e-3, atol=1e-3)

    # Ragged point count exercises the padding / auto-tm path.
    coords_r = coords[:1000]
    with jax.default_matmul_precision("highest"):
        refs_r = reference_forward(coords_r, wf, bf, wl, bl, wo, bo,
                                   output_layers)
        refs_r = [jax.block_until_ready(r) for r in refs_r]
    outs_r = multiscale_bacon_forward(coords_r, wf, bf, wl, bl, wo, bo,
                                      output_layers)
    outs_r = [jax.block_until_ready(o) for o in outs_r]
    for o, r in zip(outs_r, refs_r):
        np.testing.assert_allclose(np.asarray(o), np.asarray(r),
                                   rtol=1e-3, atol=1e-3)

    print("KERNEL_OK")
</pallas_src>

<mosaic_0001>
module attributes {stable_mosaic.version = 11 : i64} {
  func.func @_bacon_kernel(%arg0: i32, %arg1: memref<2x256xf32, #tpu.memory_space<vmem>>, %arg2: memref<4x32x2xf32, #tpu.memory_space<vmem>>, %arg3: memref<4x32x1xf32, #tpu.memory_space<vmem>>, %arg4: memref<3x40x32xf32, #tpu.memory_space<vmem>>, %arg5: memref<3x40x1xf32, #tpu.memory_space<vmem>>, %arg6: memref<3x32xf32, #tpu.memory_space<vmem>>, %arg7: memref<3x1xf32, #tpu.memory_space<vmem>>, %arg8: memref<3x3x256xf32, #tpu.memory_space<vmem>>) attributes {dimension_semantics = [#tpu.dimension_semantics<parallel>], iteration_bounds = array<i64: 4>, scalar_prefetch = 0 : i64, scratch_operands = 0 : i64, tpu.core_type = #tpu.core_type<tc>, window_params = [{transform_indices = @transform_0, window_bounds = array<i64: 2, 256>}, {pipeline_mode = #tpu.pipeline_mode<synchronous>, transform_indices = @transform_1, window_bounds = array<i64: 4, 32, 2>}, {pipeline_mode = #tpu.pipeline_mode<synchronous>, transform_indices = @transform_2, window_bounds = array<i64: 4, 32, 1>}, {pipeline_mode = #tpu.pipeline_mode<synchronous>, transform_indices = @transform_3, window_bounds = array<i64: 3, 40, 32>}, {pipeline_mode = #tpu.pipeline_mode<synchronous>, transform_indices = @transform_4, window_bounds = array<i64: 3, 40, 1>}, {pipeline_mode = #tpu.pipeline_mode<synchronous>, transform_indices = @transform_5, window_bounds = array<i64: 3, 32>}, {pipeline_mode = #tpu.pipeline_mode<synchronous>, transform_indices = @transform_6, window_bounds = array<i64: 3, 1>}, {transform_indices = @transform_7, window_bounds = array<i64: 3, 3, 256>}]} {
    %c0 = arith.constant 0 : index
    %c0_0 = arith.constant 0 : index
    %0 = vector.load %arg1[%c0, %c0_0] : memref<2x256xf32, #tpu.memory_space<vmem>>, vector<2x256xf32>
    %c0_1 = arith.constant 0 : index
    %c0_2 = arith.constant 0 : index
    %c0_3 = arith.constant 0 : index
    %1 = vector.load %arg2[%c0_1, %c0_2, %c0_3] : memref<4x32x2xf32, #tpu.memory_space<vmem>>, vector<1x32x2xf32>
    %2 = vector.shape_cast %1 : vector<1x32x2xf32> to vector<32x2xf32>
    %3 = vector.extract_strided_slice %2 {offsets = [0, 0], sizes = [32, 1], strides = [1, 1]} : vector<32x2xf32> to vector<32x1xf32>
    %4 = vector.extract_strided_slice %0 {offsets = [0, 0], sizes = [1, 256], strides = [1, 1]} : vector<2x256xf32> to vector<1x256xf32>
    %5 = vector.broadcast %3 : vector<32x1xf32> to vector<32x256xf32>
    %6 = vector.broadcast %4 : vector<1x256xf32> to vector<32x256xf32>
    %7 = arith.mulf %5, %6 : vector<32x256xf32>
    %8 = vector.extract_strided_slice %2 {offsets = [0, 1], sizes = [32, 1], strides = [1, 1]} : vector<32x2xf32> to vector<32x1xf32>
    %9 = vector.extract_strided_slice %0 {offsets = [1, 0], sizes = [1, 256], strides = [1, 1]} : vector<2x256xf32> to vector<1x256xf32>
    %10 = vector.broadcast %8 : vector<32x1xf32> to vector<32x256xf32>
    %11 = vector.broadcast %9 : vector<1x256xf32> to vector<32x256xf32>
    %12 = arith.mulf %10, %11 : vector<32x256xf32>
    %13 = arith.addf %7, %12 : vector<32x256xf32>
    %c0_4 = arith.constant 0 : index
    %c0_5 = arith.constant 0 : index
    %c0_6 = arith.constant 0 : index
    %14 = vector.load %arg3[%c0_4, %c0_5, %c0_6] : memref<4x32x1xf32, #tpu.memory_space<vmem>>, vector<1x32x1xf32>
    %15 = vector.shape_cast %14 : vector<1x32x1xf32> to vector<32x1xf32>
    %16 = vector.broadcast %15 : vector<32x1xf32> to vector<32x256xf32>
    %17 = arith.addf %13, %16 : vector<32x256xf32>
    %18 = math.sin %17 : vector<32x256xf32>
    %c0_7 = arith.constant 0 : index
    %c0_8 = arith.constant 0 : index
    %c0_9 = arith.constant 0 : index
    %19 = vector.load %arg4[%c0_7, %c0_8, %c0_9] : memref<3x40x32xf32, #tpu.memory_space<vmem>>, vector<1x40x32xf32>
    %20 = vector.shape_cast %19 : vector<1x40x32xf32> to vector<40x32xf32>
    %cst = arith.constant dense<0.000000e+00> : vector<40x256xf32>
    %21 = tpu.matmul %20, %18, %cst {dimension_numbers = #tpu.dot_dimension_numbers<[1], [0], [0], [1], [0, 0, 1, 1], [], []>} : vector<40x32xf32>, vector<32x256xf32>, vector<40x256xf32> -> vector<40x256xf32>
    %c0_10 = arith.constant 0 : index
    %c0_11 = arith.constant 0 : index
    %c0_12 = arith.constant 0 : index
    %22 = vector.load %arg5[%c0_10, %c0_11, %c0_12] : memref<3x40x1xf32, #tpu.memory_space<vmem>>, vector<1x40x1xf32>
    %23 = vector.shape_cast %22 : vector<1x40x1xf32> to vector<40x1xf32>
    %24 = vector.broadcast %23 : vector<40x1xf32> to vector<40x256xf32>
    %25 = arith.addf %21, %24 : vector<40x256xf32>
    %c1 = arith.constant 1 : index
    %c0_13 = arith.constant 0 : index
    %c0_14 = arith.constant 0 : index
    %26 = vector.load %arg2[%c1, %c0_13, %c0_14] : memref<4x32x2xf32, #tpu.memory_space<vmem>>, vector<1x32x2xf32>
    %27 = vector.shape_cast %26 : vector<1x32x2xf32> to vector<32x2xf32>
    %28 = vector.extract_strided_slice %27 {offsets = [0, 0], sizes = [32, 1], strides = [1, 1]} : vector<32x2xf32> to vector<32x1xf32>
    %29 = vector.extract_strided_slice %0 {offsets = [0, 0], sizes = [1, 256], strides = [1, 1]} : vector<2x256xf32> to vector<1x256xf32>
    %30 = vector.broadcast %28 : vector<32x1xf32> to vector<32x256xf32>
    %31 = vector.broadcast %29 : vector<1x256xf32> to vector<32x256xf32>
    %32 = arith.mulf %30, %31 : vector<32x256xf32>
    %33 = vector.extract_strided_slice %27 {offsets = [0, 1], sizes = [32, 1], strides = [1, 1]} : vector<32x2xf32> to vector<32x1xf32>
    %34 = vector.extract_strided_slice %0 {offsets = [1, 0], sizes = [1, 256], strides = [1, 1]} : vector<2x256xf32> to vector<1x256xf32>
    %35 = vector.broadcast %33 : vector<32x1xf32> to vector<32x256xf32>
    %36 = vector.broadcast %34 : vector<1x256xf32> to vector<32x256xf32>
    %37 = arith.mulf %35, %36 : vector<32x256xf32>
    %38 = arith.addf %32, %37 : vector<32x256xf32>
    %c1_15 = arith.constant 1 : index
    %c0_16 = arith.constant 0 : index
    %c0_17 = arith.constant 0 : index
    %39 = vector.load %arg3[%c1_15, %c0_16, %c0_17] : memref<4x32x1xf32, #tpu.memory_space<vmem>>, vector<1x32x1xf32>
    %40 = vector.shape_cast %39 : vector<1x32x1xf32> to vector<32x1xf32>
    %41 = vector.broadcast %40 : vector<32x1xf32> to vector<32x256xf32>
    %42 = arith.addf %38, %41 : vector<32x256xf32>
    %43 = math.sin %42 : vector<32x256xf32>
    %44 = vector.extract_strided_slice %25 {offsets = [0, 0], sizes = [32, 256], strides = [1, 1]} : vector<40x256xf32> to vector<32x256xf32>
    %45 = arith.mulf %43, %44 : vector<32x256xf32>
    %c1_18 = arith.constant 1 : index
    %c0_19 = arith.constant 0 : index
    %c0_20 = arith.constant 0 : index
    %46 = vector.load %arg4[%c1_18, %c0_19, %c0_20] : memref<3x40x32xf32, #tpu.memory_space<vmem>>, vector<1x40x32xf32>
    %47 = vector.shape_cast %46 : vector<1x40x32xf32> to vector<40x32xf32>
    %cst_21 = arith.constant dense<0.000000e+00> : vector<40x256xf32>
    %48 = tpu.matmul %47, %45, %cst_21 {dimension_numbers = #tpu.dot_dimension_numbers<[1], [0], [0], [1], [0, 0, 1, 1], [], []>} : vector<40x32xf32>, vector<32x256xf32>, vector<40x256xf32> -> vector<40x256xf32>
    %c1_22 = arith.constant 1 : index
    %c0_23 = arith.constant 0 : index
    %c0_24 = arith.constant 0 : index
    %49 = vector.load %arg5[%c1_22, %c0_23, %c0_24] : memref<3x40x1xf32, #tpu.memory_space<vmem>>, vector<1x40x1xf32>
    %50 = vector.shape_cast %49 : vector<1x40x1xf32> to vector<40x1xf32>
    %51 = vector.broadcast %50 : vector<40x1xf32> to vector<40x256xf32>
    %52 = arith.addf %48, %51 : vector<40x256xf32>
    %53 = vector.extract_strided_slice %52 {offsets = [32, 0], sizes = [3, 256], strides = [1, 1]} : vector<40x256xf32> to vector<3x256xf32>
    %c0_25 = arith.constant 0 : index
    %c0_26 = arith.constant 0 : index
    %c0_27 = arith.constant 0 : index
    %54 = vector.load %arg8[%c0_25, %c0_26, %c0_27] : memref<3x3x256xf32, #tpu.memory_space<vmem>>, vector<1x3x256xf32>
    %55 = vector.shape_cast %54 : vector<1x3x256xf32> to vector<3x256xf32>
    %56 = vector.shape_cast %53 : vector<3x256xf32> to vector<1x3x256xf32>
    tpu.vector_store %arg8[%c0_25, %c0_26, %c0_27], %56 {strides = array<i32>} : memref<3x3x256xf32, #tpu.memory_space<vmem>>, vector<1x3x256xf32>,
    %c2 = arith.constant 2 : index
    %c0_28 = arith.constant 0 : index
    %c0_29 = arith.constant 0 : index
    %57 = vector.load %arg2[%c2, %c0_28, %c0_29] : memref<4x32x2xf32, #tpu.memory_space<vmem>>, vector<1x32x2xf32>
    %58 = vector.shape_cast %57 : vector<1x32x2xf32> to vector<32x2xf32>
    %59 = vector.extract_strided_slice %58 {offsets = [0, 0], sizes = [32, 1], strides = [1, 1]} : vector<32x2xf32> to vector<32x1xf32>
    %60 = vector.extract_strided_slice %0 {offsets = [0, 0], sizes = [1, 256], strides = [1, 1]} : vector<2x256xf32> to vector<1x256xf32>
    %61 = vector.broadcast %59 : vector<32x1xf32> to vector<32x256xf32>
    %62 = vector.broadcast %60 : vector<1x256xf32> to vector<32x256xf32>
    %63 = arith.mulf %61, %62 : vector<32x256xf32>
    %64 = vector.extract_strided_slice %58 {offsets = [0, 1], sizes = [32, 1], strides = [1, 1]} : vector<32x2xf32> to vector<32x1xf32>
    %65 = vector.extract_strided_slice %0 {offsets = [1, 0], sizes = [1, 256], strides = [1, 1]} : vector<2x256xf32> to vector<1x256xf32>
    %66 = vector.broadcast %64 : vector<32x1xf32> to vector<32x256xf32>
    %67 = vector.broadcast %65 : vector<1x256xf32> to vector<32x256xf32>
    %68 = arith.mulf %66, %67 : vector<32x256xf32>
    %69 = arith.addf %63, %68 : vector<32x256xf32>
    %c2_30 = arith.constant 2 : index
    %c0_31 = arith.constant 0 : index
    %c0_32 = arith.constant 0 : index
    %70 = vector.load %arg3[%c2_30, %c0_31, %c0_32] : memref<4x32x1xf32, #tpu.memory_space<vmem>>, vector<1x32x1xf32>
    %71 = vector.shape_cast %70 : vector<1x32x1xf32> to vector<32x1xf32>
    %72 = vector.broadcast %71 : vector<32x1xf32> to vector<32x256xf32>
    %73 = arith.addf %69, %72 : vector<32x256xf32>
    %74 = math.sin %73 : vector<32x256xf32>
    %75 = vector.extract_strided_slice %52 {offsets = [0, 0], sizes = [32, 256], strides = [1, 1]} : vector<40x256xf32> to vector<32x256xf32>
    %76 = arith.mulf %74, %75 : vector<32x256xf32>
    %c2_33 = arith.constant 2 : index
    %c0_34 = arith.constant 0 : index
    %c0_35 = arith.constant 0 : index
    %77 = vector.load %arg4[%c2_33, %c0_34, %c0_35] : memref<3x40x32xf32, #tpu.memory_space<vmem>>, vector<1x40x32xf32>
    %78 = vector.shape_cast %77 : vector<1x40x32xf32> to vector<40x32xf32>
    %cst_36 = arith.constant dense<0.000000e+00> : vector<40x256xf32>
    %79 = tpu.matmul %78, %76, %cst_36 {dimension_numbers = #tpu.dot_dimension_numbers<[1], [0], [0], [1], [0, 0, 1, 1], [], []>} : vector<40x32xf32>, vector<32x256xf32>, vector<40x256xf32> -> vector<40x256xf32>
    %c2_37 = arith.constant 2 : index
    %c0_38 = arith.constant 0 : index
    %c0_39 = arith.constant 0 : index
    %80 = vector.load %arg5[%c2_37, %c0_38, %c0_39] : memref<3x40x1xf32, #tpu.memory_space<vmem>>, vector<1x40x1xf32>
    %81 = vector.shape_cast %80 : vector<1x40x1xf32> to vector<40x1xf32>
    %82 = vector.broadcast %81 : vector<40x1xf32> to vector<40x256xf32>
    %83 = arith.addf %79, %82 : vector<40x256xf32>
    %84 = vector.extract_strided_slice %83 {offsets = [32, 0], sizes = [3, 256], strides = [1, 1]} : vector<40x256xf32> to vector<3x256xf32>
    %c1_40 = arith.constant 1 : index
    %c0_41 = arith.constant 0 : index
    %c0_42 = arith.constant 0 : index
    %85 = vector.load %arg8[%c1_40, %c0_41, %c0_42] : memref<3x3x256xf32, #tpu.memory_space<vmem>>, vector<1x3x256xf32>
    %86 = vector.shape_cast %85 : vector<1x3x256xf32> to vector<3x256xf32>
    %87 = vector.shape_cast %84 : vector<3x256xf32> to vector<1x3x256xf32>
    tpu.vector_store %arg8[%c1_40, %c0_41, %c0_42], %87 {strides = array<i32>} : memref<3x3x256xf32, #tpu.memory_space<vmem>>, vector<1x3x256xf32>,
    %c3 = arith.constant 3 : index
    %c0_43 = arith.constant 0 : index
    %c0_44 = arith.constant 0 : index
    %88 = vector.load %arg2[%c3, %c0_43, %c0_44] : memref<4x32x2xf32, #tpu.memory_space<vmem>>, vector<1x32x2xf32>
    %89 = vector.shape_cast %88 : vector<1x32x2xf32> to vector<32x2xf32>
    %90 = vector.extract_strided_slice %89 {offsets = [0, 0], sizes = [32, 1], strides = [1, 1]} : vector<32x2xf32> to vector<32x1xf32>
    %91 = vector.extract_strided_slice %0 {offsets = [0, 0], sizes = [1, 256], strides = [1, 1]} : vector<2x256xf32> to vector<1x256xf32>
    %92 = vector.broadcast %90 : vector<32x1xf32> to vector<32x256xf32>
    %93 = vector.broadcast %91 : vector<1x256xf32> to vector<32x256xf32>
    %94 = arith.mulf %92, %93 : vector<32x256xf32>
    %95 = vector.extract_strided_slice %89 {offsets = [0, 1], sizes = [32, 1], strides = [1, 1]} : vector<32x2xf32> to vector<32x1xf32>
    %96 = vector.extract_strided_slice %0 {offsets = [1, 0], sizes = [1, 256], strides = [1, 1]} : vector<2x256xf32> to vector<1x256xf32>
    %97 = vector.broadcast %95 : vector<32x1xf32> to vector<32x256xf32>
    %98 = vector.broadcast %96 : vector<1x256xf32> to vector<32x256xf32>
    %99 = arith.mulf %97, %98 : vector<32x256xf32>
    %100 = arith.addf %94, %99 : vector<32x256xf32>
    %c3_45 = arith.constant 3 : index
    %c0_46 = arith.constant 0 : index
    %c0_47 = arith.constant 0 : index
    %101 = vector.load %arg3[%c3_45, %c0_46, %c0_47] : memref<4x32x1xf32, #tpu.memory_space<vmem>>, vector<1x32x1xf32>
    %102 = vector.shape_cast %101 : vector<1x32x1xf32> to vector<32x1xf32>
    %103 = vector.broadcast %102 : vector<32x1xf32> to vector<32x256xf32>
    %104 = arith.addf %100, %103 : vector<32x256xf32>
    %105 = math.sin %104 : vector<32x256xf32>
    %106 = vector.extract_strided_slice %83 {offsets = [0, 0], sizes = [32, 256], strides = [1, 1]} : vector<40x256xf32> to vector<32x256xf32>
    %107 = arith.mulf %105, %106 : vector<32x256xf32>
    %c0_48 = arith.constant 0 : index
    %c0_49 = arith.constant 0 : index
    %108 = vector.load %arg6[%c0_48, %c0_49] : memref<3x32xf32, #tpu.memory_space<vmem>>, vector<3x32xf32>
    %cst_50 = arith.constant dense<0.000000e+00> : vector<3x256xf32>
    %109 = tpu.matmul %108, %107, %cst_50 {dimension_numbers = #tpu.dot_dimension_numbers<[1], [0], [0], [1], [0, 0, 1, 1], [], []>} : vector<3x32xf32>, vector<32x256xf32>, vector<3x256xf32> -> vector<3x256xf32>
    %c0_51 = arith.constant 0 : index
    %c0_52 = arith.constant 0 : index
    %110 = vector.load %arg7[%c0_51, %c0_52] : memref<3x1xf32, #tpu.memory_space<vmem>>, vector<3x1xf32>
    %111 = vector.broadcast %110 : vector<3x1xf32> to vector<3x256xf32>
    %112 = arith.addf %109, %111 : vector<3x256xf32>
    %c2_53 = arith.constant 2 : index
    %c0_54 = arith.constant 0 : index
    %c0_55 = arith.constant 0 : index
    %113 = vector.load %arg8[%c2_53, %c0_54, %c0_55] : memref<3x3x256xf32, #tpu.memory_space<vmem>>, vector<1x3x256xf32>
    %114 = vector.shape_cast %113 : vector<1x3x256xf32> to vector<3x256xf32>
    %115 = vector.shape_cast %112 : vector<3x256xf32> to vector<1x3x256xf32>
    tpu.vector_store %arg8[%c2_53, %c0_54, %c0_55], %115 {strides = array<i32>} : memref<3x3x256xf32, #tpu.memory_space<vmem>>, vector<1x3x256xf32>,
    return
  }
  func.func @transform_0(%arg0: i32) -> (i32, i32) {
    %c0_i32 = arith.constant 0 : i32
    %c0_i32_0 = arith.constant 0 : i32
    return %c0_i32, %arg0 : i32, i32
  }
  func.func @transform_1(%arg0: i32) -> (i32, i32, i32) {
    %c0_i32 = arith.constant 0 : i32
    %c0_i32_0 = arith.constant 0 : i32
    %c0_i32_1 = arith.constant 0 : i32
    %c0_i32_2 = arith.constant 0 : i32
    return %c0_i32, %c0_i32_0, %c0_i32_1 : i32, i32, i32
  }
  func.func @transform_2(%arg0: i32) -> (i32, i32, i32) {
    %c0_i32 = arith.constant 0 : i32
    %c0_i32_0 = arith.constant 0 : i32
    %c0_i32_1 = arith.constant 0 : i32
    %c0_i32_2 = arith.constant 0 : i32
    return %c0_i32, %c0_i32_0, %c0_i32_1 : i32, i32, i32
  }
  func.func @transform_3(%arg0: i32) -> (i32, i32, i32) {
    %c0_i32 = arith.constant 0 : i32
    %c0_i32_0 = arith.constant 0 : i32
    %c0_i32_1 = arith.constant 0 : i32
    %c0_i32_2 = arith.constant 0 : i32
    return %c0_i32, %c0_i32_0, %c0_i32_1 : i32, i32, i32
  }
  func.func @transform_4(%arg0: i32) -> (i32, i32, i32) {
    %c0_i32 = arith.constant 0 : i32
    %c0_i32_0 = arith.constant 0 : i32
    %c0_i32_1 = arith.constant 0 : i32
    %c0_i32_2 = arith.constant 0 : i32
    return %c0_i32, %c0_i32_0, %c0_i32_1 : i32, i32, i32
  }
  func.func @transform_5(%arg0: i32) -> (i32, i32) {
    %c0_i32 = arith.constant 0 : i32
    %c0_i32_0 = arith.constant 0 : i32
    %c0_i32_1 = arith.constant 0 : i32
    return %c0_i32, %c0_i32_0 : i32, i32
  }
  func.func @transform_6(%arg0: i32) -> (i32, i32) {
    %c0_i32 = arith.constant 0 : i32
    %c0_i32_0 = arith.constant 0 : i32
    %c0_i32_1 = arith.constant 0 : i32
    return %c0_i32, %c0_i32_0 : i32, i32
  }
  func.func @transform_7(%arg0: i32) -> (i32, i32, i32) {
    %c0_i32 = arith.constant 0 : i32
    %c0_i32_0 = arith.constant 0 : i32
    %c0_i32_1 = arith.constant 0 : i32
    return %c0_i32, %c0_i32_0, %arg0 : i32, i32, i32
  }
}

</mosaic_0001>

<bundles_post_ra>
// kernel: tpu_custom_call.1
= control target key start
LH: loop header
LB: loop body
LE: loop exit
PB: predicated region body
PF: predicated region fallthrough
CT: control target
= control target key end

     0   :  { %12 = vsyncpa [#allocation3], 0  ;;  %s12620_s0 = inlined_call_operand.vmem [shape: f32[2,1024], index: 0, kind: input, shape index: {}]   ;;  %s12621_s1 = inlined_call_operand.vmem [shape: f32[4,32,2], index: 1, kind: input, shape index: {}]   ;;  %s12622_s2 = inlined_call_operand.vmem [shape: f32[4,32,1], index: 2, kind: input, shape index: {}]   ;;  %s12623_s3 = inlined_call_operand.vmem [shape: f32[3,40,32], index: 3, kind: input, shape index: {}]   ;;  %s12624_s4 = inlined_call_operand.vmem [shape: f32[3,40,1], index: 4, kind: input, shape index: {}]   ;;  %s12625_s5 = inlined_call_operand.vmem [shape: f32[3,32], index: 5, kind: input, shape index: {}]   ;;  %s12626_s6 = inlined_call_operand.vmem [shape: f32[3,1], index: 6, kind: input, shape index: {}]   ;;  %s12627_s7 = inlined_call_operand.hbm [shape: f32[3,3,1024], index: 7, kind: output, shape index: {}]  }
   0x1   :  { %14 = vsyncpa [#allocation3 + $0x1], 0  ;;  %s6546_s24 = smov 0   ;;  %s6548_s25 = smov 0  }
   0x2   :  { %s6550_s26 = smov 0   ;;  %s6552_s27 = smov 0  }
   0x3 LB: > { %s6567_s28 = sadd.s32 4294967295, %s6493_s27   ;;  %s6161_s29 = sadd.s32 4294967294, %s6493_s27   ;;  %s6493_s27 = sphi %s6552_s27, %s13541_s27   ;;  %s6489_s26 = sphi %s6550_s26, %s13540_s26   ;;  %s6485_s25 = sphi %s6548_s25, %s13539_s25   ;;  %s6481_s24 = sphi %s6546_s24, %s13538_s24  }
   0x4   : > { %s6571_s30 = sadd.s32 1, %s6493_s27   ;;  %s179_s8 = sadd.s32 1, %s6489_s26 }
   0x5   : > { %s176_s9 = ssub.s32 %s6493_s27, %s6571_s30  ;;  %p189_p0 = scmp.ne.s32.totalorder %s6489_s26, %s6485_s25 }
   0x6   : > { %p177_p1 = scmp.eq.s32.totalorder %s176_s9, 0  ;;  %p190_p2 = scmp.eq.s32.totalorder %s6567_s28, 3 }
   0x7   : > { %p195_p3 = scmp.ne.s32.totalorder %s6485_s25, %s6481_s24  ;;  %p196_p4 = scmp.eq.s32.totalorder %s6161_s29, 3 }
   0x8   : > { %s6582_s10 = scalar_select %p177_p1, %s6489_s26, %s179_s8  }
   0x9   : > { %p6584_p5 = por %p190_p2, %p189_p0  ;;  %p6588_p6 = por %p196_p4, %p195_p3 }
   0xa   : > { %p6164_p7 = scmp.ge.s32.totalorder %s6493_s27, 1  ;;  %p241_p8 = scmp.lt.s32.totalorder %s6493_s27, 5 }
   0xc   : > { %p242_p9 = pnand %p6164_p7, %p241_p8 }
   0xe   : > { %245 = sbr.rel (%p242_p9) target bundleno = 1566 (0x61e), region = 48 }
  0x13   : > { %v284_v0 = vld [vmem:[%s12621_s1 + $0x18] sm:$0xff]  ;;  %v283_v1 = vld [vmem:[%s12621_s1 + $0x10] sm:$0xff]  ;;  %v282_v2 = vld [vmem:[%s12621_s1 + $0x8] sm:$0xff]  ;;  %v12637_v3 = vmov 0   ;;  %v12628_v4 = vmov 1   ;;  %s6165_s17 = sshll.u32 %s6567_s28, 1 }
  0x14   : > { %6409 = vset.pattern.permute.xlu2 %v12637_v3  ;;  %6407 = vset.pattern.permute.xlu1 %v12637_v3  ;;  %v281_v5 = vld [vmem:[%s12621_s1] sm:$0xff]  ;;  %v361_v6 = vld [vmem:[%s12622_s2 + $0x18] sm:$0xff]  ;;  %v360_v7 = vld [vmem:[%s12622_s2 + $0x10] sm:$0xff]  ;;  %p274_p10 = scmp.lt.s32.totalorder %s6165_s17, 7  ;;  %v12633_v63 = vmov 2131351028  }
  0x15   : > { %6405 = vset.pattern.permute.xlu0 %v12637_v3  ;;  %297 = vperm.xlu1 %6407, %v283_v1   ;;  %v358_v8 = vld [vmem:[%s12622_s2] sm:$0xff]  ;;  %v359_v9 = vld [vmem:[%s12622_s2 + $0x8] sm:$0xff]  ;;  %v6204_v10 = vld [vmem:[%s12621_s1 + $0x38] sm:$0xff]  ;;  %s270_s18 = sand.u32 1, %s6485_s25   ;;  %s6345_s23 = sshll.u32 %s6567_s28, 3 }
  0x16   : > { %302 = vperm.xlu0 %6405, %v284_v0   ;;  %292 = vperm.xlu2 %6409, %v282_v2   ;;  %v6202_v11 = vld [vmem:[%s12621_s1 + $0x28] sm:$0xff]  ;;  %v6203_v12 = vld [vmem:[%s12621_s1 + $0x30] sm:$0xff]  ;;  %v6201_v13 = vld [vmem:[%s12621_s1 + $0x20] sm:$0xff]  ;;  %s13543_s17 = smov (!%p274_p10, %s6165_s17), 7  ;;  %s6354_s19 = smul.u32 24, %s270_s18 }
  0x17   : > { %v6206_v14 = vld [vmem:[%s12622_s2 + $0x28] sm:$0xff]  ;;  %v6208_v15 = vld [vmem:[%s12622_s2 + $0x38] sm:$0xff]  ;;  %v1637_v16 = vld [vmem:[%s12624_s4 + $0x10] sm:$0xff]  ;;  %s6166_s22 = sshll.u32 %s13543_s17, 1  ;;  %s6095_s9 = scalar_lea.hbm %s12627_s7, %s6345_s23 }
  0x18   : > { %v6207_v17 = vld [vmem:[%s12622_s2 + $0x30] sm:$0xff]  ;;  %v6256_v18 = vld [vmem:[%s12621_s1 + $0x58] sm:$0xff]  ;;  %v6205_v19 = vld [vmem:[%s12622_s2 + $0x20] sm:$0xff]  ;;  %s277_s8 = scalar_lea.vmem %s12620_s0, %s6166_s22  ;;  %s11838_s20 = scalar_lea.vmem [#allocation2], %s6354_s19 }
  0x19   : > { %v6255_v20 = vld [vmem:[%s12621_s1 + $0x50] sm:$0xff]  ;;  %v1636_v21 = vld [vmem:[%s12624_s4 + $0x8] sm:$0xff]  ;;  %v1638_v22 = vld [vmem:[%s12624_s4 + $0x18] sm:$0xff]  ;;  %s6096_s13 = sshll.u32 %s11838_s20, 4  ;;  %s6098_s14 = sshll.u32 %s6095_s9, 4  ;;  %s6097_s13 = int_to_ptr.vmem [resolvable:$true] %s6096_s13  ;;  %s6099_s14 = int_to_ptr.hbm [resolvable:$true] %s6098_s14 }
  0x1a   : > { %v1635_v23 = vld [vmem:[%s12624_s4] sm:$0xff]  ;;  %v6254_v24 = vld [vmem:[%s12621_s1 + $0x48] sm:$0xff]  ;;  %v6260_v25 = vld [vmem:[%s12622_s2 + $0x58] sm:$0xff]  ;;  %s6084_s28 = scalar_lea.sflag [#allocation3], %s270_s18  ;;  %s6445_s15 = sshra.s32 %s6099_s14, 4  ;;  %s6446_s15 = int_to_ptr.hbm [resolvable:$true] %s6445_s15 }
  0x1b   : > { %v6259_v26 = vld [vmem:[%s12622_s2 + $0x50] sm:$0xff]  ;;  %v280_v28 = vld [vmem:[%s277_s8] sm:$0xf]  ;;  %s6447_s16 = scalar_lea.hbm %s6446_s15, 24  ;;  %s6451_s21 = scalar_lea.hbm %s12627_s7, 96 }
  0x1c   : > { %v306_v29 = vperm.slane %v280_v28, 0  ;;  %v307_v30 = vperm.slane %v280_v28, 2  ;;  %v336_v31 = vperm.slane %v280_v28, 1  ;;  %v337_v32 = vperm.slane %v280_v28, 3  ;;  %v6241_v57 = vld [vmem:[%s12624_s4 + $0x40] sm:$0xff]  ;;  %v6239_v60 = vld [vmem:[%s12624_s4 + $0x30] sm:$0xff]  ;;  %p6448_p11 = scmp.ne.s32.totalorder %s6446_s15, %s6447_s16  ;;  %p6452_p0 = scmp.lt.s32.totalorder %s6446_s15, %s12627_s7 }
  0x1d   : > { %6408 = vset.pattern.permute.xlu1 %v12628_v4  ;;  %p6453_p1 = scmp.lt.s32.totalorder %s6451_s21, %s6447_s16 }
  0x1e   : > { %6406 = vset.pattern.permute.xlu0 %v12628_v4  ;;  %6410 = vset.pattern.permute.xlu2 %v12628_v4  ;;  %v6691_v33 = vperm.slane %v306_v29, 0  ;;  %v6693_v34 = vperm.slane %v307_v30, 0  ;;  %v6695_v35 = vperm.slane %v336_v31, 1  ;;  %v6697_v36 = vperm.slane %v337_v32, 1  ;;  %p6449_p12 = pnand %p6448_p11, %p6584_p5 }
  0x1f   : > { %333 = vperm.xlu0 %6406, %v284_v0   ;;  %329 = vperm.xlu1 %6408, %v283_v1   ;;  %v12631_v1 = vmov 2102212464   ;;  %p6454_p2 = por %p6453_p1, %p6452_p0 }
  0x20   : > { %325 = vperm.xlu2 %6410, %v282_v2   ;;  %12919 = vst [vmem:[#allocation5_spill] sm:$0xff] %v6691_v33  ;;  %p6450_p13 = pneg %p6449_p12 }
  0x21   : > { %12920 = vst [vmem:[#allocation6_spill] sm:$0xff] %v6693_v34 }
  0x22   : > { %12921 = vst [vmem:[#allocation7_spill] sm:$0xff] %v6695_v35  ;;  %p6455_p3 = pnand %p6454_p2, %p6450_p13 }
  0x23   : > { %12922 = vst [vmem:[#allocation8_spill] sm:$0xff] %v6697_v36 }
  0x27   : > { %6411 = vset.pattern.permute.xlu1 %v12637_v3  ;;  %321 = vperm.xlu0 %6406, %v281_v5  }
  0x28   : > { %6412 = vset.pattern.permute.xlu2 %v12637_v3  ;;  %379 = vperm.xlu1 %6411, %v361_v6  }
  0x29   : > { %287 = vperm.xlu2 %6412, %v281_v5   ;;  %v12642_v5 = vmov 1326507024  }
  0x2f   : > { %6413 = vset.pattern.permute.xlu0 %v12637_v3 }
  0x30   : > { %374 = vperm.xlu1 %6411, %v360_v7   ;;  %364 = vperm.xlu0 %6413, %v358_v8   ;;  %v12639_v7 = vmov 920167782  }
  0x31   : > { %369 = vperm.xlu2 %6412, %v359_v9   ;;  %v12635_v9 = vmov 2475754826  }
  0x38   : > { %1764 = vperm.xlu1 %6411, %v6204_v10   ;;  %1754 = vperm.xlu0 %6413, %v6202_v11  }
  0x39   : > { %6414 = vset.pattern.permute.xlu2 %v12628_v4 }
  0x3a   : > { %1788 = vperm.xlu2 %6414, %v6204_v10  }
  0x40   : > { %1759 = vperm.xlu1 %6411, %v6203_v12   ;;  %1749 = vperm.xlu0 %6413, %v6201_v13  }
  0x42   : > { %1784 = vperm.xlu2 %6414, %v6203_v12  }
  0x48   : > { %6415 = vset.pattern.permute.xlu1 %v12628_v4  ;;  %1819 = vperm.xlu0 %6413, %v6206_v14  }
  0x49   : > { %1780 = vperm.xlu1 %6415, %v6202_v11  }
  0x4a   : > { %6416 = vset.pattern.permute.xlu2 %v12637_v3 }
  0x4b   : > { %1829 = vperm.xlu2 %6416, %v6208_v15  }
  0x50   : > { %1652 = vperm.xlu0 %6413, %v1637_v16  }
  0x51   : > { %1776 = vperm.xlu1 %6415, %v6201_v13  }
  0x53   : > { %1824 = vperm.xlu2 %6416, %v6207_v17  }
  0x58   : > { %3233 = vperm.xlu0 %6413, %v6256_v18  }
  0x59   : > { %6417 = vset.pattern.permute.xlu1 %v12637_v3 }
  0x5a   : > { %1814 = vperm.xlu1 %6417, %v6205_v19  }
  0x5b   : > { %1657 = vperm.xlu2 %6416, %v1638_v22  }
  0x60   : > { %6419 = vset.pattern.permute.xlu0 %v12628_v4 }
  0x61   : > { %3253 = vperm.xlu0 %6419, %v6255_v20  }
  0x62   : > { %1647 = vperm.xlu1 %6417, %v1636_v21  }
  0x63   : > { %1642 = vperm.xlu2 %6416, %v1635_v23   ;;  %v6253_v23 = vld [vmem:[%s12621_s1 + $0x40] sm:$0xff] }
  0x69   : > { %3245 = vperm.xlu0 %6419, %v6253_v23  }
  0x6a   : > { %6418 = vset.pattern.permute.xlu1 %v12628_v4 }
  0x6b   : > { %3257 = vperm.xlu1 %6418, %v6256_v18   ;;  %3228 = vperm.xlu2 %6416, %v6255_v20  }
  0x70   : > { %v293_v55 = vpop.permute.xlu2 %292 }
  0x71   : > { %6423 = vset.pattern.permute.xlu0 %v12637_v3 }
  0x73   : > { %6420 = vset.pattern.permute.xlu1 %v12637_v3  ;;  %6421 = vset.pattern.permute.xlu2 %v12628_v4 }
  0x74   : > { %3223 = vperm.xlu1 %6420, %v6254_v24   ;;  %3249 = vperm.xlu2 %6421, %v6254_v24   ;;  %v12644_v24 = vmov 683565275  }
  0x7a   : > { %v326_v61 = vpop.permute.xlu2 %325 }
  0x7c   : > { %3298 = vperm.xlu1 %6420, %v6260_v25   ;;  %6422 = vset.pattern.permute.xlu2 %v12637_v3 }
  0x7d   : > { %3218 = vperm.xlu2 %6422, %v6253_v23  }
  0x83   : > { %v6748_v22 = vpop.permute.xlu2 %287 }
  0x84   : > { %3293 = vperm.xlu1 %6420, %v6259_v26  }
  0x87   : > { %v298_v27 = vpop.permute.xlu1 %297 }
  0x88   : > { %v316_v38 = vmul.f32 %v6691_v33, %v298_v27  ;;  %v317_v39 = vmul.f32 %v6693_v34, %v298_v27  ;;  %v303_v44 = vpop.permute.xlu0 %302 }
  0x89   : > { %v318_v47 = vmul.f32 %v6691_v33, %v303_v44  ;;  %v319_v31 = vmul.f32 %v6693_v34, %v303_v44 }
  0x8c   : > { %3117 = vperm.xlu1 %6420, %v6241_v57  }
  0x91   : > { %v330_v37 = vpop.permute.xlu1 %329  ;;  %v334_v45 = vpop.permute.xlu0 %333 }
  0x92   : > { %v346_v40 = vmul.f32 %v6695_v35, %v330_v37  ;;  %v347_v41 = vmul.f32 %v6697_v36, %v330_v37  ;;  %v348_v46 = vmul.f32 %v6695_v35, %v334_v45  ;;  %v349_v28 = vmul.f32 %v6697_v36, %v334_v45  ;;  %v6309_v45 = vld [vmem:[%s12621_s1 + $0x78] sm:$0xff] }
  0x94   : > { %v6703_v42 = vadd.f32 %v346_v40, %v316_v38  ;;  %v6705_v43 = vadd.f32 %v347_v41, %v317_v39  ;;  %v356_v49 = vadd.f32 %v348_v46, %v318_v47  ;;  %3107 = vperm.xlu1 %6420, %v6239_v60   ;;  %v314_v39 = vmul.f32 %v6691_v33, %v293_v55  ;;  %v370_v60 = vpop.permute.xlu2 %369 }
  0x95   : > { %v344_v40 = vmul.f32 %v6695_v35, %v326_v61  ;;  %v357_v41 = vadd.f32 %v349_v28, %v319_v31 }
  0x9a   : > { %v6709_v48 = vpop.permute.xlu1 %379 }
  0x9b   : > { %v6712_v50 = vadd.f32 %v6709_v48, %v356_v49  ;;  %v6788_v49 = vadd.f32 %v6709_v48, %v357_v41 }
  0x9c   : > { %6424 = vset.pattern.permute.xlu1 %v12628_v4 }
  0x9d   : > { %v1323_v51 = vand.u32 2139095040, %v6712_v50  ;;  %v1320_v62 = vand.u32 2147483647, %v6712_v50  ;;  %4726 = vperm.xlu1 %6424, %v6309_v45  }
  0x9f   : > { %v1324_v52 = vshrl.u32 %v1323_v51, 23  ;;  %v1327_v14 = vand.u32 8388607, %v1320_v62  ;;  %v315_v51 = vmul.f32 %v6693_v34, %v293_v55  ;;  %v1478_v55 = vand.u32 2139095040, %v6788_v49 }
  0xa1   : > { %v6185_v53 = vadd.s32 4294967169, %v1324_v52  ;;  %v1328_v21 = vor.u32 8388608, %v1327_v14 }
  0xa3   : > { %v1330_v54 = vadd.s32 1, %v6185_v53  ;;  %v6773_v38 = vshll.u32 %v1328_v21, 8  ;;  %v345_v53 = vmul.f32 %v6697_v36, %v326_v61 }
  0xa5   : > { %vm1331_vm0 = vcmp.gt.s32.totalorder %v1330_v54, 0  ;;  %v1369_v52 = vand.u32 65535, %v6773_v38  ;;  %v353_v61 = vadd.f32 %v345_v53, %v315_v51  ;;  %6426 = vset.pattern.permute.xlu1 %v12637_v3 }
  0xa6   : > { %v1332_v56 = vsel %vm1331_vm0, %v1330_v54, 0  ;;  %v352_v54 = vadd.f32 %v344_v40, %v314_v39 }
  0xa7   : > { %v1334_v58 = vand.u32 31, %v1332_v56  ;;  %v6735_v13 = vshrl.u32 %v1332_v56, 5  ;;  %v6257_v56 = vld [vmem:[%s12622_s2 + $0x40] sm:$0xff]  ;;  %v6807_v23 = vadd.f32 %v370_v60, %v353_v61 }
  0xa8   : > { %3283 = vperm.xlu0 %6423, %v6257_v56  }
  0xa9   : > { %v6718_v59 = vsub.s32 32, %v1334_v58  ;;  %v1340_v10 = vshll.u32 %v12635_v9, %v1334_v58  ;;  %v1343_v11 = vshll.u32 %v12633_v63, %v1334_v58  ;;  %v1349_v12 = vshll.u32 %v12639_v7, %v1334_v58 }
  0xaa   : > { %v1346_v15 = vshll.u32 %v12631_v1, %v1334_v58  ;;  %vm1352_vm1 = vcmp.lt.s32.totalorder %v6735_v13, 1  ;;  %vm1355_vm2 = vcmp.lt.s32.totalorder %v6735_v13, 4  ;;  %v1337_v25 = vshll.u32 %v12644_v24, %v1334_v58 }
  0xab   : > { %v1341_v0 = vshrl.u32 %v12633_v63, %v6718_v59  ;;  %v1344_v2 = vshrl.u32 %v12631_v1, %v6718_v59  ;;  %v1350_v6 = vshrl.u32 %v12642_v5, %v6718_v59  ;;  %v1347_v8 = vshrl.u32 %v12639_v7, %v6718_v59 }
  0xac   : > { %v1338_v20 = vshrl.u32 %v12635_v9, %v6718_v59  ;;  %vm1354_vm3 = vcmp.lt.s32.totalorder %v6735_v13, 3  ;;  %vm1353_vm4 = vcmp.lt.s32.totalorder %v6735_v13, 2 }
  0xad   : > { %v6740_v16 = vor.u32 %v1341_v0, %v1340_v10  ;;  %v6742_v17 = vor.u32 %v1344_v2, %v1343_v11  ;;  %v1351_v18 = vor.u32 %v1350_v6, %v1349_v12  ;;  %v1348_v19 = vor.u32 %v1347_v8, %v1346_v15  ;;  %v6307_v11 = vld [vmem:[%s12621_s1 + $0x68] sm:$0xff] }
  0xae   : > { %v6765_v30 = vor.u32 %v1338_v20, %v1337_v25  ;;  %v1370_v0 = vshrl.u32 %v6773_v38, 16  ;;  %v6801_v6 = vadd.f32 %v370_v60, %v352_v54  ;;  %v1479_v15 = vshrl.u32 %v1478_v55, 23  ;;  %4692 = vperm.xlu1 %6426, %v6307_v11  }
  0xaf   : > { %v1364_v26 = vsel %vm1352_vm1, %v6740_v16, %v6742_v17  ;;  %v1365_v27 = vsel %vm1355_vm2, %v1351_v18, 1326507024  ;;  %v1361_v32 = vsel %vm1355_vm2, %v1348_v19, 920167782  ;;  %v1336_v60 = vshrl.u32 %v12644_v24, %v6718_v59  ;;  %v375_v59 = vpop.permute.xlu1 %374 }
  0xb0   : > { %v1366_v29 = vsel %vm1354_vm3, %v1348_v19, %v1365_v27  ;;  %v1360_v44 = vsel %vm1352_vm1, %v6765_v30, %v6740_v16  ;;  %v1362_v46 = vsel %vm1354_vm3, %v6742_v17, %v1361_v32  ;;  %v703_v25 = vand.u32 2139095040, %v6801_v6  ;;  %4702 = vperm.xlu0 %6423, %v6309_v45  }
  0xb1   : > { %v1367_v37 = vsel %vm1353_vm4, %v1364_v26, %v1366_v29  ;;  %v1363_v57 = vsel %vm1353_vm4, %v1360_v44, %v1362_v46  ;;  %v6188_v32 = vadd.s32 4294967169, %v1479_v15  ;;  %v1357_v45 = vsel %vm1355_vm2, %v6742_v17, 2102212464 }
  0xb2   : > { %v1372_v47 = vshrl.u32 %v1367_v37, 16  ;;  %v1371_v58 = vand.u32 65535, %v1367_v37  ;;  %v1394_v2 = vshrl.u32 %v1363_v57, 16  ;;  %v1393_v10 = vand.u32 65535, %v1363_v57 }
  0xb3   : > { %v1485_v56 = vadd.s32 1, %v6188_v32  ;;  %v1358_v17 = vsel %vm1354_vm3, %v6740_v16, %v1357_v45  ;;  %v6836_v16 = vadd.f32 %v375_v59, %v6703_v42  ;;  %v313_v32 = vmul.f32 %v6693_v34, %v6748_v22 }
  0xb4   : > { %v1374_v48 = vmul.u32 %v1372_v47, %v1369_v52  ;;  %v1375_v8 = vmul.u32 %v1371_v58, %v1370_v0  ;;  %v1373_v12 = vmul.u32 %v1371_v58, %v1369_v52  ;;  %v1376_v18 = vmul.u32 %v1372_v47, %v1370_v0 }
  0xb5   : > { %v1396_v21 = vmul.u32 %v1394_v2, %v1369_v52  ;;  %v1397_v27 = vmul.u32 %v1393_v10, %v1370_v0  ;;  %v1395_v29 = vmul.u32 %v1393_v10, %v1369_v52  ;;  %v1398_v40 = vmul.u32 %v1394_v2, %v1370_v0  ;;  %v322_v2 = vpop.permute.xlu0 %321 }
  0xb6   : > { %v1377_v14 = vshll.u32 %v1374_v48, 16  ;;  %v1379_v19 = vshll.u32 %v1375_v8, 16  ;;  %v1378_v37 = vshrl.u32 %v1374_v48, 16  ;;  %v858_v47 = vand.u32 2139095040, %v6807_v23 }
  0xb7   : > { %v1399_v31 = vshll.u32 %v1396_v21, 16  ;;  %v1401_v44 = vshll.u32 %v1397_v27, 16  ;;  %v1380_v52 = vshrl.u32 %v1375_v8, 16  ;;  %v704_v58 = vshrl.u32 %v703_v25, 23 }
  0xb8   : > { %vm1381_vm5 = vc.u32 %v1373_v12, %v1377_v14  ;;  %v1383_v20 = vadd.s32 %v1377_v14, %v1373_v12  ;;  %v1400_v48 = vshrl.u32 %v1396_v21, 16  ;;  %v859_v0 = vshrl.u32 %v858_v47, 23  ;;  %6425 = vset.pattern.permute.xlu0 %v12628_v4 }
  0xb9   : > { %v1382_v26 = vsel %vm1381_vm5, 1, %v12637_v3  ;;  %vm1403_vm7 = vc.u32 %v1395_v29, %v1399_v31  ;;  %v1405_v46 = vadd.s32 %v1399_v31, %v1395_v29  ;;  %v1356_v10 = vsel %vm1352_vm1, %v1336_v60, %v6765_v30 }
  0xba   : > { %v1384_v28 = vadd.s32 %v1382_v26, %v1376_v18  ;;  %vm1385_vm6 = vc.u32 %v1383_v20, %v1379_v19  ;;  %v1404_v51 = vsel %vm1403_vm7, 1, %v12637_v3  ;;  %v1402_v8 = vshrl.u32 %v1397_v27, 16 }
  0xbb   : > { %v1386_v39 = vsel %vm1385_vm6, 1, %v12637_v3  ;;  %v1406_v54 = vadd.s32 %v1404_v51, %v1398_v40  ;;  %vm1407_vm8 = vc.u32 %v1405_v46, %v1401_v44  ;;  %vm1486_vm9 = vcmp.gt.s32.totalorder %v1485_v56, 0 }
  0xbc   : > { %v1388_v41 = vadd.s32 %v1386_v39, %v1384_v28  ;;  %v1408_v57 = vsel %vm1407_vm8, 1, %v12637_v3  ;;  %v6829_v12 = vadd.s32 %v1405_v46, %v1401_v44  ;;  %v6173_v14 = vadd.s32 4294967169, %v704_v58 }
  0xbd   : > { %v1410_v55 = vadd.s32 %v1408_v57, %v1406_v54  ;;  %v6176_v18 = vadd.s32 4294967169, %v859_v0  ;;  %v1359_v19 = vsel %vm1353_vm4, %v1356_v10, %v1358_v17  ;;  %v1487_v30 = vsel %vm1486_vm9, %v1485_v56, 0  ;;  %v1789_v54 = vpop.permute.xlu2 %1788 }
  0xbe   : > { %v1389_v53 = vadd.s32 %v1388_v41, %v1378_v37  ;;  %v312_v21 = vmul.f32 %v6691_v33, %v6748_v22  ;;  %v6841_v25 = vadd.f32 %v375_v59, %v6705_v43  ;;  %v710_v26 = vadd.s32 1, %v6173_v14  ;;  %v365_v43 = vpop.permute.xlu0 %364 }
  0xbf   : > { %v1411_v11 = vadd.s32 %v1410_v55, %v1400_v48  ;;  %v342_v27 = vmul.f32 %v6695_v35, %v322_v2  ;;  %v1413_v13 = vmul.u32 %v6773_v38, %v1359_v19  ;;  %v865_v29 = vadd.s32 1, %v6176_v18 }
  0xc0   : > { %v6820_v61 = vadd.s32 %v1389_v53, %v1380_v52  ;;  %v1489_v31 = vand.u32 31, %v1487_v30  ;;  %v343_v42 = vmul.f32 %v6697_v36, %v322_v2  ;;  %v1013_v37 = vand.u32 2139095040, %v6836_v16 }
  0xc1   : > { %v1412_v15 = vadd.s32 %v1411_v11, %v1402_v8  ;;  %v1168_v40 = vand.u32 2139095040, %v6841_v25  ;;  %vm711_vm11 = vcmp.gt.s32.totalorder %v710_v26, 0  ;;  %v350_v41 = vadd.f32 %v342_v27, %v312_v21 }
  0xc2   : > { %vm1415_vm10 = vc.u32 %v6820_v61, %v6829_v12  ;;  %vm866_vm12 = vcmp.gt.s32.totalorder %v865_v29, 0  ;;  %v6850_v46 = vsub.s32 32, %v1489_v31  ;;  %v1014_v38 = vshrl.u32 %v1013_v37, 23 }
  0xc3   : > { %v1416_v20 = vadd.s32 1, %v1412_v15  ;;  %v351_v47 = vadd.f32 %v343_v42, %v313_v32  ;;  %v6852_v51 = vadd.f32 %v365_v43, %v350_v41  ;;  %v712_v22 = vsel %vm711_vm11, %v710_v26, 0 }
  0xc4   : > { %v1169_v56 = vshrl.u32 %v1168_v40, 23  ;;  %v6857_v45 = vmul.f32 %v1789_v54, %v6695_v35  ;;  %v6861_v57 = vshrl.u32 %v712_v22, 5  ;;  %v867_v58 = vsel %vm866_vm12, %v865_v29, 0 }
  0xc5   : > { %v1417_v28 = vsel %vm1415_vm10, %v1416_v20, %v1412_v15  ;;  %v6859_v52 = vadd.f32 %v365_v43, %v351_v47  ;;  %v6864_v60 = vmul.f32 %v1789_v54, %v6697_v36  ;;  %v1502_v48 = vshrl.u32 %v12639_v7, %v6850_v46 }
  0xc6   : > { %v1418_v39 = vadd.s32 %v1417_v28, %v1413_v13  ;;  %v6868_v55 = vand.u32 31, %v712_v22  ;;  %v6179_v0 = vadd.s32 4294967169, %v1014_v38  ;;  %v393_v2 = vand.u32 2139095040, %v6852_v51 }
  0xc7   : > { %v6182_v17 = vadd.s32 4294967169, %v1169_v56  ;;  %v1493_v8 = vshrl.u32 %v12635_v9, %v6850_v46  ;;  %v1496_v11 = vshrl.u32 %v12633_v63, %v6850_v46  ;;  %v1501_v59 = vshll.u32 %v12631_v1, %v1489_v31 }
  0xc8   : > { %v1419_v44 = vadd.s32 536870912, %v1418_v39  ;;  %v6877_v14 = vshrl.u32 %v1487_v30, 5  ;;  %v548_v15 = vand.u32 2139095040, %v6859_v52  ;;  %v1499_v19 = vshrl.u32 %v12631_v1, %v6850_v46 }
  0xc9   : > { %v12629_v20 = vand.u32 2147483647, %v6788_v49  ;;  %v1492_v21 = vshll.u32 %v12644_v24, %v1489_v31  ;;  %v1495_v26 = vshll.u32 %v12635_v9, %v1489_v31  ;;  %v1503_v27 = vor.u32 %v1502_v48, %v1501_v59 }
  0xca   : > { %v6854_v53 = vshrl.u32 %v1419_v44, 30  ;;  %v6887_v13 = vand.u32 31, %v867_v58  ;;  %v1020_v28 = vadd.s32 1, %v6179_v0  ;;  %v1498_v30 = vshll.u32 %v12633_v63, %v1489_v31 }
  0xcb   : > { %v1505_v29 = vshrl.u32 %v12642_v5, %v6850_v46  ;;  %v1175_v32 = vadd.s32 1, %v6182_v17  ;;  %v1494_v42 = vor.u32 %v1493_v8, %v1492_v21  ;;  %v1497_v37 = vor.u32 %v1496_v11, %v1495_v26 }
  0xcc   : > { %v1421_v10 = vshll.u32 %v6854_v53, 30  ;;  %v1500_v43 = vor.u32 %v1499_v19, %v1498_v30  ;;  %vm1510_vm14 = vcmp.lt.s32.totalorder %v6877_v14, 4  ;;  %v394_v41 = vshrl.u32 %v393_v2, 23 }
  0xcd   : > { %v549_v44 = vshrl.u32 %v548_v15, 23  ;;  %v1482_v38 = vand.u32 8388607, %v12629_v20  ;;  %v1516_v47 = vsel %vm1510_vm14, %v1503_v27, 920167782  ;;  %v6901_v22 = vsub.s32 32, %v6868_v55 }
  0xce   : > { %v6880_v18 = vsub.s32 %v1418_v39, %v1421_v10  ;;  %v1504_v39 = vshll.u32 %v12639_v7, %v1489_v31  ;;  %v6903_v54 = vshrl.u32 %v867_v58, 5  ;;  %v6906_v31 = vsub.s32 32, %v6887_v13 }
  0xcf   : > { %vm1021_vm15 = vcmp.gt.s32.totalorder %v1020_v28, 0  ;;  %vm1507_vm0 = vcmp.lt.s32.totalorder %v6877_v14, 1  ;;  %vm1509_vm1 = vcmp.lt.s32.totalorder %v6877_v14, 3  ;;  %vm1176_vm2 = vcmp.gt.s32.totalorder %v1175_v32, 0 }
  0xd0   : > { %vm1423_vm13 = vcmp.lt.s32.totalorder %v6880_v18, 0  ;;  %v1424_v40 = vsub.s32 0, %v6880_v18  ;;  %v1506_v56 = vor.u32 %v1505_v29, %v1504_v39  ;;  %v1515_v2 = vsel %vm1507_vm0, %v1494_v42, %v1497_v37 }
  0xd1   : > { %v1517_v58 = vsel %vm1509_vm1, %v1500_v43, %v1516_v47  ;;  %v6915_v10 = vadd.s32 4294967169, %v394_v41  ;;  %v6917_v17 = vadd.s32 4294967169, %v549_v44  ;;  %v1483_v8 = vor.u32 8388608, %v1482_v38 }
  0xd2   : > { %v1425_v48 = vsel %vm1423_vm13, %v1424_v40, %v6880_v18  ;;  %v1512_v11 = vsel %vm1510_vm14, %v1500_v43, 2102212464  ;;  %vm1322_vm3 = vcmp.lt.s32.totalorder %v6712_v50, 0  ;;  %v1491_v15 = vshrl.u32 %v12644_v24, %v6850_v46 }
  0xd3   : > { %v1426_v0 = vclz %v1425_v48  ;;  %vm1508_vm4 = vcmp.lt.s32.totalorder %v6877_v14, 2  ;;  %v1520_v19 = vsel %vm1510_vm14, %v1506_v56, 1326507024  ;;  %v1022_v21 = vsel %vm1021_vm15, %v1020_v28, 0 }
  0xd4   : > { %v6928_v26 = vsel %vm1176_vm2, %v1175_v32, 0  ;;  %v1518_v30 = vsel %vm1508_vm4, %v1515_v2, %v1517_v58  ;;  %v1519_v29 = vsel %vm1507_vm0, %v1497_v37, %v1500_v43  ;;  %v1414_v39 = vadd.s32 %v6829_v12, %v6820_v61 }
  0xd5   : > { %v6186_v59 = vadd.s32 4294967294, %v1426_v0  ;;  %v1511_v46 = vsel %vm1507_vm0, %v1491_v15, %v1494_v42  ;;  %v1513_v40 = vsel %vm1509_vm1, %v1497_v37, %v1512_v11  ;;  %v1444_v28 = vsub.s32 4, %v6854_v53 }
  0xd6   : > { %v1521_v32 = vsel %vm1509_vm1, %v1503_v27, %v1520_v19  ;;  %v6943_v44 = vshll.u32 %v1483_v8, 8  ;;  %v1548_v12 = vand.u32 65535, %v1518_v30  ;;  %vm6949_vm6 = vcmp.le.f32.partialorder %v1320_v62, 0.7853982 }
  0xd7   : > { %vm6187_vm5 = vcmp.lt.s32.totalorder %v6186_v59, 0  ;;  %v1522_v61 = vsel %vm1508_vm4, %v1519_v29, %v1521_v32  ;;  %v1549_v58 = vshrl.u32 %v1518_v30, 16  ;;  %v6956_v8 = vshrl.u32 %v1022_v21, 5 }
  0xd8   : > { %v1429_v41 = vsel %vm6187_vm5, 0, %v6186_v59  ;;  %v1524_v37 = vand.u32 65535, %v6943_v44  ;;  %v1525_v47 = vshrl.u32 %v6943_v44, 16  ;;  %v1526_v56 = vand.u32 65535, %v1522_v61 }
  0xd9   : > { %v1430_v38 = vsub.s32 32, %v1429_v41  ;;  %v1434_v43 = vsub.s32 4294967266, %v1429_v41  ;;  %v1527_v27 = vshrl.u32 %v1522_v61, 16  ;;  %v1431_v48 = vshll.u32 %v6880_v18, %v1429_v41 }
  0xda   : > { %v6958_v11 = vand.u32 31, %v1022_v21  ;;  %v1530_v62 = vmul.u32 %v1526_v56, %v1525_v47  ;;  %v6962_v29 = vsel %vm1508_vm4, %v1511_v46, %v1513_v40  ;;  %v1551_v32 = vmul.u32 %v1549_v58, %v1524_v37 }
  0xdb   : > { %v1432_v0 = vshrl.u32 %v1414_v39, %v1430_v38  ;;  %v1435_v2 = vadd.s32 127, %v1434_v43  ;;  %v1529_v59 = vmul.u32 %v1527_v27, %v1524_v37  ;;  %v1445_v18 = vsel %vm1322_vm3, %v1444_v28, %v6854_v53 }
  0xdc   : > { %v1528_v39 = vmul.u32 %v1526_v56, %v1524_v37  ;;  %v1531_v41 = vmul.u32 %v1527_v27, %v1525_v47  ;;  %v1534_v43 = vshll.u32 %v1530_v62, 16  ;;  %v1550_v21 = vmul.u32 %v1548_v12, %v1524_v37 }
  0xdd   : > { %v1433_v15 = vor.u32 %v1432_v0, %v1431_v48  ;;  %v1436_v19 = vshll.u32 %v1435_v2, 23  ;;  %v1532_v30 = vshll.u32 %v1529_v59, 16  ;;  %v1552_v61 = vmul.u32 %v1548_v12, %v1525_v47 }
  0xde   : > { %v1554_v0 = vshll.u32 %v1551_v32, 16  ;;  %v1553_v46 = vmul.u32 %v1549_v58, %v1525_v47  ;;  %v1447_v56 = vsel %vm6949_vm6, 0, %v1445_v18  ;;  %v1533_v27 = vshrl.u32 %v1529_v59, 16 }
  0xdf   : > { %v1437_v38 = vor.u32 4788187, %v1436_v19  ;;  %v1440_v4 = vcvt.s32.f32 %v1433_v15  ;;  %vm1536_vm7 = vc.u32 %v1528_v39, %v1532_v30  ;;  %v1538_v48 = vadd.s32 %v1532_v30, %v1528_v39 }
  0xe0   : > { %v1537_v14 = vsel %vm1536_vm7, 1, %v12637_v3  ;;  %v1556_v40 = vshll.u32 %v1552_v61, 16  ;;  %vm1558_vm9 = vc.u32 %v1550_v21, %v1554_v0  ;;  %v1560_v53 = vadd.s32 %v1554_v0, %v1550_v21 }
  0xe1   : > { %v1438_v2 = vand.u32 2147483647, %v1437_v38  ;;  %v1539_v20 = vadd.s32 %v1537_v14, %v1531_v41  ;;  %vm1540_vm8 = vc.u32 %v1538_v48, %v1534_v43  ;;  %v1559_v12 = vsel %vm1558_vm9, 1, %v12637_v3 }
  0xe2   : > { %v1541_v37 = vsel %vm1540_vm8, 1, %v12637_v3  ;;  %v1561_v19 = vadd.s32 %v1559_v12, %v1553_v46  ;;  %vm1562_vm10 = vc.u32 %v1560_v53, %v1556_v40  ;;  %v6973_v39 = vsub.s32 32, %v6958_v11 }
  0xe3   : > { %v1441_v28 = vmul.f32 %v1440_v4, %v1438_v2  ;;  %v1543_v15 = vadd.s32 %v1541_v37, %v1539_v20  ;;  %v1563_v58 = vsel %vm1562_vm10, 1, %v12637_v3  ;;  %v12630_v41 = vand.u32 2147483647, %v6836_v16 }
  0xe4   : > { %v1535_v4 = vshrl.u32 %v1530_v62, 16  ;;  %v1555_v38 = vshrl.u32 %v1551_v32, 16  ;;  %v1565_v18 = vadd.s32 %v1563_v58, %v1561_v19  ;;  %v6978_v43 = vand.u32 31, %v6928_v26 }
  0xe5   : > { %v1442_v47 = vxor.u32 2147483648, %v1441_v28  ;;  %v1544_v30 = vadd.s32 %v1543_v15, %v1533_v27  ;;  %v1464_v59 = vadd.s32 3, %v1447_v56  ;;  %v1568_v21 = vmul.u32 %v6943_v44, %v6962_v29 }
  0xe6   : > { %v1557_v62 = vshrl.u32 %v1552_v61, 16  ;;  %v1566_v2 = vadd.s32 %v1565_v18, %v1555_v38  ;;  %v6989_v14 = vadd.s32 %v1560_v53, %v1556_v40  ;;  %v1017_v46 = vand.u32 8388607, %v12630_v41 }
  0xe7   : > { %v1443_v20 = vsel %vm1322_vm3, %v1442_v47, %v1441_v28  ;;  %v6987_v0 = vadd.s32 %v1544_v30, %v1535_v4  ;;  %v1027_v28 = vshll.u32 %v12644_v24, %v6958_v11  ;;  %v1028_v44 = vshrl.u32 %v12635_v9, %v6973_v39 }
  0xe8   : > { %v1446_v48 = vsel %vm6949_vm6, %v6712_v50, %v1443_v20  ;;  %v1567_v56 = vadd.s32 %v1566_v2, %v1557_v62  ;;  %v1030_v42 = vshll.u32 %v12635_v9, %v6958_v11  ;;  %v1031_v29 = vshrl.u32 %v12633_v63, %v6973_v39 }
  0xe9   : > { %v1448_v32 = vmul.f32 %v1446_v48, %v1446_v48  ;;  %vm1570_vm11 = vc.u32 %v6987_v0, %v6989_v14  ;;  %v1034_v40 = vshrl.u32 %v12631_v1, %v6973_v39  ;;  %v1033_v12 = vshll.u32 %v12633_v63, %v6958_v11 }
  0xea   : > { %v1571_v53 = vadd.s32 1, %v1567_v56  ;;  %v1036_v27 = vshll.u32 %v12631_v1, %v6958_v11  ;;  %v1037_v15 = vshrl.u32 %v12639_v7, %v6973_v39  ;;  %v1039_v58 = vshll.u32 %v12639_v7, %v6958_v11 }
  0xeb   : > { %v1449_v61 = vmul.f32 -0.001358992, %v1448_v32  ;;  %v1456_v37 = vmul.f32 -0.00019511016, %v1448_v32  ;;  %v1040_v4 = vshrl.u32 %v12642_v5, %v6973_v39  ;;  %v7015_v38 = vor.u32 %v1031_v29, %v1030_v42 }
  0xec   : > { %v1572_v30 = vsel %vm1570_vm11, %v1571_v53, %v1567_v56  ;;  %v1035_v18 = vor.u32 %v1034_v40, %v1033_v12  ;;  %v1038_v20 = vor.u32 %v1037_v15, %v1036_v27  ;;  %v7018_v63 = vsub.s32 32, %v6978_v43 }
  0xed   : > { %v1450_v19 = vadd.f32 0.041655596, %v1449_v61  ;;  %v1457_v47 = vadd.f32 0.008332121, %v1456_v37  ;;  %v1573_v41 = vadd.s32 %v1572_v30, %v1568_v21  ;;  %v1041_v1 = vor.u32 %v1040_v4, %v1039_v58 }
  0xee   : > { %v1465_v61 = vand.u32 3, %v1464_v59  ;;  %v1018_v37 = vor.u32 8388608, %v1017_v46  ;;  %v1029_v9 = vor.u32 %v1028_v44, %v1027_v28  ;;  %vm1045_vm12 = vcmp.lt.s32.totalorder %v6956_v8, 4 }
  0xef   : > { %v1451_v62 = vmul.f32 %v1450_v19, %v1448_v32  ;;  %v1458_v2 = vmul.f32 %v1457_v47, %v1448_v32  ;;  %v1574_v7 = vadd.s32 536870912, %v1573_v41  ;;  %vm1042_vm13 = vcmp.lt.s32.totalorder %v6956_v8, 1 }
  0xf0   : > { %vm1044_vm14 = vcmp.lt.s32.totalorder %v6956_v8, 3  ;;  %v1051_v56 = vsel %vm1045_vm12, %v1038_v20, 920167782  ;;  %v1055_v21 = vsel %vm1045_vm12, %v1041_v1, 1326507024  ;;  %v1054_v46 = vsel %vm1042_vm13, %v7015_v38, %v1035_v18 }
  0xf1   : > { %v1452_v3 = vadd.f32 -0.4999988, %v1451_v62  ;;  %v1459_v11 = vadd.f32 -0.16666654, %v1458_v2  ;;  %v7027_v59 = vshrl.u32 %v1574_v7, 30  ;;  %vm1043_vm15 = vcmp.lt.s32.totalorder %v6956_v8, 2 }
  0xf2   : > { %v1050_v28 = vsel %vm1042_vm13, %v1029_v9, %v7015_v38  ;;  %v1056_v44 = vsel %vm1044_vm14, %v1038_v20, %v1055_v21  ;;  %v7038_v40 = vshll.u32 %v1018_v37, 8  ;;  %vm1463_vm0 = vweird.f32 %v6712_v50 }
  0xf3   : > { %v1453_v42 = vmul.f32 %v1452_v3, %v1448_v32  ;;  %v1460_v29 = vmul.f32 %v1459_v11, %v1448_v32  ;;  %v1576_v7 = vshll.u32 %v7027_v59, 30  ;;  %v1052_v32 = vsel %vm1044_vm14, %v1035_v18, %v1051_v56 }
  0xf4   : > { %vm1466_vm1 = vcmp.lt.s32.totalorder %v1465_v61, 2  ;;  %vm1467_vm2 = vcmp.eq.s32.totalorder %v1465_v61, 0  ;;  %v1057_v53 = vsel %vm1043_vm15, %v1054_v46, %v1056_v44  ;;  %vm1470_vm3 = vcmp.eq.s32.totalorder %v1465_v61, 2 }
  0xf5   : > { %v1454_v1 = vadd.f32 1.0, %v1453_v42  ;;  %v1461_v3 = vadd.f32 1.0, %v1460_v29  ;;  %v1577_v15 = vsub.s32 %v1573_v41, %v1576_v7  ;;  %v1053_v19 = vsel %vm1043_vm15, %v1050_v28, %v1052_v32 }
  0xf6   : > { %v1059_v47 = vand.u32 65535, %v7038_v40  ;;  %v1061_v58 = vand.u32 65535, %v1057_v53  ;;  %v1062_v4 = vshrl.u32 %v1057_v53, 16  ;;  %v1060_v62 = vshrl.u32 %v7038_v40, 16 }
  0xf7   : > { %v1462_v12 = vmul.f32 %v1461_v3, %v1446_v48  ;;  %v1471_v27 = vxor.u32 2147483648, %v1454_v1  ;;  %vm1578_vm4 = vcmp.lt.s32.totalorder %v1577_v15, 0  ;;  %v1579_v20 = vsub.s32 0, %v1577_v15 }
  0xf8   : > { %v1026_v37 = vshrl.u32 %v12644_v24, %v6973_v39  ;;  %v1047_v48 = vsel %vm1045_vm12, %v1035_v18, 2102212464  ;;  %v1064_v41 = vmul.u32 %v1062_v4, %v1059_v47  ;;  %v1065_v21 = vmul.u32 %v1061_v58, %v1060_v62 }
  0xf9   : > { %v1468_v30 = vxor.u32 2147483648, %v1462_v12  ;;  %v1472_v2 = vsel %vm1470_vm3, %v1471_v27, %v1462_v12  ;;  %v1580_v56 = vsel %vm1578_vm4, %v1579_v20, %v1577_v15  ;;  %v1084_v42 = vshrl.u32 %v1053_v19, 16 }
  0xfa   : > { %vm1477_vm5 = vcmp.lt.s32.totalorder %v6788_v49, 0  ;;  %v1581_v46 = vclz %v1580_v56  ;;  %v1067_v28 = vshll.u32 %v1064_v41, 16  ;;  %v1083_v44 = vand.u32 65535, %v1053_v19 }
  0xfb   : > { %v1469_v11 = vsel %vm1467_vm2, %v1454_v1, %v1468_v30  ;;  %v1569_v39 = vadd.s32 %v6989_v14, %v6987_v0  ;;  %v1046_v18 = vsel %vm1042_vm13, %v1026_v37, %v1029_v9  ;;  %v1063_v1 = vmul.u32 %v1061_v58, %v1059_v47 }
  0xfc   : > { %v1473_v29 = vsel %vm1466_vm1, %v1469_v11, %v1472_v2  ;;  %v6189_v7 = vadd.s32 4294967294, %v1581_v46  ;;  %v1599_v61 = vsub.s32 4, %v7027_v59  ;;  %v1048_v32 = vsel %vm1044_vm14, %v7015_v38, %v1047_v48 }
  0xfd   : > { %v1474_v3 = vsel %vm1463_vm0, nan, %v1473_v29  ;;  %v1066_v53 = vmul.u32 %v1062_v4, %v1060_v62  ;;  %v1069_v12 = vshll.u32 %v1065_v21, 16  ;;  %vm1071_vm6 = vc.u32 %v1063_v1, %v1067_v28 }
  0xfe   : > { %1692 = vmatpush.msra.mxu0 %v1474_v3  ;;  %6346 = vmatpush.msra.mxu2 %v1474_v3  ;;  %v1073_v50 = vadd.s32 %v1067_v28, %v1063_v1  ;;  %v1086_v27 = vmul.u32 %v1084_v42, %v1059_v47  ;;  %vm6190_vm7 = vcmp.lt.s32.totalorder %v6189_v7, 0  ;;  %v1068_v0 = vshrl.u32 %v1064_v41, 16 }
  0xff   : > { %v12925_v14 = vmov 0   ;;  %v1087_v9 = vmul.u32 %v1083_v44, %v1060_v62  ;;  %v1584_v58 = vsel %vm6190_vm7, 0, %v6189_v7  ;;  %v1085_v56 = vmul.u32 %v1083_v44, %v1059_v47 }
 0x100   : > { %v1072_v19 = vsel %vm1071_vm6, 1, %v12925_v14  ;;  %vm1075_vm8 = vc.u32 %v1073_v50, %v1069_v12  ;;  %v1089_v20 = vshll.u32 %v1086_v27, 16  ;;  %v1585_v2 = vsub.s32 32, %v1584_v58 }
 0x101   : > { %v1074_v30 = vadd.s32 %v1072_v19, %v1066_v53  ;;  %v1589_v37 = vsub.s32 4294967266, %v1584_v58  ;;  %v1076_v11 = vsel %vm1075_vm8, 1, %v12925_v14  ;;  %v1586_v38 = vshll.u32 %v1577_v15, %v1584_v58  ;;  %v6313_v15 = vld [vmem:[%s12622_s2 + $0x78] sm:$0xff] }
 0x102   : > { %v1088_v48 = vmul.u32 %v1084_v42, %v1060_v62  ;;  %v1091_v29 = vshll.u32 %v1087_v9, 16  ;;  %v1587_v46 = vshrl.u32 %v1569_v39, %v1585_v2  ;;  %vm1093_vm9 = vc.u32 %v1085_v56, %v1089_v20  ;;  %4767 = vperm.xlu1 %6426, %v6313_v15  }
 0x103   : > { %v1078_v4 = vadd.s32 %v1076_v11, %v1074_v30  ;;  %v1590_v28 = vadd.s32 127, %v1589_v37  ;;  %v1095_v41 = vadd.s32 %v1089_v20, %v1085_v56  ;;  %v1600_v3 = vsel %vm1477_vm5, %v1599_v61, %v7027_v59 }
 0x104   : > { %v1070_v1 = vshrl.u32 %v1065_v21, 16  ;;  %v1094_v53 = vsel %vm1093_vm9, 1, %v12925_v14  ;;  %v1588_v12 = vor.u32 %v1587_v46, %v1586_v38  ;;  %v1049_v47 = vsel %vm1043_vm15, %v1046_v18, %v1048_v32 }
 0x105   : > { %v1079_v7 = vadd.s32 %v1078_v4, %v1068_v0  ;;  %v1591_v50 = vshll.u32 %v1590_v28, 23  ;;  %v1096_v19 = vadd.s32 %v1094_v53, %v1088_v48  ;;  %vm1097_vm10 = vc.u32 %v1095_v41, %v1091_v29 }
 0x106   : > { %v1098_v42 = vsel %vm1097_vm10, 1, %v12925_v14  ;;  %v12641_v59 = vand.u32 2147483647, %v6841_v25  ;;  %v12926_v21 = vand.u32 2147483647, %v6788_v49  ;;  %v1090_v61 = vshrl.u32 %v1086_v27, 16 }
 0x107   : > { %v7078_v62 = vadd.s32 %v1079_v7, %v1070_v1  ;;  %v1592_v39 = vor.u32 4788187, %v1591_v50  ;;  %v1100_v0 = vadd.s32 %v1098_v42, %v1096_v19  ;;  %v7089_v58 = vshrl.u32 %v6928_v26, 5 }
 0x108   : > { %vm7084_vm11 = vcmp.le.f32.partialorder %v12926_v21, 0.7853982  ;;  %v1092_v18 = vshrl.u32 %v1087_v9, 16  ;;  %v1099_v32 = vadd.s32 %v1095_v41, %v1091_v29  ;;  %v1595_v20 = vcvt.s32.f32 %v1588_v12 }
 0x109   : > { %v1602_v8 = vsel %vm7084_vm11, 0, %v1600_v3  ;;  %v1593_v30 = vand.u32 2147483647, %v1592_v39  ;;  %v1101_v2 = vadd.s32 %v1100_v0, %v1090_v61  ;;  %v1103_v37 = vmul.u32 %v7038_v40, %v1049_v47  ;;  %v1765_v40 = vpop.permute.xlu1 %1764 }
 0x10a   : > { %vm1105_vm12 = vc.u32 %v7078_v62, %v1099_v32  ;;  %v1172_v11 = vand.u32 8388607, %v12641_v59  ;;  %v12929_v27 = vmov 2475754826   ;;  %v12930_v26 = vmov 2131351028  }
 0x10b   : > { %v1183_v56 = vshrl.u32 %v12929_v27, %v7018_v63  ;;  %v1186_v38 = vshrl.u32 %v12930_v26, %v7018_v63  ;;  %v1596_v4 = vmul.f32 %v1595_v20, %v1593_v30  ;;  %v1102_v48 = vadd.s32 %v1101_v2, %v1092_v18 }
 0x10c   : > { %v1182_v9 = vshll.u32 %v12644_v24, %v6978_v43  ;;  %v12931_v29 = vmov 2102212464   ;;  %v1185_v28 = vshll.u32 %v12929_v27, %v6978_v43  ;;  %v1188_v41 = vshll.u32 %v12930_v26, %v6978_v43 }
 0x10d   : > { %v1189_v46 = vshrl.u32 %v12931_v29, %v7018_v63  ;;  %v1191_v3 = vshll.u32 %v12931_v29, %v6978_v43  ;;  %v12932_v1 = vmov 920167782   ;;  %v1597_v53 = vxor.u32 2147483648, %v1596_v4 }
 0x10e   : > { %v1192_v7 = vshrl.u32 %v12932_v1, %v7018_v63  ;;  %v1106_v12 = vadd.s32 1, %v1102_v48  ;;  %v1194_v50 = vshll.u32 %v12932_v1, %v6978_v43  ;;  %v1195_v19 = vshrl.u32 %v12642_v5, %v7018_v63 }
 0x10f   : > { %v7117_v15 = vor.u32 %v1183_v56, %v1182_v9  ;;  %v7119_v47 = vor.u32 %v1186_v38, %v1185_v28  ;;  %v1190_v42 = vor.u32 %v1189_v46, %v1188_v41  ;;  %v7122_v39 = vmul.f32 %v1765_v40, %v6691_v33 }
 0x110   : > { %v1193_v21 = vor.u32 %v1192_v7, %v1191_v3  ;;  %v1598_v61 = vsel %vm1477_vm5, %v1597_v53, %v1596_v4  ;;  %v1107_v0 = vsel %vm1105_vm12, %v1106_v12, %v1102_v48  ;;  %v1196_v18 = vor.u32 %v1195_v19, %v1194_v50 }
 0x111   : > { %v7131_v43 = vsel %vm7084_vm11, %v6788_v49, %v1598_v61  ;;  %v1108_v30 = vadd.s32 %v1107_v0, %v1103_v37  ;;  %v1173_v20 = vor.u32 8388608, %v1172_v11  ;;  %vm1200_vm13 = vcmp.lt.s32.totalorder %v7089_v58, 4 }
 0x112   : > { %v1603_v2 = vmul.f32 %v7131_v43, %v7131_v43  ;;  %v1619_v56 = vadd.s32 3, %v1602_v8  ;;  %vm1197_vm14 = vcmp.lt.s32.totalorder %v7089_v58, 1  ;;  %v1206_v38 = vsel %vm1200_vm13, %v1193_v21, 920167782 }
 0x113   : > { %v1109_v4 = vadd.s32 536870912, %v1108_v30  ;;  %vm1199_vm15 = vcmp.lt.s32.totalorder %v7089_v58, 3  ;;  %v1205_v44 = vsel %vm1197_vm14, %v7117_v15, %v7119_v47  ;;  %v1209_v37 = vsel %vm1197_vm14, %v7119_v47, %v1190_v42 }
 0x114   : > { %v1604_v11 = vmul.f32 -0.001358992, %v1603_v2  ;;  %v1611_v48 = vmul.f32 -0.00019511016, %v1603_v2  ;;  %v1207_v8 = vsel %vm1199_vm15, %v1190_v42, %v1206_v38  ;;  %v1210_v9 = vsel %vm1200_vm13, %v1196_v18, 1326507024 }
 0x115   : > { %v1110_v46 = vshrl.u32 %v1109_v4, 30  ;;  %vm1198_vm0 = vcmp.lt.s32.totalorder %v7089_v58, 2  ;;  %v1211_v28 = vsel %vm1199_vm15, %v1193_v21, %v1210_v9  ;;  %v7154_v41 = vshll.u32 %v1173_v20, 8 }
 0x116   : > { %v7157_v3 = vmul.f32 %v1765_v40, %v6693_v34  ;;  %v1605_v7 = vadd.f32 0.041655596, %v1604_v11  ;;  %v1612_v53 = vadd.f32 0.008332121, %v1611_v48  ;;  %v1212_v12 = vsel %vm1198_vm0, %v1209_v37, %v1211_v28 }
 0x117   : > { %v7162_v50 = vadd.s32 1, %v6915_v10  ;;  %v1620_v19 = vand.u32 3, %v1619_v56  ;;  %v1111_v61 = vshll.u32 %v1110_v46, 30  ;;  %v7166_v0 = vsel %vm1198_vm0, %v1205_v44, %v1207_v8 }
 0x118   : > { %v1606_v21 = vmul.f32 %v1605_v7, %v1603_v2  ;;  %v1613_v18 = vmul.f32 %v1612_v53, %v1603_v2  ;;  %vm1012_vm1 = vcmp.lt.s32.totalorder %v6836_v16, 0  ;;  %v1217_v40 = vshrl.u32 %v1212_v12, 16 }
 0x119   : > { %v1104_v20 = vadd.s32 %v1099_v32, %v7078_v62  ;;  %v7170_v38 = vsub.s32 %v1108_v30, %v1111_v61  ;;  %v1214_v4 = vand.u32 65535, %v7154_v41  ;;  %v1216_v37 = vand.u32 65535, %v1212_v12 }
 0x11a   : > { %v1607_v10 = vadd.f32 -0.4999988, %v1606_v21  ;;  %v1614_v11 = vadd.f32 -0.16666654, %v1613_v18  ;;  %v1181_v56 = vshrl.u32 %v12644_v24, %v7018_v63  ;;  %v1239_v44 = vshrl.u32 %v7166_v0, 16 }
 0x11b   : > { %vm1622_vm2 = vcmp.eq.s32.totalorder %v1620_v19, 0  ;;  %vm1625_vm3 = vcmp.eq.s32.totalorder %v1620_v19, 2  ;;  %vm1113_vm4 = vcmp.lt.s32.totalorder %v7170_v38, 0  ;;  %v1114_v48 = vsub.s32 0, %v7170_v38 }
 0x11c   : > { %v1215_v62 = vshrl.u32 %v7154_v41, 16  ;;  %v1219_v32 = vmul.u32 %v1217_v40, %v1214_v4  ;;  %v1608_v30 = vmul.f32 %v1607_v10, %v1603_v2  ;;  %v1615_v8 = vmul.f32 %v1614_v11, %v1603_v2 }
 0x11d   : > { %vm1621_vm5 = vcmp.lt.s32.totalorder %v1620_v19, 2  ;;  %v1202_v9 = vsel %vm1200_vm13, %v1190_v42, 2102212464  ;;  %v1238_v28 = vand.u32 65535, %v7166_v0  ;;  %vm1618_vm6 = vweird.f32 %v6788_v49 }
 0x11e   : > { %v1115_v63 = vsel %vm1113_vm4, %v1114_v48, %v7170_v38  ;;  %v1134_v7 = vsub.s32 4, %v1110_v46  ;;  %v7184_v53 = vmul.u32 %v1216_v37, %v1215_v62  ;;  %v1222_v12 = vshll.u32 %v1219_v32, 16 }
 0x11f   : > { %v1609_v61 = vadd.f32 1.0, %v1608_v30  ;;  %v1616_v21 = vadd.f32 1.0, %v1615_v8  ;;  %v1116_v18 = vclz %v1115_v63  ;;  %v1218_v59 = vmul.u32 %v1216_v37, %v1214_v4 }
 0x120   : > { %v1201_v2 = vsel %vm1197_vm14, %v1181_v56, %v7117_v15  ;;  %v1203_v42 = vsel %vm1199_vm15, %v7119_v47, %v1202_v9  ;;  %v1221_v0 = vmul.u32 %v1217_v40, %v1215_v62  ;;  %v1241_v10 = vmul.u32 %v1239_v44, %v1214_v4 }
 0x121   : > { %v1617_v11 = vmul.f32 %v1616_v21, %v7131_v43  ;;  %v1626_v48 = vxor.u32 2147483648, %v1609_v61  ;;  %v6180_v5 = vadd.s32 4294967294, %v1116_v18  ;;  %vm1226_vm7 = vc.u32 %v1218_v59, %v1222_v12 }
 0x122   : > { %v7195_v30 = vsel %vm1012_vm1, %v1134_v7, %v1110_v46  ;;  %v1224_v37 = vshll.u32 %v7184_v53, 16  ;;  %v1227_v8 = vsel %vm1226_vm7, 1, %v12925_v14  ;;  %v1228_v15 = vadd.s32 %v1222_v12, %v1218_v59 }
 0x123   : > { %v1623_v56 = vxor.u32 2147483648, %v1617_v11  ;;  %vm6181_vm8 = vcmp.lt.s32.totalorder %v6180_v5, 0  ;;  %v1229_v63 = vadd.s32 %v1227_v8, %v1221_v0  ;;  %v1240_v47 = vmul.u32 %v1238_v28, %v1214_v4 }
 0x124   : > { %v1119_v40 = vsel %vm6181_vm8, 0, %v6180_v5  ;;  %vm1230_vm9 = vc.u32 %v1228_v15, %v1224_v37  ;;  %v1242_v9 = vmul.u32 %v1238_v28, %v1215_v62  ;;  %v1244_v43 = vshll.u32 %v1241_v10, 16 }
 0x125   : > { %v1624_v21 = vsel %vm1622_vm2, %v1609_v61, %v1623_v56  ;;  %v1627_v18 = vsel %vm1625_vm3, %v1626_v48, %v1617_v11  ;;  %v1120_v24 = vsub.s32 32, %v1119_v40  ;;  %v1124_v46 = vsub.s32 4294967266, %v1119_v40 }
 0x126   : > { %v1628_v7 = vsel %vm1621_vm5, %v1624_v21, %v1627_v18  ;;  %v1121_v34 = vshll.u32 %v7170_v38, %v1119_v40  ;;  %v1223_v33 = vshrl.u32 %v1219_v32, 16  ;;  %v1231_v59 = vsel %vm1230_vm9, 1, %v12925_v14 }
 0x127   : > { %v1629_v4 = vsel %vm1618_vm6, nan, %v1628_v7  ;;  %v1122_v5 = vshrl.u32 %v1104_v20, %v1120_v24  ;;  %v1125_v12 = vadd.s32 127, %v1124_v46  ;;  %v1233_v28 = vadd.s32 %v1231_v59, %v1229_v63 }
 0x128   : > { %1723 = vmatpush.msra.mxu1 %v1629_v4  ;;  %6350 = vmatpush.msra.mxu3 %v1629_v4  ;;  %v1243_v61 = vmul.u32 %v1239_v44, %v1215_v62  ;;  %v1246_v0 = vshll.u32 %v1242_v9, 16  ;;  %vm1248_vm10 = vc.u32 %v1240_v47, %v1244_v43  ;;  %v1250_v11 = vadd.s32 %v1244_v43, %v1240_v47 }
 0x129   : > { %v1123_v48 = vor.u32 %v1122_v5, %v1121_v34  ;;  %v1126_v19 = vshll.u32 %v1125_v12, 23  ;;  %v1234_v37 = vadd.s32 %v1233_v28, %v1223_v33  ;;  %v1249_v38 = vsel %vm1248_vm10, 1, %v12925_v14 }
 0x12a   : > { %v7208_v32 = vadd.s32 1, %v6917_v17  ;;  %v1251_v8 = vadd.s32 %v1249_v38, %v1243_v61  ;;  %vm1252_vm11 = vc.u32 %v1250_v11, %v1246_v0  ;;  %v700_v24 = vand.u32 2147483647, %v6801_v6 }
 0x12b   : > { %vm401_vm12 = vcmp.gt.s32.totalorder %v7162_v50, 0  ;;  %v12933_v49 = vand.u32 2147483647, %v6836_v16  ;;  %v1127_v34 = vor.u32 4788187, %v1126_v19  ;;  %v1225_v33 = vshrl.u32 %v7184_v53, 16 }
 0x12c   : > { %v1253_v44 = vsel %vm1252_vm11, 1, %v12925_v14  ;;  %v1204_v62 = vsel %vm1198_vm0, %v1201_v2, %v1203_v42  ;;  %v1245_v15 = vshrl.u32 %v1241_v10, 16  ;;  %v1130_v47 = vcvt.s32.f32 %v1123_v48 }
 0x12d   : > { %vm7214_vm13 = vcmp.le.f32.partialorder %v12933_v49, 0.7853982  ;;  %v1255_v56 = vadd.s32 %v1253_v44, %v1251_v8  ;;  %v1128_v63 = vand.u32 2147483647, %v1127_v34  ;;  %v7225_v40 = vadd.s32 %v1234_v37, %v1225_v33 }
 0x12e   : > { %v1137_v17 = vsel %vm7214_vm13, 0, %v7195_v30  ;;  %v1247_v43 = vshrl.u32 %v1242_v9, 16  ;;  %v7227_v21 = vadd.s32 %v1250_v11, %v1246_v0  ;;  %v707_v53 = vand.u32 8388607, %v700_v24 }
 0x12f   : > { %v1256_v18 = vadd.s32 %v1255_v56, %v1245_v15  ;;  %v12936_v46 = vmov 683565275   ;;  %v1131_v30 = vmul.f32 %v1130_v47, %v1128_v63  ;;  %v718_v58 = vshrl.u32 %v12929_v27, %v6901_v22 }
 0x130   : > { %v717_v7 = vshll.u32 %v12936_v46, %v6868_v55  ;;  %v720_v2 = vshll.u32 %v12929_v27, %v6868_v55  ;;  %v721_v42 = vshrl.u32 %v12930_v26, %v6901_v22  ;;  %v723_v9 = vshll.u32 %v12930_v26, %v6868_v55 }
 0x131   : > { %v1257_v10 = vadd.s32 %v1256_v18, %v1247_v43  ;;  %v724_v59 = vshrl.u32 %v12931_v29, %v6901_v22  ;;  %v726_v4 = vshll.u32 %v12931_v29, %v6868_v55  ;;  %vm556_vm14 = vcmp.gt.s32.totalorder %v7208_v32, 0 }
 0x132   : > { %v1132_v5 = vxor.u32 2147483648, %v1131_v30  ;;  %vm1260_vm15 = vc.u32 %v7225_v40, %v7227_v21  ;;  %v727_v12 = vshrl.u32 %v12932_v1, %v6901_v22  ;;  %v729_v28 = vshll.u32 %v12932_v1, %v6868_v55 }
 0x133   : > { %v1154_v61 = vadd.s32 3, %v1137_v17  ;;  %v1258_v0 = vmul.u32 %v7154_v41, %v1204_v62  ;;  %v1261_v11 = vadd.s32 1, %v1257_v10  ;;  %v12937_v48 = vmov 1326507024  }
 0x134   : > { %v730_v19 = vshrl.u32 %v12937_v48, %v6901_v22  ;;  %v1133_v37 = vsel %vm1012_vm1, %v1132_v5, %v1131_v30  ;;  %v7257_v38 = vor.u32 %v718_v58, %v717_v7  ;;  %v7259_v8 = vor.u32 %v721_v42, %v720_v2 }
 0x135   : > { %v728_v49 = vor.u32 %v727_v12, %v726_v4  ;;  %v7264_v34 = vsel %vm7214_vm13, %v6836_v16, %v1133_v37  ;;  %v1262_v55 = vsel %vm1260_vm15, %v1261_v11, %v1257_v10  ;;  %v725_v33 = vor.u32 %v724_v59, %v723_v9 }
 0x136   : > { %v731_v41 = vor.u32 %v730_v19, %v729_v28  ;;  %v1138_v44 = vmul.f32 %v7264_v34, %v7264_v34  ;;  %v1263_v17 = vadd.s32 %v1262_v55, %v1258_v0  ;;  %v708_v62 = vor.u32 8388608, %v707_v53 }
 0x137   : > { %vm735_vm0 = vcmp.lt.s32.totalorder %v6861_v57, 4  ;;  %v7272_v15 = vsel %vm401_vm12, %v7162_v50, 0  ;;  %v7274_v56 = vand.u32 3, %v1154_v61  ;;  %vm732_vm1 = vcmp.lt.s32.totalorder %v6861_v57, 1 }
 0x138   : > { %v741_v20 = vsel %vm735_vm0, %v728_v49, 920167782  ;;  %v1139_v63 = vmul.f32 -0.001358992, %v1138_v44  ;;  %v1146_v47 = vmul.f32 -0.00019511016, %v1138_v44  ;;  %v740_v18 = vsel %vm732_vm1, %v7257_v38, %v7259_v8 }
 0x139   : > { %v1264_v43 = vadd.s32 536870912, %v1263_v17  ;;  %vm734_vm2 = vcmp.lt.s32.totalorder %v6861_v57, 3  ;;  %v744_v53 = vsel %vm732_vm1, %v7259_v8, %v725_v33  ;;  %v745_v7 = vsel %vm735_vm0, %v731_v41, 1326507024 }
 0x13a   : > { %v742_v50 = vsel %vm734_vm2, %v725_v33, %v741_v20  ;;  %v1140_v30 = vadd.f32 0.041655596, %v1139_v63  ;;  %v1147_v58 = vadd.f32 0.008332121, %v1146_v47  ;;  %v7293_v42 = vshll.u32 %v708_v62, 8 }
 0x13b   : > { %v7291_v2 = vshrl.u32 %v1264_v43, 30  ;;  %v7297_v10 = vadd.f32 %v6857_v45, %v7122_v39  ;;  %v7301_v9 = vadd.f32 %v6864_v60, %v7157_v3  ;;  %vm733_vm3 = vcmp.lt.s32.totalorder %v6861_v57, 2 }
 0x13c   : > { %v746_v59 = vsel %vm734_vm2, %v728_v49, %v745_v7  ;;  %v1141_v4 = vmul.f32 %v1140_v30, %v1138_v44  ;;  %v1148_v5 = vmul.f32 %v1147_v58, %v1138_v44  ;;  %v7309_v28 = vsel %vm733_vm3, %v740_v18, %v742_v50 }
 0x13d   : > { %v1266_v12 = vshll.u32 %v7291_v2, 30  ;;  %v7312_v45 = vshrl.u32 %v7272_v15, 5  ;;  %v7317_v60 = vsel %vm556_vm14, %v7208_v32, 0  ;;  %v716_v39 = vshrl.u32 %v12936_v46, %v6901_v22 }
 0x13e   : > { %v747_v3 = vsel %vm733_vm3, %v744_v53, %v746_v59  ;;  %v1142_v61 = vadd.f32 -0.4999988, %v1141_v4  ;;  %v1149_v0 = vadd.f32 -0.16666654, %v1148_v5  ;;  %vm1160_vm4 = vcmp.eq.s32.totalorder %v7274_v56, 2 }
 0x13f   : > { %v7324_v11 = vsub.s32 %v1263_v17, %v1266_v12  ;;  %v749_v19 = vand.u32 65535, %v7293_v42  ;;  %vm1157_vm5 = vcmp.eq.s32.totalorder %v7274_v56, 0  ;;  %v750_v37 = vshrl.u32 %v7293_v42, 16 }
 0x140   : > { %v751_v32 = vand.u32 65535, %v747_v3  ;;  %v752_v49 = vshrl.u32 %v747_v3, 16  ;;  %v774_v55 = vshrl.u32 %v7309_v28, 16  ;;  %v1143_v22 = vmul.f32 %v1142_v61, %v1138_v44 }
 0x141   : > { %v1150_v41 = vmul.f32 %v1149_v0, %v1138_v44  ;;  %vm1156_vm6 = vcmp.lt.s32.totalorder %v7274_v56, 2  ;;  %vm1268_vm7 = vcmp.lt.s32.totalorder %v7324_v11, 0  ;;  %v1269_v62 = vsub.s32 0, %v7324_v11 }
 0x142   : > { %vm1153_vm8 = vweird.f32 %v6836_v16  ;;  %vm1167_vm9 = vcmp.lt.s32.totalorder %v6841_v25, 0  ;;  %v1259_v17 = vadd.s32 %v7227_v21, %v7225_v40  ;;  %v737_v20 = vsel %vm735_vm0, %v725_v33, 2102212464 }
 0x143   : > { %v754_v63 = vmul.u32 %v752_v49, %v749_v19  ;;  %v773_v47 = vand.u32 65535, %v7309_v28  ;;  %v1144_v44 = vadd.f32 1.0, %v1143_v22  ;;  %v1151_v43 = vadd.f32 1.0, %v1150_v41 }
 0x144   : > { %v1270_v18 = vsel %vm1268_vm7, %v1269_v62, %v7324_v11  ;;  %v755_v50 = vmul.u32 %v751_v32, %v750_v37  ;;  %v736_v7 = vsel %vm732_vm1, %v716_v39, %v7257_v38  ;;  %v776_v58 = vmul.u32 %v774_v55, %v749_v19 }
 0x145   : > { %v1271_v53 = vclz %v1270_v18  ;;  %v757_v30 = vshll.u32 %v754_v63, 16  ;;  %v1152_v40 = vmul.f32 %v1151_v43, %v7264_v34  ;;  %v1161_v21 = vxor.u32 2147483648, %v1144_v44 }
 0x146   : > { %v738_v33 = vsel %vm734_vm2, %v7259_v8, %v737_v20  ;;  %v753_v59 = vmul.u32 %v751_v32, %v749_v19  ;;  %v1289_v5 = vsub.s32 4, %v7291_v2  ;;  %v756_v12 = vmul.u32 %v752_v49, %v750_v37 }
 0x147   : > { %v6183_v4 = vadd.s32 4294967294, %v1271_v53  ;;  %v777_v28 = vmul.u32 %v773_v47, %v750_v37  ;;  %v1158_v3 = vxor.u32 2147483648, %v1152_v40  ;;  %v759_v61 = vshll.u32 %v755_v50, 16 }
 0x148   : > { %vm761_vm10 = vc.u32 %v753_v59, %v757_v30  ;;  %v763_v0 = vadd.s32 %v757_v30, %v753_v59  ;;  %v1162_v38 = vsel %vm1160_vm4, %v1161_v21, %v1152_v40  ;;  %v779_v39 = vshll.u32 %v776_v58, 16 }
 0x149   : > { %vm6184_vm11 = vcmp.lt.s32.totalorder %v6183_v4, 0  ;;  %v762_v34 = vsel %vm761_vm10, 1, %v12925_v14  ;;  %v1159_v8 = vsel %vm1157_vm5, %v1144_v44, %v1158_v3  ;;  %v775_v20 = vmul.u32 %v773_v47, %v749_v19 }
 0x14a   : > { %v1274_v32 = vsel %vm6184_vm11, 0, %v6183_v4  ;;  %v764_v22 = vadd.s32 %v762_v34, %v756_v12  ;;  %vm765_vm12 = vc.u32 %v763_v0, %v759_v61  ;;  %v1163_v49 = vsel %vm1156_vm6, %v1159_v8, %v1162_v38 }
 0x14b   : > { %v1275_v41 = vsub.s32 32, %v1274_v32  ;;  %v1279_v62 = vsub.s32 4294967266, %v1274_v32  ;;  %v1164_v43 = vsel %vm1153_vm8, nan, %v1163_v49  ;;  %v1290_v18 = vsel %vm1167_vm9, %v1289_v5, %v7291_v2 }
 0x14c   : > { %v758_v53 = vshrl.u32 %v754_v63, 16  ;;  %v766_v30 = vsel %vm765_vm12, 1, %v12925_v14  ;;  %1693 = vmatpush.msra.mxu0 %v1164_v43  ;;  %6347 = vmatpush.msra.mxu2 %v1164_v43  ;;  %v1276_v44 = vshll.u32 %v7324_v11, %v1274_v32  ;;  %v778_v59 = vmul.u32 %v774_v55, %v750_v37  ;;  %v7368_v11 = vpop.permute.xlu2 %1784 }
 0x14d   : > { %v1277_v40 = vshrl.u32 %v1259_v17, %v1275_v41  ;;  %v1280_v56 = vadd.s32 127, %v1279_v62  ;;  %v768_v21 = vadd.s32 %v766_v30, %v764_v22  ;;  %v781_v4 = vshll.u32 %v777_v28, 16 }
 0x14e   : > { %vm783_vm13 = vc.u32 %v775_v20, %v779_v39  ;;  %v785_v19 = vadd.s32 %v779_v39, %v775_v20  ;;  %v760_v2 = vshrl.u32 %v755_v50, 16  ;;  %v855_v5 = vand.u32 2147483647, %v6807_v23 }
 0x14f   : > { %v1278_v16 = vor.u32 %v1277_v40, %v1276_v44  ;;  %v1281_v47 = vshll.u32 %v1280_v56, 23  ;;  %v769_v12 = vadd.s32 %v768_v21, %v758_v53  ;;  %v784_v3 = vsel %vm783_vm13, 1, %v12925_v14 }
 0x150   : > { %v786_v63 = vadd.s32 %v784_v3, %v778_v59  ;;  %vm787_vm14 = vc.u32 %v785_v19, %v781_v4  ;;  %v7366_v61 = vand.u32 31, %v7272_v15  ;;  %v12938_v37 = vand.u32 2147483647, %v6841_v25 }
 0x151   : > { %v1282_v17 = vor.u32 4788187, %v1281_v47  ;;  %v788_v0 = vsel %vm787_vm14, 1, %v12925_v14  ;;  %v739_v50 = vsel %vm733_vm3, %v736_v7, %v738_v33  ;;  %v7379_v38 = vadd.s32 %v769_v12, %v760_v2 }
 0x152   : > { %vm7372_vm15 = vcmp.le.f32.partialorder %v12938_v37, 0.7853982  ;;  %v780_v34 = vshrl.u32 %v776_v58, 16  ;;  %v790_v39 = vadd.s32 %v788_v0, %v786_v63  ;;  %v1285_v8 = vcvt.s32.f32 %v1278_v16 }
 0x153   : > { %v1283_v15 = vand.u32 2147483647, %v1282_v17  ;;  %v1292_v32 = vsel %vm7372_vm15, 0, %v1290_v18  ;;  %v782_v22 = vshrl.u32 %v777_v28, 16  ;;  %v7383_v49 = vadd.s32 %v785_v19, %v781_v4 }
 0x154   : > { %v791_v41 = vadd.s32 %v790_v39, %v780_v34  ;;  %v862_v62 = vand.u32 8388607, %v855_v5  ;;  %v875_v57 = vshll.u32 %v12929_v27, %v6887_v13  ;;  %v876_v58 = vshrl.u32 %v12930_v26, %v6906_v31  ;;  %v7424_v37 = vpop.permute.xlu2 %1829 }
 0x155   : > { %v1286_v7 = vmul.f32 %v1285_v8, %v1283_v15  ;;  %v878_v33 = vshll.u32 %v12930_v26, %v6887_v13  ;;  %v879_v20 = vshrl.u32 %v12931_v29, %v6906_v31  ;;  %vm795_vm0 = vc.u32 %v7379_v38, %v7383_v49 }
 0x156   : > { %v792_v28 = vadd.s32 %v791_v41, %v782_v22  ;;  %v881_v43 = vshll.u32 %v12931_v29, %v6887_v13  ;;  %v882_v18 = vshrl.u32 %v12932_v1, %v6906_v31  ;;  %v872_v30 = vshll.u32 %v12936_v46, %v6887_v13 }
 0x157   : > { %v1287_v53 = vxor.u32 2147483648, %v1286_v7  ;;  %v873_v44 = vshrl.u32 %v12929_v27, %v6906_v31  ;;  %v884_v40 = vshll.u32 %v12932_v1, %v6887_v13  ;;  %v1309_v56 = vadd.s32 3, %v1292_v32 }
 0x158   : > { %v796_v21 = vadd.s32 1, %v792_v28  ;;  %v883_v59 = vor.u32 %v882_v18, %v881_v43  ;;  %v885_v4 = vshrl.u32 %v12937_v48, %v6906_v31  ;;  %v793_v16 = vmul.u32 %v7293_v42, %v739_v50 }
 0x159   : > { %v1288_v19 = vsel %vm1167_vm9, %v1287_v53, %v1286_v7  ;;  %v7412_v47 = vor.u32 %v876_v58, %v875_v57  ;;  %v7414_v12 = vor.u32 %v879_v20, %v878_v33  ;;  %v863_v2 = vor.u32 8388608, %v862_v62 }
 0x15a   : > { %v7419_v3 = vsel %vm7372_vm15, %v6841_v25, %v1288_v19  ;;  %v797_v13 = vsel %vm795_vm0, %v796_v21, %v792_v28  ;;  %v886_v63 = vor.u32 %v885_v4, %v884_v40  ;;  %v7428_v0 = vor.u32 %v873_v44, %v872_v30 }
 0x15b   : > { %v1293_v42 = vmul.f32 %v7419_v3, %v7419_v3  ;;  %v798_v17 = vadd.s32 %v797_v13, %v793_v16  ;;  %vm890_vm1 = vcmp.lt.s32.totalorder %v6903_v54, 4  ;;  %vm887_vm2 = vcmp.lt.s32.totalorder %v6903_v54, 1 }
 0x15c   : > { %vm889_vm3 = vcmp.lt.s32.totalorder %v6903_v54, 3  ;;  %v896_v55 = vsel %vm890_vm1, %v883_v59, 920167782  ;;  %v900_v50 = vsel %vm890_vm1, %v886_v63, 1326507024  ;;  %v899_v8 = vsel %vm887_vm2, %v7412_v47, %v7414_v12 }
 0x15d   : > { %v1294_v34 = vmul.f32 -0.001358992, %v1293_v42  ;;  %v1301_v39 = vmul.f32 -0.00019511016, %v1293_v42  ;;  %v799_v15 = vadd.s32 536870912, %v798_v17  ;;  %v7442_v32 = vshrl.u32 %v7317_v60, 5 }
 0x15e   : > { %v7446_v22 = vadd.f32 %v7424_v37, %v7297_v10  ;;  %v901_v41 = vsel %vm889_vm3, %v883_v59, %v900_v50  ;;  %v7450_v62 = vshll.u32 %v863_v2, 8  ;;  %vm888_vm4 = vcmp.lt.s32.totalorder %v6903_v54, 2 }
 0x15f   : > { %v1295_v57 = vadd.f32 0.041655596, %v1294_v34  ;;  %v1302_v7 = vadd.f32 0.008332121, %v1301_v39  ;;  %v7452_v58 = vshrl.u32 %v799_v15, 30  ;;  %v7455_v33 = vand.u32 3, %v1309_v56 }
 0x160   : > { %v895_v20 = vsel %vm887_vm2, %v7428_v0, %v7412_v47  ;;  %v897_v10 = vsel %vm889_vm3, %v7414_v12, %v896_v55  ;;  %v902_v28 = vsel %vm888_vm4, %v899_v8, %v901_v41  ;;  %v7467_v43 = vsub.s32 32, %v7366_v61 }
 0x161   : > { %v1296_v18 = vmul.f32 %v1295_v57, %v1293_v42  ;;  %v1303_v53 = vmul.f32 %v1302_v7, %v1293_v42  ;;  %v801_v30 = vshll.u32 %v7452_v58, 30  ;;  %v904_v44 = vand.u32 65535, %v7450_v62 }
 0x162   : > { %v7472_v40 = vshrl.u32 %v7450_v62, 16  ;;  %v906_v56 = vand.u32 65535, %v902_v28  ;;  %v907_v21 = vshrl.u32 %v902_v28, 16  ;;  %v898_v16 = vsel %vm888_vm4, %v895_v20, %v897_v10 }
 0x163   : > { %v1297_v59 = vadd.f32 -0.4999988, %v1296_v18  ;;  %v1304_v4 = vadd.f32 -0.16666654, %v1303_v53  ;;  %v7474_v19 = vsub.s32 %v798_v17, %v801_v30  ;;  %vm1312_vm5 = vcmp.eq.s32.totalorder %v7455_v33, 0 }
 0x164   : > { %vm1315_vm6 = vcmp.eq.s32.totalorder %v7455_v33, 2  ;;  %v871_v13 = vshrl.u32 %v12936_v46, %v6906_v31  ;;  %v909_v2 = vmul.u32 %v907_v21, %v904_v44  ;;  %v7483_v63 = vmul.u32 %v906_v56, %v7472_v40 }
 0x165   : > { %v1298_v55 = vmul.f32 %v1297_v59, %v1293_v42  ;;  %v1305_v50 = vmul.f32 %v1304_v4, %v1293_v42  ;;  %vm1311_vm7 = vcmp.lt.s32.totalorder %v7455_v33, 2  ;;  %vm803_vm8 = vcmp.lt.s32.totalorder %v7474_v19, 0 }
 0x166   : > { %v804_v17 = vsub.s32 0, %v7474_v19  ;;  %vm1308_vm9 = vweird.f32 %v6841_v25  ;;  %vm702_vm10 = vcmp.lt.s32.totalorder %v6801_v6, 0  ;;  %v794_v34 = vadd.s32 %v7383_v49, %v7379_v38 }
 0x167   : > { %v908_v31 = vmul.u32 %v906_v56, %v904_v44  ;;  %v912_v39 = vshll.u32 %v909_v2, 16  ;;  %v928_v15 = vand.u32 65535, %v898_v16  ;;  %v1299_v8 = vadd.f32 1.0, %v1298_v55 }
 0x168   : > { %v1306_v41 = vadd.f32 1.0, %v1305_v50  ;;  %v805_v42 = vsel %vm803_vm8, %v804_v17, %v7474_v19  ;;  %v929_v57 = vshrl.u32 %v898_v16, 16  ;;  %v911_v20 = vmul.u32 %v907_v21, %v7472_v40 }
 0x169   : > { %v806_v7 = vclz %v805_v42  ;;  %v914_v10 = vshll.u32 %v7483_v63, 16  ;;  %vm916_vm11 = vc.u32 %v908_v31, %v912_v39  ;;  %v1316_v18 = vxor.u32 2147483648, %v1299_v8 }
 0x16a   : > { %v1307_v28 = vmul.f32 %v1306_v41, %v7419_v3  ;;  %v917_v53 = vsel %vm916_vm11, 1, %v12925_v14  ;;  %v918_v38 = vadd.s32 %v912_v39, %v908_v31  ;;  %vm7499_vm12 = vcmp.le.f32.partialorder %v700_v24, 0.7853982 }
 0x16b   : > { %v6174_v30 = vadd.s32 4294967294, %v806_v7  ;;  %v824_v56 = vsub.s32 4, %v7452_v58  ;;  %v891_v21 = vsel %vm887_vm2, %v871_v13, %v7428_v0  ;;  %v892_v3 = vsel %vm890_vm1, %v7414_v12, 2102212464 }
 0x16c   : > { %v1313_v59 = vxor.u32 2147483648, %v1307_v28  ;;  %v913_v4 = vshrl.u32 %v909_v2, 16  ;;  %v919_v16 = vadd.s32 %v917_v53, %v911_v20  ;;  %vm920_vm13 = vc.u32 %v918_v38, %v914_v10 }
 0x16d   : > { %v1317_v24 = vsel %vm1315_vm6, %v1316_v18, %v1307_v28  ;;  %vm6175_vm14 = vcmp.lt.s32.totalorder %v6174_v30, 0  ;;  %v921_v55 = vsel %vm920_vm13, 1, %v12925_v14  ;;  %v931_v50 = vmul.u32 %v929_v57, %v904_v44 }
 0x16e   : > { %v1314_v17 = vsel %vm1312_vm5, %v1299_v8, %v1313_v59  ;;  %v809_v31 = vsel %vm6175_vm14, 0, %v6174_v30  ;;  %v923_v0 = vadd.s32 %v921_v55, %v919_v16  ;;  %v932_v13 = vmul.u32 %v928_v15, %v7472_v40 }
 0x16f   : > { %v1318_v12 = vsel %vm1311_vm7, %v1314_v17, %v1317_v24  ;;  %v810_v2 = vsub.s32 32, %v809_v31  ;;  %v814_v39 = vsub.s32 4294967266, %v809_v31  ;;  %v930_v41 = vmul.u32 %v928_v15, %v904_v44 }
 0x170   : > { %v1319_v42 = vsel %vm1308_vm9, nan, %v1318_v12  ;;  %v825_v7 = vsel %vm702_vm10, %v824_v56, %v7452_v58  ;;  %v924_v20 = vadd.s32 %v923_v0, %v913_v4  ;;  %v934_v10 = vshll.u32 %v931_v50, 16 }
 0x171   : > { %1724 = vmatpush.msra.mxu1 %v1319_v42  ;;  %6351 = vmatpush.msra.mxu3 %v1319_v42  ;;  %v811_v8 = vshll.u32 %v7474_v19, %v809_v31  ;;  %v812_v28 = vshrl.u32 %v794_v34, %v810_v2  ;;  %v815_v18 = vadd.s32 127, %v814_v39  ;;  %v915_v33 = vshrl.u32 %v7483_v63, 16 }
 0x172   : > { %v933_v53 = vmul.u32 %v929_v57, %v7472_v40  ;;  %v936_v44 = vshll.u32 %v932_v13, 16  ;;  %vm938_vm15 = vc.u32 %v930_v41, %v934_v10  ;;  %v940_v25 = vadd.s32 %v934_v10, %v930_v41 }
 0x173   : > { %v813_v15 = vor.u32 %v812_v28, %v811_v8  ;;  %v816_v38 = vshll.u32 %v815_v18, 23  ;;  %v893_v58 = vsel %vm889_vm3, %v7412_v47, %v892_v3  ;;  %v939_v30 = vsel %vm938_vm15, 1, %v12925_v14 }
 0x174   : > { %v827_v19 = vsel %vm7499_vm12, 0, %v825_v7  ;;  %v7532_v34 = vadd.s32 %v924_v20, %v915_v33  ;;  %v941_v56 = vadd.s32 %v939_v30, %v933_v53  ;;  %vm942_vm0 = vc.u32 %v940_v25, %v936_v44 }
 0x175   : > { %v7535_v40 = vand.u32 31, %v7317_v60  ;;  %v817_v63 = vor.u32 4788187, %v816_v38  ;;  %v943_v57 = vsel %vm942_vm0, 1, %v12925_v14  ;;  %v390_v59 = vand.u32 2147483647, %v6852_v51 }
 0x176   : > { %v2773_v4 = vand.u32 2139095040, %v7446_v22  ;;  %v935_v47 = vshrl.u32 %v931_v50, 16  ;;  %v7540_v3 = vadd.s32 %v940_v25, %v936_v44  ;;  %v945_v16 = vadd.s32 %v943_v57, %v941_v56 }
 0x177   : > { %v818_v24 = vand.u32 2147483647, %v817_v63  ;;  %v820_v55 = vcvt.s32.f32 %v813_v15  ;;  %v844_v17 = vadd.s32 3, %v827_v19  ;;  %v894_v31 = vsel %vm888_vm4, %v891_v21, %v893_v58 }
 0x178   : > { %v937_v0 = vshrl.u32 %v932_v13, 16  ;;  %v946_v60 = vadd.s32 %v945_v16, %v935_v47  ;;  %vm950_vm1 = vc.u32 %v7532_v34, %v7540_v3  ;;  %v411_v12 = vshrl.u32 %v12930_v26, %v7467_v43 }
 0x179   : > { %v821_v2 = vmul.f32 %v820_v55, %v818_v24  ;;  %v397_v50 = vand.u32 8388607, %v390_v59  ;;  %v408_v39 = vshrl.u32 %v12929_v27, %v7467_v43  ;;  %v414_v41 = vshrl.u32 %v12931_v29, %v7467_v43 }
 0x17a   : > { %v947_v54 = vadd.s32 %v946_v60, %v937_v0  ;;  %v410_v21 = vshll.u32 %v12929_v27, %v7366_v61  ;;  %v413_v13 = vshll.u32 %v12930_v26, %v7366_v61  ;;  %v417_v42 = vshrl.u32 %v12932_v1, %v7467_v43 }
 0x17b   : > { %v822_v7 = vxor.u32 2147483648, %v821_v2  ;;  %v407_v20 = vshll.u32 %v12936_v46, %v7366_v61  ;;  %v419_v10 = vshll.u32 %v12932_v1, %v7366_v61  ;;  %v420_v8 = vshrl.u32 %v12937_v48, %v7467_v43 }
 0x17c   : > { %v951_v28 = vadd.s32 1, %v947_v54  ;;  %v7566_v18 = vor.u32 %v411_v12, %v410_v21  ;;  %v7568_v33 = vor.u32 %v414_v41, %v413_v13  ;;  %v416_v53 = vshll.u32 %v12931_v29, %v7366_v61 }
 0x17d   : > { %v823_v44 = vsel %vm702_vm10, %v822_v7, %v821_v2  ;;  %v948_v25 = vmul.u32 %v7450_v62, %v894_v31  ;;  %v398_v15 = vor.u32 8388608, %v397_v50  ;;  %v421_v38 = vor.u32 %v420_v8, %v419_v10 }
 0x17e   : > { %v826_v58 = vsel %vm7499_vm12, %v6801_v6, %v823_v44  ;;  %v952_v30 = vsel %vm950_vm1, %v951_v28, %v947_v54  ;;  %v7581_v19 = vor.u32 %v408_v39, %v407_v20  ;;  %v418_v56 = vor.u32 %v417_v42, %v416_v53 }
 0x17f   : > { %v828_v63 = vmul.f32 %v826_v58, %v826_v58  ;;  %v953_v61 = vadd.s32 %v952_v30, %v948_v25  ;;  %vm422_vm2 = vcmp.lt.s32.totalorder %v7312_v45, 1  ;;  %vm425_vm3 = vcmp.lt.s32.totalorder %v7312_v45, 4 }
 0x180   : > { %v7585_v62 = vand.u32 3, %v844_v17  ;;  %vm423_vm4 = vcmp.lt.s32.totalorder %v7312_v45, 2  ;;  %v434_v49 = vsel %vm422_vm2, %v7566_v18, %v7568_v33  ;;  %v435_v57 = vsel %vm425_vm3, %v421_v38, 1326507024 }
 0x181   : > { %v829_v47 = vmul.f32 -0.001358992, %v828_v63  ;;  %v836_v16 = vmul.f32 -0.00019511016, %v828_v63  ;;  %v954_v24 = vadd.s32 536870912, %v953_v61  ;;  %vm424_vm5 = vcmp.lt.s32.totalorder %v7312_v45, 3 }
 0x182   : > { %v430_v55 = vsel %vm422_vm2, %v7581_v19, %v7566_v18  ;;  %v431_v17 = vsel %vm425_vm3, %v418_v56, 920167782  ;;  %v436_v31 = vsel %vm424_vm5, %v418_v56, %v435_v57  ;;  %v7603_v0 = vshll.u32 %v398_v15, 8 }
 0x183   : > { %v830_v60 = vadd.f32 0.041655596, %v829_v47  ;;  %v837_v12 = vadd.f32 0.008332121, %v836_v16  ;;  %v7605_v2 = vshrl.u32 %v954_v24, 30  ;;  %v437_v50 = vsel %vm423_vm4, %v434_v49, %v436_v31 }
 0x184   : > { %v7610_v39 = vand.u32 65535, %v7603_v0  ;;  %v7613_v41 = vshrl.u32 %v7603_v0, 16  ;;  %v441_v54 = vand.u32 65535, %v437_v50  ;;  %v442_v21 = vshrl.u32 %v437_v50, 16 }
 0x185   : > { %v831_v13 = vmul.f32 %v830_v60, %v828_v63  ;;  %v838_v42 = vmul.f32 %v837_v12, %v828_v63  ;;  %v956_v7 = vshll.u32 %v7605_v2, 30  ;;  %v432_v20 = vsel %vm424_vm5, %v7568_v33, %v431_v17 }
 0x186   : > { %v7620_v10 = vsub.s32 32, %v7535_v40  ;;  %v7624_v8 = vadd.f32 %v7424_v37, %v7301_v9  ;;  %v444_v28 = vmul.u32 %v442_v21, %v7610_v39  ;;  %v7628_v53 = vmul.u32 %v441_v54, %v7613_v41 }
 0x187   : > { %v7632_v44 = vshrl.u32 %v2773_v4, 23  ;;  %v832_v25 = vadd.f32 -0.4999988, %v831_v13  ;;  %v839_v15 = vadd.f32 -0.16666654, %v838_v42  ;;  %v7634_v38 = vsub.s32 %v953_v61, %v956_v7 }
 0x188   : > { %v406_v30 = vshrl.u32 %v12936_v46, %v7467_v43  ;;  %v433_v9 = vsel %vm423_vm4, %v430_v55, %v432_v20  ;;  %v443_v37 = vmul.u32 %v441_v54, %v7610_v39  ;;  %v447_v56 = vshll.u32 %v444_v28, 16 }
 0x189   : > { %v833_v49 = vmul.f32 %v832_v25, %v828_v63  ;;  %v840_v57 = vmul.f32 %v839_v15, %v828_v63  ;;  %vm846_vm6 = vcmp.lt.s32.totalorder %v7585_v62, 2  ;;  %vm958_vm7 = vcmp.lt.s32.totalorder %v7634_v38, 0 }
 0x18a   : > { %v959_v4 = vsub.s32 0, %v7634_v38  ;;  %vm843_vm8 = vweird.f32 %v6801_v6  ;;  %v446_v61 = vmul.u32 %v442_v21, %v7613_v41  ;;  %v449_v43 = vshll.u32 %v7628_v53, 16 }
 0x18b   : > { %vm451_vm9 = vc.u32 %v443_v37, %v447_v56  ;;  %v453_v47 = vadd.s32 %v447_v56, %v443_v37  ;;  %v834_v16 = vadd.f32 1.0, %v833_v49  ;;  %v841_v24 = vadd.f32 1.0, %v840_v57 }
 0x18c   : > { %v960_v55 = vsel %vm958_vm7, %v959_v4, %v7634_v38  ;;  %v452_v63 = vsel %vm451_vm9, 1, %v12925_v14  ;;  %v427_v31 = vsel %vm425_vm3, %v7568_v33, 2102212464  ;;  %vm857_vm11 = vcmp.lt.s32.totalorder %v6807_v23, 0 }
 0x18d   : > { %v961_v17 = vclz %v960_v55  ;;  %v454_v60 = vadd.s32 %v452_v63, %v446_v61  ;;  %vm455_vm10 = vc.u32 %v453_v47, %v449_v43  ;;  %v842_v12 = vmul.f32 %v841_v24, %v826_v58 }
 0x18e   : > { %v851_v50 = vxor.u32 2147483648, %v834_v16  ;;  %v456_v54 = vsel %vm455_vm10, 1, %v12925_v14  ;;  %v463_v21 = vand.u32 65535, %v433_v9  ;;  %vm847_vm12 = vcmp.eq.s32.totalorder %v7585_v62, 0 }
 0x18f   : > { %vm850_vm13 = vcmp.eq.s32.totalorder %v7585_v62, 2  ;;  %v949_v13 = vadd.s32 %v7540_v3, %v7532_v34  ;;  %v6177_v42 = vadd.s32 4294967294, %v961_v17  ;;  %v848_v7 = vxor.u32 2147483648, %v842_v12 }
 0x190   : > { %v426_v33 = vsel %vm422_vm2, %v406_v30, %v7581_v19  ;;  %v458_v58 = vadd.s32 %v456_v54, %v454_v60  ;;  %v464_v20 = vshrl.u32 %v433_v9, 16  ;;  %v852_v25 = vsel %vm850_vm13, %v851_v50, %v842_v12 }
 0x191   : > { %vm6178_vm14 = vcmp.lt.s32.totalorder %v6177_v42, 0  ;;  %v428_v15 = vsel %vm424_vm5, %v7566_v18, %v427_v31  ;;  %v448_v37 = vshrl.u32 %v444_v28, 16  ;;  %v849_v56 = vsel %vm847_vm12, %v834_v16, %v848_v7 }
 0x192   : > { %v964_v49 = vsel %vm6178_vm14, 0, %v6177_v42  ;;  %v466_v57 = vmul.u32 %v464_v20, %v7610_v39  ;;  %v467_v34 = vmul.u32 %v463_v21, %v7613_v41  ;;  %v853_v3 = vsel %vm846_vm6, %v849_v56, %v852_v25 }
 0x193   : > { %v965_v4 = vsub.s32 32, %v964_v49  ;;  %v969_v19 = vsub.s32 4294967266, %v964_v49  ;;  %v979_v30 = vsub.s32 4, %v7605_v2  ;;  %v854_v9 = vsel %vm843_vm8, nan, %v853_v3 }
 0x194   : > { %v459_v61 = vadd.s32 %v458_v58, %v448_v37  ;;  %v465_v18 = vmul.u32 %v463_v21, %v7610_v39  ;;  %v469_v28 = vshll.u32 %v466_v57, 16  ;;  %1694 = vmatpush.msra.mxu0 %v854_v9  ;;  %6348 = vmatpush.msra.mxu2 %v854_v9  ;;  %v966_v43 = vshll.u32 %v7634_v38, %v964_v49  ;;  %v7682_v38 = vld [vmem:[%s12621_s1 + $0x70] sm:$0xff] }
 0x195   : > { %v967_v47 = vshrl.u32 %v949_v13, %v965_v4  ;;  %v970_v16 = vadd.s32 127, %v969_v19  ;;  %v450_v62 = vshrl.u32 %v7628_v53, 16  ;;  %v468_v24 = vmul.u32 %v464_v20, %v7613_v41  ;;  %v6258_v41 = vld [vmem:[%s12622_s2 + $0x48] sm:$0xff]  ;;  %4722 = vperm.xlu0 %6425, %v7682_v38  }
 0x196   : > { %v471_v55 = vshll.u32 %v467_v34, 16  ;;  %vm473_vm15 = vc.u32 %v465_v18, %v469_v28  ;;  %v475_v63 = vadd.s32 %v469_v28, %v465_v18  ;;  %v980_v39 = vsel %vm857_vm11, %v979_v30, %v7605_v2  ;;  %3288 = vperm.xlu2 %6422, %v6258_v41  }
 0x197   : > { %v968_v17 = vor.u32 %v967_v47, %v966_v43  ;;  %v971_v6 = vshll.u32 %v970_v16, 23  ;;  %v474_v31 = vsel %vm473_vm15, 1, %v12925_v14  ;;  %v7687_v53 = vadd.s32 %v459_v61, %v450_v62 }
 0x198   : > { %v476_v60 = vadd.s32 %v474_v31, %v468_v24  ;;  %vm477_vm0 = vc.u32 %v475_v63, %v471_v55  ;;  %v545_v12 = vand.u32 2147483647, %v6859_v52  ;;  %v7691_v50 = vadd.s32 4294967169, %v7632_v44 }
 0x199   : > { %vm7695_vm1 = vcmp.le.f32.partialorder %v855_v5, 0.7853982  ;;  %v972_v54 = vor.u32 4788187, %v971_v6  ;;  %v478_v21 = vsel %vm477_vm0, 1, %v12925_v14  ;;  %v429_v13 = vsel %vm423_vm4, %v426_v33, %v428_v15 }
 0x19a   : > { %v470_v42 = vshrl.u32 %v466_v57, 16  ;;  %v7703_v7 = vadd.s32 %v475_v63, %v471_v55  ;;  %v480_v44 = vadd.s32 %v478_v21, %v476_v60  ;;  %v975_v20 = vcvt.s32.f32 %v968_v17 }
 0x19b   : > { %v973_v58 = vand.u32 2147483647, %v972_v54  ;;  %v982_v5 = vsel %vm7695_vm1, 0, %v980_v39  ;;  %v472_v25 = vshrl.u32 %v467_v34, 16  ;;  %v552_v56 = vand.u32 8388607, %v545_v12 }
 0x19c   : > { %v481_v37 = vadd.s32 %v480_v44, %v470_v42  ;;  %vm485_vm2 = vc.u32 %v7687_v53, %v7703_v7  ;;  %v566_v45 = vshrl.u32 %v12930_v26, %v7620_v10  ;;  %v563_v15 = vshrl.u32 %v12929_v27, %v7620_v10 }
 0x19d   : > { %v976_v33 = vmul.f32 %v975_v20, %v973_v58  ;;  %v565_v49 = vshll.u32 %v12929_v27, %v7535_v40  ;;  %v569_v57 = vshrl.u32 %v12931_v29, %v7620_v10  ;;  %v568_v3 = vshll.u32 %v12930_v26, %v7535_v40 }
 0x19e   : > { %v482_v34 = vadd.s32 %v481_v37, %v472_v25  ;;  %v571_v4 = vshll.u32 %v12931_v29, %v7535_v40  ;;  %v572_v19 = vshrl.u32 %v12932_v1, %v7620_v10  ;;  %v562_v9 = vshll.u32 %v12936_v46, %v7535_v40 }
 0x19f   : > { %v977_v30 = vxor.u32 2147483648, %v976_v33  ;;  %v574_v61 = vshll.u32 %v12932_v1, %v7535_v40  ;;  %v575_v18 = vshrl.u32 %v12937_v48, %v7620_v10  ;;  %v7731_v43 = vor.u32 %v566_v45, %v565_v49 }
 0x1a0   : > { %v486_v28 = vadd.s32 1, %v482_v34  ;;  %v7733_v47 = vor.u32 %v569_v57, %v568_v3  ;;  %v573_v16 = vor.u32 %v572_v19, %v571_v4  ;;  %v483_v24 = vmul.u32 %v7603_v0, %v429_v13 }
 0x1a1   : > { %v978_v62 = vsel %vm857_vm11, %v977_v30, %v976_v33  ;;  %v553_v55 = vor.u32 8388608, %v552_v56  ;;  %v576_v63 = vor.u32 %v575_v18, %v574_v61  ;;  %v7744_v6 = vor.u32 %v563_v15, %v562_v9 }
 0x1a2   : > { %v981_v40 = vsel %vm7695_vm1, %v6807_v23, %v978_v62  ;;  %v487_v17 = vsel %vm485_vm2, %v486_v28, %v482_v34  ;;  %vm580_vm3 = vcmp.lt.s32.totalorder %v7442_v32, 4  ;;  %vm577_vm4 = vcmp.lt.s32.totalorder %v7442_v32, 1 }
 0x1a3   : > { %v983_v39 = vmul.f32 %v981_v40, %v981_v40  ;;  %v488_v31 = vadd.s32 %v487_v17, %v483_v24  ;;  %v586_v0 = vsel %vm580_vm3, %v573_v16, 920167782  ;;  %v999_v41 = vadd.s32 3, %v982_v5 }
 0x1a4   : > { %vm578_vm5 = vcmp.lt.s32.totalorder %v7442_v32, 2  ;;  %v589_v60 = vsel %vm577_vm4, %v7731_v43, %v7733_v47  ;;  %v590_v2 = vsel %vm580_vm3, %v576_v63, 1326507024  ;;  %vm579_vm6 = vcmp.lt.s32.totalorder %v7442_v32, 3 }
 0x1a5   : > { %v984_v54 = vmul.f32 -0.001358992, %v983_v39  ;;  %v991_v21 = vmul.f32 -0.00019511016, %v983_v39  ;;  %v489_v13 = vadd.s32 536870912, %v488_v31  ;;  %v585_v42 = vsel %vm577_vm4, %v7744_v6, %v7731_v43 }
 0x1a6   : > { %v587_v44 = vsel %vm579_vm6, %v7733_v47, %v586_v0  ;;  %v591_v58 = vsel %vm579_vm6, %v573_v16, %v590_v2  ;;  %v7767_v20 = vshll.u32 %v553_v55, 8  ;;  %v2928_v4 = vand.u32 2139095040, %v7624_v8 }
 0x1a7   : > { %v985_v5 = vadd.f32 0.041655596, %v984_v54  ;;  %v992_v25 = vadd.f32 0.008332121, %v991_v21  ;;  %v7769_v37 = vshrl.u32 %v489_v13, 30  ;;  %v592_v56 = vsel %vm578_vm5, %v589_v60, %v591_v58 }
 0x1a8   : > { %v594_v45 = vand.u32 65535, %v7767_v20  ;;  %v595_v33 = vshrl.u32 %v7767_v20, 16  ;;  %v596_v15 = vand.u32 65535, %v592_v56  ;;  %v597_v49 = vshrl.u32 %v592_v56, 16 }
 0x1a9   : > { %v986_v57 = vmul.f32 %v985_v5, %v983_v39  ;;  %v993_v34 = vmul.f32 %v992_v25, %v983_v39  ;;  %v491_v3 = vshll.u32 %v7769_v37, 30  ;;  %v588_v28 = vsel %vm578_vm5, %v585_v42, %v587_v44 }
 0x1aa   : > { %v7777_v19 = vmul.u32 %v597_v49, %v594_v45  ;;  %v7779_v30 = vmul.u32 %v596_v15, %v595_v33  ;;  %v2780_v16 = vadd.s32 1, %v7691_v50  ;;  %v1000_v62 = vand.u32 3, %v999_v41 }
 0x1ab   : > { %v987_v9 = vadd.f32 -0.4999988, %v986_v57  ;;  %v994_v61 = vadd.f32 -0.16666654, %v993_v34  ;;  %v492_v18 = vsub.s32 %v488_v31, %v491_v3  ;;  %v598_v24 = vmul.u32 %v596_v15, %v594_v45 }
 0x1ac   : > { %v602_v55 = vshll.u32 %v7777_v19, 16  ;;  %v604_v60 = vshll.u32 %v7779_v30, 16  ;;  %v619_v54 = vshrl.u32 %v588_v28, 16  ;;  %v601_v50 = vmul.u32 %v597_v49, %v595_v33 }
 0x1ad   : > { %v988_v63 = vmul.f32 %v987_v9, %v983_v39  ;;  %v995_v17 = vmul.f32 %v994_v61, %v983_v39  ;;  %vm493_vm7 = vcmp.lt.s32.totalorder %v492_v18, 0  ;;  %v494_v0 = vsub.s32 0, %v492_v18 }
 0x1ae   : > { %vm606_vm8 = vc.u32 %v598_v24, %v602_v55  ;;  %v608_v2 = vadd.s32 %v602_v55, %v598_v24  ;;  %v618_v41 = vand.u32 65535, %v588_v28  ;;  %vm2781_vm10 = vcmp.gt.s32.totalorder %v2780_v16, 0 }
 0x1af   : > { %v989_v21 = vadd.f32 1.0, %v988_v63  ;;  %v996_v31 = vadd.f32 1.0, %v995_v17  ;;  %v495_v13 = vsel %vm493_vm7, %v494_v0, %v492_v18  ;;  %v607_v42 = vsel %vm606_vm8, 1, %v12925_v14 }
 0x1b0   : > { %v496_v44 = vclz %v495_v13  ;;  %vm610_vm9 = vc.u32 %v608_v2, %v604_v60  ;;  %vm998_vm11 = vweird.f32 %v6807_v23  ;;  %vm1001_vm12 = vcmp.lt.s32.totalorder %v1000_v62, 2 }
 0x1b1   : > { %v997_v58 = vmul.f32 %v996_v31, %v981_v40  ;;  %v1006_v39 = vxor.u32 2147483648, %v989_v21  ;;  %vm1002_vm13 = vcmp.eq.s32.totalorder %v1000_v62, 0  ;;  %v609_v25 = vadd.s32 %v607_v42, %v601_v50 }
 0x1b2   : > { %v6168_v5 = vadd.s32 4294967294, %v496_v44  ;;  %vm1005_vm14 = vcmp.eq.s32.totalorder %v1000_v62, 2  ;;  %v611_v15 = vsel %vm610_vm9, 1, %v12925_v14  ;;  %v621_v57 = vmul.u32 %v619_v54, %v594_v45 }
 0x1b3   : > { %v1003_v56 = vxor.u32 2147483648, %v997_v58  ;;  %v1007_v34 = vsel %vm1005_vm14, %v1006_v39, %v997_v58  ;;  %v484_v49 = vadd.s32 %v7703_v7, %v7687_v53  ;;  %v620_v3 = vmul.u32 %v618_v41, %v594_v45 }
 0x1b4   : > { %vm6169_vm15 = vcmp.lt.s32.totalorder %v6168_v5, 0  ;;  %v622_v61 = vmul.u32 %v618_v41, %v595_v33  ;;  %v624_v28 = vshll.u32 %v621_v57, 16  ;;  %v613_v17 = vadd.s32 %v611_v15, %v609_v25 }
 0x1b5   : > { %v1004_v9 = vsel %vm1002_vm13, %v989_v21, %v1003_v56  ;;  %v499_v40 = vsel %vm6169_vm15, 0, %v6168_v5  ;;  %v2929_v0 = vshrl.u32 %v2928_v4, 23  ;;  %v603_v2 = vshrl.u32 %v7777_v19, 16 }
 0x1b6   : > { %v1008_v24 = vsel %vm1001_vm12, %v1004_v9, %v1007_v34  ;;  %v500_v55 = vsub.s32 32, %v499_v40  ;;  %v504_v63 = vsub.s32 4294967266, %v499_v40  ;;  %v623_v31 = vmul.u32 %v619_v54, %v595_v33 }
 0x1b7   : > { %v1009_v60 = vsel %vm998_vm11, nan, %v1008_v24  ;;  %v501_v53 = vshll.u32 %v492_v18, %v499_v40  ;;  %vm628_vm0 = vc.u32 %v620_v3, %v624_v28  ;;  %v2782_v21 = vsel %vm2781_vm10, %v2780_v16, 0 }
 0x1b8   : > { %1725 = vmatpush.msra.mxu1 %v1009_v60  ;;  %6352 = vmatpush.msra.mxu3 %v1009_v60  ;;  %v502_v7 = vshrl.u32 %v484_v49, %v500_v55  ;;  %v505_v45 = vadd.s32 127, %v504_v63  ;;  %v626_v62 = vshll.u32 %v622_v61, 16  ;;  %v629_v13 = vsel %vm628_vm0, 1, %v12925_v14 }
 0x1b9   : > { %v630_v42 = vadd.s32 %v624_v28, %v620_v3  ;;  %v614_v50 = vadd.s32 %v613_v17, %v603_v2  ;;  %v631_v23 = vadd.s32 %v629_v13, %v623_v31  ;;  %v6230_v41 = vadd.s32 4294967169, %v2929_v0 }
 0x1ba   : > { %v503_v44 = vor.u32 %v502_v7, %v501_v53  ;;  %v506_v4 = vshll.u32 %v505_v45, 23  ;;  %v561_v33 = vshrl.u32 %v12936_v46, %v7620_v10  ;;  %v582_v19 = vsel %vm580_vm3, %v7733_v47, 2102212464 }
 0x1bb   : > { %vm632_vm1 = vc.u32 %v630_v42, %v626_v62  ;;  %v2784_v18 = vand.u32 31, %v2782_v21  ;;  %v605_v16 = vshrl.u32 %v7779_v30, 16  ;;  %v625_v5 = vshrl.u32 %v621_v57, 16 }
 0x1bc   : > { %v507_v54 = vor.u32 4788187, %v506_v4  ;;  %v633_v58 = vsel %vm632_vm1, 1, %v12925_v14  ;;  %v581_v39 = vsel %vm577_vm4, %v561_v33, %v7744_v6  ;;  %v510_v15 = vcvt.s32.f32 %v503_v44 }
 0x1bd   : > { %v635_v25 = vadd.s32 %v633_v58, %v631_v23  ;;  %v583_v10 = vsel %vm579_vm6, %v7731_v43, %v582_v19  ;;  %v7810_v47 = vadd.s32 %v614_v50, %v605_v16  ;;  %v627_v34 = vshrl.u32 %v622_v61, 16 }
 0x1be   : > { %v508_v56 = vand.u32 2147483647, %v507_v54  ;;  %v7812_v3 = vsub.s32 32, %v2784_v18  ;;  %v2935_v30 = vadd.s32 1, %v6230_v41  ;;  %v7814_v40 = vadd.s32 %v630_v42, %v626_v62 }
 0x1bf   : > { %v636_v49 = vadd.s32 %v635_v25, %v625_v5  ;;  %v584_v6 = vsel %vm578_vm5, %v581_v39, %v583_v10  ;;  %v7818_v28 = vshrl.u32 %v2782_v21, 5  ;;  %vm392_vm3 = vcmp.lt.s32.totalorder %v6852_v51, 0 }
 0x1c0   : > { %v511_v9 = vmul.f32 %v510_v15, %v508_v56  ;;  %vm640_vm2 = vc.u32 %v7810_v47, %v7814_v40  ;;  %v514_v43 = vsub.s32 4, %v7769_v37  ;;  %v2800_v55 = vshrl.u32 %v12937_v48, %v7812_v3 }
 0x1c1   : > { %v637_v57 = vadd.s32 %v636_v49, %v627_v34  ;;  %vm2936_vm4 = vcmp.gt.s32.totalorder %v2935_v30, 0  ;;  %vm7828_vm6 = vcmp.le.f32.partialorder %v390_v59, 0.7853982  ;;  %v638_v17 = vmul.u32 %v7767_v20, %v584_v6 }
 0x1c2   : > { %v512_v24 = vxor.u32 2147483648, %v511_v9  ;;  %v2796_v0 = vshll.u32 %v12931_v29, %v2784_v18  ;;  %v2797_v60 = vshrl.u32 %v12932_v1, %v7812_v3  ;;  %v2799_v59 = vshll.u32 %v12932_v1, %v2784_v18 }
 0x1c3   : > { %v641_v61 = vadd.s32 1, %v637_v57  ;;  %vm2805_vm5 = vcmp.lt.s32.totalorder %v7818_v28, 4  ;;  %v515_v20 = vsel %vm392_vm3, %v514_v43, %v7769_v37  ;;  %v12651_v45 = vand.u32 2147483647, %v7446_v22 }
 0x1c4   : > { %v513_v63 = vsel %vm392_vm3, %v512_v24, %v511_v9  ;;  %v2791_v21 = vshrl.u32 %v12930_v26, %v7812_v3  ;;  %v2794_v62 = vshrl.u32 %v12931_v29, %v7812_v3  ;;  %v2801_v13 = vor.u32 %v2800_v55, %v2799_v59 }
 0x1c5   : > { %v516_v2 = vsel %vm7828_vm6, %v6852_v51, %v513_v63  ;;  %v642_v31 = vsel %vm640_vm2, %v641_v61, %v637_v57  ;;  %v2798_v50 = vor.u32 %v2797_v60, %v2796_v0  ;;  %v2788_v23 = vshrl.u32 %v12929_v27, %v7812_v3 }
 0x1c6   : > { %v518_v53 = vmul.f32 %v516_v2, %v516_v2  ;;  %v643_v7 = vadd.s32 %v642_v31, %v638_v17  ;;  %v2790_v41 = vshll.u32 %v12929_v27, %v2784_v18  ;;  %v2793_v37 = vshll.u32 %v12930_v26, %v2784_v18 }
 0x1c7   : > { %v517_v33 = vsel %vm7828_vm6, 0, %v515_v20  ;;  %v2777_v58 = vand.u32 8388607, %v12651_v45  ;;  %v2787_v39 = vshll.u32 %v12936_v46, %v2784_v18  ;;  %v2815_v56 = vsel %vm2805_vm5, %v2801_v13, 1326507024 }
 0x1c8   : > { %v519_v42 = vmul.f32 -0.001358992, %v518_v53  ;;  %v526_v44 = vmul.f32 -0.00019511016, %v518_v53  ;;  %v644_v4 = vadd.s32 536870912, %v643_v7  ;;  %v7862_v5 = vor.u32 %v2791_v21, %v2790_v41 }
 0x1c9   : > { %v7864_v25 = vor.u32 %v2794_v62, %v2793_v37  ;;  %v2811_v49 = vsel %vm2805_vm5, %v2798_v50, 920167782  ;;  %v534_v9 = vadd.s32 3, %v517_v33  ;;  %v7871_v6 = vor.u32 %v2788_v23, %v2787_v39 }
 0x1ca   : > { %v520_v19 = vadd.f32 0.041655596, %v519_v42  ;;  %v527_v54 = vadd.f32 0.008332121, %v526_v44  ;;  %v7857_v16 = vshrl.u32 %v644_v4, 30  ;;  %vm2802_vm7 = vcmp.lt.s32.totalorder %v7818_v28, 1 }
 0x1cb   : > { %vm2804_vm8 = vcmp.lt.s32.totalorder %v7818_v28, 3  ;;  %v2937_v43 = vsel %vm2936_vm4, %v2935_v30, 0  ;;  %v2778_v61 = vor.u32 8388608, %v2777_v58  ;;  %v2814_v55 = vsel %vm2802_vm7, %v7862_v5, %v7864_v25 }
 0x1cc   : > { %v521_v15 = vmul.f32 %v520_v19, %v518_v53  ;;  %v528_v10 = vmul.f32 %v527_v54, %v518_v53  ;;  %v646_v34 = vshll.u32 %v7857_v16, 30  ;;  %v2816_v32 = vsel %vm2804_vm8, %v2798_v50, %v2815_v56  ;;  %v7902_v50 = vpop.permute.xlu1 %1759 }
 0x1cd   : > { %v535_v60 = vand.u32 3, %v534_v9  ;;  %vm2803_vm10 = vcmp.lt.s32.totalorder %v7818_v28, 2  ;;  %v2810_v30 = vsel %vm2802_vm7, %v7871_v6, %v7862_v5  ;;  %v2812_v31 = vsel %vm2804_vm8, %v7864_v25, %v2811_v49 }
 0x1ce   : > { %v522_v18 = vadd.f32 -0.4999988, %v521_v15  ;;  %v529_v57 = vadd.f32 -0.16666654, %v528_v10  ;;  %v647_v24 = vsub.s32 %v643_v7, %v646_v34  ;;  %v7894_v62 = vshll.u32 %v2778_v61, 8 }
 0x1cf   : > { %v7898_v44 = vsel %vm2803_vm10, %v2810_v30, %v2812_v31  ;;  %v7900_v4 = vand.u32 31, %v2937_v43  ;;  %vm533_vm11 = vweird.f32 %v6852_v51  ;;  %vm536_vm12 = vcmp.lt.s32.totalorder %v535_v60, 2  ;;  %v7938_v30 = vld [vmem:[%s12623_s3] sm:$0xff]  ;;  %v7943_v31 = vld [vmem:[%s12623_s3 + $0x18] sm:$0xff] }
 0x1d0   : > { %v523_v63 = vmul.f32 %v522_v18, %v518_v53  ;;  %v530_v17 = vmul.f32 %v529_v57, %v518_v53  ;;  %vm648_vm9 = vcmp.lt.s32.totalorder %v647_v24, 0  ;;  %v649_v0 = vsub.s32 0, %v647_v24 }
 0x1d1   : > { %v7892_v53 = vsel %vm2803_vm10, %v2814_v55, %v2816_v32  ;;  %vm537_vm13 = vcmp.eq.s32.totalorder %v535_v60, 0  ;;  %vm540_vm14 = vcmp.eq.s32.totalorder %v535_v60, 2  ;;  %v2844_v33 = vshrl.u32 %v7898_v44, 16 }
 0x1d2   : > { %v524_v59 = vadd.f32 1.0, %v523_v63  ;;  %v531_v7 = vadd.f32 1.0, %v530_v17  ;;  %v650_v20 = vsel %vm648_vm9, %v649_v0, %v647_v24  ;;  %v2822_v41 = vshrl.u32 %v7892_v53, 16 }
 0x1d3   : > { %v651_v21 = vclz %v650_v20  ;;  %v639_v58 = vadd.s32 %v7814_v40, %v7810_v47  ;;  %v7915_v49 = vsub.s32 32, %v7900_v4  ;;  %v2821_v18 = vand.u32 65535, %v7892_v53  ;;  %v6240_v20 = vld [vmem:[%s12624_s4 + $0x38] sm:$0xff] }
 0x1d4   : > { %v532_v13 = vmul.f32 %v531_v7, %v516_v2  ;;  %v541_v42 = vxor.u32 2147483648, %v524_v59  ;;  %v2819_v2 = vand.u32 65535, %v7894_v62  ;;  %v2843_v55 = vand.u32 65535, %v7898_v44  ;;  %v6312_v7 = vld [vmem:[%s12622_s2 + $0x70] sm:$0xff]  ;;  %3112 = vperm.xlu2 %6422, %v6240_v20  }
 0x1d5   : > { %v6171_v23 = vadd.s32 4294967294, %v651_v21  ;;  %v2820_v17 = vshrl.u32 %v7894_v62, 16  ;;  %v7927_v0 = vshrl.u32 %v2937_v43, 5  ;;  %v2952_v60 = vshrl.u32 %v12932_v1, %v7915_v49  ;;  %v7945_v43 = vpop.permute.xlu1 %1780  ;;  %4762 = vperm.xlu1 %6426, %v6312_v7   ;;  %v6238_v7 = vld [vmem:[%s12624_s4 + $0x28] sm:$0xff] }
 0x1d6   : > { %v538_v37 = vxor.u32 2147483648, %v532_v13  ;;  %v542_v54 = vsel %vm540_vm14, %v541_v42, %v532_v13  ;;  %v7912_v34 = vmul.u32 %v2822_v41, %v2819_v2  ;;  %v7922_v61 = vmul.u32 %v2844_v33, %v2819_v2 }
 0x1d7   : > { %vm6172_vm15 = vcmp.lt.s32.totalorder %v6171_v23, 0  ;;  %vm1664_vm0 = vcmask 261120   ;;  %v2823_v21 = vmul.u32 %v2821_v18, %v2819_v2  ;;  %v7957_v13 = vmul.u32 %v2821_v18, %v2820_v17 }
 0x1d8   : > { %v539_v19 = vsel %vm537_vm13, %v524_v59, %v538_v37  ;;  %v654_v39 = vsel %vm6172_vm15, 0, %v6171_v23  ;;  %v2827_v51 = vshll.u32 %v7912_v34, 16  ;;  %v2849_v42 = vshll.u32 %v7922_v61, 16 }
 0x1d9   : > { %v543_v56 = vsel %vm536_vm12, %v539_v19, %v542_v54  ;;  %v655_v15 = vsub.s32 32, %v654_v39  ;;  %v659_v10 = vsub.s32 4294967266, %v654_v39  ;;  %v656_v57 = vshll.u32 %v647_v24, %v654_v39 }
 0x1da   : > { %v544_v9 = vsel %vm533_vm11, nan, %v543_v56  ;;  %v7933_v24 = vshrl.u32 %v12937_v48, %v7915_v49  ;;  %v2951_v23 = vshll.u32 %v12931_v29, %v7900_v4  ;;  %v2954_v37 = vshll.u32 %v12932_v1, %v7900_v4 }
 0x1db   : > { %1695 = vmatpush.msra.mxu0 %v544_v9  ;;  %6349 = vmatpush.msra.mxu2 %v544_v9  ;;  %v657_v47 = vshrl.u32 %v639_v58, %v655_v15  ;;  %v660_v40 = vadd.s32 127, %v659_v10  ;;  %v2845_v19 = vmul.u32 %v2843_v55, %v2819_v2  ;;  %v2833_v39 = vadd.s32 %v2827_v51, %v2823_v21 }
 0x1dc   : > { %6191 = vmatmul.msk.f32.vlgmr.msra.gmra.mxu0 %vm1664_vm0, %v7938_v30  ;;  %6194 = vmatmul.msk.f32.vlgmr.msra.gmra.mxu2 %vm1664_vm0, %v7943_v31  ;;  %v7964_v56 = vmul.u32 %v2843_v55, %v2820_v17  ;;  %v7966_v15 = vor.u32 %v2952_v60, %v2951_v23  ;;  %v2956_v10 = vor.u32 %v7933_v24, %v2954_v37  ;;  %vm2960_vm2 = vcmp.lt.s32.totalorder %v7927_v0, 4 }
 0x1dd   : > { %v658_v32 = vor.u32 %v657_v47, %v656_v57  ;;  %v661_v63 = vshll.u32 %v660_v40, 23  ;;  %vm2831_vm1 = vc.u32 %v2823_v21, %v2827_v51  ;;  %v2829_v18 = vshll.u32 %v7957_v13, 16  ;;  %v7984_v40 = vld [vmem:[%s12623_s3 + $0x8] sm:$0xff]  ;;  %3102 = vperm.xlu2 %6422, %v6238_v7   ;;  %v8024_v23 = vpop.permute.xlu1 %1776 }
 0x1de   : > { %vm2853_vm3 = vc.u32 %v2845_v19, %v2849_v42  ;;  %v7971_v57 = vadd.s32 %v2849_v42, %v2845_v19  ;;  %vm7975_vm4 = vcmp.le.f32.partialorder %v545_v12, 0.7853982  ;;  %vm547_vm6 = vcmp.lt.s32.totalorder %v6859_v52, 0 }
 0x1df   : > { %v662_v59 = vor.u32 4788187, %v661_v63  ;;  %v665_v58 = vcvt.s32.f32 %v658_v32  ;;  %v669_v47 = vsub.s32 4, %v7857_v16  ;;  %v2826_v55 = vmul.u32 %v2822_v41, %v2820_v17 }
 0x1e0   : > { %v2832_v63 = vsel %vm2831_vm1, 1, %v12925_v14  ;;  %vm7989_vm9 = vc.u32 %v2833_v39, %v2829_v18  ;;  %v2851_v51 = vshll.u32 %v7964_v56, 16  ;;  %v2848_v60 = vmul.u32 %v2844_v33, %v2820_v17 }
 0x1e1   : > { %v663_v54 = vand.u32 2147483647, %v662_v59  ;;  %v2854_v24 = vsel %vm2853_vm3, 1, %v12925_v14  ;;  %v12650_v59 = vand.u32 2147483647, %v7624_v8  ;;  %v2943_v53 = vshrl.u32 %v12929_v27, %v7915_v49 }
 0x1e2   : > { %vm2857_vm11 = vc.u32 %v7971_v57, %v2851_v51  ;;  %v2946_v44 = vshrl.u32 %v12930_v26, %v7915_v49  ;;  %v2949_v33 = vshrl.u32 %v12931_v29, %v7915_v49  ;;  %v670_v17 = vsel %vm547_vm6, %v669_v47, %v7857_v16 }
 0x1e3   : > { %v666_v9 = vmul.f32 %v665_v58, %v663_v54  ;;  %v2834_v21 = vadd.s32 %v2832_v63, %v2826_v55  ;;  %v2942_v42 = vshll.u32 %v12936_v46, %v7900_v4  ;;  %v2856_v19 = vadd.s32 %v2854_v24, %v2848_v60  ;;  %v8054_v24 = vld [vmem:[%s12623_s3 + $0x10] sm:$0xff] }
 0x1e4   : > { %6192 = vmatmul.msk.f32.gmra.mxu0 %vm1664_vm0, %v7984_v40  ;;  %v2945_v54 = vshll.u32 %v12929_v27, %v7900_v4  ;;  %v2948_v16 = vshll.u32 %v12930_v26, %v7900_v4  ;;  %v2836_v58 = vsel %vm7989_vm9, 1, %v12925_v14  ;;  %v2858_v39 = vsel %vm2857_vm11, 1, %v12925_v14 }
 0x1e5   : > { %v667_v32 = vxor.u32 2147483648, %v666_v9  ;;  %v8038_v18 = vor.u32 %v2943_v53, %v2942_v42  ;;  %v2966_v4 = vsel %vm2960_vm2, %v7966_v15, 920167782  ;;  %v2970_v12 = vsel %vm2960_vm2, %v2956_v10, 1326507024  ;;  %v8061_v10 = vpop.permute.xlu0 %1754  ;;  %4697 = vperm.xlu2 %6422, %v7682_v38  }
 0x1e6   : > { %v8042_v63 = vor.u32 %v2949_v33, %v2948_v16  ;;  %v672_v60 = vsel %vm7975_vm4, 0, %v670_v17  ;;  %v2786_v53 = vshrl.u32 %v12936_v46, %v7812_v3  ;;  %v2860_v33 = vadd.s32 %v2858_v39, %v2856_v19 }
 0x1e7   : > { %v668_v41 = vsel %vm547_vm6, %v667_v32, %v666_v9  ;;  %v2932_v9 = vand.u32 8388607, %v12650_v59  ;;  %v8040_v32 = vor.u32 %v2946_v44, %v2945_v54  ;;  %v2850_v44 = vshrl.u32 %v7922_v61, 16 }
 0x1e8   : > { %v8020_v20 = vsel %vm7975_vm4, %v6859_v52, %v668_v41  ;;  %v2838_v42 = vadd.s32 %v2836_v58, %v2834_v21  ;;  %vm2957_vm12 = vcmp.lt.s32.totalorder %v7927_v0, 1  ;;  %vm2959_vm13 = vcmp.lt.s32.totalorder %v7927_v0, 3 }
 0x1e9   : > { %v673_v37 = vmul.f32 %v8020_v20, %v8020_v20  ;;  %v2933_v54 = vor.u32 8388608, %v2932_v9  ;;  %v2965_v3 = vsel %vm2957_vm12, %v8038_v18, %v8040_v32  ;;  %v2967_v61 = vsel %vm2959_vm13, %v8042_v63, %v2966_v4  ;;  %v8090_v4 = vpop.permute.xlu1 %1814 }
 0x1ea   : > { %v2807_v21 = vsel %vm2805_vm5, %v7864_v25, 2102212464  ;;  %v2828_v19 = vshrl.u32 %v7912_v34, 16  ;;  %v2969_v16 = vsel %vm2957_vm12, %v8040_v32, %v8042_v63  ;;  %v2971_v58 = vsel %vm2959_vm13, %v7966_v15, %v2970_v12 }
 0x1eb   : > { %v674_v47 = vmul.f32 -0.001358992, %v673_v37  ;;  %v681_v55 = vmul.f32 -0.00019511016, %v673_v37  ;;  %vm2958_vm14 = vcmp.lt.s32.totalorder %v7927_v0, 2  ;;  %v689_v38 = vadd.s32 3, %v672_v60 }
 0x1ec   : > { %6193 = vmatmul.msk.f32.gmra.mxu0 %vm1664_vm0, %v8054_v24  ;;  %v2852_v25 = vshrl.u32 %v7964_v56, 16  ;;  %v8088_v34 = vsel %vm2958_vm14, %v2965_v3, %v2967_v61  ;;  %v8094_v15 = vsel %vm2958_vm14, %v2969_v16, %v2971_v58  ;;  %v8096_v12 = vshll.u32 %v2933_v54, 8  ;;  %v12951_v58 = vld [vmem:[#allocation5_spill] sm:$0xff] }
 0x1ed   : > { %v675_v41 = vadd.f32 0.041655596, %v674_v47  ;;  %v682_v7 = vadd.f32 0.008332121, %v681_v55  ;;  %v2861_v47 = vadd.s32 %v2860_v33, %v2850_v44  ;;  %v2839_v55 = vadd.s32 %v2838_v42, %v2828_v19 }
 0x1ee   : > { %v2806_v60 = vsel %vm2802_vm7, %v2786_v53, %v7871_v6  ;;  %v2830_v44 = vshrl.u32 %v7957_v13, 16  ;;  %v690_v3 = vand.u32 3, %v689_v38  ;;  %v2977_v54 = vshrl.u32 %v8094_v15, 16 }
 0x1ef   : > { %v676_v2 = vmul.f32 %v675_v41, %v673_v37  ;;  %v683_v17 = vmul.f32 %v682_v7, %v673_v37  ;;  %v1795_v19 = vmul.f32 %v7368_v11, %v6695_v35  ;;  %v2974_v53 = vand.u32 65535, %v8096_v12 }
 0x1f0   : > { %v8106_v61 = vadd.s32 %v2839_v55, %v2830_v44  ;;  %v1796_v16 = vmul.f32 %v7368_v11, %v6697_v36  ;;  %vm692_vm5 = vcmp.eq.s32.totalorder %v690_v3, 0  ;;  %vm695_vm7 = vcmp.eq.s32.totalorder %v690_v3, 2  ;;  %v1825_v44 = vpop.permute.xlu2 %1824 }
 0x1f1   : > { %v677_v39 = vadd.f32 -0.4999988, %v676_v2  ;;  %v684_v9 = vadd.f32 -0.16666654, %v683_v17  ;;  %v2862_v2 = vadd.s32 %v2861_v47, %v2852_v25  ;;  %v2999_v17 = vshrl.u32 %v8088_v34, 16 }
 0x1f2   : > { %v12953_v47 = vmov 1   ;;  %v8140_v56 = vmul.u32 %v2977_v54, %v2974_v53  ;;  %vm688_vm15 = vweird.f32 %v6859_v52 }
 0x1f3   : > { %v678_v41 = vmul.f32 %v677_v39, %v673_v37  ;;  %v685_v7 = vmul.f32 %v684_v9, %v673_v37  ;;  %v2808_v37 = vsel %vm2804_vm8, %v7862_v5, %v2807_v21  ;;  %v1771_v39 = vmul.f32 %v7902_v50, %v12951_v58  ;;  %v12952_v9 = vld [vmem:[#allocation6_spill] sm:$0xff]  ;;  %6427 = vset.pattern.permute.xlu2 %v12953_v47 }
 0x1f4   : > { %v1772_v5 = vmul.f32 %v7902_v50, %v12952_v9  ;;  %v8122_v21 = vadd.s32 %v7971_v57, %v2851_v51  ;;  %v2809_v55 = vsel %vm2803_vm10, %v2806_v60, %v2808_v37  ;;  %v2866_v11 = vadd.s32 1, %v2862_v2  ;;  %v6430_v50 = vld [vmem:[%s12621_s1 + $0x68] sm:$0xff] }
 0x1f5   : > { %v679_v33 = vadd.f32 1.0, %v678_v41  ;;  %v686_v42 = vadd.f32 1.0, %v685_v7  ;;  %v8131_v25 = vmul.u32 %v2999_v17, %v2974_v53  ;;  %4718 = vperm.xlu2 %6427, %v6430_v50   ;;  %vm691_vm10 = vcmp.lt.s32.totalorder %v690_v3, 2 }
 0x1f6   : > { %vm2865_vm8 = vc.u32 %v8106_v61, %v8122_v21  ;;  %v2998_v51 = vand.u32 65535, %v8088_v34  ;;  %v1803_v41 = vadd.f32 %v1795_v19, %v1771_v39  ;;  %v2976_v60 = vand.u32 65535, %v8094_v15 }
 0x1f7   : > { %v687_v6 = vmul.f32 %v686_v42, %v8020_v20  ;;  %v696_v13 = vxor.u32 2147483648, %v679_v33  ;;  %v8125_v20 = vpop.permute.xlu0 %1749  ;;  %v8145_v42 = vpop.permute.xlu1 %1647  ;;  %v2867_v47 = vsel %vm2865_vm8, %v2866_v11, %v2862_v2  ;;  %v2975_v50 = vshrl.u32 %v8096_v12, 16 }
 0x1f8   : > { %12954 = vst [vmem:[#allocation9_spill] sm:$0xff] %v8145_v42  ;;  %v3004_v59 = vshll.u32 %v8131_v25, 16  ;;  %v1804_v3 = vadd.f32 %v1796_v16, %v1772_v5  ;;  %v2982_v19 = vshll.u32 %v8140_v56, 16  ;;  %v3000_v52 = vmul.u32 %v2998_v51, %v2974_v53 }
 0x1f9   : > { %v693_v38 = vxor.u32 2147483648, %v687_v6  ;;  %v697_v57 = vsel %vm695_vm7, %v696_v13, %v687_v6  ;;  %v8155_v6 = vmul.u32 %v2998_v51, %v2975_v50  ;;  %v8157_v2 = vadd.f32 %v1825_v44, %v1803_v41 }
 0x1fa   : > { %v2978_v39 = vmul.u32 %v2976_v60, %v2974_v53  ;;  %v8159_v16 = vmul.u32 %v2976_v60, %v2975_v50  ;;  %vm3008_vm1 = vc.u32 %v3000_v52, %v3004_v59  ;;  %v8161_v5 = vadd.s32 %v3004_v59, %v3000_v52 }
 0x1fb   : > { %v694_v28 = vsel %vm692_vm5, %v679_v33, %v693_v38  ;;  %v2863_v33 = vmul.u32 %v7894_v62, %v2809_v55  ;;  %v8164_v62 = vadd.f32 %v1825_v44, %v1804_v3  ;;  %v2463_v55 = vand.u32 2139095040, %v8157_v2 }
 0x1fc   : > { %v698_v7 = vsel %vm691_vm10, %v694_v28, %v697_v57  ;;  %vm2986_vm3 = vc.u32 %v2978_v39, %v2982_v19  ;;  %v2984_v53 = vshll.u32 %v8159_v16, 16  ;;  %v3009_v28 = vsel %vm3008_vm1, 1, %v12925_v14 }
 0x1fd   : > { %v699_v37 = vsel %vm688_vm15, nan, %v698_v7  ;;  %v2868_v13 = vadd.s32 %v2867_v47, %v2863_v33  ;;  %6428 = vset.pattern.permute.xlu2 %v12925_v14  ;;  %v2987_v59 = vsel %vm2986_vm3, 1, %v12925_v14  ;;  %v3003_v57 = vmul.u32 %v2999_v17, %v2975_v50 }
 0x1fe   : > { %1726 = vmatpush.msra.mxu1 %v699_v37  ;;  %6353 = vmatpush.msra.mxu3 %v699_v37  ;;  %v2618_v51 = vand.u32 2139095040, %v8164_v62  ;;  %v2981_v41 = vmul.u32 %v2977_v54, %v2975_v50  ;;  %v2464_v44 = vshrl.u32 %v2463_v55, 23  ;;  %v1791_v15 = vmul.f32 %v8024_v23, %v6695_v35  ;;  %v8191_v54 = vpop.permute.xlu2 %1657 }
 0x1ff   : > { %6196 = vmatmul.msk.f32.vlgmr.msra.gmra.mxu1 %vm1664_vm0, %v7938_v30  ;;  %6199 = vmatmul.msk.f32.vlgmr.msra.gmra.mxu3 %vm1664_vm0, %v7943_v31  ;;  %v2988_v30 = vadd.s32 %v2982_v19, %v2978_v39  ;;  %v8166_v38 = vpop.permute.xlu0 %1819  ;;  %v3006_v31 = vshll.u32 %v8155_v6, 16  ;;  %v2869_v11 = vadd.s32 536870912, %v2868_v13  ;;  %v8181_v7 = vpop.permute.xlu1 %3257  ;;  %v3011_v60 = vadd.s32 %v3009_v28, %v3003_v57 }
 0x200   : > { %v2989_v34 = vadd.s32 %v2987_v59, %v2981_v41  ;;  %v2619_v3 = vshrl.u32 %v2618_v51, 23  ;;  %v6221_v19 = vadd.s32 4294967169, %v2464_v44  ;;  %v1793_v52 = vmul.f32 %v7945_v43, %v6695_v35 }
 0x201   : > { %vm3012_vm4 = vc.u32 %v8161_v5, %v3006_v31  ;;  %vm2990_vm6 = vc.u32 %v2988_v30, %v2984_v53  ;;  %v8185_v37 = vshrl.u32 %v2869_v11, 30  ;;  %v1792_v30 = vmul.f32 %v8024_v23, %v6697_v36 }
 0x202   : > { %v3013_v17 = vsel %vm3012_vm4, 1, %v12925_v14  ;;  %v2991_v47 = vsel %vm2990_vm6, 1, %v12925_v14  ;;  %v3005_v55 = vshrl.u32 %v8131_v25, 16  ;;  %v1767_v11 = vmul.f32 %v8125_v20, %v12951_v58 }
 0x203   : > { %v3015_v33 = vadd.s32 %v3013_v17, %v3011_v60  ;;  %v2871_v50 = vshll.u32 %v8185_v37, 30  ;;  %v6224_v53 = vadd.s32 4294967169, %v2619_v3  ;;  %v2983_v28 = vshrl.u32 %v8140_v56, 16 }
 0x204   : > { %v1769_v59 = vmul.f32 %v8061_v10, %v12951_v58  ;;  %v1768_v57 = vmul.f32 %v8125_v20, %v12952_v9  ;;  %v1794_v51 = vmul.f32 %v7945_v43, %v6697_v36  ;;  %v2470_v25 = vadd.s32 1, %v6221_v19 }
 0x205   : > { %v3016_v23 = vadd.s32 %v3015_v33, %v3005_v55  ;;  %v1799_v41 = vadd.f32 %v1791_v15, %v1767_v11  ;;  %v8212_v60 = vsub.s32 %v2868_v13, %v2871_v50  ;;  %v1770_v56 = vmul.f32 %v8061_v10, %v12952_v9 }
 0x206   : > { %v1800_v17 = vadd.f32 %v1792_v30, %v1768_v57  ;;  %v3007_v20 = vshrl.u32 %v8155_v6, 16  ;;  %v2625_v3 = vadd.s32 1, %v6224_v53  ;;  %v2962_v10 = vsel %vm2960_vm2, %v8042_v63, 2102212464 }
 0x207   : > { %6197 = vmatmul.msk.f32.gmra.mxu1 %vm1664_vm0, %v7984_v40  ;;  %v2993_v40 = vadd.s32 %v2991_v47, %v2989_v34  ;;  %v8196_v39 = vpop.permute.xlu0 %1652  ;;  %v1801_v34 = vadd.f32 %v1793_v52, %v1769_v59  ;;  %v8216_v47 = vpop.permute.xlu1 %3223  ;;  %v8220_v43 = vadd.f32 %v8090_v4, %v1799_v41  ;;  %v1802_v33 = vadd.f32 %v1794_v51, %v1770_v56 }
 0x208   : > { %12955 = vst [vmem:[#allocation10_spill] sm:$0xff] %v8196_v39  ;;  %v8224_v13 = vadd.f32 %v8090_v4, %v1800_v17  ;;  %v3017_v19 = vadd.s32 %v3016_v23, %v3007_v20  ;;  %vm2471_vm9 = vcmp.gt.s32.totalorder %v2470_v25, 0  ;;  %v2874_v15 = vsub.s32 0, %v8212_v60 }
 0x209   : > { %v2994_v44 = vadd.s32 %v2993_v40, %v2983_v28  ;;  %12956 = vst [vmem:[#allocation11_spill] sm:$0xff] %v8220_v43  ;;  %v2941_v50 = vshrl.u32 %v12936_v46, %v7915_v49  ;;  %v8235_v52 = vadd.f32 %v8166_v38, %v1801_v34  ;;  %vm2873_vm11 = vcmp.lt.s32.totalorder %v8212_v60, 0 }
 0x20a   : > { %12957 = vst [vmem:[#allocation12_spill] sm:$0xff] %v8224_v13  ;;  %v1843_v4 = vand.u32 2139095040, %v8220_v43  ;;  %v2963_v30 = vsel %vm2959_vm13, %v8040_v32, %v2962_v10  ;;  %v8250_v49 = vadd.s32 %v8161_v5, %v3006_v31  ;;  %v2472_v55 = vsel %vm2471_vm9, %v2470_v25, 0 }
 0x20b   : > { %12958 = vst [vmem:[#allocation13_spill] sm:$0xff] %v8235_v52  ;;  %v2961_v63 = vsel %vm2957_vm12, %v2941_v50, %v8038_v18  ;;  %vm2626_vm2 = vcmp.gt.s32.totalorder %v2625_v3, 0  ;;  %v1998_v53 = vand.u32 2139095040, %v8224_v13  ;;  %v3021_v28 = vadd.s32 1, %v3017_v19 }
 0x20c   : > { %v8254_v59 = vadd.f32 %v8166_v38, %v1802_v33  ;;  %v3266_v18 = vmul.f32 %v8181_v7, %v6695_v35  ;;  %v2875_v57 = vsel %vm2873_vm11, %v2874_v15, %v8212_v60  ;;  %v2153_v32 = vand.u32 2139095040, %v8235_v52 }
 0x20d   : > { %v2964_v6 = vsel %vm2958_vm14, %v2961_v63, %v2963_v30  ;;  %v2627_v5 = vsel %vm2626_vm2, %v2625_v3, 0  ;;  %v1844_v51 = vshrl.u32 %v1843_v4, 23  ;;  %v3267_v38 = vmul.f32 %v8181_v7, %v6697_v36 }
 0x20e   : > { %12960 = vst [vmem:[#allocation15_spill] sm:$0xff] %v8254_v59  ;;  %v8267_v23 = vand.u32 31, %v2472_v55  ;;  %v1999_v25 = vshrl.u32 %v1998_v53, 23  ;;  %v2308_v34 = vand.u32 2139095040, %v8254_v59  ;;  %v3018_v0 = vmul.u32 %v8096_v12, %v2964_v6 }
 0x20f   : > { %6198 = vmatmul.msk.f32.gmra.mxu1 %vm1664_vm0, %v8054_v24  ;;  %v2985_v24 = vshrl.u32 %v8159_v16, 16  ;;  %v8239_v16 = vpop.permute.xlu2 %1642  ;;  %v3234_v11 = vpop.permute.xlu0 %3233  ;;  %v8272_v3 = vand.u32 31, %v2627_v5  ;;  %v6209_v33 = vadd.s32 4294967169, %v1844_v51  ;;  %v8278_v63 = vshrl.u32 %v2472_v55, 5 }
 0x210   : > { %12959 = vst [vmem:[#allocation14_spill] sm:$0xff] %v8239_v16  ;;  %v3242_v31 = vmul.f32 %v3234_v11, %v12951_v58  ;;  %v3299_v41 = vpop.permute.xlu1 %3298  ;;  %v3243_v17 = vmul.f32 %v3234_v11, %v12952_v9  ;;  %v6212_v50 = vadd.s32 4294967169, %v1999_v25  ;;  %v2309_v30 = vshrl.u32 %v2308_v34, 23 }
 0x211   : > { %v8232_v40 = vadd.s32 %v2994_v44, %v2985_v24  ;;  %v2876_v44 = vclz %v2875_v57  ;;  %v2154_v24 = vshrl.u32 %v2153_v32, 23  ;;  %v8290_v57 = vsub.s32 32, %v8272_v3 }
 0x212   : > { %v3274_v20 = vadd.f32 %v3266_v18, %v3242_v31  ;;  %v3275_v10 = vadd.f32 %v3267_v38, %v3243_v17  ;;  %v8287_v18 = vshrl.u32 %v2627_v5, 5  ;;  %v2489_v55 = vshll.u32 %v12932_v1, %v8267_v23 }
 0x213   : > { %vm3020_vm12 = vc.u32 %v8232_v40, %v8250_v49  ;;  %v6228_v4 = vadd.s32 4294967294, %v2876_v44  ;;  %12964 = vst [vmem:[#allocation19_spill] sm:$0xff] %v8290_v57  ;;  %v6215_v32 = vadd.s32 4294967169, %v2154_v24  ;;  %v1850_v6 = vadd.s32 1, %v6209_v33 }
 0x214   : > { %v3022_v56 = vsel %vm3020_vm12, %v3021_v28, %v3017_v19  ;;  %v8274_v15 = vadd.f32 %v3299_v41, %v3274_v20  ;;  %v8281_v19 = vsub.s32 32, %v8267_v23  ;;  %v8283_v11 = vadd.f32 %v3299_v41, %v3275_v10  ;;  %12963 = vst [vmem:[#allocation18_spill] sm:$0xff] %v8287_v18 }
 0x215   : > { %v8276_v7 = vadd.s32 %v3022_v56, %v3018_v0  ;;  %v2486_v28 = vshll.u32 %v12931_v29, %v8267_v23  ;;  %v2005_v38 = vadd.s32 1, %v6212_v50  ;;  %vm6229_vm13 = vcmp.lt.s32.totalorder %v6228_v4, 0 }
 0x216   : > { %12961 = vst [vmem:[#allocation16_spill] sm:$0xff] %v8274_v15  ;;  %v4242_v31 = vand.u32 2139095040, %v8274_v15  ;;  %v2487_v5 = vshrl.u32 %v12932_v1, %v8281_v19  ;;  %v2490_v44 = vshrl.u32 %v12937_v48, %v8281_v19  ;;  %v6218_v56 = vadd.s32 4294967169, %v2309_v30 }
 0x217   : > { %12962 = vst [vmem:[#allocation17_spill] sm:$0xff] %v8283_v11  ;;  %v3254_v12 = vpop.permute.xlu0 %3253  ;;  %v3229_v53 = vpop.permute.xlu2 %3228  ;;  %v3024_v51 = vadd.s32 536870912, %v8276_v7  ;;  %v4397_v34 = vand.u32 2139095040, %v8283_v11  ;;  %v2641_v17 = vshll.u32 %v12931_v29, %v8272_v3  ;;  %v2642_v20 = vshrl.u32 %v12932_v1, %v8290_v57 }
 0x218   : > { %v3264_v25 = vmul.f32 %v3254_v12, %v6695_v35  ;;  %v3240_v41 = vmul.f32 %v3229_v53, %v12951_v58  ;;  %v2644_v0 = vshll.u32 %v12932_v1, %v8272_v3  ;;  %v2160_v24 = vadd.s32 1, %v6215_v32  ;;  %v3294_v32 = vpop.permute.xlu1 %3293 }
 0x219   : > { %vm1851_vm14 = vcmp.gt.s32.totalorder %v1850_v6, 0  ;;  %v4243_v33 = vshrl.u32 %v4242_v31, 23  ;;  %v8309_v10 = vsel %vm6229_vm13, 0, %v6228_v4  ;;  %v8311_v50 = vshrl.u32 %v3024_v51, 30 }
 0x21a   : > { %vm2006_vm5 = vcmp.gt.s32.totalorder %v2005_v38, 0  ;;  %v3265_v30 = vmul.f32 %v3254_v12, %v6697_v36  ;;  %v3241_v45 = vmul.f32 %v3229_v53, %v12952_v9  ;;  %v3272_v11 = vadd.f32 %v3264_v25, %v3240_v41 }
 0x21b   : > { %v8315_v16 = vor.u32 %v2487_v5, %v2486_v28  ;;  %v2645_v15 = vshrl.u32 %v12937_v48, %v8290_v57  ;;  %v2315_v13 = vadd.s32 1, %v6218_v56  ;;  %v4398_v42 = vshrl.u32 %v4397_v34, 23 }
 0x21c   : > { %v2491_v43 = vor.u32 %v2490_v44, %v2489_v55  ;;  %v8319_v31 = vor.u32 %v2642_v20, %v2641_v17  ;;  %v1852_v4 = vsel %vm1851_vm14, %v1850_v6, 0  ;;  %v2884_v51 = vsub.s32 4294967266, %v8309_v10 }
 0x21d   : > { %vm2161_vm7 = vcmp.gt.s32.totalorder %v2160_v24, 0  ;;  %v2007_v59 = vsel %vm2006_vm5, %v2005_v38, 0  ;;  %v6279_v12 = vadd.s32 4294967169, %v4243_v33  ;;  %v3026_v53 = vshll.u32 %v8311_v50, 30 }
 0x21e   : > { %12965 = vst [vmem:[#allocation20_spill] sm:$0xff] %v8319_v31  ;;  %vm2495_vm8 = vcmp.lt.s32.totalorder %v8278_v63, 4  ;;  %vm2650_vm10 = vcmp.lt.s32.totalorder %v8287_v18, 4  ;;  %v3273_v28 = vadd.f32 %v3265_v30, %v3241_v45  ;;  %v8325_v25 = vadd.f32 %v3294_v32, %v3272_v11 }
 0x21f   : > { %v2646_v41 = vor.u32 %v2645_v15, %v2644_v0  ;;  %vm2316_vm15 = vcmp.gt.s32.totalorder %v2315_v13, 0  ;;  %v8327_v55 = vand.u32 31, %v1852_v4  ;;  %v6282_v5 = vadd.s32 4294967169, %v4398_v42 }
 0x220   : > { %12966 = vst [vmem:[#allocation21_spill] sm:$0xff] %v8325_v25  ;;  %v8332_v6 = vsel %vm2495_vm8, %v8315_v16, 920167782  ;;  %v2162_v38 = vsel %vm2161_vm7, %v2160_v24, 0  ;;  %v8334_v44 = vand.u32 31, %v2007_v59  ;;  %v2885_v56 = vadd.s32 127, %v2884_v51 }
 0x221   : > { %12967 = vst [vmem:[#allocation22_spill] sm:$0xff] %v8327_v55  ;;  %v8338_v34 = vsel %vm2495_vm8, %v2491_v43, 1326507024  ;;  %v8343_v45 = vsel %vm2650_vm10, %v8319_v31, 920167782  ;;  %v4249_v15 = vadd.s32 1, %v6279_v12  ;;  %v8346_v42 = vsub.s32 %v8276_v7, %v3026_v53 }
 0x222   : > { %12968 = vst [vmem:[#allocation23_spill] sm:$0xff] %v8334_v44  ;;  %v2317_v11 = vsel %vm2316_vm15, %v2315_v13, 0  ;;  %v8348_v17 = vadd.f32 %v3294_v32, %v3273_v28  ;;  %v3932_v20 = vand.u32 2139095040, %v8325_v25  ;;  %v2880_v0 = vsub.s32 32, %v8309_v10 }
 0x223   : > { %12969 = vst [vmem:[#allocation24_spill] sm:$0xff] %v8343_v45  ;;  %v8354_v43 = vsel %vm2650_vm10, %v2646_v41, 1326507024  ;;  %v8356_v24 = vshrl.u32 %v2162_v38, 5  ;;  %v8359_v33 = vsub.s32 32, %v8327_v55  ;;  %v4404_v30 = vadd.s32 1, %v6282_v5 }
 0x224   : > { %12970 = vst [vmem:[#allocation25_spill] sm:$0xff] %v8348_v17  ;;  %v8361_v51 = vand.u32 31, %v2162_v38  ;;  %v8364_v13 = vsub.s32 32, %v8334_v44  ;;  %v2864_v7 = vadd.s32 %v8122_v21, %v8106_v61  ;;  %v2886_v32 = vshll.u32 %v2885_v56, 23 }
 0x225   : > { %12971 = vst [vmem:[#allocation26_spill] sm:$0xff] %v8354_v43  ;;  %v8368_v12 = vand.u32 31, %v2317_v11  ;;  %v8370_v53 = vshrl.u32 %v1852_v4, 5  ;;  %vm4250_vm1 = vcmp.gt.s32.totalorder %v4249_v15, 0  ;;  %v3029_v28 = vsub.s32 0, %v8346_v42 }
 0x226   : > { %12972 = vst [vmem:[#allocation27_spill] sm:$0xff] %v8356_v24  ;;  %v3933_v41 = vshrl.u32 %v3932_v20, 23  ;;  %v4087_v25 = vand.u32 2139095040, %v8348_v17  ;;  %v2882_v5 = vshrl.u32 %v2864_v7, %v2880_v0  ;;  %vm3028_vm3 = vcmp.lt.s32.totalorder %v8346_v42, 0  ;;  %v8383_v20 = vpop.permute.xlu2 %3249 }
 0x227   : > { %12973 = vst [vmem:[#allocation28_spill] sm:$0xff] %v8359_v33  ;;  %v1866_v38 = vshll.u32 %v12931_v29, %v8327_v55  ;;  %v1867_v61 = vshrl.u32 %v12932_v1, %v8359_v33  ;;  %v1870_v21 = vshrl.u32 %v12937_v48, %v8359_v33  ;;  %vm4405_vm4 = vcmp.gt.s32.totalorder %v4404_v30, 0 }
 0x228   : > { %12974 = vst [vmem:[#allocation29_spill] sm:$0xff] %v8364_v13  ;;  %v2022_v4 = vshrl.u32 %v12932_v1, %v8364_v13  ;;  %v4251_v56 = vsel %vm4250_vm1, %v4249_v15, 0  ;;  %v2881_v0 = vshll.u32 %v8212_v60, %v8309_v10  ;;  %v2887_v7 = vor.u32 4788187, %v2886_v32 }
 0x229   : > { %12975 = vst [vmem:[#allocation30_spill] sm:$0xff] %v8368_v12  ;;  %v1869_v17 = vshll.u32 %v12932_v1, %v8327_v55  ;;  %v2021_v39 = vshll.u32 %v12931_v29, %v8334_v44  ;;  %v2025_v33 = vshrl.u32 %v12937_v48, %v8364_v13  ;;  %v3030_v24 = vsel %vm3028_vm3, %v3029_v28, %v8346_v42 }
 0x22a   : > { %12976 = vst [vmem:[#allocation31_spill] sm:$0xff] %v8370_v53  ;;  %v4406_v52 = vsel %vm4405_vm4, %v4404_v30, 0  ;;  %v6273_v31 = vadd.s32 4294967169, %v3933_v41  ;;  %v4088_v15 = vshrl.u32 %v4087_v25, 23  ;;  %v2883_v43 = vor.u32 %v2882_v5, %v2881_v0 }
 0x22b   : > { %v8394_v45 = vor.u32 %v1867_v61, %v1866_v38  ;;  %v8396_v18 = vshrl.u32 %v2007_v59, 5  ;;  %v2024_v60 = vshll.u32 %v12932_v1, %v8334_v44  ;;  %v8400_v10 = vand.u32 31, %v4251_v56 }
 0x22c   : > { %v1871_v32 = vor.u32 %v1870_v21, %v1869_v17  ;;  %v8402_v55 = vor.u32 %v2022_v4, %v2021_v39  ;;  %v2888_v57 = vand.u32 2147483647, %v2887_v7  ;;  %v3031_v13 = vclz %v3030_v24 }
 0x22d   : > { %12977 = vst [vmem:[#allocation32_spill] sm:$0xff] %v8394_v45  ;;  %v8405_v28 = vsub.s32 32, %v8361_v51  ;;  %v8407_v30 = vshrl.u32 %v2317_v11, 5  ;;  %v2026_v25 = vor.u32 %v2025_v33, %v2024_v60  ;;  %v8409_v41 = vand.u32 31, %v4406_v52 }
 0x22e   : > { %12978 = vst [vmem:[#allocation33_spill] sm:$0xff] %v8396_v18  ;;  %vm1875_vm6 = vcmp.lt.s32.totalorder %v8370_v53, 4  ;;  %v3939_v59 = vadd.s32 1, %v6273_v31  ;;  %v6276_v5 = vadd.s32 4294967169, %v4088_v15  ;;  %v2890_v38 = vcvt.s32.f32 %v2883_v43  ;;  %v3246_v43 = vpop.permute.xlu0 %3245 }
 0x22f   : > { %12979 = vst [vmem:[#allocation34_spill] sm:$0xff] %v8400_v10  ;;  %v8413_v61 = vsub.s32 32, %v8368_v12  ;;  %v8418_v39 = vsel %vm1875_vm6, %v8394_v45, 920167782  ;;  %vm2030_vm9 = vcmp.lt.s32.totalorder %v8396_v18, 4  ;;  %v8422_v11 = vsub.s32 32, %v8400_v10 }
 0x230   : > { %12980 = vst [vmem:[#allocation35_spill] sm:$0xff] %v8402_v55  ;;  %v8426_v17 = vsel %vm1875_vm6, %v1871_v32, 1326507024  ;;  %v8431_v31 = vsel %vm2030_vm9, %v8402_v55, 920167782  ;;  %v2891_v24 = vmul.f32 %v2890_v38, %v2888_v57  ;;  %v6231_v33 = vadd.s32 4294967294, %v3031_v13  ;;  %v3219_v13 = vpop.permute.xlu2 %3218 }
 0x231   : > { %12981 = vst [vmem:[#allocation36_spill] sm:$0xff] %v8407_v30  ;;  %v8435_v21 = vsel %vm2030_vm9, %v2026_v25, 1326507024  ;;  %v3238_v4 = vmul.f32 %v8216_v47, %v12951_v58  ;;  %v3239_v0 = vmul.f32 %v8216_v47, %v12952_v9  ;;  %v8442_v7 = vsub.s32 32, %v8409_v41 }
 0x232   : > { %12982 = vst [vmem:[#allocation37_spill] sm:$0xff] %v8409_v41  ;;  %v8444_v15 = vshrl.u32 %v4251_v56, 5  ;;  %v8446_v60 = vshrl.u32 %v4406_v52, 5  ;;  %vm3940_vm11 = vcmp.gt.s32.totalorder %v3939_v59, 0  ;;  %v4094_v57 = vadd.s32 1, %v6276_v5 }
 0x233   : > { %12983 = vst [vmem:[#allocation38_spill] sm:$0xff] %v8413_v61  ;;  %v4265_v32 = vshll.u32 %v12931_v29, %v8400_v10  ;;  %v4266_v25 = vshrl.u32 %v12932_v1, %v8422_v11  ;;  %v3236_v38 = vmul.f32 %v3219_v13, %v12951_v58  ;;  %v3260_v47 = vmul.f32 %v3246_v43, %v6695_v35 }
 0x234   : > { %12984 = vst [vmem:[#allocation39_spill] sm:$0xff] %v8418_v39  ;;  %v4269_v52 = vshrl.u32 %v12937_v48, %v8422_v11  ;;  %v2892_v56 = vxor.u32 2147483648, %v2891_v24  ;;  %vm6232_vm2 = vcmp.lt.s32.totalorder %v6231_v33, 0  ;;  %v4420_v5 = vshll.u32 %v12931_v29, %v8409_v41 }
 0x235   : > { %12985 = vst [vmem:[#allocation40_spill] sm:$0xff] %v8422_v11  ;;  %v4421_v55 = vshrl.u32 %v12932_v1, %v8442_v7  ;;  %v3941_v18 = vsel %vm3940_vm11, %v3939_v59, 0  ;;  %v4423_v44 = vshll.u32 %v12932_v1, %v8409_v41  ;;  %vm4095_vm12 = vcmp.gt.s32.totalorder %v4094_v57, 0 }
 0x236   : > { %12986 = vst [vmem:[#allocation41_spill] sm:$0xff] %v8426_v17  ;;  %v3261_v11 = vmul.f32 %v3246_v43, %v6697_v36  ;;  %v8468_v39 = vor.u32 %v4266_v25, %v4265_v32  ;;  %v3268_v45 = vadd.f32 %v3260_v47, %v3236_v38  ;;  %vm2772_vm13 = vcmp.lt.s32.totalorder %v7446_v22, 0  ;;  %v3284_v38 = vpop.permute.xlu0 %3283 }
 0x237   : > { %12987 = vst [vmem:[#allocation42_spill] sm:$0xff] %v8431_v31  ;;  %v4268_v31 = vshll.u32 %v12932_v1, %v8400_v10  ;;  %v3237_v10 = vmul.f32 %v3219_v13, %v12952_v9  ;;  %v3034_v17 = vsel %vm6232_vm2, 0, %v6231_v33  ;;  %v8471_v30 = vand.u32 31, %v3941_v18 }
 0x238   : > { %12988 = vst [vmem:[#allocation43_spill] sm:$0xff] %v8435_v21  ;;  %v4424_v21 = vshrl.u32 %v12937_v48, %v8442_v7  ;;  %v3262_v59 = vmul.f32 %v8383_v20, %v6695_v35  ;;  %v2893_v41 = vsel %vm2772_vm13, %v2892_v56, %v2891_v24  ;;  %vm4274_vm14 = vcmp.lt.s32.totalorder %v8444_v15, 4 }
 0x239   : > { %12989 = vst [vmem:[#allocation44_spill] sm:$0xff] %v8442_v7  ;;  %v4270_v53 = vor.u32 %v4269_v52, %v4268_v31  ;;  %v8478_v13 = vor.u32 %v4421_v55, %v4420_v5  ;;  %v4096_v32 = vsel %vm4095_vm12, %v4094_v57, 0  ;;  %v3263_v25 = vmul.f32 %v8383_v20, %v6697_v36 }
 0x23a   : > { %12990 = vst [vmem:[#allocation45_spill] sm:$0xff] %v8444_v15  ;;  %v4425_v43 = vor.u32 %v4424_v21, %v4423_v44  ;;  %v3269_v33 = vadd.f32 %v3261_v11, %v3237_v10  ;;  %v12995_v31 = vand.u32 2147483647, %v7446_v22  ;;  %v3039_v52 = vsub.s32 4294967266, %v3034_v17 }
 0x23b   : > { %12991 = vst [vmem:[#allocation46_spill] sm:$0xff] %v8446_v60  ;;  %v8491_v24 = vsel %vm4274_vm14, %v8468_v39, 920167782  ;;  %vm12733_vm7 = vcmp.lt.s32.totalorder %v8446_v60, 4  ;;  %v8494_v55 = vadd.f32 %v3284_v38, %v3268_v45  ;;  %v8503_v20 = vsel %vm4274_vm14, %v4270_v53, 1326507024 }
 0x23c   : > { %12992 = vst [vmem:[#allocation47_spill] sm:$0xff] %v8468_v39  ;;  %vm8484_vm5 = vcmp.le.f32.partialorder %v12995_v31, 0.7853982  ;;  %v8506_v10 = vsub.s32 32, %v8471_v30  ;;  %v8508_v11 = vand.u32 31, %v4096_v32  ;;  %v3270_v21 = vadd.f32 %v3262_v59, %v3238_v4  ;;  %v3289_v59 = vpop.permute.xlu2 %3288 }
 0x23d   : > { %12993 = vst [vmem:[#allocation48_spill] sm:$0xff] %v8471_v30  ;;  %v8499_v44 = vsel %vm8484_vm5, %v7446_v22, %v2893_v41  ;;  %v8513_v45 = vsel %vm12733_vm7, %v8478_v13, 920167782  ;;  %v8515_v57 = vshrl.u32 %v3941_v18, 5  ;;  %v3035_v56 = vsub.s32 32, %v3034_v17 }
 0x23e   : > { %12994 = vst [vmem:[#allocation49_spill] sm:$0xff] %v8478_v13  ;;  %v3040_v41 = vadd.s32 127, %v3039_v52  ;;  %v8519_v5 = vsel %vm12733_vm7, %v4425_v43, 1326507024  ;;  %v3271_v53 = vadd.f32 %v3263_v25, %v3239_v0  ;;  %v8521_v31 = vadd.f32 %v3284_v38, %v3269_v33 }
 0x23f   : > { %12998 = vst [vmem:[#allocation50_spill] sm:$0xff] %v8491_v24  ;;  %v8525_v7 = vmul.f32 %v8499_v44, %v8499_v44  ;;  %v8527_v4 = vshrl.u32 %v4096_v32, 5  ;;  %v3019_v18 = vadd.s32 %v8250_v49, %v8232_v40  ;;  %v3955_v43 = vshll.u32 %v12931_v29, %v8471_v30  ;;  %v8546_v49 = vpop.permute.xlu1 %3117 }
 0x240   : > { %12999 = vst [vmem:[#allocation51_spill] sm:$0xff] %v8494_v55  ;;  %v3041_v52 = vshll.u32 %v3040_v41, 23  ;;  %v3956_v0 = vshrl.u32 %v12932_v1, %v8506_v10  ;;  %v8537_v25 = vsub.s32 32, %v8508_v11  ;;  %v8539_v38 = vadd.f32 %v3289_v59, %v3270_v21 }
 0x241   : > { %13000 = vst [vmem:[#allocation52_spill] sm:$0xff] %v8503_v20  ;;  %v3958_v32 = vshll.u32 %v12932_v1, %v8471_v30  ;;  %vm12732_vm15 = vcmp.lt.s32.totalorder %v8515_v57, 4  ;;  %v4110_v40 = vshll.u32 %v12931_v29, %v8508_v11  ;;  %v3037_v33 = vshrl.u32 %v3019_v18, %v3035_v56 }
 0x242   : > { %13001 = vst [vmem:[#allocation53_spill] sm:$0xff] %v8506_v10  ;;  %v8550_v41 = vshll.u32 %v12932_v1, %v8508_v11  ;;  %v3467_v21 = vand.u32 2139095040, %v8521_v31  ;;  %v2906_v13 = vmul.f32 -0.00019511016, %v8525_v7  ;;  %v3959_v30 = vshrl.u32 %v12937_v48, %v8506_v10 }
 0x243   : > { %13002 = vst [vmem:[#allocation54_spill] sm:$0xff] %v8508_v11  ;;  %v3036_v60 = vshll.u32 %v8346_v42, %v3034_v17  ;;  %v3042_v24 = vor.u32 4788187, %v3041_v52  ;;  %v8559_v39 = vor.u32 %v3956_v0, %v3955_v43  ;;  %v4111_v56 = vshrl.u32 %v12932_v1, %v8537_v25 }
 0x244   : > { %13003 = vst [vmem:[#allocation55_spill] sm:$0xff] %v8513_v45  ;;  %v3312_v45 = vand.u32 2139095040, %v8494_v55  ;;  %v8552_v55 = vadd.f32 %v3289_v59, %v3271_v53  ;;  %v4114_v53 = vshrl.u32 %v12937_v48, %v8537_v25  ;;  %v3622_v59 = vand.u32 2139095040, %v8539_v38 }
 0x245   : > { %13004 = vst [vmem:[#allocation56_spill] sm:$0xff] %v8515_v57  ;;  %v3038_v18 = vor.u32 %v3037_v33, %v3036_v60  ;;  %v2484_v42 = vshrl.u32 %v12931_v29, %v8281_v19  ;;  %vm12723_vm1 = vcmp.lt.s32.totalorder %v8527_v4, 4  ;;  %v2894_v52 = vsub.s32 4, %v8185_v37 }
 0x246   : > { %13005 = vst [vmem:[#allocation57_spill] sm:$0xff] %v8519_v5  ;;  %v3313_v5 = vshrl.u32 %v3312_v45, 23  ;;  %v3777_v17 = vand.u32 2139095040, %v8552_v55  ;;  %v3468_v45 = vshrl.u32 %v3467_v21, 23  ;;  %v2907_v43 = vadd.f32 0.008332121, %v2906_v13 }
 0x247   : > { %13006 = vst [vmem:[#allocation58_spill] sm:$0xff] %v8521_v31  ;;  %v2480_v60 = vshll.u32 %v12929_v27, %v8267_v23  ;;  %v2483_v33 = vshll.u32 %v12930_v26, %v8267_v23  ;;  %v3960_v31 = vor.u32 %v3959_v30, %v3958_v32  ;;  %v3623_v11 = vshrl.u32 %v3622_v59, 23 }
 0x248   : > { %13007 = vst [vmem:[#allocation59_spill] sm:$0xff] %v8527_v4  ;;  %v6261_v0 = vadd.s32 4294967169, %v3313_v5  ;;  %v2899_v10 = vmul.f32 -0.001358992, %v8525_v7  ;;  %v3045_v20 = vcvt.s32.f32 %v3038_v18  ;;  %v13014_v21 = vand.u32 2147483647, %v8157_v2 }
 0x249   : > { %13008 = vst [vmem:[#allocation60_spill] sm:$0xff] %v8537_v25  ;;  %v3043_v25 = vand.u32 2147483647, %v3042_v24  ;;  %v8585_v13 = vor.u32 %v2484_v42, %v2483_v33  ;;  %v8590_v24 = vsel %vm12732_vm15, %v8559_v39, 920167782  ;;  %v4115_v30 = vor.u32 %v4114_v53, %v8550_v41 }
 0x24a   : > { %13009 = vst [vmem:[#allocation61_spill] sm:$0xff] %v8539_v38  ;;  %v8578_v38 = vor.u32 %v4111_v56, %v4110_v40  ;;  %v3778_v5 = vshrl.u32 %v3777_v17, 23  ;;  %v2908_v32 = vmul.f32 %v2907_v43, %v8525_v7  ;;  %v8594_v40 = vpop.permute.xlu1 %3107  ;;  %v3319_v56 = vadd.s32 1, %v6261_v0 }
 0x24b   : > { %13010 = vst [vmem:[#allocation62_spill] sm:$0xff] %v8546_v49  ;;  %v2481_v49 = vshrl.u32 %v12930_v26, %v8281_v19  ;;  %v6264_v59 = vadd.s32 4294967169, %v3468_v45  ;;  %v3046_v18 = vmul.f32 %v3045_v20, %v3043_v25  ;;  %v2900_v42 = vadd.f32 0.041655596, %v2899_v10 }
 0x24c   : > { %13011 = vst [vmem:[#allocation63_spill] sm:$0xff] %v8552_v55  ;;  %v2467_v55 = vand.u32 8388607, %v13014_v21  ;;  %vm2492_vm3 = vcmp.lt.s32.totalorder %v8278_v63, 1  ;;  %vm2494_vm4 = vcmp.lt.s32.totalorder %v8278_v63, 3  ;;  %v6267_v41 = vadd.s32 4294967169, %v3623_v11 }
 0x24d   : > { %13012 = vst [vmem:[#allocation64_spill] sm:$0xff] %v8559_v39  ;;  %v8583_v15 = vor.u32 %v2481_v49, %v2480_v60  ;;  %v2895_v49 = vsel %vm2772_vm13, %v2894_v52, %v8185_v37  ;;  %v2478_v60 = vshrl.u32 %v12929_v27, %v8281_v19  ;;  %v2506_v37 = vsel %vm2494_vm4, %v8315_v16, %v8338_v34 }
 0x24e   : > { %13013 = vst [vmem:[#allocation65_spill] sm:$0xff] %v8578_v38  ;;  %v2468_v53 = vor.u32 8388608, %v2467_v55  ;;  %v6270_v20 = vadd.s32 4294967169, %v3778_v5  ;;  %v2897_v10 = vsel %vm8484_vm5, 0, %v2895_v49  ;;  %v2909_v25 = vadd.f32 -0.16666654, %v2908_v32 }
 0x24f   : > { %13015 = vst [vmem:[#allocation66_spill] sm:$0xff] %v8590_v24  ;;  %v2504_v17 = vsel %vm2492_vm3, %v8583_v15, %v8585_v13  ;;  %v2477_v45 = vshll.u32 %v12936_v46, %v8267_v23  ;;  %v8617_v55 = vsel %vm12732_vm15, %v3960_v31, 1326507024  ;;  %vm3320_vm11 = vcmp.gt.s32.totalorder %v3319_v56, 0 }
 0x250   : > { %13016 = vst [vmem:[#allocation67_spill] sm:$0xff] %v8594_v40  ;;  %v3047_v11 = vxor.u32 2147483648, %v3046_v18  ;;  %vm2493_vm2 = vcmp.lt.s32.totalorder %v8278_v63, 2  ;;  %v3474_v52 = vadd.s32 1, %v6264_v59  ;;  %v2901_v43 = vmul.f32 %v2900_v42, %v8525_v7 }
 0x251   : > { %13017 = vst [vmem:[#allocation68_spill] sm:$0xff] %v8617_v55  ;;  %v8621_v16 = vor.u32 %v2478_v60, %v2477_v45  ;;  %v8625_v34 = vsel %vm2493_vm2, %v2504_v17, %v2506_v37  ;;  %v8630_v23 = vsel %vm12723_vm1, %v8578_v38, 920167782  ;;  %v3629_v47 = vadd.s32 1, %v6267_v41 }
 0x252   : > { %13018 = vst [vmem:[#allocation69_spill] sm:$0xff] %v8630_v23  ;;  %v2914_v31 = vadd.s32 3, %v2897_v10  ;;  %v8632_v0 = vshll.u32 %v2468_v53, 8  ;;  %v3784_v33 = vadd.s32 1, %v6270_v20  ;;  %v3321_v21 = vsel %vm3320_vm11, %v3319_v56, 0  ;;  %v4727_v53 = vpop.permute.xlu1 %4726 }
 0x253   : > { %v2910_v5 = vmul.f32 %v2909_v25, %v8525_v7  ;;  %vm2927_vm12 = vcmp.lt.s32.totalorder %v7624_v8, 0  ;;  %v8638_v32 = vsel %vm12723_vm1, %v4115_v30, 1326507024  ;;  %v13020_v59 = vand.u32 2147483647, %v7624_v8 }
 0x254   : > { %13019 = vst [vmem:[#allocation70_spill] sm:$0xff] %v8638_v32  ;;  %v3048_v42 = vsel %vm2927_vm12, %v3047_v11, %v3046_v18  ;;  %v12725_v60 = vshrl.u32 %v8625_v34, 16  ;;  %vm3475_vm5 = vcmp.gt.s32.totalorder %v3474_v52, 0  ;;  %v2902_v56 = vadd.f32 -0.4999988, %v2901_v43 }
 0x255   : > { %vm8642_vm13 = vcmp.le.f32.partialorder %v13020_v59, 0.7853982  ;;  %v2500_v41 = vsel %vm2492_vm3, %v8621_v16, %v8583_v15  ;;  %v2502_v30 = vsel %vm2494_vm4, %v8585_v13, %v8332_v6  ;;  %vm3630_vm11 = vcmp.gt.s32.totalorder %v3629_v47, 0 }
 0x256   : > { %v8657_v17 = vand.u32 31, %v3321_v21  ;;  %v8659_v37 = vand.u32 3, %v2914_v31  ;;  %v8662_v18 = vand.u32 65535, %v8632_v0  ;;  %vm3785_vm1 = vcmp.gt.s32.totalorder %v3784_v33, 0 }
 0x257   : > { %v8665_v20 = vmul.f32 %v4727_v53, %v6695_v35  ;;  %v2911_v10 = vadd.f32 1.0, %v2910_v5  ;;  %v8670_v25 = vsel %vm8642_vm13, %v7624_v8, %v3048_v42  ;;  %v8673_v6 = vmul.f32 %v4727_v53, %v6697_v36 }
 0x258   : > { %13023 = vst [vmem:[#allocation71_spill] sm:$0xff] %v8657_v17  ;;  %v3476_v45 = vsel %vm3475_vm5, %v3474_v52, 0  ;;  %v8677_v11 = vsel %vm2493_vm2, %v2500_v41, %v2502_v30  ;;  %v8682_v43 = vmul.u32 %v12725_v60, %v8662_v18  ;;  %v3631_v31 = vsel %vm3630_vm11, %v3629_v47, 0 }
 0x259   : > { %13024 = vst [vmem:[#allocation72_spill] sm:$0xff] %v8665_v20  ;;  %v8684_v5 = vshrl.u32 %v3321_v21, 5  ;;  %v8686_v59 = vshrl.u32 %v3476_v45, 5  ;;  %v2903_v42 = vmul.f32 %v2902_v56, %v8525_v7  ;;  %v3786_v40 = vsel %vm3785_vm1, %v3784_v33, 0 }
 0x25a   : > { %13025 = vst [vmem:[#allocation73_spill] sm:$0xff] %v8673_v6  ;;  %v8690_v53 = vsub.s32 32, %v8657_v17  ;;  %vm2917_vm5 = vcmp.eq.s32.totalorder %v8659_v37, 0  ;;  %v8695_v52 = vmul.f32 %v8670_v25, %v8670_v25  ;;  %v2511_v41 = vand.u32 65535, %v8625_v34 }
 0x25b   : > { %13026 = vst [vmem:[#allocation74_spill] sm:$0xff] %v8684_v5  ;;  %v8698_v30 = vand.u32 31, %v3476_v45  ;;  %v2912_v47 = vmul.f32 %v2911_v10, %v8499_v44  ;;  %v3049_v21 = vsub.s32 4, %v8311_v50  ;;  %v8703_v33 = vshrl.u32 %v3631_v31, 5 }
 0x25c   : > { %13027 = vst [vmem:[#allocation75_spill] sm:$0xff] %v8686_v59  ;;  %v3335_v56 = vshll.u32 %v12931_v29, %v8657_v17  ;;  %vm2920_vm1 = vcmp.eq.s32.totalorder %v8659_v37, 2  ;;  %v8709_v60 = vshrl.u32 %v8632_v0, 16  ;;  %v2517_v38 = vshll.u32 %v8682_v43, 16 }
 0x25d   : > { %13028 = vst [vmem:[#allocation76_spill] sm:$0xff] %v8690_v53  ;;  %v8712_v45 = vand.u32 31, %v3631_v31  ;;  %v8714_v32 = vshrl.u32 %v3786_v40, 5  ;;  %v8716_v44 = vand.u32 31, %v3786_v40  ;;  %v2904_v10 = vadd.f32 1.0, %v2903_v42 }
 0x25e   : > { %13029 = vst [vmem:[#allocation77_spill] sm:$0xff] %v8698_v30  ;;  %vm2916_vm11 = vcmp.lt.s32.totalorder %v8659_v37, 2  ;;  %v3336_v7 = vshrl.u32 %v12932_v1, %v8690_v53  ;;  %v3054_v23 = vmul.f32 -0.001358992, %v8695_v52  ;;  %v2513_v4 = vmul.u32 %v2511_v41, %v8662_v18 }
 0x25f   : > { %13030 = vst [vmem:[#allocation78_spill] sm:$0xff] %v8703_v33  ;;  %v8724_v24 = vmul.u32 %v2511_v41, %v8709_v60  ;;  %v2918_v39 = vxor.u32 2147483648, %v2912_v47  ;;  %v3050_v31 = vsel %vm2927_vm12, %v3049_v21, %v8311_v50  ;;  %v3061_v40 = vmul.f32 -0.00019511016, %v8695_v52  ;;  %v1706_v49 = vpop.f32.mrf.mxu2 }
 0x260   : > { %13031 = vst [vmem:[#allocation79_spill] sm:$0xff] %v8712_v45  ;;  %v13034_v42 = vshrl.u32 %v8677_v11, 16  ;;  %v8737_v57 = vshll.u32 %v12932_v1, %v8657_v17  ;;  %v8741_v41 = vshrl.u32 %v12937_v48, %v8690_v53  ;;  %vm2913_vm15 = vweird.f32 %v7446_v22  ;;  %v1634_v17 = vld [vmem:[%s12623_s3 + $0x20] sm:$0xff] }
 0x261   : > { %13032 = vst [vmem:[#allocation80_spill] sm:$0xff] %v8714_v32  ;;  %vm2521_vm7 = vc.u32 %v2513_v4, %v2517_v38  ;;  %v2523_v36 = vadd.s32 %v2517_v38, %v2513_v4  ;;  %v8745_v50 = vsub.s32 32, %v8712_v45  ;;  %v8749_v21 = vshll.u32 %v12931_v29, %v8712_v45  ;;  %6195 = vmatmul.msk.f32.gmra.mxu2 %vm1664_vm0, %v1634_v17 }
 0x262   : > { %13033 = vst [vmem:[#allocation81_spill] sm:$0xff] %v8716_v44  ;;  %v8733_v55 = vmul.u32 %v13034_v42, %v8662_v18  ;;  %v2921_v42 = vxor.u32 2147483648, %v2904_v10  ;;  %v2533_v35 = vand.u32 65535, %v8677_v11  ;;  %v8757_v53 = vshll.u32 %v12932_v1, %v8712_v45  ;;  %6200 = vmatmul.msk.f32.gmra.mxu3 %vm1664_vm0, %v1634_v17 }
 0x263   : > { %13035 = vst [vmem:[#allocation82_spill] sm:$0xff] %v8745_v50  ;;  %v3052_v4 = vsel %vm8642_vm13, 0, %v3050_v31  ;;  %v3055_v38 = vadd.f32 0.041655596, %v3054_v23  ;;  %v2519_v59 = vshll.u32 %v8724_v24, 16  ;;  %v2919_v32 = vsel %vm2917_vm5, %v2904_v10, %v2918_v39 }
 0x264   : > { %v3062_v6 = vadd.f32 0.008332121, %v3061_v40  ;;  %v2522_v12 = vsel %vm2521_vm7, 1, %v12925_v14  ;;  %v2539_v61 = vshll.u32 %v8733_v55, 16  ;;  %v8769_v45 = vsub.s32 32, %v8716_v44 }
 0x265   : > { %v8773_v23 = vshll.u32 %v12931_v29, %v8716_v44  ;;  %v13037_v31 = vshrl.u32 %v8625_v34, 16  ;;  %vm2525_vm12 = vc.u32 %v2523_v36, %v2519_v59  ;;  %v8780_v39 = vshll.u32 %v12932_v1, %v8716_v44 }
 0x266   : > { %13036 = vst [vmem:[#allocation83_spill] sm:$0xff] %v8769_v45  ;;  %v2922_v17 = vsel %vm2920_vm1, %v2921_v42, %v2912_v47  ;;  %v2476_v10 = vshrl.u32 %v12936_v46, %v8281_v19  ;;  %v2535_v40 = vmul.u32 %v2533_v35, %v8662_v18  ;;  %v3056_v33 = vmul.f32 %v3055_v38, %v8695_v52 }
 0x267   : > { %v2516_v20 = vmul.u32 %v13037_v31, %v8709_v60  ;;  %13038 = vst [vmem:[#allocation84_spill] sm:$0xff] %v8780_v39  ;;  %v2923_v9 = vsel %vm2916_vm11, %v2919_v32, %v2922_v17  ;;  %v3069_v34 = vadd.s32 3, %v3052_v4  ;;  %v1707_v36 = vadd.f32 %v1706_v49, %v8191_v54 }
 0x268   : > { %v3063_v59 = vmul.f32 %v3062_v6, %v8695_v52  ;;  %v2526_v44 = vsel %vm2525_vm12, 1, %v12925_v14  ;;  %vm2543_vm7 = vc.u32 %v2535_v40, %v2539_v61  ;;  %v8795_v47 = vshrl.u32 %v12932_v1, %v8745_v50 }
 0x269   : > { %v2524_v31 = vadd.s32 %v2522_v12, %v2516_v20  ;;  %v8799_v19 = vshrl.u32 %v12937_v48, %v8745_v50  ;;  %v8801_v32 = vor.u32 %v3336_v7, %v3335_v56  ;;  %v2497_v12 = vsel %vm2495_vm8, %v8585_v13, 2102212464 }
 0x26a   : > { %v3340_v37 = vor.u32 %v8741_v41, %v8737_v57  ;;  %v2924_v18 = vsel %vm2913_vm15, nan, %v2923_v9  ;;  %v2496_v20 = vsel %vm2492_vm3, %v2476_v10, %v8621_v16  ;;  %v2537_v6 = vmul.u32 %v2533_v35, %v8709_v60  ;;  %v8924_v41 = vpop.f32.mrf.mxu0 }
 0x26b   : > { %13039 = vst [vmem:[#allocation85_spill] sm:$0xff] %v8801_v32  ;;  %v3086_v42 = vmul.f32 %v2924_v18, %v1707_v36  ;;  %v3057_v4 = vadd.f32 -0.4999988, %v3056_v33  ;;  %v2528_v7 = vadd.s32 %v2526_v44, %v2524_v31  ;;  %v2544_v56 = vsel %vm2543_vm7, 1, %v12925_v14 }
 0x26c   : > { %v3064_v38 = vadd.f32 -0.16666654, %v3063_v59  ;;  %v3070_v49 = vand.u32 3, %v3069_v34  ;;  %v2498_v13 = vsel %vm2494_vm4, %v8583_v15, %v2497_v12  ;;  %v13040_v22 = vshrl.u32 %v8677_v11, 16  ;;  %13052 = vst [vmem:[#allocation87_spill] sm:$0xff] %v8924_v41 }
 0x26d   : > { %v8823_v16 = vshrl.u32 %v12932_v1, %v8769_v45  ;;  %v8827_v35 = vshrl.u32 %v12937_v48, %v8769_v45  ;;  %3152 = vmatpush.msrb.mxu2 %v3086_v42  ;;  %v3058_v33 = vmul.f32 %v3057_v4, %v8695_v52  ;;  %v2518_v44 = vshrl.u32 %v8682_v43, 16 }
 0x26e   : > { %v2538_v9 = vmul.u32 %v13040_v22, %v8709_v60  ;;  %v3065_v17 = vmul.f32 %v3064_v38, %v8695_v52  ;;  %v2541_v15 = vshll.u32 %v2537_v6, 16  ;;  %v2545_v10 = vadd.s32 %v2539_v61, %v2535_v40 }
 0x26f   : > { %13041 = vst [vmem:[#allocation86_spill] sm:$0xff] %v8827_v35  ;;  %v3059_v11 = vadd.f32 1.0, %v3058_v33  ;;  %v2499_v60 = vsel %vm2493_vm2, %v2496_v20, %v2498_v13  ;;  %v2529_v31 = vadd.s32 %v2528_v7, %v2518_v44  ;;  %v12754_v36 = vand.u32 2147483647, %v8164_v62  ;;  %v13042_v13 = vld [vmem:[#allocation19_spill] sm:$0xff] }
 0x270   : > { %v2546_v34 = vadd.s32 %v2544_v56, %v2538_v9  ;;  %v3066_v59 = vadd.f32 1.0, %v3065_v17  ;;  %vm3068_vm8 = vweird.f32 %v7624_v8  ;;  %vm3071_vm15 = vcmp.lt.s32.totalorder %v3070_v49, 2  ;;  %v13045_v8 = vld [vmem:[#allocation24_spill] sm:$0xff] }
 0x271   : > { %vm3072_vm3 = vcmp.eq.s32.totalorder %v3070_v49, 0  ;;  %vm2547_vm4 = vc.u32 %v2545_v10, %v2541_v15  ;;  %vm3075_vm13 = vcmp.eq.s32.totalorder %v3070_v49, 2  ;;  %v3076_v43 = vxor.u32 2147483648, %v3059_v11 }
 0x272   : > { %v2520_v52 = vshrl.u32 %v8724_v24, 16  ;;  %v2548_v61 = vsel %vm2547_vm4, 1, %v12925_v14  ;;  %vm12799_vm5 = vcmp.lt.s32.totalorder %v8684_v5, 4  ;;  %v3067_v63 = vmul.f32 %v3066_v59, %v8670_v25 }
 0x273   : > { %v2540_v40 = vshrl.u32 %v8733_v55, 16  ;;  %v2542_v12 = vshrl.u32 %v2537_v6, 16  ;;  %v2550_v18 = vadd.s32 %v2548_v61, %v2546_v34  ;;  %v8843_v42 = vadd.s32 %v2545_v10, %v2541_v15 }
 0x274   : > { %v8841_v20 = vadd.s32 %v2529_v31, %v2520_v52  ;;  %v2622_v4 = vand.u32 8388607, %v12754_v36  ;;  %v2632_v24 = vshll.u32 %v12936_v46, %v8272_v3  ;;  %v3073_v7 = vxor.u32 2147483648, %v3067_v63 }
 0x275   : > { %v3077_v56 = vsel %vm3075_vm13, %v3076_v43, %v3067_v63  ;;  %v2551_v38 = vadd.s32 %v2550_v18, %v2540_v40  ;;  %v2633_v25 = vshrl.u32 %v12929_v27, %v13042_v13  ;;  %v2635_v55 = vshll.u32 %v12929_v27, %v8272_v3 }
 0x276   : > { %v2623_v22 = vor.u32 8388608, %v2622_v4  ;;  %v2636_v6 = vshrl.u32 %v12930_v26, %v13042_v13  ;;  %v2638_v9 = vshll.u32 %v12930_v26, %v8272_v3  ;;  %v3074_v33 = vsel %vm3072_vm3, %v3059_v11, %v3073_v7  ;;  %v13044_v11 = vld [vmem:[#allocation18_spill] sm:$0xff] }
 0x277   : > { %v2552_v44 = vadd.s32 %v2551_v38, %v2542_v12  ;;  %v2634_v17 = vor.u32 %v2633_v25, %v2632_v24  ;;  %v2639_v15 = vshrl.u32 %v12931_v29, %v13042_v13  ;;  %v8861_v10 = vsub.s32 32, %v8698_v30  ;;  %v13047_v38 = vld [vmem:[#allocation26_spill] sm:$0xff]  ;;  %v13048_v25 = vld [vmem:[#allocation20_spill] sm:$0xff] }
 0x278   : > { %v3078_v31 = vsel %vm3071_vm15, %v3074_v33, %v3077_v56  ;;  %vm2555_vm2 = vc.u32 %v8841_v20, %v8843_v42  ;;  %v2637_v59 = vor.u32 %v2636_v6, %v2635_v55  ;;  %vm2647_vm1 = vcmp.lt.s32.totalorder %v13044_v11, 1 }
 0x279   : > { %13043 = vst [vmem:[#allocation19_spill] sm:$0xff] %v8861_v10  ;;  %v2556_v3 = vadd.s32 1, %v2552_v44  ;;  %v2640_v52 = vor.u32 %v2639_v15, %v2638_v9  ;;  %v3079_v61 = vsel %vm3068_vm8, nan, %v3078_v31  ;;  %v2553_v63 = vmul.u32 %v8632_v0, %v2499_v60 }
 0x27a   : > { %v2655_v40 = vsel %vm2647_vm1, %v2634_v17, %v2637_v59  ;;  %v8873_v49 = vshll.u32 %v2623_v22, 8  ;;  %v8877_v12 = vshll.u32 %v12931_v29, %v8698_v30  ;;  %vm2649_vm11 = vcmp.lt.s32.totalorder %v13044_v11, 3 }
 0x27b   : > { %vm2648_vm12 = vcmp.lt.s32.totalorder %v13044_v11, 2  ;;  %v2657_v0 = vsel %vm2649_vm11, %v2640_v52, %v13045_v8  ;;  %v2659_v60 = vsel %vm2647_vm1, %v2637_v59, %v2640_v52  ;;  %v8888_v24 = vor.u32 %v8795_v47, %v8749_v21  ;;  %v13057_v11 = vld [vmem:[#allocation13_spill] sm:$0xff] }
 0x27c   : > { %v2658_v56 = vsel %vm2648_vm12, %v2655_v40, %v2657_v0  ;;  %v2661_v22 = vsel %vm2649_vm11, %v13048_v25, %v13047_v38  ;;  %v8901_v55 = vsel %vm12799_vm5, %v8801_v32, 920167782  ;;  %v2664_v47 = vand.u32 65535, %v8873_v49 }
 0x27d   : > { %13046 = vst [vmem:[#allocation18_spill] sm:$0xff] %v8888_v24  ;;  %v2662_v21 = vsel %vm2648_vm12, %v2659_v60, %v2661_v22  ;;  %v2665_v9 = vshrl.u32 %v8873_v49, 16  ;;  %v2689_v15 = vshrl.u32 %v2658_v56, 16  ;;  %vm2462_vm7 = vcmp.lt.s32.totalorder %v8157_v2, 0 }
 0x27e   : > { %13049 = vst [vmem:[#allocation24_spill] sm:$0xff] %v8901_v55  ;;  %v2666_v33 = vand.u32 65535, %v2662_v21 }
 0x282   : > { %v1737_v34 = vpop.f32.mrf.mxu3 }
 0x283   : > { %v1738_v43 = vadd.f32 %v1737_v34, %v8191_v54  ;;  %v2557_v54 = vsel %vm2555_vm2, %v2556_v3, %v2552_v44  ;;  %v2667_v44 = vshrl.u32 %v2662_v21, 16  ;;  %v8912_v34 = vsel %vm12799_vm5, %v3340_v37, 1326507024 }
 0x284   : > { %v2558_v4 = vadd.s32 %v2557_v54, %v2553_v63  ;;  %13050 = vst [vmem:[#allocation26_spill] sm:$0xff] %v8912_v34  ;;  %v2688_v3 = vand.u32 65535, %v2658_v56  ;;  %v2631_v63 = vshrl.u32 %v12936_v46, %v13042_v13  ;;  %v2691_v54 = vmul.u32 %v2689_v15, %v2664_v47 }
 0x285   : > { %v3087_v18 = vmul.f32 %v3079_v61, %v1738_v43  ;;  %v2652_v43 = vsel %vm2650_vm10, %v2640_v52, 2102212464  ;;  %v8918_v61 = vor.u32 %v8823_v16, %v8773_v23  ;;  %v2669_v40 = vmul.u32 %v2667_v44, %v2664_v47 }
 0x286   : > { %v2559_v6 = vadd.s32 536870912, %v2558_v4  ;;  %v2651_v52 = vsel %vm2647_vm1, %v2631_v63, %v2634_v17  ;;  %v2653_v23 = vsel %vm2649_vm11, %v2637_v59, %v2652_v43  ;;  %v2668_v16 = vmul.u32 %v2666_v33, %v2664_v47 }
 0x287   : > { %3184 = vmatpush.msrb.mxu3 %v3087_v18  ;;  %13051 = vst [vmem:[#allocation20_spill] sm:$0xff] %v8918_v61  ;;  %v2670_v18 = vmul.u32 %v2666_v33, %v2665_v9  ;;  %v2672_v8 = vshll.u32 %v2669_v40, 16  ;;  %v2690_v0 = vmul.u32 %v2688_v3, %v2664_v47  ;;  %v2692_v60 = vmul.u32 %v2688_v3, %v2665_v9 }
 0x288   : > { %v2560_v31 = vshrl.u32 %v2559_v6, 30  ;;  %v2694_v56 = vshll.u32 %v2691_v54, 16  ;;  %v2671_v38 = vmul.u32 %v2667_v44, %v2665_v9  ;;  %v2673_v7 = vshrl.u32 %v2669_v40, 16 }
 0x289   : > { %v2674_v25 = vshll.u32 %v2670_v18, 16  ;;  %vm2676_vm10 = vc.u32 %v2668_v16, %v2672_v8  ;;  %v2678_v22 = vadd.s32 %v2672_v8, %v2668_v16  ;;  %v2693_v63 = vmul.u32 %v2689_v15, %v2665_v9 }
 0x28a   : > { %v2561_v37 = vshll.u32 %v2560_v31, 30  ;;  %v2584_v21 = vsub.s32 4, %v2560_v31  ;;  %v2677_v57 = vsel %vm2676_vm10, 1, %v12925_v14  ;;  %vm2698_vm3 = vc.u32 %v2690_v0, %v2694_v56 }
 0x28b   : > { %v2679_v17 = vadd.s32 %v2677_v57, %v2671_v38  ;;  %vm2680_vm15 = vc.u32 %v2678_v22, %v2674_v25  ;;  %v2699_v44 = vsel %vm2698_vm3, 1, %v12925_v14  ;;  %v2700_v3 = vadd.s32 %v2694_v56, %v2690_v0  ;;  %v8942_v38 = vpop.f32.mrf.mxu0 }
 0x28c   : > { %v2562_v13 = vsub.s32 %v2558_v4, %v2561_v37  ;;  %v2681_v33 = vsel %vm2680_vm15, 1, %v12925_v14  ;;  %v2696_v4 = vshll.u32 %v2692_v60, 16  ;;  %v8936_v37 = vshrl.u32 %v12932_v1, %v8861_v10 }
 0x28d   : > { %v2683_v43 = vadd.s32 %v2681_v33, %v2679_v17  ;;  %v2585_v40 = vsel %vm2462_vm7, %v2584_v21, %v2560_v31  ;;  %v2654_v9 = vsel %vm2648_vm12, %v2651_v52, %v2653_v23  ;;  %v2701_v15 = vadd.s32 %v2699_v44, %v2693_v63 }
 0x28e   : > { %vm2563_vm8 = vcmp.lt.s32.totalorder %v2562_v13, 0  ;;  %v2564_v6 = vsub.s32 0, %v2562_v13  ;;  %13053 = vst [vmem:[#allocation88_spill] sm:$0xff] %v8936_v37  ;;  %v2675_v16 = vshrl.u32 %v2670_v18, 16  ;;  %vm2702_vm4 = vc.u32 %v2700_v3, %v2696_v4 }
 0x28f   : > { %v2684_v8 = vadd.s32 %v2683_v43, %v2673_v7  ;;  %v13054_v25 = vand.u32 2147483647, %v8157_v2  ;;  %v2554_v56 = vadd.s32 %v8843_v42, %v8841_v20  ;;  %v2703_v31 = vsel %vm2702_vm4, 1, %v12925_v14 }
 0x290   : > { %v2565_v59 = vsel %vm2563_vm8, %v2564_v6, %v2562_v13  ;;  %v12753_v52 = vand.u32 2147483647, %v13057_v11  ;;  %v2695_v7 = vshrl.u32 %v2691_v54, 16  ;;  %v2705_v18 = vadd.s32 %v2703_v31, %v2701_v15 }
 0x291   : > { %v2566_v47 = vclz %v2565_v59  ;;  %vm8946_vm13 = vcmp.le.f32.partialorder %v13054_v25, 0.7853982  ;;  %v8954_v23 = vadd.s32 %v2684_v8, %v2675_v16  ;;  %v8958_v21 = vadd.s32 %v2700_v3, %v2696_v4 }
 0x292   : > { %v2587_v6 = vsel %vm8946_vm13, 0, %v2585_v40  ;;  %v2708_v17 = vmul.u32 %v8873_v49, %v2654_v9  ;;  %v2697_v20 = vshrl.u32 %v2692_v60, 16  ;;  %v2706_v42 = vadd.s32 %v2705_v18, %v2695_v7  ;;  %v8987_v7 = vpop.permute.xlu0 %4702 }
 0x293   : > { %v6222_v57 = vadd.s32 4294967294, %v2566_v47  ;;  %vm2710_vm1 = vc.u32 %v8954_v23, %v8958_v21  ;;  %v2157_v54 = vand.u32 8388607, %v12753_v52  ;;  %v2168_v47 = vshrl.u32 %v12929_v27, %v8405_v28  ;;  %v13058_v52 = vld [vmem:[#allocation27_spill] sm:$0xff] }
 0x294   : > { %v2707_v4 = vadd.s32 %v2706_v42, %v2697_v20  ;;  %v2170_v49 = vshll.u32 %v12929_v27, %v8361_v51  ;;  %v2171_v60 = vshrl.u32 %v12930_v26, %v8405_v28  ;;  %v2174_v3 = vshrl.u32 %v12931_v29, %v8405_v28  ;;  %v1703_v42 = vpop.f32.mrf.mxu0 }
 0x295   : > { %vm6223_vm2 = vcmp.lt.s32.totalorder %v6222_v57, 0  ;;  %v2176_v40 = vshll.u32 %v12931_v29, %v8361_v51  ;;  %v2177_v16 = vshrl.u32 %v12932_v1, %v8405_v28  ;;  %v2167_v8 = vshll.u32 %v12936_v46, %v8361_v51 }
 0x296   : > { %v2569_v22 = vsel %vm6223_vm2, 0, %v6222_v57  ;;  %v2711_v57 = vadd.s32 1, %v2707_v4  ;;  %v8981_v25 = vor.u32 %v2171_v60, %v2170_v49  ;;  %v2180_v31 = vshrl.u32 %v12937_v48, %v8405_v28 }
 0x297   : > { %v2570_v63 = vsub.s32 32, %v2569_v22  ;;  %v2574_v59 = vsub.s32 4294967266, %v2569_v22  ;;  %v2571_v33 = vshll.u32 %v2562_v13, %v2569_v22  ;;  %v2173_v13 = vshll.u32 %v12930_v26, %v8361_v51 }
 0x298   : > { %v2712_v22 = vsel %vm2710_vm1, %v2711_v57, %v2707_v4  ;;  %v8994_v20 = vmul.f32 %v8987_v7, %v12951_v58  ;;  %v2158_v60 = vor.u32 8388608, %v2157_v54  ;;  %vm2185_vm11 = vcmp.lt.s32.totalorder %v13058_v52, 4 }
 0x299   : > { %v2572_v43 = vshrl.u32 %v2554_v56, %v2570_v63  ;;  %v2575_v44 = vadd.s32 127, %v2574_v59  ;;  %v2179_v56 = vshll.u32 %v12932_v1, %v8361_v51  ;;  %v2175_v63 = vor.u32 %v2174_v3, %v2173_v13  ;;  %v13059_v13 = vld [vmem:[#allocation10_spill] sm:$0xff] }
 0x29a   : > { %v2178_v59 = vor.u32 %v2177_v16, %v2176_v40  ;;  %vm2182_vm12 = vcmp.lt.s32.totalorder %v13058_v52, 1  ;;  %v9001_v3 = vadd.f32 %v1703_v42, %v13059_v13  ;;  %vm2184_vm10 = vcmp.lt.s32.totalorder %v13058_v52, 3 }
 0x29b   : > { %v2573_v9 = vor.u32 %v2572_v43, %v2571_v33  ;;  %v2576_v15 = vshll.u32 %v2575_v44, 23  ;;  %v2713_v33 = vadd.s32 %v2712_v22, %v2708_v17  ;;  %v2169_v43 = vor.u32 %v2168_v47, %v2167_v8 }
 0x29c   : > { %v2181_v51 = vor.u32 %v2180_v31, %v2179_v56  ;;  %v2191_v4 = vsel %vm2185_vm11, %v2178_v59, 920167782  ;;  %v2194_v17 = vsel %vm2182_vm12, %v8981_v25, %v2175_v63  ;;  %vm2183_vm8 = vcmp.lt.s32.totalorder %v13058_v52, 2 }
 0x29d   : > { %v2577_v18 = vor.u32 4788187, %v2576_v15  ;;  %v2580_v49 = vcvt.s32.f32 %v2573_v9  ;;  %v2604_v15 = vadd.s32 3, %v2587_v6  ;;  %v2714_v36 = vadd.s32 536870912, %v2713_v33 }
 0x29e   : > { %v2190_v6 = vsel %vm2182_vm12, %v2169_v43, %v8981_v25  ;;  %v2192_v47 = vsel %vm2184_vm10, %v2175_v63, %v2191_v4  ;;  %v2195_v9 = vsel %vm2185_vm11, %v2181_v51, 1326507024  ;;  %v9017_v8 = vshll.u32 %v2158_v60, 8 }
 0x29f   : > { %v2578_v44 = vand.u32 2147483647, %v2577_v18  ;;  %v2715_v54 = vshrl.u32 %v2714_v36, 30  ;;  %v2196_v16 = vsel %vm2184_vm10, %v2178_v59, %v2195_v9  ;;  %v9019_v56 = vand.u32 3, %v2604_v15 }
 0x2a0   : > { %vm2617_vm15 = vcmp.lt.s32.totalorder %v8164_v62, 0  ;;  %v2197_v31 = vsel %vm2183_vm8, %v2194_v17, %v2196_v16  ;;  %v13060_v22 = vand.u32 2147483647, %v8164_v62  ;;  %v2166_v59 = vshrl.u32 %v12936_v46, %v8405_v28 }
 0x2a1   : > { %v2581_v40 = vmul.f32 %v2580_v49, %v2578_v44  ;;  %v2716_v36 = vshll.u32 %v2715_v54, 30  ;;  %v9036_v51 = vsel %vm2183_vm8, %v2190_v6, %v2192_v47  ;;  %v2199_v44 = vand.u32 65535, %v9017_v8 }
 0x2a2   : > { %vm9028_vm3 = vcmp.le.f32.partialorder %v13060_v22, 0.7853982  ;;  %v2201_v15 = vand.u32 65535, %v2197_v31  ;;  %v2202_v4 = vshrl.u32 %v2197_v31, 16  ;;  %v2709_v28 = vadd.s32 %v8958_v21, %v8954_v23 }
 0x2a3   : > { %v2582_v57 = vxor.u32 2147483648, %v2581_v40  ;;  %v9044_v60 = vsub.s32 %v2713_v33, %v2716_v36  ;;  %v2739_v17 = vsub.s32 4, %v2715_v54  ;;  %v2187_v6 = vsel %vm2185_vm11, %v2175_v63, 2102212464 }
 0x2a4   : > { %v2200_v47 = vshrl.u32 %v9017_v8, 16  ;;  %v2204_v33 = vmul.u32 %v2202_v4, %v2199_v44  ;;  %v9057_v16 = vsel %vm2182_vm12, %v2166_v59, %v2169_v43  ;;  %v2224_v36 = vshrl.u32 %v9036_v51, 16 }
 0x2a5   : > { %v2583_v18 = vsel %vm2462_vm7, %v2582_v57, %v2581_v40  ;;  %vm2718_vm7 = vcmp.lt.s32.totalorder %v9044_v60, 0  ;;  %v2719_v0 = vsub.s32 0, %v9044_v60  ;;  %v2203_v21 = vmul.u32 %v2201_v15, %v2199_v44 }
 0x2a6   : > { %v9042_v49 = vsel %vm8946_vm13, %v8157_v2, %v2583_v18  ;;  %v9061_v31 = vmul.u32 %v2201_v15, %v2200_v47  ;;  %v2207_v63 = vshll.u32 %v2204_v33, 16  ;;  %v2740_v34 = vsel %vm2617_vm15, %v2739_v17, %v2715_v54 }
 0x2a7   : > { %v2588_v40 = vmul.f32 %v9042_v49, %v9042_v49  ;;  %v2720_v23 = vsel %vm2718_vm7, %v2719_v0, %v9044_v60  ;;  %v2188_v55 = vsel %vm2184_vm10, %v8981_v25, %v2187_v6  ;;  %v2206_v43 = vmul.u32 %v2202_v4, %v2200_v47  ;;  %v13063_v4 = vld [vmem:[#allocation78_spill] sm:$0xff] }
 0x2a8   : > { %v2721_v32 = vclz %v2720_v23  ;;  %vm2211_vm4 = vc.u32 %v2203_v21, %v2207_v63  ;;  %v2223_v59 = vand.u32 65535, %v9036_v51  ;;  %v2213_v23 = vadd.s32 %v2207_v63, %v2203_v21 }
 0x2a9   : > { %v2589_v9 = vmul.f32 -0.001358992, %v2588_v40  ;;  %v2596_v57 = vmul.f32 -0.00019511016, %v2588_v40  ;;  %v2212_v15 = vsel %vm2211_vm4, 1, %v12925_v14  ;;  %v9073_v54 = vmul.u32 %v2224_v36, %v2199_v44 }
 0x2aa   : > { %v6225_v45 = vadd.s32 4294967294, %v2721_v32  ;;  %v2214_v25 = vadd.s32 %v2212_v15, %v2206_v43  ;;  %vm12807_vm2 = vcmp.lt.s32.totalorder %v13063_v4, 4  ;;  %vm2607_vm1 = vcmp.eq.s32.totalorder %v9019_v56, 0  ;;  %v9083_v15 = vpop.f32.mrf.mxu1 }
 0x2ab   : > { %v2590_v18 = vadd.f32 0.041655596, %v2589_v9  ;;  %v2597_v22 = vadd.f32 0.008332121, %v2596_v57  ;;  %v2742_v9 = vsel %vm9028_vm3, 0, %v2740_v34  ;;  %v2209_v57 = vshll.u32 %v9061_v31, 16 }
 0x2ac   : > { %vm6226_vm13 = vcmp.lt.s32.totalorder %v6225_v45, 0  ;;  %vm2610_vm11 = vcmp.eq.s32.totalorder %v9019_v56, 2  ;;  %v2227_v51 = vmul.u32 %v2223_v59, %v2200_v47  ;;  %v2229_v34 = vshll.u32 %v9073_v54, 16 }
 0x2ad   : > { %v2591_v5 = vmul.f32 %v2590_v18, %v2588_v40  ;;  %v2598_v0 = vmul.f32 %v2597_v22, %v2588_v40  ;;  %v2724_v32 = vsel %vm6226_vm13, 0, %v6225_v45  ;;  %vm2215_vm12 = vc.u32 %v2213_v23, %v2209_v57 }
 0x2ae   : > { %vm2606_vm10 = vcmp.lt.s32.totalorder %v9019_v56, 2  ;;  %v2725_v21 = vsub.s32 32, %v2724_v32  ;;  %vm2603_vm7 = vweird.f32 %v8157_v2  ;;  %v2726_v63 = vshll.u32 %v9044_v60, %v2724_v32 }
 0x2af   : > { %v2592_v17 = vadd.f32 -0.4999988, %v2591_v5  ;;  %v2599_v50 = vadd.f32 -0.16666654, %v2598_v0  ;;  %v2208_v5 = vshrl.u32 %v2204_v33, 16  ;;  %v2729_v22 = vsub.s32 4294967266, %v2724_v32 }
 0x2b0   : > { %v2216_v43 = vsel %vm2215_vm12, 1, %v12925_v14  ;;  %v2225_v0 = vmul.u32 %v2223_v59, %v2199_v44  ;;  %v2727_v23 = vshrl.u32 %v2709_v28, %v2725_v21  ;;  %v2228_v32 = vmul.u32 %v2224_v36, %v2200_v47 }
 0x2b1   : > { %v2593_v6 = vmul.f32 %v2592_v17, %v2588_v40  ;;  %v2600_v18 = vmul.f32 %v2599_v50, %v2588_v40  ;;  %v2218_v41 = vadd.s32 %v2216_v43, %v2214_v25  ;;  %v2730_v17 = vadd.s32 127, %v2729_v22  ;;  %v13068_v43 = vld [vmem:[#allocation6_spill] sm:$0xff] }
 0x2b2   : > { %v2231_v50 = vshll.u32 %v2227_v51, 16  ;;  %vm2233_vm4 = vc.u32 %v2225_v0, %v2229_v34  ;;  %v2235_v40 = vadd.s32 %v2229_v34, %v2225_v0  ;;  %v2728_v39 = vor.u32 %v2727_v23, %v2726_v63 }
 0x2b3   : > { %v2594_v45 = vadd.f32 1.0, %v2593_v6  ;;  %v2601_v57 = vadd.f32 1.0, %v2600_v18  ;;  %v2219_v35 = vadd.s32 %v2218_v41, %v2208_v5  ;;  %v2731_v60 = vshll.u32 %v2730_v17, 23  ;;  %v13070_v17 = vld [vmem:[#allocation38_spill] sm:$0xff] }
 0x2b4   : > { %v2234_v37 = vsel %vm2233_vm4, 1, %v12925_v14  ;;  %vm2237_vm13 = vc.u32 %v2235_v40, %v2231_v50  ;;  %v2759_v59 = vadd.s32 3, %v2742_v9  ;;  %v2189_v28 = vsel %vm2183_vm8, %v9057_v16, %v2188_v55 }
 0x2b5   : > { %v2602_v33 = vmul.f32 %v2601_v57, %v9042_v49  ;;  %v2611_v58 = vxor.u32 2147483648, %v2594_v45  ;;  %v2210_v25 = vshrl.u32 %v9061_v31, 16  ;;  %v2732_v6 = vor.u32 4788187, %v2731_v60  ;;  %v13064_v31 = vld [vmem:[#allocation15_spill] sm:$0xff] }
 0x2b6   : > { %v2230_v34 = vshrl.u32 %v9073_v54, 16  ;;  %v2236_v49 = vadd.s32 %v2234_v37, %v2228_v32  ;;  %v2238_v18 = vsel %vm2237_vm13, 1, %v12925_v14  ;;  %v2735_v36 = vcvt.s32.f32 %v2728_v39 }
 0x2b7   : > { %v2608_v44 = vxor.u32 2147483648, %v2602_v33  ;;  %v2612_v47 = vsel %vm2610_vm11, %v2611_v58, %v2602_v33  ;;  %v9097_v9 = vadd.s32 %v2219_v35, %v2210_v25  ;;  %v2733_v52 = vand.u32 2147483647, %v2732_v6 }
 0x2b8   : > { %v2240_v16 = vadd.s32 %v2238_v18, %v2236_v49  ;;  %v12765_v21 = vand.u32 2147483647, %v13064_v31  ;;  %v9105_v37 = vsel %vm12807_vm2, %v8888_v24, 920167782  ;;  %v13066_v54 = vor.u32 %v8799_v19, %v8757_v53  ;;  %v9123_v53 = vpop.f32.mrf.mxu1 }
 0x2b9   : > { %v2609_v41 = vsel %vm2607_vm1, %v2594_v45, %v2608_v44  ;;  %13065 = vst [vmem:[#allocation13_spill] sm:$0xff] %v9105_v37  ;;  %v2232_v35 = vshrl.u32 %v2227_v51, 16  ;;  %v2736_v5 = vmul.f32 %v2735_v36, %v2733_v52  ;;  %v2239_v63 = vadd.s32 %v2235_v40, %v2231_v50  ;;  %v13069_v45 = vld [vmem:[#allocation72_spill] sm:$0xff]  ;;  %v13071_v50 = vld [vmem:[#allocation30_spill] sm:$0xff] }
 0x2ba   : > { %v2613_v55 = vsel %vm2606_vm10, %v2609_v41, %v2612_v47  ;;  %v9112_v58 = vsel %vm12807_vm2, %v13066_v54, 1326507024  ;;  %v2241_v22 = vadd.s32 %v2240_v16, %v2230_v34  ;;  %v4712_v0 = vmul.f32 %v8987_v7, %v13068_v43 }
 0x2bb   : > { %13067 = vst [vmem:[#allocation27_spill] sm:$0xff] %v9112_v58  ;;  %v2614_v39 = vsel %vm2603_vm7, nan, %v2613_v55  ;;  %v9121_v57 = vadd.f32 %v13069_v45, %v8994_v20  ;;  %v9125_v19 = vand.u32 3, %v2759_v59  ;;  %v2243_v2 = vmul.u32 %v9017_v8, %v2189_v28 }
 0x2bc   : > { %v3084_v56 = vmul.f32 %v2614_v39, %v9001_v3  ;;  %v2737_v51 = vxor.u32 2147483648, %v2736_v5  ;;  %v2242_v23 = vadd.s32 %v2241_v22, %v2232_v35  ;;  %vm2245_vm8 = vc.u32 %v9097_v9, %v2239_v63 }
 0x2bd   : > { %v2312_v3 = vand.u32 8388607, %v12765_v21  ;;  %v2323_v7 = vshrl.u32 %v12929_v27, %v13070_v17  ;;  %v2325_v20 = vshll.u32 %v12929_v27, %v13071_v50  ;;  %v2326_v40 = vshrl.u32 %v12930_v26, %v13070_v17 }
 0x2be   : > { %3153 = vmatpush.msrb.mxu2 %v3084_v56  ;;  %v2329_v8 = vshrl.u32 %v12931_v29, %v13070_v17  ;;  %v2738_v33 = vsel %vm2617_vm15, %v2737_v51, %v2736_v5  ;;  %v2246_v60 = vadd.s32 1, %v2242_v23  ;;  %v2331_v32 = vshll.u32 %v12931_v29, %v13071_v50  ;;  %v13072_v56 = vld [vmem:[#allocation36_spill] sm:$0xff]  ;;  %v13073_v5 = vld [vmem:[#allocation73_spill] sm:$0xff] }
 0x2bf   : > { %v2332_v44 = vshrl.u32 %v12932_v1, %v13070_v17  ;;  %v9148_v59 = vsel %vm9028_vm3, %v8164_v62, %v2738_v33  ;;  %v2328_v28 = vshll.u32 %v12930_v26, %v13071_v50  ;;  %v2334_v25 = vshll.u32 %v12932_v1, %v13071_v50 }
 0x2c0   : > { %v2335_v6 = vshrl.u32 %v12937_v48, %v13070_v17  ;;  %v2743_v34 = vmul.f32 %v9148_v59, %v9148_v59  ;;  %v2247_v49 = vsel %vm2245_vm8, %v2246_v60, %v2242_v23  ;;  %v2322_v18 = vshll.u32 %v12936_v46, %v13071_v50  ;;  %v1734_v23 = vpop.f32.mrf.mxu1 }
 0x2c1   : > { %v2333_v41 = vor.u32 %v2332_v44, %v2331_v32  ;;  %v2248_v42 = vadd.s32 %v2247_v49, %v2243_v2  ;;  %v9160_v47 = vor.u32 %v2326_v40, %v2325_v20  ;;  %v2330_v36 = vor.u32 %v2329_v8, %v2328_v28 }
 0x2c2   : > { %v2336_v55 = vor.u32 %v2335_v6, %v2334_v25  ;;  %v2744_v52 = vmul.f32 -0.001358992, %v2743_v34  ;;  %v2751_v16 = vmul.f32 -0.00019511016, %v2743_v34  ;;  %v2313_v54 = vor.u32 8388608, %v2312_v3 }
 0x2c3   : > { %v2324_v39 = vor.u32 %v2323_v7, %v2322_v18  ;;  %v2249_v35 = vadd.s32 536870912, %v2248_v42  ;;  %vm2337_vm15 = vcmp.lt.s32.totalorder %v13072_v56, 1  ;;  %vm2338_vm3 = vcmp.lt.s32.totalorder %v13072_v56, 2 }
 0x2c4   : > { %vm2340_vm1 = vcmp.lt.s32.totalorder %v13072_v56, 4  ;;  %v9166_v22 = vadd.f32 %v13073_v5, %v4712_v0  ;;  %v2745_v45 = vadd.f32 0.041655596, %v2744_v52  ;;  %v2752_v2 = vadd.f32 0.008332121, %v2751_v16 }
 0x2c5   : > { %v2346_v51 = vsel %vm2340_vm1, %v2333_v41, 920167782  ;;  %v9170_v50 = vshrl.u32 %v2249_v35, 30  ;;  %vm2339_vm11 = vcmp.lt.s32.totalorder %v13072_v56, 3  ;;  %v2349_v3 = vsel %vm2337_vm15, %v9160_v47, %v2330_v36 }
 0x2c6   : > { %v2350_v7 = vsel %vm2340_vm1, %v2336_v55, 1326507024  ;;  %v2746_v20 = vmul.f32 %v2745_v45, %v2743_v34  ;;  %v2753_v0 = vmul.f32 %v2752_v2, %v2743_v34  ;;  %v9180_v8 = vshll.u32 %v2313_v54, 8 }
 0x2c7   : > { %v2351_v40 = vsel %vm2339_vm11, %v2333_v41, %v2350_v7  ;;  %v2251_v33 = vshll.u32 %v9170_v50, 30  ;;  %v2345_v60 = vsel %vm2337_vm15, %v2324_v39, %v9160_v47  ;;  %v2347_v32 = vsel %vm2339_vm11, %v2330_v36, %v2346_v51  ;;  %v9211_v7 = vpop.permute.xlu1 %4692 }
 0x2c8   : > { %v2352_v44 = vsel %vm2338_vm3, %v2349_v3, %v2351_v40  ;;  %v1735_v28 = vadd.f32 %v1734_v23, %v13059_v13  ;;  %v2747_v25 = vadd.f32 -0.4999988, %v2746_v20  ;;  %v2754_v6 = vadd.f32 -0.16666654, %v2753_v0 }
 0x2c9   : > { %vm2765_vm12 = vcmp.eq.s32.totalorder %v9125_v19, 2  ;;  %vm2762_vm10 = vcmp.eq.s32.totalorder %v9125_v19, 0  ;;  %v2244_v49 = vadd.s32 %v2239_v63, %v9097_v9  ;;  %v9194_v18 = vsub.s32 %v2248_v42, %v2251_v33 }
 0x2ca   : > { %v2356_v41 = vand.u32 65535, %v2352_v44  ;;  %v2357_v55 = vshrl.u32 %v2352_v44, 16  ;;  %v2748_v52 = vmul.f32 %v2747_v25, %v2743_v34  ;;  %v2755_v16 = vmul.f32 %v2754_v6, %v2743_v34 }
 0x2cb   : > { %vm2761_vm7 = vcmp.lt.s32.totalorder %v9125_v19, 2  ;;  %v2348_v54 = vsel %vm2338_vm3, %v2345_v60, %v2347_v32  ;;  %v2354_v13 = vand.u32 65535, %v9180_v8  ;;  %vm2758_vm4 = vweird.f32 %v8164_v62 }
 0x2cc   : > { %vm2253_vm13 = vcmp.lt.s32.totalorder %v9194_v18, 0  ;;  %v2254_v35 = vsub.s32 0, %v9194_v18  ;;  %v2321_v9 = vshrl.u32 %v12936_v46, %v13070_v17  ;;  %v2355_v63 = vshrl.u32 %v9180_v8, 16 }
 0x2cd   : > { %v2749_v42 = vadd.f32 1.0, %v2748_v52  ;;  %v2756_v34 = vadd.f32 1.0, %v2755_v16  ;;  %v2342_v5 = vsel %vm2340_vm1, %v2330_v36, 2102212464  ;;  %v2359_v45 = vmul.u32 %v2357_v55, %v2354_v13 }
 0x2ce   : > { %v2255_v2 = vsel %vm2253_vm13, %v2254_v35, %v9194_v18  ;;  %v9209_v51 = vmul.u32 %v2356_v41, %v2355_v63  ;;  %v2378_v23 = vand.u32 65535, %v2348_v54  ;;  %v2379_v3 = vshrl.u32 %v2348_v54, 16 }
 0x2cf   : > { %v2757_v20 = vmul.f32 %v2756_v34, %v9148_v59  ;;  %v2766_v0 = vxor.u32 2147483648, %v2749_v42  ;;  %v2256_v17 = vclz %v2255_v2  ;;  %v2362_v40 = vshll.u32 %v2359_v45, 16  ;;  %v4768_v62 = vpop.permute.xlu1 %4767 }
 0x2d0   : > { %v2274_v33 = vsub.s32 4, %v9170_v50  ;;  %v2341_v60 = vsel %vm2337_vm15, %v2321_v9, %v2324_v39  ;;  %v2343_v36 = vsel %vm2339_vm11, %v9160_v47, %v2342_v5  ;;  %v2358_v32 = vmul.u32 %v2356_v41, %v2354_v13 }
 0x2d1   : > { %v2763_v44 = vxor.u32 2147483648, %v2757_v20  ;;  %v2767_v25 = vsel %vm2765_vm12, %v2766_v0, %v2757_v20  ;;  %v6216_v6 = vadd.s32 4294967294, %v2256_v17  ;;  %v2361_v52 = vmul.u32 %v2357_v55, %v2355_v63 }
 0x2d2   : > { %v2364_v59 = vshll.u32 %v9209_v51, 16  ;;  %vm2366_vm8 = vc.u32 %v2358_v32, %v2362_v40  ;;  %v2368_v16 = vadd.s32 %v2362_v40, %v2358_v32  ;;  %v2381_v54 = vmul.u32 %v2379_v3, %v2354_v13 }
 0x2d3   : > { %v2764_v35 = vsel %vm2762_vm10, %v2749_v42, %v2763_v44  ;;  %vm6217_vm15 = vcmp.lt.s32.totalorder %v6216_v6, 0  ;;  %v2367_v39 = vsel %vm2366_vm8, 1, %v12925_v14  ;;  %v2382_v9 = vmul.u32 %v2378_v23, %v2355_v63 }
 0x2d4   : > { %v2768_v47 = vsel %vm2761_vm7, %v2764_v35, %v2767_v25  ;;  %v2259_v41 = vsel %vm6217_vm15, 0, %v6216_v6  ;;  %v2369_v34 = vadd.s32 %v2367_v39, %v2361_v52  ;;  %vm2370_vm1 = vc.u32 %v2368_v16, %v2364_v59 }
 0x2d5   : > { %v2769_v55 = vsel %vm2758_vm4, nan, %v2768_v47  ;;  %v2260_v5 = vsub.s32 32, %v2259_v41  ;;  %v2264_v2 = vsub.s32 4294967266, %v2259_v41  ;;  %v2380_v20 = vmul.u32 %v2378_v23, %v2354_v13  ;;  %v13078_v47 = vld [vmem:[#allocation11_spill] sm:$0xff] }
 0x2d6   : > { %v3085_v0 = vmul.f32 %v2769_v55, %v1735_v28  ;;  %v2363_v17 = vshrl.u32 %v2359_v45, 16  ;;  %v2371_v42 = vsel %vm2370_vm1, 1, %v12925_v14  ;;  %v2384_v40 = vshll.u32 %v2381_v54, 16 }
 0x2d7   : > { %v2261_v32 = vshll.u32 %v9194_v18, %v2259_v41  ;;  %v2262_v44 = vshrl.u32 %v2244_v49, %v2260_v5  ;;  %v2265_v21 = vadd.s32 127, %v2264_v2  ;;  %v2373_v19 = vadd.s32 %v2371_v42, %v2369_v34 }
 0x2d8   : > { %3185 = vmatpush.msrb.mxu3 %v3085_v0  ;;  %v2383_v25 = vmul.u32 %v2379_v3, %v2355_v63  ;;  %v2386_v6 = vshll.u32 %v2382_v9, 16  ;;  %vm2388_vm11 = vc.u32 %v2380_v20, %v2384_v40  ;;  %v2390_v52 = vadd.s32 %v2384_v40, %v2380_v20  ;;  %v13085_v63 = vld [vmem:[#allocation39_spill] sm:$0xff] }
 0x2d9   : > { %v2263_v59 = vor.u32 %v2262_v44, %v2261_v32  ;;  %v2266_v16 = vshll.u32 %v2265_v21, 23  ;;  %v2374_v35 = vadd.s32 %v2373_v19, %v2363_v17  ;;  %v2389_v28 = vsel %vm2388_vm11, 1, %v12925_v14  ;;  %v13080_v17 = vld [vmem:[#allocation28_spill] sm:$0xff] }
 0x2da   : > { %v9234_v13 = vadd.f32 %v4768_v62, %v9121_v57  ;;  %vm2152_vm12 = vcmp.lt.s32.totalorder %v13057_v11, 0  ;;  %v2391_v18 = vadd.s32 %v2389_v28, %v2383_v25  ;;  %vm2392_vm10 = vc.u32 %v2390_v52, %v2386_v6 }
 0x2db   : > { %v13075_v49 = vand.u32 2147483647, %v13057_v11  ;;  %v2267_v45 = vor.u32 4788187, %v2266_v16  ;;  %v2365_v23 = vshrl.u32 %v9209_v51, 16  ;;  %v2393_v21 = vsel %vm2392_vm10, 1, %v12925_v14 }
 0x2dc   : > { %13074 = vst [vmem:[#allocation10_spill] sm:$0xff] %v9234_v13  ;;  %v2344_v3 = vsel %vm2338_vm3, %v2341_v60, %v2343_v36  ;;  %v2385_v57 = vshrl.u32 %v2381_v54, 16  ;;  %v2395_v39 = vadd.s32 %v2393_v21, %v2391_v18  ;;  %v12766_v41 = vand.u32 2147483647, %v13078_v47  ;;  %v13079_v36 = vld [vmem:[#allocation22_spill] sm:$0xff] }
 0x2dd   : > { %vm9239_vm7 = vcmp.le.f32.partialorder %v13075_v49, 0.7853982  ;;  %v2268_v34 = vand.u32 2147483647, %v2267_v45  ;;  %v2270_v55 = vcvt.s32.f32 %v2263_v59  ;;  %v2275_v5 = vsel %vm2152_vm12, %v2274_v33, %v9170_v50  ;;  %v13082_v49 = vld [vmem:[#allocation31_spill] sm:$0xff] }
 0x2de   : > { %v9251_v2 = vadd.s32 %v2374_v35, %v2365_v23  ;;  %v2387_v20 = vshrl.u32 %v2382_v9, 16  ;;  %v9253_v0 = vadd.s32 %v2390_v52, %v2386_v6  ;;  %v2396_v51 = vadd.s32 %v2395_v39, %v2385_v57  ;;  %v13083_v57 = vld [vmem:[#allocation41_spill] sm:$0xff]  ;;  %v13084_v39 = vld [vmem:[#allocation32_spill] sm:$0xff] }
 0x2df   : > { %v1847_v56 = vand.u32 8388607, %v12766_v41  ;;  %v2271_v60 = vmul.f32 %v2270_v55, %v2268_v34  ;;  %v1857_v54 = vshll.u32 %v12936_v46, %v13079_v36  ;;  %v1858_v42 = vshrl.u32 %v12929_v27, %v13080_v17 }
 0x2e0   : > { %v1861_v40 = vshrl.u32 %v12930_v26, %v13080_v17  ;;  %v2397_v50 = vadd.s32 %v2396_v51, %v2387_v20  ;;  %v1860_v33 = vshll.u32 %v12929_v27, %v13079_v36  ;;  %v1863_v9 = vshll.u32 %v12930_v26, %v13079_v36 }
 0x2e1   : > { %v1864_v32 = vshrl.u32 %v12931_v29, %v13080_v17  ;;  %v2272_v44 = vxor.u32 2147483648, %v2271_v60  ;;  %v2277_v19 = vsel %vm9239_vm7, 0, %v2275_v5  ;;  %vm2400_vm3 = vc.u32 %v9251_v2, %v9253_v0 }
 0x2e2   : > { %v1848_v25 = vor.u32 8388608, %v1847_v56  ;;  %v2401_v6 = vadd.s32 1, %v2397_v50  ;;  %v9273_v52 = vor.u32 %v1858_v42, %v1857_v54  ;;  %v9275_v59 = vor.u32 %v1861_v40, %v1860_v33 }
 0x2e3   : > { %v9277_v16 = vor.u32 %v1864_v32, %v1863_v9  ;;  %v9280_v35 = vadd.f32 %v4768_v62, %v9166_v22  ;;  %v2273_v28 = vsel %vm2152_vm12, %v2272_v44, %v2271_v60  ;;  %v2398_v18 = vmul.u32 %v9180_v8, %v2344_v3 }
 0x2e4   : > { %vm1874_vm4 = vcmp.lt.s32.totalorder %v13082_v49, 3  ;;  %v9289_v45 = vsel %vm9239_vm7, %v13057_v11, %v2273_v28  ;;  %v2294_v23 = vadd.s32 3, %v2277_v19  ;;  %v2402_v21 = vsel %vm2400_vm3, %v2401_v6, %v2397_v50 }
 0x2e5   : > { %13081 = vst [vmem:[#allocation15_spill] sm:$0xff] %v9280_v35  ;;  %v1886_v22 = vsel %vm1874_vm4, %v13084_v39, %v13083_v57  ;;  %v2278_v62 = vmul.f32 %v9289_v45, %v9289_v45  ;;  %v2403_v34 = vadd.s32 %v2402_v21, %v2398_v18  ;;  %vm1872_vm13 = vcmp.lt.s32.totalorder %v13082_v49, 1 }
 0x2e6   : > { %vm1873_vm8 = vcmp.lt.s32.totalorder %v13082_v49, 2  ;;  %v1880_v8 = vsel %vm1872_vm13, %v9273_v52, %v9275_v59  ;;  %v1882_v3 = vsel %vm1874_vm4, %v9277_v16, %v13085_v63  ;;  %v1884_v55 = vsel %vm1872_vm13, %v9275_v59, %v9277_v16 }
 0x2e7   : > { %v9311_v5 = vshll.u32 %v1848_v25, 8  ;;  %v2279_v20 = vmul.f32 -0.001358992, %v2278_v62  ;;  %v2286_v51 = vmul.f32 -0.00019511016, %v2278_v62  ;;  %v2404_v56 = vadd.s32 536870912, %v2403_v34 }
 0x2e8   : > { %v1887_v60 = vsel %vm1873_vm8, %v1884_v55, %v1886_v22  ;;  %v1883_v32 = vsel %vm1873_vm8, %v1880_v8, %v1882_v3  ;;  %v12767_v44 = vand.u32 2147483647, %v9234_v13  ;;  %v2295_v19 = vand.u32 3, %v2294_v23 }
 0x2e9   : > { %v1889_v36 = vand.u32 65535, %v9311_v5  ;;  %v9317_v54 = vshrl.u32 %v9311_v5, 16  ;;  %v1891_v42 = vand.u32 65535, %v1887_v60  ;;  %v1892_v40 = vshrl.u32 %v1887_v60, 16 }
 0x2ea   : > { %v2280_v50 = vadd.f32 0.041655596, %v2279_v20  ;;  %v2287_v33 = vadd.f32 0.008332121, %v2286_v51  ;;  %v9319_v9 = vshrl.u32 %v2404_v56, 30  ;;  %v5711_v28 = vand.u32 2139095040, %v9234_v13 }
 0x2eb   : > { %v1894_v25 = vmul.u32 %v1892_v40, %v1889_v36  ;;  %v9325_v6 = vmul.u32 %v1891_v42, %v9317_v54  ;;  %v1893_v22 = vmul.u32 %v1891_v42, %v1889_v36  ;;  %v1914_v55 = vshrl.u32 %v1883_v32, 16  ;;  %v13086_v20 = vld [vmem:[#allocation9_spill] sm:$0xff] }
 0x2ec   : > { %v2281_v18 = vmul.f32 %v2280_v50, %v2278_v62  ;;  %v2288_v21 = vmul.f32 %v2287_v33, %v2278_v62  ;;  %v2406_v57 = vshll.u32 %v9319_v9, 30  ;;  %v1701_v8 = vadd.f32 %v8942_v38, %v13086_v20  ;;  %v1709_v33 = vpop.f32.mrf.mxu2  ;;  %v1740_v38 = vpop.f32.mrf.mxu3 }
 0x2ed   : > { %v1897_v63 = vshll.u32 %v1894_v25, 16  ;;  %vm2297_vm15 = vcmp.eq.s32.totalorder %v2295_v19, 0  ;;  %v1896_v56 = vmul.u32 %v1892_v40, %v9317_v54  ;;  %v1899_v60 = vshll.u32 %v9325_v6, 16 }
 0x2ee   : > { %v2282_v3 = vadd.f32 -0.4999988, %v2281_v18  ;;  %v2289_v23 = vadd.f32 -0.16666654, %v2288_v21  ;;  %v9332_v51 = vsub.s32 %v2403_v34, %v2406_v57  ;;  %vm2296_vm11 = vcmp.lt.s32.totalorder %v2295_v19, 2 }
 0x2ef   : > { %vm1901_vm1 = vc.u32 %v1893_v22, %v1897_v63  ;;  %v1903_v50 = vadd.s32 %v1897_v63, %v1893_v22  ;;  %vm2293_vm10 = vweird.f32 %v13057_v11  ;;  %v1913_v18 = vand.u32 65535, %v1883_v32 }
 0x2f0   : > { %v2283_v41 = vmul.f32 %v2282_v3, %v2278_v62  ;;  %v2290_v39 = vmul.f32 %v2289_v23, %v2278_v62  ;;  %vm2408_vm12 = vcmp.lt.s32.totalorder %v9332_v51, 0  ;;  %v2409_v42 = vsub.s32 0, %v9332_v51 }
 0x2f1   : > { %v1902_v34 = vsel %vm1901_vm1, 1, %v12925_v14  ;;  %vm1905_vm7 = vc.u32 %v1903_v50, %v1899_v60  ;;  %v1916_v40 = vmul.u32 %v1914_v55, %v1889_v36  ;;  %vm2300_vm3 = vcmp.eq.s32.totalorder %v2295_v19, 2 }
 0x2f2   : > { %v2284_v21 = vadd.f32 1.0, %v2283_v41  ;;  %v2291_v57 = vadd.f32 1.0, %v2290_v39  ;;  %v2410_v22 = vsel %vm2408_vm12, %v2409_v42, %v9332_v51  ;;  %v1904_v63 = vadd.s32 %v1902_v34, %v1896_v56 }
 0x2f3   : > { %v2411_v62 = vclz %v2410_v22  ;;  %v1856_v3 = vshrl.u32 %v12936_v46, %v13080_v17  ;;  %v1906_v23 = vsel %vm1905_vm7, 1, %v12925_v14  ;;  %v1877_v32 = vsel %vm1875_vm6, %v9277_v16, 2102212464 }
 0x2f4   : > { %v2292_v33 = vmul.f32 %v2291_v57, %v9289_v45  ;;  %v2301_v38 = vxor.u32 2147483648, %v2284_v21  ;;  %v1908_v60 = vadd.s32 %v1906_v23, %v1904_v63  ;;  %v2399_v41 = vadd.s32 %v9253_v0, %v9251_v2 }
 0x2f5   : > { %v6219_v39 = vadd.s32 4294967294, %v2411_v62  ;;  %v1876_v56 = vsel %vm1872_vm13, %v1856_v3, %v9273_v52  ;;  %v1917_v17 = vmul.u32 %v1913_v18, %v9317_v54  ;;  %v1898_v42 = vshrl.u32 %v1894_v25, 16 }
 0x2f6   : > { %v2298_v50 = vxor.u32 2147483648, %v2292_v33  ;;  %v1915_v34 = vmul.u32 %v1913_v18, %v1889_v36  ;;  %v1919_v45 = vshll.u32 %v1916_v40, 16  ;;  %v2302_v57 = vsel %vm2300_vm3, %v2301_v38, %v2292_v33  ;;  %v13087_v38 = vld [vmem:[#allocation12_spill] sm:$0xff] }
 0x2f7   : > { %vm6220_vm1 = vcmp.lt.s32.totalorder %v6219_v39, 0  ;;  %v1878_v16 = vsel %vm1874_vm4, %v9275_v59, %v1877_v32  ;;  %v1918_v2 = vmul.u32 %v1914_v55, %v9317_v54  ;;  %v1909_v63 = vadd.s32 %v1908_v60, %v1898_v42 }
 0x2f8   : > { %v2299_v0 = vsel %vm2297_vm15, %v2284_v21, %v2298_v50  ;;  %v2414_v22 = vsel %vm6220_vm1, 0, %v6219_v39  ;;  %vm1923_vm6 = vc.u32 %v1915_v34, %v1919_v45  ;;  %v1921_v36 = vshll.u32 %v1917_v17, 16 }
 0x2f9   : > { %v2303_v52 = vsel %vm2296_vm11, %v2299_v0, %v2302_v57  ;;  %v2415_v62 = vsub.s32 32, %v2414_v22  ;;  %v2419_v25 = vsub.s32 4294967266, %v2414_v22  ;;  %v2416_v3 = vshll.u32 %v9332_v51, %v2414_v22  ;;  %v13091_v0 = vld [vmem:[#allocation23_spill] sm:$0xff] }
 0x2fa   : > { %v2304_v18 = vsel %vm2293_vm10, nan, %v2303_v52  ;;  %v1924_v23 = vsel %vm1923_vm6, 1, %v12925_v14  ;;  %v1925_v59 = vadd.s32 %v1919_v45, %v1915_v34  ;;  %vm2307_vm4 = vcmp.lt.s32.totalorder %v13064_v31, 0  ;;  %v13092_v52 = vld [vmem:[#allocation29_spill] sm:$0xff] }
 0x2fb   : > { %v3082_v33 = vmul.f32 %v2304_v18, %v1701_v8  ;;  %v2417_v54 = vshrl.u32 %v2399_v41, %v2415_v62  ;;  %v2420_v55 = vadd.s32 127, %v2419_v25  ;;  %v1926_v21 = vadd.s32 %v1924_v23, %v1918_v2 }
 0x2fc   : > { %v1879_v19 = vsel %vm1873_vm8, %v1876_v56, %v1878_v16  ;;  %vm1927_vm13 = vc.u32 %v1925_v59, %v1921_v36  ;;  %v12768_v32 = vand.u32 2147483647, %v13087_v38  ;;  %v1900_v51 = vshrl.u32 %v9325_v6, 16 }
 0x2fd   : > { %3154 = vmatpush.msrb.mxu2 %v3082_v33  ;;  %v2418_v11 = vor.u32 %v2417_v54, %v2416_v3  ;;  %v2421_v60 = vshll.u32 %v2420_v55, 23  ;;  %v1928_v39 = vsel %vm1927_vm13, 1, %v12925_v14  ;;  %v13088_v8 = vand.u32 2147483647, %v13064_v31 }
 0x2fe   : > { %v2429_v50 = vsub.s32 4, %v9319_v9  ;;  %v1920_v49 = vshrl.u32 %v1916_v40, 16  ;;  %v1922_v56 = vshrl.u32 %v1917_v17, 16  ;;  %v1930_v42 = vadd.s32 %v1928_v39, %v1926_v21  ;;  %v13094_v39 = vld [vmem:[#allocation43_spill] sm:$0xff] }
 0x2ff   : > { %vm9373_vm15 = vcmp.le.f32.partialorder %v13088_v8, 0.7853982  ;;  %v2422_v34 = vor.u32 4788187, %v2421_v60  ;;  %v9378_v45 = vadd.s32 %v1909_v63, %v1900_v51  ;;  %v9380_v57 = vadd.s32 %v1925_v59, %v1921_v36  ;;  %v13095_v8 = vld [vmem:[#allocation35_spill] sm:$0xff] }
 0x300   : > { %v2002_v6 = vand.u32 8388607, %v12768_v32  ;;  %v2425_v16 = vcvt.s32.f32 %v2418_v11  ;;  %v1931_v2 = vadd.s32 %v1930_v42, %v1920_v49  ;;  %v2012_v22 = vshll.u32 %v12936_v46, %v13091_v0  ;;  %v13093_v11 = vld [vmem:[#allocation33_spill] sm:$0xff] }
 0x301   : > { %v2013_v62 = vshrl.u32 %v12929_v27, %v13092_v52  ;;  %v2423_v25 = vand.u32 2147483647, %v2422_v34  ;;  %v2015_v17 = vshll.u32 %v12929_v27, %v13091_v0  ;;  %v2016_v63 = vshrl.u32 %v12930_v26, %v13092_v52 }
 0x302   : > { %v2003_v40 = vor.u32 8388608, %v2002_v6  ;;  %v1932_v36 = vadd.s32 %v1931_v2, %v1922_v56  ;;  %v2018_v3 = vshll.u32 %v12930_v26, %v13091_v0  ;;  %v2019_v23 = vshrl.u32 %v12931_v29, %v13092_v52  ;;  %v13096_v56 = vld [vmem:[#allocation42_spill] sm:$0xff] }
 0x303   : > { %v9392_v18 = vor.u32 %v2013_v62, %v2012_v22  ;;  %v2426_v59 = vmul.f32 %v2425_v16, %v2423_v25  ;;  %v2430_v33 = vsel %vm2307_vm4, %v2429_v50, %v9319_v9  ;;  %vm1935_vm8 = vc.u32 %v9378_v45, %v9380_v57 }
 0x304   : > { %v9403_v54 = vor.u32 %v2016_v63, %v2015_v17  ;;  %v1936_v55 = vadd.s32 1, %v1932_v36  ;;  %v9405_v21 = vor.u32 %v2019_v23, %v2018_v3  ;;  %vm2027_vm11 = vcmp.lt.s32.totalorder %v13093_v11, 1 }
 0x305   : > { %vm2029_vm12 = vcmp.lt.s32.totalorder %v13093_v11, 3  ;;  %v2427_v60 = vxor.u32 2147483648, %v2426_v59  ;;  %v1933_v51 = vmul.u32 %v9311_v5, %v1879_v19  ;;  %v9426_v19 = vshll.u32 %v2003_v40, 8 }
 0x306   : > { %v2035_v9 = vsel %vm2027_vm11, %v9392_v18, %v9403_v54  ;;  %v2041_v50 = vsel %vm2029_vm12, %v13095_v8, %v13094_v39  ;;  %v1937_v49 = vsel %vm1935_vm8, %v1936_v55, %v1932_v36  ;;  %v2037_v42 = vsel %vm2029_vm12, %v9405_v21, %v13096_v56 }
 0x307   : > { %v2039_v5 = vsel %vm2027_vm11, %v9403_v54, %v9405_v21  ;;  %v2428_v34 = vsel %vm2307_vm4, %v2427_v60, %v2426_v59  ;;  %v2432_v6 = vsel %vm9373_vm15, 0, %v2430_v33  ;;  %v1938_v16 = vadd.s32 %v1937_v49, %v1933_v51 }
 0x308   : > { %vm2028_vm10 = vcmp.lt.s32.totalorder %v13093_v11, 2  ;;  %v5712_v2 = vshrl.u32 %v5711_v28, 23  ;;  %v5866_v0 = vand.u32 2139095040, %v9280_v35  ;;  %v2431_v22 = vsel %vm9373_vm15, %v13064_v31, %v2428_v34 }
 0x309   : > { %v2042_v62 = vsel %vm2028_vm10, %v2039_v5, %v2041_v50  ;;  %v2433_v25 = vmul.f32 %v2431_v22, %v2431_v22  ;;  %v1939_v40 = vadd.s32 536870912, %v1938_v16  ;;  %v9443_v17 = vsel %vm2028_vm10, %v2035_v9, %v2037_v42 }
 0x30a   : > { %v2046_v63 = vand.u32 65535, %v2042_v62  ;;  %v2449_v36 = vadd.s32 3, %v2432_v6  ;;  %v2044_v3 = vand.u32 65535, %v9426_v19  ;;  %v2045_v28 = vshrl.u32 %v9426_v19, 16 }
 0x30b   : > { %v2047_v23 = vshrl.u32 %v2042_v62, 16  ;;  %v9449_v41 = vshll.u32 %v12932_v1, %v8698_v30  ;;  %v2434_v59 = vmul.f32 -0.001358992, %v2433_v25  ;;  %v2441_v33 = vmul.f32 -0.00019511016, %v2433_v25 }
 0x30c   : > { %v9451_v55 = vshrl.u32 %v1939_v40, 30  ;;  %v9455_v60 = vand.u32 8388607, %v12767_v44  ;;  %v9457_v9 = vmul.u32 %v2046_v63, %v2045_v28  ;;  %v2069_v39 = vshrl.u32 %v9443_v17, 16 }
 0x30d   : > { %v2049_v51 = vmul.u32 %v2047_v23, %v2044_v3  ;;  %v9460_v8 = vshrl.u32 %v5866_v0, 23  ;;  %v2435_v50 = vadd.f32 0.041655596, %v2434_v59  ;;  %v2442_v49 = vadd.f32 0.008332121, %v2441_v33 }
 0x30e   : > { %v1941_v56 = vshll.u32 %v9451_v55, 30  ;;  %v9463_v42 = vadd.s32 4294967169, %v5712_v2  ;;  %v2450_v5 = vand.u32 3, %v2449_v36  ;;  %v2048_v34 = vmul.u32 %v2046_v63, %v2044_v3 }
 0x30f   : > { %v2052_v6 = vshll.u32 %v2049_v51, 16  ;;  %v2436_v62 = vmul.f32 %v2435_v50, %v2433_v25  ;;  %v2443_v40 = vmul.f32 %v2442_v49, %v2433_v25  ;;  %v2051_v32 = vmul.u32 %v2047_v23, %v2045_v28 }
 0x310   : > { %v1942_v44 = vsub.s32 %v1938_v16, %v1941_v56  ;;  %v2054_v13 = vshll.u32 %v9457_v9, 16  ;;  %v9466_v37 = vmul.u32 %v2069_v39, %v2044_v3  ;;  %v1732_v2 = vadd.f32 %v9123_v53, %v13086_v20 }
 0x311   : > { %vm2056_vm7 = vc.u32 %v2048_v34, %v2052_v6  ;;  %v2058_v30 = vadd.s32 %v2052_v6, %v2048_v34  ;;  %v2437_v0 = vadd.f32 -0.4999988, %v2436_v62  ;;  %v2444_v59 = vadd.f32 -0.16666654, %v2443_v40 }
 0x312   : > { %vm1943_vm3 = vcmp.lt.s32.totalorder %v1942_v44, 0  ;;  %v1944_v33 = vsub.s32 0, %v1942_v44  ;;  %v2057_v63 = vsel %vm2056_vm7, 1, %v12925_v14  ;;  %v2068_v36 = vand.u32 65535, %v9443_v17 }
 0x313   : > { %vm2060_vm1 = vc.u32 %v2058_v30, %v2054_v13  ;;  %v2438_v16 = vmul.f32 %v2437_v0, %v2433_v25  ;;  %v2445_v23 = vmul.f32 %v2444_v59, %v2433_v25  ;;  %v2059_v49 = vadd.s32 %v2057_v63, %v2051_v32  ;;  %v13097_v32 = vld [vmem:[#allocation80_spill] sm:$0xff] }
 0x314   : > { %v1945_v50 = vsel %vm1943_vm3, %v1944_v33, %v1942_v44  ;;  %vm2448_vm6 = vweird.f32 %v13064_v31  ;;  %vm2451_vm4 = vcmp.lt.s32.totalorder %v2450_v5, 2  ;;  %v2061_v34 = vsel %vm2060_vm1, 1, %v12925_v14 }
 0x315   : > { %v1946_v56 = vclz %v1945_v50  ;;  %v2439_v6 = vadd.f32 1.0, %v2438_v16  ;;  %v2446_v62 = vadd.f32 1.0, %v2445_v23  ;;  %v2063_v40 = vadd.s32 %v2061_v34, %v2059_v49 }
 0x316   : > { %v2074_v53 = vshll.u32 %v9466_v37, 16  ;;  %vm2452_vm13 = vcmp.eq.s32.totalorder %v2450_v5, 0  ;;  %v2070_v30 = vmul.u32 %v2068_v36, %v2044_v3  ;;  %v2072_v13 = vmul.u32 %v2068_v36, %v2045_v28 }
 0x317   : > { %v6210_v20 = vadd.s32 4294967294, %v1946_v56  ;;  %v2447_v17 = vmul.f32 %v2446_v62, %v2431_v22  ;;  %vm2455_vm15 = vcmp.eq.s32.totalorder %v2450_v5, 2  ;;  %v2456_v25 = vxor.u32 2147483648, %v2439_v6 }
 0x318   : > { %v2053_v0 = vshrl.u32 %v2049_v51, 16  ;;  %vm12805_vm8 = vcmp.lt.s32.totalorder %v13097_v32, 4  ;;  %v1934_v59 = vadd.s32 %v9380_v57, %v9378_v45  ;;  %v2011_v33 = vshrl.u32 %v12936_v46, %v13092_v52 }
 0x319   : > { %vm6211_vm7 = vcmp.lt.s32.totalorder %v6210_v20, 0  ;;  %vm2078_vm3 = vc.u32 %v2070_v30, %v2074_v53  ;;  %v2453_v63 = vxor.u32 2147483648, %v2447_v17  ;;  %v2073_v50 = vmul.u32 %v2069_v39, %v2045_v28 }
 0x31a   : > { %v1949_v16 = vsel %vm6211_vm7, 0, %v6210_v20  ;;  %v2064_v23 = vadd.s32 %v2063_v40, %v2053_v0  ;;  %v2076_v22 = vshll.u32 %v2072_v13, 16  ;;  %v2079_v49 = vsel %vm2078_vm3, 1, %v12925_v14 }
 0x31b   : > { %v1950_v3 = vsub.s32 32, %v1949_v16  ;;  %v1954_v36 = vsub.s32 4294967266, %v1949_v16  ;;  %v2454_v51 = vsel %vm2452_vm13, %v2439_v6, %v2453_v63  ;;  %v2457_v56 = vsel %vm2455_vm15, %v2456_v25, %v2447_v17 }
 0x31c   : > { %v2080_v34 = vadd.s32 %v2074_v53, %v2070_v30  ;;  %v2081_v45 = vadd.s32 %v2079_v49, %v2073_v50  ;;  %v2458_v57 = vsel %vm2451_vm4, %v2454_v51, %v2457_v56  ;;  %v1951_v62 = vshll.u32 %v1942_v44, %v1949_v16 }
 0x31d   : > { %v1952_v52 = vshrl.u32 %v1934_v59, %v1950_v3  ;;  %v1955_v24 = vadd.s32 127, %v1954_v36  ;;  %v2459_v40 = vsel %vm2448_vm6, nan, %v2458_v57  ;;  %v2032_v28 = vsel %vm2030_vm9, %v9405_v21, 2102212464  ;;  %v13099_v59 = vld [vmem:[#allocation75_spill] sm:$0xff]  ;;  %v13101_v36 = vld [vmem:[#allocation88_spill] sm:$0xff] }
 0x31e   : > { %v2055_v39 = vshrl.u32 %v9457_v9, 16  ;;  %vm2082_vm1 = vc.u32 %v2080_v34, %v2076_v22  ;;  %v3083_v6 = vmul.f32 %v2459_v40, %v1732_v2  ;;  %v5718_v5 = vadd.s32 1, %v9463_v42 }
 0x31f   : > { %v1953_v20 = vor.u32 %v1952_v52, %v1951_v62  ;;  %v1956_v17 = vshll.u32 %v1955_v24, 23  ;;  %v2083_v53 = vsel %vm2082_vm1, 1, %v12925_v14  ;;  %v6335_v44 = vadd.s32 4294967169, %v9460_v8 }
 0x320   : > { %v2075_v30 = vshrl.u32 %v9466_v37, 16  ;;  %v2085_v31 = vadd.s32 %v2083_v53, %v2081_v45  ;;  %3186 = vmatpush.msrb.mxu3 %v3083_v6  ;;  %v2031_v21 = vsel %vm2027_vm11, %v2011_v33, %v9392_v18  ;;  %v2033_v9 = vsel %vm2029_vm12, %v9403_v54, %v2032_v28  ;;  %v13126_v6 = vld [vmem:[#allocation16_spill] sm:$0xff] }
 0x321   : > { %v1957_v25 = vor.u32 4788187, %v1956_v17  ;;  %v9500_v24 = vadd.s32 %v2064_v23, %v2055_v39  ;;  %v3494_v42 = vshrl.u32 %v12937_v48, %v8861_v10  ;;  %v13098_v8 = vand.u32 2147483647, %v9280_v35 }
 0x322   : > { %v2077_v37 = vshrl.u32 %v2072_v13, 16  ;;  %v2086_v0 = vadd.s32 %v2085_v31, %v2075_v30  ;;  %vm12798_vm9 = vcmp.lt.s32.totalorder %v13099_v59, 4  ;;  %v1960_v16 = vcvt.s32.f32 %v1953_v20  ;;  %v13114_v30 = vld [vmem:[#allocation5_spill] sm:$0xff] }
 0x323   : > { %v5870_v2 = vand.u32 8388607, %v13098_v8  ;;  %v1958_v63 = vand.u32 2147483647, %v1957_v25  ;;  %v9507_v50 = vadd.s32 %v2080_v34, %v2076_v22  ;;  %v9512_v18 = vsel %vm12805_vm8, %v8918_v61, 920167782  ;;  %v4723_v25 = vpop.permute.xlu0 %4722 }
 0x324   : > { %13100 = vst [vmem:[#allocation72_spill] sm:$0xff] %v9512_v18  ;;  %v5716_v54 = vor.u32 8388608, %v9455_v60  ;;  %v2034_v33 = vsel %vm2028_vm10, %v2031_v21, %v2033_v9  ;;  %v2087_v23 = vadd.s32 %v2086_v0, %v2077_v37  ;;  %vm5719_vm11 = vcmp.gt.s32.totalorder %v5718_v5, 0  ;;  %v13103_v34 = vld [vmem:[#allocation86_spill] sm:$0xff]  ;;  %v13104_v60 = vld [vmem:[#allocation84_spill] sm:$0xff] }
 0x325   : > { %v5873_v13 = vadd.s32 1, %v6335_v44  ;;  %v1961_v3 = vmul.f32 %v1960_v16, %v1958_v63  ;;  %vm2090_vm12 = vc.u32 %v9500_v24, %v9507_v50  ;;  %v9521_v22 = vor.u32 %v13101_v36, %v8877_v12 }
 0x326   : > { %v5871_v49 = vor.u32 8388608, %v5870_v2  ;;  %v1964_v51 = vsub.s32 4, %v9451_v55  ;;  %v2091_v56 = vadd.s32 1, %v2087_v23  ;;  %v13105_v45 = vor.u32 %v13103_v34, %v13104_v60  ;;  %v13124_v60 = vld [vmem:[#allocation8_spill] sm:$0xff] }
 0x327   : > { %13102 = vst [vmem:[#allocation38_spill] sm:$0xff] %v9521_v22  ;;  %v3495_v57 = vor.u32 %v3494_v42, %v9449_v41  ;;  %v1962_v62 = vxor.u32 2147483648, %v1961_v3  ;;  %v2088_v52 = vmul.u32 %v9426_v19, %v2034_v33  ;;  %v5720_v40 = vsel %vm5719_vm11, %v5718_v5, 0 }
 0x328   : > { %v9529_v11 = vsel %vm12805_vm8, %v13105_v45, 1326507024  ;;  %v9533_v28 = vshll.u32 %v5716_v54, 8  ;;  %vm1842_vm10 = vcmp.lt.s32.totalorder %v13078_v47, 0  ;;  %v2092_v12 = vsel %vm2090_vm12, %v2091_v56, %v2087_v23  ;;  %v13121_v23 = vld [vmem:[#allocation7_spill] sm:$0xff] }
 0x329   : > { %13106 = vst [vmem:[#allocation30_spill] sm:$0xff] %v9529_v11  ;;  %vm5874_vm6 = vcmp.gt.s32.totalorder %v5873_v13, 0  ;;  %v13108_v39 = vand.u32 2147483647, %v13078_v47  ;;  %v1963_v20 = vsel %vm1842_vm10, %v1962_v62, %v1961_v3  ;;  %v2093_v17 = vadd.s32 %v2092_v12, %v2088_v52 }
 0x32a   : > { %13107 = vst [vmem:[#allocation36_spill] sm:$0xff] %v9533_v28  ;;  %v9545_v41 = vsel %vm12798_vm9, %v9521_v22, 920167782  ;;  %v9547_v19 = vshll.u32 %v5871_v49, 8  ;;  %v1965_v53 = vsel %vm1842_vm10, %v1964_v51, %v9451_v55  ;;  %v9555_v44 = vsel %vm12798_vm9, %v3495_v57, 1326507024 }
 0x32b   : > { %vm9538_vm4 = vcmp.le.f32.partialorder %v13108_v39, 0.7853982  ;;  %13111 = vst [vmem:[#allocation73_spill] sm:$0xff] %v9545_v41  ;;  %v9559_v31 = vmul.f32 %v9211_v7, %v13114_v30  ;;  %v2094_v9 = vadd.s32 536870912, %v2093_v17  ;;  %v9563_v42 = vmul.f32 %v9211_v7, %v13068_v43  ;;  %v13129_v22 = vld [vmem:[#allocation14_spill] sm:$0xff]  ;;  %v13152_v43 = vld [vmem:[#allocation55_spill] sm:$0xff] }
 0x32c   : > { %13112 = vst [vmem:[#allocation11_spill] sm:$0xff] %v9547_v19  ;;  %v1966_v5 = vsel %vm9538_vm4, %v13078_v47, %v1963_v20  ;;  %v9565_v55 = vand.u32 31, %v5720_v40  ;;  %v9568_v8 = vand.u32 65535, %v9533_v28  ;;  %v9571_v2 = vsel %vm5874_vm6, %v5873_v13, 0 }
 0x32d   : > { %13113 = vst [vmem:[#allocation22_spill] sm:$0xff] %v9555_v44  ;;  %v1968_v21 = vmul.f32 %v1966_v5, %v1966_v5  ;;  %v1967_v37 = vsel %vm9538_vm4, 0, %v1965_v53  ;;  %v9575_v16 = vshrl.u32 %v2094_v9, 30  ;;  %v9578_v54 = vshrl.u32 %v9533_v28, 16  ;;  %v13127_v53 = vld [vmem:[#allocation40_spill] sm:$0xff]  ;;  %v13130_v44 = vld [vmem:[#allocation87_spill] sm:$0xff] }
 0x32e   : > { %13115 = vst [vmem:[#allocation28_spill] sm:$0xff] %v9559_v31  ;;  %v9581_v7 = vand.u32 65535, %v9547_v19  ;;  %v9584_v33 = vshrl.u32 %v9547_v19, 16  ;;  %v9587_v3 = vmul.f32 %v4723_v25, %v13121_v23  ;;  %v9589_v13 = vshrl.u32 %v5720_v40, 5 }
 0x32f   : > { %13116 = vst [vmem:[#allocation31_spill] sm:$0xff] %v9563_v42  ;;  %v1969_v0 = vmul.f32 -0.001358992, %v1968_v21  ;;  %v1976_v63 = vmul.f32 -0.00019511016, %v1968_v21  ;;  %v2096_v51 = vshll.u32 %v9575_v16, 30  ;;  %v9599_v45 = vmul.f32 %v4723_v25, %v13124_v60 }
 0x330   : > { %13117 = vst [vmem:[#allocation41_spill] sm:$0xff] %v9568_v8  ;;  %v9593_v56 = vsub.s32 32, %v9565_v55  ;;  %v9596_v34 = vand.u32 31, %v9571_v2  ;;  %v1984_v57 = vadd.s32 3, %v1967_v37  ;;  %v9603_v62 = vshll.u32 %v12936_v46, %v9565_v55 }
 0x331   : > { %13118 = vst [vmem:[#allocation32_spill] sm:$0xff] %v9578_v54  ;;  %v1970_v36 = vadd.f32 0.041655596, %v1969_v0  ;;  %v1977_v49 = vadd.f32 0.008332121, %v1976_v63  ;;  %v2097_v12 = vsub.s32 %v2093_v17, %v2096_v51  ;;  %v9607_v39 = vshll.u32 %v12929_v27, %v9565_v55  ;;  %v13151_v54 = vld [vmem:[#allocation49_spill] sm:$0xff] }
 0x332   : > { %13119 = vst [vmem:[#allocation39_spill] sm:$0xff] %v9581_v7  ;;  %v4260_v9 = vshrl.u32 %v12930_v26, %v13127_v53  ;;  %v4263_v25 = vshrl.u32 %v12931_v29, %v13127_v53  ;;  %v1985_v17 = vand.u32 3, %v1984_v57  ;;  %v9624_v35 = vshll.u32 %v12931_v29, %v9565_v55 }
 0x333   : > { %13120 = vst [vmem:[#allocation9_spill] sm:$0xff] %v9584_v33  ;;  %v1971_v52 = vmul.f32 %v1970_v36, %v1968_v21  ;;  %v1978_v40 = vmul.f32 %v1977_v49, %v1968_v21  ;;  %vm2098_vm13 = vcmp.lt.s32.totalorder %v2097_v12, 0  ;;  %v2099_v63 = vsub.s32 0, %v2097_v12  ;;  %v13128_v49 = vld [vmem:[#allocation34_spill] sm:$0xff] }
 0x334   : > { %13122 = vst [vmem:[#allocation12_spill] sm:$0xff] %v9587_v3  ;;  %v9616_v36 = vshll.u32 %v12930_v26, %v9565_v55  ;;  %v4259_v51 = vshll.u32 %v12929_v27, %v13128_v49  ;;  %v4262_v20 = vshll.u32 %v12930_v26, %v13128_v49  ;;  %v1698_v59 = vadd.f32 %v13130_v44, %v13129_v22 }
 0x335   : > { %13123 = vst [vmem:[#allocation23_spill] sm:$0xff] %v9596_v34  ;;  %v1972_v37 = vadd.f32 -0.4999988, %v1971_v52  ;;  %v1979_v0 = vadd.f32 -0.16666654, %v1978_v40  ;;  %v2100_v40 = vsel %vm2098_vm13, %v2099_v63, %v2097_v12  ;;  %vm1983_vm15 = vweird.f32 %v13078_v47  ;;  %v13132_v63 = vld [vmem:[#allocation45_spill] sm:$0xff] }
 0x336   : > { %13125 = vst [vmem:[#allocation29_spill] sm:$0xff] %v9599_v45  ;;  %v2101_v10 = vclz %v2100_v40  ;;  %v9628_v18 = vor.u32 %v4260_v9, %v4259_v51  ;;  %v9630_v57 = vor.u32 %v4263_v25, %v4262_v20  ;;  %v13131_v32 = vand.u32 2147483647, %v13126_v6  ;;  %v13134_v20 = vld [vmem:[#allocation47_spill] sm:$0xff] }
 0x337   : > { %v1973_v41 = vmul.f32 %v1972_v37, %v1968_v21  ;;  %v1980_v52 = vmul.f32 %v1979_v0, %v1968_v21  ;;  %vm1986_vm7 = vcmp.lt.s32.totalorder %v1985_v17, 2  ;;  %vm1987_vm3 = vcmp.eq.s32.totalorder %v1985_v17, 0 }
 0x338   : > { %v4246_v58 = vand.u32 8388607, %v13131_v32  ;;  %v6213_v37 = vadd.s32 4294967294, %v2101_v10  ;;  %v4257_v21 = vshrl.u32 %v12929_v27, %v13127_v53  ;;  %vm4271_vm1 = vcmp.lt.s32.totalorder %v13132_v63, 1  ;;  %v13133_v32 = vld [vmem:[#allocation52_spill] sm:$0xff] }
 0x339   : > { %v1974_v61 = vadd.f32 1.0, %v1973_v41  ;;  %v1981_v11 = vadd.f32 1.0, %v1980_v52  ;;  %vm4273_vm11 = vcmp.lt.s32.totalorder %v13132_v63, 3  ;;  %vm1990_vm12 = vcmp.eq.s32.totalorder %v1985_v17, 2 }
 0x33a   : > { %vm6214_vm10 = vcmp.lt.s32.totalorder %v6213_v37, 0  ;;  %v4283_v41 = vsel %vm4271_vm1, %v9628_v18, %v9630_v57  ;;  %v4285_v10 = vsel %vm4273_vm11, %v13134_v20, %v13133_v32  ;;  %v2089_v51 = vadd.s32 %v9507_v50, %v9500_v24 }
 0x33b   : > { %v1982_v0 = vmul.f32 %v1981_v11, %v1966_v5  ;;  %v1991_v44 = vxor.u32 2147483648, %v1974_v61  ;;  %v2104_v25 = vsel %vm6214_vm10, 0, %v6213_v37  ;;  %v4247_v11 = vor.u32 8388608, %v4246_v58 }
 0x33c   : > { %v4256_v5 = vshll.u32 %v12936_v46, %v13128_v49  ;;  %v2105_v52 = vsub.s32 32, %v2104_v25  ;;  %v2109_v40 = vsub.s32 4294967266, %v2104_v25  ;;  %vm4272_vm6 = vcmp.lt.s32.totalorder %v13132_v63, 2 }
 0x33d   : > { %v1988_v9 = vxor.u32 2147483648, %v1982_v0  ;;  %v1992_v42 = vsel %vm1990_vm12, %v1991_v44, %v1982_v0  ;;  %v9657_v32 = vsel %vm4272_vm6, %v4283_v41, %v4285_v10  ;;  %v2106_v37 = vshll.u32 %v2097_v12, %v2104_v25  ;;  %v13136_v25 = vld [vmem:[#allocation50_spill] sm:$0xff] }
 0x33e   : > { %v9653_v60 = vor.u32 %v4257_v21, %v4256_v5  ;;  %v2107_v49 = vshrl.u32 %v2089_v51, %v2105_v52  ;;  %v2110_v20 = vadd.s32 127, %v2109_v40  ;;  %v5726_v24 = vshrl.u32 %v12929_v27, %v9593_v56  ;;  %v9704_v51 = vld [vmem:[%s12623_s3 + $0x28] sm:$0xff] }
 0x33f   : > { %v1989_v4 = vsel %vm1987_vm3, %v1974_v61, %v1988_v9  ;;  %v5729_v50 = vshrl.u32 %v12930_v26, %v9593_v56  ;;  %v9666_v21 = vshll.u32 %v4247_v11, 8  ;;  %v5732_v0 = vshrl.u32 %v12931_v29, %v9593_v56 }
 0x340   : > { %v1993_v58 = vsel %vm1986_vm7, %v1989_v4, %v1992_v42  ;;  %v2108_v17 = vor.u32 %v2107_v49, %v2106_v37  ;;  %v2111_v4 = vshll.u32 %v2110_v20, 23  ;;  %v5735_v42 = vshrl.u32 %v12932_v1, %v9593_v56 }
 0x341   : > { %v1994_v61 = vsel %vm1983_vm15, nan, %v1993_v58  ;;  %v9674_v12 = vshll.u32 %v12932_v1, %v9565_v55  ;;  %v9678_v41 = vshrl.u32 %v12937_v48, %v9593_v56  ;;  %v12783_v47 = vshrl.u32 %v9657_v32, 16 }
 0x342   : > { %v3080_v44 = vmul.f32 %v1994_v61, %v1698_v59  ;;  %v9682_v10 = vshrl.u32 %v9571_v2, 5  ;;  %v2112_v59 = vor.u32 4788187, %v2111_v4  ;;  %v4279_v9 = vsel %vm4271_vm1, %v9653_v60, %v9628_v18  ;;  %v13139_v61 = vld [vmem:[#allocation17_spill] sm:$0xff] }
 0x343   : > { %v4281_v55 = vsel %vm4273_vm11, %v9630_v57, %v13136_v25  ;;  %v5724_v11 = vshrl.u32 %v12936_v46, %v9593_v56  ;;  %v9695_v5 = vor.u32 %v5726_v24, %v9603_v62  ;;  %v9698_v2 = vor.u32 %v5729_v50, %v9607_v39 }
 0x344   : > { %13135 = vst [vmem:[#allocation33_spill] sm:$0xff] %v9682_v10  ;;  %3155 = vmatpush.msrb.mxu2 %v3080_v44  ;;  %vm5740_vm4 = vcmp.lt.s32.totalorder %v9589_v13, 1  ;;  %v9707_v52 = vand.u32 65535, %v9666_v21  ;;  %v9710_v40 = vor.u32 %v5732_v0, %v9616_v36  ;;  %v9713_v56 = vsub.s32 32, %v9596_v34  ;;  %v13140_v44 = vld [vmem:[#allocation44_spill] sm:$0xff] }
 0x345   : > { %v2113_v62 = vand.u32 2147483647, %v2112_v59  ;;  %v2115_v58 = vcvt.s32.f32 %v2108_v17  ;;  %6243 = vmatmul.msk.f32.vlgmr.msrb.gmra.mxu2 %vm1664_vm0, %v9704_v51  ;;  %v9718_v39 = vor.u32 %v5735_v42, %v9624_v35  ;;  %v9724_v49 = vsel %vm4272_vm6, %v4279_v9, %v4281_v55 }
 0x346   : > { %v9729_v36 = vmul.u32 %v12783_v47, %v9707_v52  ;;  %v9733_v20 = vshll.u32 %v12936_v46, %v9596_v34  ;;  %v9737_v35 = vshll.u32 %v12929_v27, %v9596_v34  ;;  %v4290_v50 = vand.u32 65535, %v9657_v32  ;;  %v13144_v47 = vld [vmem:[#allocation37_spill] sm:$0xff] }
 0x347   : > { %v2116_v24 = vmul.f32 %v2115_v58, %v2113_v62  ;;  %vm1997_vm13 = vcmp.lt.s32.totalorder %v13087_v38, 0  ;;  %v4412_v17 = vshrl.u32 %v12929_v27, %v13140_v44  ;;  %v4415_v4 = vshrl.u32 %v12930_v26, %v13140_v44  ;;  %v9760_v58 = vld [vmem:[%s12623_s3 + $0x30] sm:$0xff] }
 0x348   : > { %13137 = vst [vmem:[#allocation43_spill] sm:$0xff] %v9733_v20  ;;  %vm5743_vm15 = vcmp.lt.s32.totalorder %v9589_v13, 4  ;;  %v13141_v42 = vand.u32 2147483647, %v13087_v38  ;;  %v4418_v55 = vshrl.u32 %v12931_v29, %v13140_v44  ;;  %v2119_v62 = vsub.s32 4, %v9575_v16 }
 0x349   : > { %13138 = vst [vmem:[#allocation35_spill] sm:$0xff] %v9737_v35  ;;  %v2117_v9 = vxor.u32 2147483648, %v2116_v24  ;;  %v4296_v37 = vshll.u32 %v9729_v36, 16  ;;  %v4414_v0 = vshll.u32 %v12929_v27, %v13144_v47  ;;  %v9770_v31 = vshrl.u32 %v9666_v21, 16 }
 0x34a   : > { %vm9749_vm7 = vcmp.le.f32.partialorder %v13141_v42, 0.7853982  ;;  %v4411_v42 = vshll.u32 %v12936_v46, %v13144_v47  ;;  %v4292_v23 = vmul.u32 %v4290_v50, %v9707_v52  ;;  %v4417_v6 = vshll.u32 %v12930_v26, %v13144_v47 }
 0x34b   : > { %v2118_v25 = vsel %vm1997_vm13, %v2117_v9, %v2116_v24  ;;  %v13145_v19 = vand.u32 2147483647, %v13139_v61  ;;  %v9784_v10 = vor.u32 %v4415_v4, %v4414_v0  ;;  %v9789_v24 = vsel %vm5740_vm4, %v5724_v11, %v9695_v5  ;;  %v6306_v9 = vld [vmem:[%s12621_s1 + $0x60] sm:$0xff]  ;;  %v13150_v61 = vld [vmem:[#allocation57_spill] sm:$0xff] }
 0x34c   : > { %v9778_v33 = vsel %vm9749_vm7, %v13087_v38, %v2118_v25  ;;  %v9782_v45 = vor.u32 %v4412_v17, %v4411_v42  ;;  %v9801_v0 = vor.u32 %v4418_v55, %v4417_v6  ;;  %v2120_v11 = vsel %vm1997_vm13, %v2119_v62, %v9575_v16  ;;  %4714 = vperm.xlu0 %6425, %v6306_v9   ;;  %v13149_v55 = vld [vmem:[#allocation46_spill] sm:$0xff] }
 0x34d   : > { %v4401_v7 = vand.u32 8388607, %v13145_v19  ;;  %v2123_v47 = vmul.f32 %v9778_v33, %v9778_v33  ;;  %6244 = vmatmul.msk.f32.gmra.mxu2 %vm1664_vm0, %v9760_v58  ;;  %v9799_v19 = vmul.u32 %v4290_v50, %v9770_v31  ;;  %4687 = vperm.xlu2 %6428, %v6306_v9   ;;  %vm9806_vm3 = vc.u32 %v4292_v23, %v4296_v37 }
 0x34e   : > { %v4312_v4 = vand.u32 65535, %v9724_v49  ;;  %v13148_v25 = vshrl.u32 %v9724_v49, 16  ;;  %vm4426_vm12 = vcmp.lt.s32.totalorder %v13149_v55, 1  ;;  %vm4428_vm10 = vcmp.lt.s32.totalorder %v13149_v55, 3 }
 0x34f   : > { %v2124_v50 = vmul.f32 -0.001358992, %v2123_v47  ;;  %v2131_v6 = vmul.f32 -0.00019511016, %v2123_v47  ;;  %v4302_v16 = vadd.s32 %v4296_v37, %v4292_v23  ;;  %v4402_v62 = vor.u32 8388608, %v4401_v7 }
 0x350   : > { %v9814_v42 = vmul.u32 %v13148_v25, %v9707_v52  ;;  %v4434_v9 = vsel %vm4426_vm12, %v9782_v45, %v9784_v10  ;;  %v4440_v3 = vsel %vm4428_vm10, %v13151_v54, %v13150_v61  ;;  %v4436_v8 = vsel %vm4428_vm10, %v9801_v0, %v13152_v43  ;;  %v9848_v43 = vld [vmem:[%s12623_s3 + $0x38] sm:$0xff] }
 0x351   : > { %v2125_v25 = vadd.f32 0.041655596, %v2124_v50  ;;  %v2132_v35 = vadd.f32 0.008332121, %v2131_v6  ;;  %v4438_v7 = vsel %vm4426_vm12, %v9784_v10, %v9801_v0  ;;  %v9837_v23 = vsel %vm5743_vm15, %v9710_v40, 2102212464 }
 0x352   : > { %v9843_v54 = vsel %vm5740_vm4, %v9695_v5, %v9698_v2  ;;  %v4298_v37 = vshll.u32 %v9799_v19, 16  ;;  %v4318_v61 = vshll.u32 %v9814_v42, 16  ;;  %v2122_v50 = vsel %vm9749_vm7, 0, %v2120_v11 }
 0x353   : > { %13153 = vst [vmem:[#allocation42_spill] sm:$0xff] %v9843_v54  ;;  %v2126_v6 = vmul.f32 %v2125_v25, %v2123_v47  ;;  %v2133_v48 = vmul.f32 %v2132_v35, %v2123_v47  ;;  %vm4427_vm13 = vcmp.lt.s32.totalorder %v13149_v55, 2  ;;  %v4301_v5 = vsel %vm9806_vm3, 1, %v12925_v14  ;;  %v6310_v35 = vld [vmem:[%s12622_s2 + $0x60] sm:$0xff] }
 0x354   : > { %v4314_v1 = vmul.u32 %v4312_v4, %v9707_v52  ;;  %v9861_v30 = vsel %vm4427_vm13, %v4434_v9, %v4436_v8  ;;  %v9865_v34 = vsel %vm4427_vm13, %v4438_v7, %v4440_v3  ;;  %vm4304_vm7 = vc.u32 %v4302_v16, %v4298_v37  ;;  %6429 = vset.pattern.permute.xlu0 %v12925_v14 }
 0x355   : > { %v2127_v59 = vadd.f32 -0.4999988, %v2126_v6  ;;  %v2134_v11 = vadd.f32 -0.16666654, %v2133_v48  ;;  %6245 = vmatmul.msk.f32.gmra.mxu2 %vm1664_vm0, %v9848_v43  ;;  %v9872_v17 = vshll.u32 %v4402_v62, 8  ;;  %v2139_v52 = vadd.s32 3, %v2122_v50  ;;  %4752 = vperm.xlu0 %6429, %v6310_v35  }
 0x356   : > { %v13154_v8 = vshrl.u32 %v9657_v32, 16  ;;  %v9879_v9 = vmul.u32 %v4312_v4, %v9770_v31  ;;  %vm9881_vm3 = vc.u32 %v4314_v1, %v4318_v61  ;;  %v12800_v16 = vshrl.u32 %v9865_v34, 16 }
 0x357   : > { %v2128_v25 = vmul.f32 %v2127_v59, %v2123_v47  ;;  %v2135_v7 = vmul.f32 %v2134_v11, %v2123_v47  ;;  %v9891_v32 = vsel %vm5740_vm4, %v9698_v2, %v9710_v40  ;;  %v1729_v4 = vadd.f32 %v9083_v15, %v13129_v22 }
 0x358   : > { %v4295_v3 = vmul.u32 %v13154_v8, %v9770_v31  ;;  %13157 = vst [vmem:[#allocation88_spill] sm:$0xff] %v9891_v32  ;;  %v4305_v50 = vsel %vm4304_vm7, 1, %v12925_v14  ;;  %v9896_v47 = vadd.s32 %v4318_v61, %v4314_v1  ;;  %v4443_v11 = vand.u32 65535, %v9872_v17  ;;  %v9903_v8 = vld [vmem:[%s12623_s3 + $0x40] sm:$0xff] }
 0x359   : > { %v2129_v6 = vadd.f32 1.0, %v2128_v25  ;;  %v2136_v59 = vadd.f32 1.0, %v2135_v7  ;;  %vm2138_vm9 = vweird.f32 %v13087_v38  ;;  %v2140_v35 = vand.u32 3, %v2139_v52 }
 0x35a   : > { %v4303_v37 = vadd.s32 %v4301_v5, %v4295_v3  ;;  %v12803_v62 = vshll.u32 %v9879_v9, 16  ;;  %v4323_v15 = vsel %vm9881_vm3, 1, %v12925_v14  ;;  %v9912_v61 = vmul.u32 %v12800_v16, %v4443_v11 }
 0x35b   : > { %v2137_v22 = vmul.f32 %v2136_v59, %v9778_v33  ;;  %v2146_v1 = vxor.u32 2147483648, %v2129_v6  ;;  %v13158_v5 = vshrl.u32 %v9861_v30, 16  ;;  %v9920_v3 = vshrl.u32 %v12936_v46, %v13127_v53  ;;  %v6293_v53 = vld [vmem:[%s12624_s4 + $0x68] sm:$0xff] }
 0x35c   : > { %v4297_v25 = vshrl.u32 %v9729_v36, 16  ;;  %v4307_v7 = vadd.s32 %v4305_v50, %v4303_v37  ;;  %v13159_v48 = vshrl.u32 %v9724_v49, 16  ;;  %vm4326_vm4 = vc.u32 %v9896_v47, %v12803_v62  ;;  %4586 = vperm.xlu1 %6426, %v6293_v53   ;;  %v13160_v53 = vld [vmem:[#allocation21_spill] sm:$0xff] }
 0x35d   : > { %v9916_v52 = vmul.u32 %v13158_v5, %v4443_v11  ;;  %v2143_v59 = vxor.u32 2147483648, %v2137_v22  ;;  %6246 = vmatmul.msk.f32.gmra.mxu2 %vm1664_vm0, %v9903_v8  ;;  %v6311_v5 = vld [vmem:[%s12622_s2 + $0x68] sm:$0xff]  ;;  %v4445_v36 = vand.u32 65535, %v9865_v34  ;;  %vm2141_vm7 = vcmp.lt.s32.totalorder %v2140_v35, 2 }
 0x35e   : > { %v4317_v33 = vmul.u32 %v13159_v48, %v9770_v31  ;;  %v4467_v31 = vand.u32 65535, %v9861_v30  ;;  %vm2142_vm3 = vcmp.eq.s32.totalorder %v2140_v35, 0  ;;  %vm2145_vm5 = vcmp.eq.s32.totalorder %v2140_v35, 2  ;;  %4757 = vperm.xlu2 %6428, %v6311_v5  }
 0x35f   : > { %v2144_v37 = vsel %vm2142_vm3, %v2129_v6, %v2143_v59  ;;  %v2147_v50 = vsel %vm2145_vm5, %v2146_v1, %v2137_v22  ;;  %v4451_v48 = vshll.u32 %v9912_v61, 16  ;;  %v4473_v16 = vshll.u32 %v9916_v52, 16 }
 0x360   : > { %v4325_v49 = vadd.s32 %v4323_v15, %v4317_v33  ;;  %v2148_v20 = vsel %vm2141_vm7, %v2144_v37, %v2147_v50  ;;  %v4319_v28 = vshrl.u32 %v9814_v42, 16  ;;  %v4327_v62 = vsel %vm4326_vm4, 1, %v12925_v14  ;;  %v6291_v42 = vld [vmem:[%s12624_s4 + $0x58] sm:$0xff]  ;;  %v13168_v37 = vld [vmem:[#allocation68_spill] sm:$0xff] }
 0x361   : > { %v4444_v32 = vshrl.u32 %v9872_v17, 16  ;;  %v2149_v54 = vsel %vm2138_vm9, nan, %v2148_v20  ;;  %v4447_v35 = vmul.u32 %v4445_v36, %v4443_v11  ;;  %v4469_v5 = vmul.u32 %v4467_v31, %v4443_v11  ;;  %v13164_v11 = vld [vmem:[#allocation53_spill] sm:$0xff] }
 0x362   : > { %v12804_v15 = vand.u32 2147483647, %v13160_v53  ;;  %v3081_v6 = vmul.f32 %v2149_v54, %v1729_v4  ;;  %v4308_v22 = vadd.s32 %v4307_v7, %v4297_v25  ;;  %v4329_v59 = vadd.s32 %v4327_v62, %v4325_v49  ;;  %v13163_v54 = vld [vmem:[#allocation48_spill] sm:$0xff] }
 0x363   : > { %v9947_v1 = vmul.u32 %v4445_v36, %v4444_v32  ;;  %v9949_v33 = vmul.u32 %v4467_v31, %v4444_v32  ;;  %vm9954_vm5 = vc.u32 %v4447_v35, %v4451_v48  ;;  %vm4477_vm9 = vc.u32 %v4469_v5, %v4473_v16 }
 0x364   : > { %v3936_v38 = vand.u32 8388607, %v12804_v15  ;;  %3187 = vmatpush.msrb.mxu3 %v3081_v6  ;;  %v9960_v20 = vadd.s32 %v4473_v16, %v4469_v5  ;;  %v3946_v4 = vshll.u32 %v12936_v46, %v13163_v54  ;;  %v3947_v25 = vshrl.u32 %v12929_v27, %v13164_v11  ;;  %4576 = vperm.xlu1 %6426, %v6291_v42  }
 0x365   : > { %v3949_v62 = vshll.u32 %v12929_v27, %v13163_v54  ;;  %6248 = vmatmul.msk.f32.vlgmr.msrb.gmra.mxu3 %vm1664_vm0, %v9704_v51  ;;  %v4457_v7 = vadd.s32 %v4451_v48, %v4447_v35  ;;  %v3950_v31 = vshrl.u32 %v12930_v26, %v13164_v11  ;;  %v3952_v16 = vshll.u32 %v12930_v26, %v13163_v54  ;;  %v13165_v35 = vld [vmem:[#allocation56_spill] sm:$0xff] }
 0x366   : > { %v3937_v36 = vor.u32 8388608, %v3936_v38  ;;  %v4453_v49 = vshll.u32 %v9947_v1, 16  ;;  %v12808_v50 = vshll.u32 %v9949_v33, 16  ;;  %v4478_v5 = vsel %vm4477_vm9, 1, %v12925_v14 }
 0x367   : > { %v3953_v6 = vshrl.u32 %v12931_v29, %v13164_v11  ;;  %vm5742_vm4 = vcmp.lt.s32.totalorder %v9589_v13, 3  ;;  %v9980_v51 = vor.u32 %v3947_v25, %v3946_v4  ;;  %v9982_v48 = vor.u32 %v3950_v31, %v3949_v62 }
 0x368   : > { %vm3961_vm7 = vcmp.lt.s32.totalorder %v13165_v35, 1  ;;  %vm3963_vm3 = vcmp.lt.s32.totalorder %v13165_v35, 3  ;;  %v4456_v42 = vsel %vm9954_vm5, 1, %v12925_v14  ;;  %v13166_v38 = vshrl.u32 %v9861_v30, 16 }
 0x369   : > { %vm4481_vm9 = vc.u32 %v9960_v20, %v12808_v50  ;;  %v9994_v15 = vor.u32 %v3953_v6, %v3952_v16  ;;  %v4330_v4 = vadd.s32 %v4329_v59, %v4319_v28  ;;  %v13167_v25 = vshrl.u32 %v9865_v34, 16  ;;  %v6294_v28 = vld [vmem:[%s12624_s4 + $0x70] sm:$0xff] }
 0x36a   : > { %v4472_v54 = vmul.u32 %v13166_v38, %v4444_v32  ;;  %vm4459_vm8 = vc.u32 %v4457_v7, %v4453_v49  ;;  %v9998_v31 = vshll.u32 %v3937_v36, 8  ;;  %vm3962_vm2 = vcmp.lt.s32.totalorder %v13165_v35, 2  ;;  %v13169_v38 = vld [vmem:[#allocation64_spill] sm:$0xff]  ;;  %v13170_v7 = vld [vmem:[#allocation66_spill] sm:$0xff] }
 0x36b   : > { %v4450_v62 = vmul.u32 %v13167_v25, %v4444_v32  ;;  %v3973_v30 = vsel %vm3961_vm7, %v9982_v48, %v9994_v15  ;;  %v3975_v16 = vsel %vm3963_vm3, %v13169_v38, %v13168_v37  ;;  %v4482_v32 = vsel %vm4481_vm9, 1, %v12925_v14 }
 0x36c   : > { %v4480_v53 = vadd.s32 %v4478_v5, %v4472_v54  ;;  %v3969_v59 = vsel %vm3961_vm7, %v9980_v51, %v9982_v48  ;;  %v3971_v36 = vsel %vm3963_vm3, %v9994_v15, %v13170_v7  ;;  %v4275_v49 = vsel %vm4271_vm1, %v9920_v3, %v9653_v60  ;;  %v10039_v3 = vpop.permute.xlu2 %3112  ;;  %4591 = vperm.xlu1 %6426, %v6294_v28  }
 0x36d   : > { %v4458_v34 = vadd.s32 %v4456_v42, %v4450_v62  ;;  %v4276_v5 = vsel %vm4274_vm14, %v9630_v57, 2102212464  ;;  %v4299_v6 = vshrl.u32 %v9799_v19, 16  ;;  %v4460_v42 = vsel %vm4459_vm8, 1, %v12925_v14  ;;  %6249 = vmatmul.msk.f32.gmra.mxu3 %vm1664_vm0, %v9760_v58  ;;  %13171 = vst [vmem:[#allocation86_spill] sm:$0xff] %v10039_v3 }
 0x36e   : > { %v4321_v54 = vshrl.u32 %v9879_v9, 16  ;;  %v3976_v25 = vsel %vm3962_vm2, %v3973_v30, %v3975_v16  ;;  %v3978_v62 = vand.u32 65535, %v9998_v31  ;;  %v10037_v60 = vshrl.u32 %v9998_v31, 16 }
 0x36f   : > { %v10041_v57 = vadd.s32 %v4308_v22, %v4299_v6  ;;  %v4484_v19 = vadd.s32 %v4482_v32, %v4480_v53  ;;  %v3972_v37 = vsel %vm3962_vm2, %v3969_v59, %v3971_v36  ;;  %v3980_v58 = vand.u32 65535, %v3976_v25 }
 0x370   : > { %v4277_v38 = vsel %vm4273_vm11, %v9628_v18, %v4276_v5  ;;  %v4331_v30 = vadd.s32 %v4330_v4, %v4321_v54  ;;  %v4462_v16 = vadd.s32 %v4460_v42, %v4458_v34  ;;  %v3981_v7 = vshrl.u32 %v3976_v25, 16 }
 0x371   : > { %v5746_v50 = vsel %vm5742_vm4, %v9698_v2, %v9837_v23  ;;  %v13172_v22 = vshll.u32 %v9879_v9, 16  ;;  %v4452_v28 = vshrl.u32 %v9912_v61, 16  ;;  %v4474_v32 = vshrl.u32 %v9916_v52, 16 }
 0x372   : > { %vm5741_vm14 = vcmp.lt.s32.totalorder %v9589_v13, 2  ;;  %v3982_v18 = vmul.u32 %v3980_v58, %v3978_v62  ;;  %v3983_v4 = vmul.u32 %v3981_v7, %v3978_v62  ;;  %v10061_v34 = vmul.u32 %v3980_v58, %v10037_v60 }
 0x373   : > { %v10055_v53 = vadd.s32 %v9896_v47, %v13172_v22  ;;  %v4003_v59 = vshrl.u32 %v3972_v37, 16  ;;  %v5749_v2 = vsel %vm5743_vm15, %v9718_v39, 920167782  ;;  %v4278_v23 = vsel %vm4272_vm6, %v4275_v49, %v4277_v38 }
 0x374   : > { %v4485_v9 = vadd.s32 %v4484_v19, %v4474_v32  ;;  %v4335_v47 = vadd.s32 1, %v4331_v30  ;;  %v4463_v61 = vadd.s32 %v4462_v16, %v4452_v28  ;;  %v3986_v52 = vshll.u32 %v3983_v4, 16 }
 0x375   : > { %vm4334_vm8 = vc.u32 %v10041_v57, %v10055_v53  ;;  %v3988_v36 = vshll.u32 %v10061_v34, 16  ;;  %vm13173_vm1 = vcmp.lt.s32.totalorder %v13149_v55, 4  ;;  %v4476_v6 = vshrl.u32 %v9949_v33, 16  ;;  %6250 = vmatmul.msk.f32.gmra.mxu3 %vm1664_vm0, %v9848_v43 }
 0x376   : > { %v4431_v5 = vsel %vm13173_vm1, %v9801_v0, 2102212464  ;;  %v3985_v42 = vmul.u32 %v3981_v7, %v10037_v60  ;;  %v4002_v54 = vand.u32 65535, %v3972_v37  ;;  %v4454_v63 = vshrl.u32 %v9947_v1, 16  ;;  %v10095_v7 = vpop.permute.xlu2 %3102 }
 0x377   : > { %vm3990_vm11 = vc.u32 %v3982_v18, %v3986_v52  ;;  %v3992_v49 = vadd.s32 %v3986_v52, %v3982_v18  ;;  %v10079_v25 = vmul.u32 %v4003_v59, %v3978_v62  ;;  %v13174_v19 = vor.u32 %v9678_v41, %v9674_v12  ;;  %13175 = vst [vmem:[#allocation84_spill] sm:$0xff] %v10095_v7 }
 0x378   : > { %v4332_v58 = vmul.u32 %v9666_v21, %v4278_v23  ;;  %v4410_v37 = vshrl.u32 %v12936_v46, %v13140_v44  ;;  %v4486_v38 = vadd.s32 %v4485_v9, %v4476_v6  ;;  %v4336_v43 = vsel %vm4334_vm8, %v4335_v47, %v4331_v30  ;;  %v13181_v6 = vld [vmem:[#allocation88_spill] sm:$0xff] }
 0x379   : > { %v5753_v0 = vsel %vm5743_vm15, %v13174_v19, 1326507024  ;;  %v10092_v1 = vadd.s32 %v4463_v61, %v4454_v63  ;;  %v3991_v16 = vsel %vm3990_vm11, 1, %v12925_v14  ;;  %vm3994_vm6 = vc.u32 %v3992_v49, %v3988_v36 }
 0x37a   : > { %v4430_v12 = vsel %vm4426_vm12, %v4410_v37, %v9782_v45  ;;  %v4432_v21 = vsel %vm4428_vm10, %v9784_v10, %v4431_v5  ;;  %v3993_v41 = vadd.s32 %v3991_v16, %v3985_v42  ;;  %v4006_v44 = vmul.u32 %v4002_v54, %v10037_v60 }
 0x37b   : > { %v13176_v30 = vshll.u32 %v9949_v33, 16  ;;  %v3995_v28 = vsel %vm3994_vm6, 1, %v12925_v14  ;;  %v4004_v32 = vmul.u32 %v4002_v54, %v3978_v62  ;;  %v4008_v18 = vshll.u32 %v10079_v25, 16 }
 0x37c   : > { %v10114_v45 = vsel %vm5741_vm14, %v9789_v24, %v5746_v50  ;;  %v10118_v10 = vshrl.u32 %v12936_v46, %v9713_v56  ;;  %v10120_v23 = vadd.s32 %v4336_v43, %v4332_v58  ;;  %v4490_v33 = vadd.s32 1, %v4486_v38 }
 0x37d   : > { %v10107_v22 = vadd.s32 %v9960_v20, %v13176_v30  ;;  %13177 = vst [vmem:[#allocation40_spill] sm:$0xff] %v10114_v45  ;;  %v5750_v20 = vsel %vm5742_vm4, %v9710_v40, %v5749_v2  ;;  %v3987_v62 = vshrl.u32 %v3983_v4, 16  ;;  %v3997_v9 = vadd.s32 %v3995_v28, %v3993_v41  ;;  %6251 = vmatmul.msk.f32.gmra.mxu3 %vm1664_vm0, %v9903_v8  ;;  %v13184_v30 = vld [vmem:[#allocation43_spill] sm:$0xff] }
 0x37e   : > { %v5754_v24 = vsel %vm5742_vm4, %v9718_v39, %v5753_v0  ;;  %v4433_v50 = vsel %vm4427_vm13, %v4430_v12, %v4432_v21  ;;  %v4007_v47 = vmul.u32 %v4003_v59, %v10037_v60  ;;  %v4010_v61 = vshll.u32 %v4006_v44, 16  ;;  %v13179_v59 = vld [vmem:[#allocation42_spill] sm:$0xff]  ;;  %v4698_v0 = vpop.permute.xlu2 %4697  ;;  %v13185_v28 = vld [vmem:[#allocation23_spill] sm:$0xff] }
 0x37f   : > { %vm4489_vm15 = vc.u32 %v10092_v1, %v10107_v22  ;;  %v5881_v52 = vshrl.u32 %v12929_v27, %v9713_v56  ;;  %v3945_v40 = vshrl.u32 %v12936_v46, %v13164_v11  ;;  %vm4012_vm12 = vc.u32 %v4004_v32, %v4008_v18 }
 0x380   : > { %v4014_v4 = vadd.s32 %v4008_v18, %v4004_v32  ;;  %v4338_v2 = vadd.s32 536870912, %v10120_v23  ;;  %v4491_v39 = vsel %vm4489_vm15, %v4490_v33, %v4486_v38  ;;  %vm13178_vm10 = vcmp.lt.s32.totalorder %v13165_v35, 4  ;;  %v13186_v18 = vld [vmem:[#allocation5_spill] sm:$0xff] }
 0x381   : > { %v3966_v55 = vsel %vm13178_vm10, %v9994_v15, 2102212464  ;;  %v4013_v60 = vsel %vm4012_vm12, 1, %v12925_v14  ;;  %v10147_v36 = vsel %vm5741_vm14, %v13179_v59, %v5750_v20  ;;  %v4487_v8 = vmul.u32 %v9872_v17, %v4433_v50 }
 0x382   : > { %13180 = vst [vmem:[#allocation34_spill] sm:$0xff] %v10147_v36  ;;  %v3989_v11 = vshrl.u32 %v10061_v34, 16  ;;  %v3998_v5 = vadd.s32 %v3997_v9, %v3987_v62  ;;  %v10154_v42 = vsel %vm5741_vm14, %v13181_v6, %v5754_v24  ;;  %v4009_v54 = vshrl.u32 %v10079_v25, 16 }
 0x383   : > { %13182 = vst [vmem:[#allocation14_spill] sm:$0xff] %v10154_v42  ;;  %v4015_v15 = vadd.s32 %v4013_v60, %v4007_v47  ;;  %vm4016_vm13 = vc.u32 %v4014_v4, %v4010_v61  ;;  %v10157_v63 = vadd.s32 %v4491_v39, %v4487_v8  ;;  %v3965_v49 = vsel %vm3961_vm7, %v3945_v40, %v9980_v51 }
 0x384   : > { %v3967_v17 = vsel %vm3963_vm3, %v9982_v48, %v3966_v55  ;;  %v4017_v34 = vsel %vm4016_vm13, 1, %v12925_v14  ;;  %v10168_v58 = vshrl.u32 %v4338_v2, 30  ;;  %v4011_v25 = vshrl.u32 %v4006_v44, 16  ;;  %v13191_v55 = vld [vmem:[#allocation6_spill] sm:$0xff] }
 0x385   : > { %v4019_v37 = vadd.s32 %v4017_v34, %v4015_v15  ;;  %v5760_v38 = vshrl.u32 %v10154_v42, 16  ;;  %v5884_v43 = vshrl.u32 %v12930_v26, %v9713_v56  ;;  %v10173_v51 = vadd.s32 %v3998_v5, %v3989_v11  ;;  %v13193_v11 = vld [vmem:[#allocation35_spill] sm:$0xff] }
 0x386   : > { %v10175_v16 = vadd.s32 %v4014_v4, %v4010_v61  ;;  %v12809_v48 = vand.u32 65535, %v10154_v42  ;;  %v5782_v12 = vshrl.u32 %v10147_v36, 16  ;;  %v3968_v21 = vsel %vm3962_vm2, %v3965_v49, %v3967_v17  ;;  %v13189_v61 = vld [vmem:[#allocation41_spill] sm:$0xff]  ;;  %v4763_v17 = vpop.permute.xlu1 %4762 }
 0x387   : > { %v4020_v41 = vadd.s32 %v4019_v37, %v4009_v54  ;;  %v10182_v44 = vor.u32 %v5881_v52, %v13184_v30  ;;  %v5886_v32 = vshll.u32 %v12930_v26, %v13185_v28  ;;  %v4709_v33 = vmul.f32 %v4698_v0, %v13186_v18  ;;  %v6237_v54 = vld [vmem:[%s12623_s3 + $0x48] sm:$0xff] }
 0x388   : > { %v4493_v20 = vadd.s32 536870912, %v10157_v63  ;;  %v13187_v62 = vmov 920167782   ;;  %v13188_v24 = vmov 1326507024   ;;  %v4340_v35 = vshll.u32 %v10168_v58, 30  ;;  %6252 = vmatmul.msk.f32.gmra.mxu3 %vm1664_vm0, %v6237_v54  ;;  %6247 = vmatmul.msk.f32.gmra.mxu2 %vm1664_vm0, %v6237_v54 }
 0x389   : > { %v5892_v9 = vshll.u32 %v13187_v62, %v13185_v28  ;;  %v5893_v50 = vshrl.u32 %v13188_v24, %v9713_v56  ;;  %v4021_v47 = vadd.s32 %v4020_v41, %v4011_v25  ;;  %v10194_v40 = vmul.u32 %v5760_v38, %v13189_v61  ;;  %v13195_v25 = vld [vmem:[#allocation32_spill] sm:$0xff] }
 0x38a   : > { %v5887_v52 = vshrl.u32 %v12931_v29, %v9713_v56  ;;  %v4022_v4 = vmul.u32 %v9998_v31, %v3968_v21  ;;  %vm4024_vm2 = vc.u32 %v10173_v51, %v10175_v16  ;;  %v5889_v2 = vshll.u32 %v12931_v29, %v13185_v28  ;;  %v13194_v31 = vld [vmem:[#allocation12_spill] sm:$0xff]  ;;  %v13197_v21 = vld [vmem:[#allocation33_spill] sm:$0xff] }
 0x38b   : > { %13190 = vst [vmem:[#allocation87_spill] sm:$0xff] %v10194_v40  ;;  %v5890_v39 = vshrl.u32 %v13187_v62, %v9713_v56  ;;  %v4710_v60 = vmul.f32 %v4698_v0, %v13191_v55  ;;  %v4025_v59 = vadd.s32 1, %v4021_v47  ;;  %v10209_v8 = vmul.u32 %v12809_v48, %v13189_v61 }
 0x38c   : > { %v5885_v5 = vor.u32 %v5884_v43, %v13193_v11  ;;  %v4741_v6 = vadd.f32 %v13194_v31, %v4709_v33  ;;  %v10216_v15 = vshrl.u32 %v4493_v20, 30  ;;  %v5894_v49 = vor.u32 %v5893_v50, %v5892_v9  ;;  %v13199_v20 = vld [vmem:[#allocation29_spill] sm:$0xff] }
 0x38d   : > { %13192 = vst [vmem:[#allocation45_spill] sm:$0xff] %v10209_v8  ;;  %v10222_v34 = vsub.s32 %v10120_v23, %v4340_v35  ;;  %v4026_v0 = vsel %vm4024_vm2, %v4025_v59, %v4021_v47  ;;  %v10228_v37 = vmul.u32 %v5760_v38, %v13195_v25  ;;  %v12810_v43 = vshll.u32 %v10194_v40, 16 }
 0x38e   : > { %vm5898_vm5 = vcmp.lt.s32.totalorder %v13197_v21, 4  ;;  %v4027_v41 = vadd.s32 %v4026_v0, %v4022_v4  ;;  %v10233_v30 = vmul.u32 %v5782_v12, %v13189_v61  ;;  %v5888_v28 = vor.u32 %v5887_v52, %v5886_v32  ;;  %v13205_v0 = vld [vmem:[#allocation54_spill] sm:$0xff] }
 0x38f   : > { %13196 = vst [vmem:[#allocation52_spill] sm:$0xff] %v10228_v37  ;;  %v5891_v33 = vor.u32 %v5890_v39, %v5889_v2  ;;  %v4742_v23 = vadd.f32 %v13199_v20, %v4710_v60  ;;  %vm5895_vm4 = vcmp.lt.s32.totalorder %v13197_v21, 1  ;;  %v10237_v9 = vadd.f32 %v4763_v17, %v4741_v6  ;;  %v13204_v6 = vld [vmem:[#allocation25_spill] sm:$0xff] }
 0x390   : > { %13198 = vst [vmem:[#allocation47_spill] sm:$0xff] %v10233_v30  ;;  %v4495_v50 = vshll.u32 %v10216_v15, 30  ;;  %v4028_v38 = vadd.s32 536870912, %v4027_v41  ;;  %v10241_v35 = vmul.u32 %v5782_v12, %v13195_v25  ;;  %vm5897_vm7 = vcmp.lt.s32.totalorder %v13197_v21, 3 }
 0x391   : > { %13200 = vst [vmem:[#allocation50_spill] sm:$0xff] %v10237_v9  ;;  %v5908_v47 = vsel %vm5898_vm5, %v5894_v49, 1326507024  ;;  %v4343_v32 = vsub.s32 0, %v10222_v34  ;;  %v10250_v52 = vadd.s32 %v12810_v43, %v10209_v8  ;;  %vm5896_vm3 = vcmp.lt.s32.totalorder %v13197_v21, 2 }
 0x392   : > { %13201 = vst [vmem:[#allocation44_spill] sm:$0xff] %v10241_v35  ;;  %vm4342_vm9 = vcmp.lt.s32.totalorder %v10222_v34, 0  ;;  %v10254_v4 = vshrl.u32 %v4028_v38, 30  ;;  %v5899_v12 = vsel %vm5895_vm4, %v10118_v10, %v10182_v44  ;;  %v5904_v2 = vsel %vm5898_vm5, %v5891_v33, 920167782  ;;  %v13206_v38 = vld [vmem:[#allocation60_spill] sm:$0xff] }
 0x393   : > { %13202 = vst [vmem:[#allocation37_spill] sm:$0xff] %v10250_v52  ;;  %v5907_v39 = vsel %vm5895_vm4, %v5885_v5, %v5888_v28  ;;  %v10264_v60 = vadd.f32 %v4763_v17, %v4742_v23  ;;  %v5909_v59 = vsel %vm5897_vm7, %v5891_v33, %v5908_v47  ;;  %v5401_v11 = vand.u32 2139095040, %v10237_v9 }
 0x394   : > { %v10270_v31 = vsub.s32 %v10157_v63, %v4495_v50  ;;  %v12812_v54 = vand.u32 2147483647, %v13204_v6  ;;  %v4344_v10 = vsel %vm4342_vm9, %v4343_v32, %v10222_v34  ;;  %v4030_v49 = vshll.u32 %v10254_v4, 30 }
 0x395   : > { %13203 = vst [vmem:[#allocation46_spill] sm:$0xff] %v10264_v60  ;;  %v4101_v20 = vshll.u32 %v12936_v46, %v13205_v0  ;;  %v4102_v17 = vshrl.u32 %v12929_v27, %v13206_v38  ;;  %v4104_v33 = vshll.u32 %v12929_v27, %v13205_v0  ;;  %v4105_v23 = vshrl.u32 %v12930_v26, %v13206_v38 }
 0x396   : > { %v4107_v63 = vshll.u32 %v12930_v26, %v13205_v0  ;;  %v4108_v50 = vshrl.u32 %v12931_v29, %v13206_v38  ;;  %v5900_v47 = vsel %vm5898_vm5, %v5888_v28, 2102212464  ;;  %v5903_v32 = vsel %vm5895_vm4, %v10182_v44, %v5885_v5 }
 0x397   : > { %v5905_v19 = vsel %vm5897_vm7, %v5888_v28, %v5904_v2  ;;  %v5556_v56 = vand.u32 2139095040, %v10264_v60  ;;  %v10297_v48 = vsel %vm5896_vm3, %v5907_v39, %v5909_v59  ;;  %v4498_v43 = vsub.s32 0, %v10270_v31 }
 0x398   : > { %13207 = vst [vmem:[#allocation57_spill] sm:$0xff] %v10297_v48  ;;  %v4091_v45 = vand.u32 8388607, %v12812_v54  ;;  %v5402_v13 = vshrl.u32 %v5401_v11, 23  ;;  %v4345_v35 = vclz %v4344_v10  ;;  %vm4497_vm14 = vcmp.lt.s32.totalorder %v10270_v31, 0  ;;  %v13209_v11 = vld [vmem:[#allocation59_spill] sm:$0xff] }
 0x399   : > { %v10304_v44 = vsub.s32 %v4027_v41, %v4030_v49  ;;  %v5901_v28 = vsel %vm5897_vm7, %v5885_v5, %v5900_v47  ;;  %v10308_v2 = vor.u32 %v4102_v17, %v4101_v20  ;;  %v10310_v39 = vor.u32 %v4105_v23, %v4104_v33  ;;  %v13213_v47 = vld [vmem:[#allocation65_spill] sm:$0xff] }
 0x39a   : > { %v10312_v59 = vor.u32 %v4108_v50, %v4107_v63  ;;  %v10316_v0 = vsel %vm5896_vm3, %v5903_v32, %v5905_v19  ;;  %v5557_v54 = vshrl.u32 %v5556_v56, 23  ;;  %vm4116_vm8 = vcmp.lt.s32.totalorder %v13209_v11, 1  ;;  %v13211_v63 = vld [vmem:[#allocation69_spill] sm:$0xff]  ;;  %v13212_v50 = vld [vmem:[#allocation70_spill] sm:$0xff] }
 0x39b   : > { %13208 = vst [vmem:[#allocation49_spill] sm:$0xff] %v10316_v0  ;;  %vm4118_vm1 = vcmp.lt.s32.totalorder %v13209_v11, 3  ;;  %v5915_v41 = vshrl.u32 %v10297_v48, 16  ;;  %v4499_v5 = vsel %vm4497_vm14, %v4498_v43, %v10270_v31  ;;  %v4092_v49 = vor.u32 8388608, %v4091_v45 }
 0x39c   : > { %v6326_v20 = vadd.s32 4294967169, %v5402_v13  ;;  %v13210_v17 = vand.u32 2147483647, %v10237_v9  ;;  %v6280_v23 = vadd.s32 4294967294, %v4345_v35  ;;  %v4033_v19 = vsub.s32 0, %v10304_v44  ;;  %v13215_v9 = vld [vmem:[#allocation39_spill] sm:$0xff] }
 0x39d   : > { %vm4032_vm11 = vcmp.lt.s32.totalorder %v10304_v44, 0  ;;  %vm4117_vm6 = vcmp.lt.s32.totalorder %v13209_v11, 2  ;;  %v4124_v56 = vsel %vm4116_vm8, %v10308_v2, %v10310_v39  ;;  %v4126_v45 = vsel %vm4118_vm1, %v10312_v59, %v13211_v63 }
 0x39e   : > { %v5405_v33 = vand.u32 8388607, %v13210_v17  ;;  %v6329_v13 = vadd.s32 4294967169, %v5557_v54  ;;  %v4500_v43 = vclz %v4499_v5  ;;  %v4128_v35 = vsel %vm4116_vm8, %v10310_v39, %v10312_v59 }
 0x39f   : > { %v4130_v32 = vsel %vm4118_vm1, %v13213_v47, %v13212_v50  ;;  %v10346_v17 = vsel %vm5896_vm3, %v5899_v12, %v5901_v28  ;;  %v10350_v63 = vmul.u32 %v5915_v41, %v13215_v9  ;;  %v10352_v54 = vshll.u32 %v4092_v49, 8 }
 0x3a0   : > { %13214 = vst [vmem:[#allocation55_spill] sm:$0xff] %v10346_v17  ;;  %v13217_v5 = vand.u32 2147483647, %v10264_v60  ;;  %vm6281_vm15 = vcmp.lt.s32.totalorder %v6280_v23, 0  ;;  %v4034_v37 = vsel %vm4032_vm11, %v4033_v19, %v10304_v44  ;;  %v10359_v50 = vsel %vm4117_vm6, %v4124_v56, %v4126_v45 }
 0x3a1   : > { %13216 = vst [vmem:[#allocation48_spill] sm:$0xff] %v10350_v63  ;;  %v5937_v12 = vshrl.u32 %v10316_v0, 16  ;;  %v5406_v28 = vor.u32 8388608, %v5405_v33  ;;  %v10365_v47 = vsel %vm4117_vm6, %v4128_v35, %v4130_v32  ;;  %v5563_v60 = vadd.s32 1, %v6329_v13 }
 0x3a2   : > { %v5560_v30 = vand.u32 8388607, %v13217_v5  ;;  %v5408_v5 = vadd.s32 1, %v6326_v20  ;;  %v6283_v36 = vadd.s32 4294967294, %v4500_v43  ;;  %v10369_v19 = vsel %vm6281_vm15, 0, %v6280_v23  ;;  %v13221_v20 = vld [vmem:[#allocation9_spill] sm:$0xff] }
 0x3a3   : > { %v4035_v61 = vclz %v4034_v37  ;;  %v4133_v56 = vand.u32 65535, %v10352_v54  ;;  %v4158_v45 = vshrl.u32 %v10359_v50, 16  ;;  %v13219_v33 = vand.u32 65535, %v10297_v48 }
 0x3a4   : > { %v5561_v32 = vor.u32 8388608, %v5560_v30  ;;  %v4136_v10 = vshrl.u32 %v10365_v47, 16  ;;  %v10381_v13 = vmul.u32 %v5915_v41, %v13221_v20  ;;  %v10384_v23 = vmul.u32 %v5937_v12, %v13215_v9 }
 0x3a5   : > { %v10376_v21 = vmul.u32 %v13219_v33, %v13215_v9  ;;  %v10387_v37 = vmul.u32 %v5937_v12, %v13221_v20  ;;  %v10389_v43 = vshll.u32 %v5406_v28, 8  ;;  %vm5409_vm12 = vcmp.gt.s32.totalorder %v5408_v5, 0 }
 0x3a6   : > { %13222 = vst [vmem:[#allocation56_spill] sm:$0xff] %v10381_v13  ;;  %vm5564_vm10 = vcmp.gt.s32.totalorder %v5563_v60, 0  ;;  %v4353_v33 = vsub.s32 4294967266, %v10369_v19  ;;  %vm6284_vm13 = vcmp.lt.s32.totalorder %v6283_v36, 0  ;;  %v6274_v35 = vadd.s32 4294967294, %v4035_v61 }
 0x3a7   : > { %13220 = vst [vmem:[#allocation53_spill] sm:$0xff] %v10376_v21  ;;  %v4134_v30 = vshrl.u32 %v10352_v54, 16  ;;  %v4157_v17 = vand.u32 65535, %v10359_v50  ;;  %v10394_v41 = vmul.u32 %v4158_v45, %v4133_v56  ;;  %v13226_v49 = vshll.u32 %v10350_v63, 16 }
 0x3a8   : > { %13223 = vst [vmem:[#allocation68_spill] sm:$0xff] %v10384_v23  ;;  %v10401_v12 = vshll.u32 %v5561_v32, 8  ;;  %v4135_v28 = vand.u32 65535, %v10365_v47  ;;  %v5410_v0 = vsel %vm5409_vm12, %v5408_v5, 0  ;;  %v10407_v61 = vand.u32 65535, %v10389_v43 }
 0x3a9   : > { %13224 = vst [vmem:[#allocation64_spill] sm:$0xff] %v10387_v37  ;;  %v10399_v23 = vadd.s32 %v13226_v49, %v10376_v21  ;;  %v10404_v37 = vmul.u32 %v4136_v10, %v4133_v56  ;;  %v10410_v9 = vshrl.u32 %v10389_v43, 16  ;;  %v10412_v50 = vsel %vm6284_vm13, 0, %v6283_v36 }
 0x3aa   : > { %13225 = vst [vmem:[#allocation66_spill] sm:$0xff] %v10389_v43  ;;  %v5565_v13 = vsel %vm5564_vm10, %v5563_v60, 0  ;;  %v4333_v49 = vadd.s32 %v10055_v53, %v10041_v57  ;;  %v4349_v32 = vsub.s32 32, %v10369_v19  ;;  %vm6275_vm2 = vcmp.lt.s32.totalorder %v6274_v35, 0 }
 0x3ab   : > { %13227 = vst [vmem:[#allocation42_spill] sm:$0xff] %v10399_v23  ;;  %v4354_v23 = vadd.s32 127, %v4353_v33  ;;  %v4159_v47 = vmul.u32 %v4157_v17, %v4133_v56  ;;  %v10417_v48 = vmul.u32 %v4157_v17, %v4134_v30  ;;  %v4163_v5 = vshll.u32 %v10394_v41, 16 }
 0x3ac   : > { %13228 = vst [vmem:[#allocation88_spill] sm:$0xff] %v10401_v12  ;;  %v4508_v20 = vsub.s32 4294967266, %v10412_v50  ;;  %v4137_v21 = vmul.u32 %v4135_v28, %v4133_v56  ;;  %v10421_v63 = vmul.u32 %v4135_v28, %v4134_v30  ;;  %v4141_v36 = vshll.u32 %v10404_v37, 16 }
 0x3ad   : > { %13229 = vst [vmem:[#allocation43_spill] sm:$0xff] %v10407_v61  ;;  %v10424_v60 = vshrl.u32 %v5410_v0, 5  ;;  %v5412_v52 = vand.u32 31, %v5410_v0  ;;  %v10427_v57 = vand.u32 65535, %v10401_v12  ;;  %v10430_v53 = vshrl.u32 %v10401_v12, 16 }
 0x3ae   : > { %13230 = vst [vmem:[#allocation23_spill] sm:$0xff] %v10410_v9  ;;  %v10432_v17 = vshrl.u32 %v5565_v13, 5  ;;  %v10434_v33 = vand.u32 31, %v5565_v13  ;;  %v4351_v42 = vshrl.u32 %v4333_v49, %v4349_v32  ;;  %v4038_v25 = vsel %vm6275_vm2, 0, %v6274_v35 }
 0x3af   : > { %13231 = vst [vmem:[#allocation35_spill] sm:$0xff] %v10427_v57  ;;  %v4355_v56 = vshll.u32 %v4354_v23, 23  ;;  %v12842_v28 = vshll.u32 %v10417_v48, 16  ;;  %vm4167_vm5 = vc.u32 %v4159_v47, %v4163_v5  ;;  %v10437_v8 = vadd.s32 %v4163_v5, %v4159_v47 }
 0x3b0   : > { %13232 = vst [vmem:[#allocation12_spill] sm:$0xff] %v10430_v53  ;;  %v4509_v40 = vadd.s32 127, %v4508_v20  ;;  %v4143_v0 = vshll.u32 %v10421_v63, 16  ;;  %vm4145_vm4 = vc.u32 %v4137_v21, %v4141_v36  ;;  %v4147_v7 = vadd.s32 %v4141_v36, %v4137_v21 }
 0x3b1   : > { %v5413_v3 = vsub.s32 32, %v5412_v52  ;;  %v5415_v6 = vshll.u32 %v12936_v46, %v5412_v52  ;;  %v4043_v55 = vsub.s32 4294967266, %v4038_v25  ;;  %v4162_v18 = vmul.u32 %v4158_v45, %v4134_v30 }
 0x3b2   : > { %v4350_v13 = vshll.u32 %v10222_v34, %v10369_v19  ;;  %v4504_v35 = vsub.s32 32, %v10412_v50  ;;  %v4140_v23 = vmul.u32 %v4136_v10, %v4134_v30  ;;  %v4168_v49 = vsel %vm4167_vm5, 1, %v12925_v14 }
 0x3b3   : > { %v10446_v32 = vshll.u32 %v12929_v27, %v5412_v52  ;;  %v4356_v20 = vor.u32 4788187, %v4355_v56  ;;  %v4146_v47 = vsel %vm4145_vm4, 1, %v12925_v14  ;;  %vm4171_vm7 = vc.u32 %v10437_v8, %v12842_v28 }
 0x3b4   : > { %v4352_v21 = vor.u32 %v4351_v42, %v4350_v13  ;;  %v4488_v45 = vadd.s32 %v10107_v22, %v10092_v1  ;;  %v4510_v34 = vshll.u32 %v4509_v40, 23  ;;  %vm4149_vm3 = vc.u32 %v4147_v7, %v4143_v0 }
 0x3b5   : > { %v4023_v10 = vadd.s32 %v10175_v16, %v10173_v51  ;;  %v4039_v19 = vsub.s32 32, %v4038_v25  ;;  %v4044_v30 = vadd.s32 127, %v4043_v55  ;;  %v4170_v5 = vadd.s32 %v4168_v49, %v4162_v18 }
 0x3b6   : > { %v5421_v36 = vshll.u32 %v12930_v26, %v5412_v52  ;;  %v4506_v56 = vshrl.u32 %v4488_v45, %v4504_v35  ;;  %v4148_v53 = vadd.s32 %v4146_v47, %v4140_v23  ;;  %v4172_v12 = vsel %vm4171_vm7, 1, %v12925_v14 }
 0x3b7   : > { %v5424_v28 = vshll.u32 %v12931_v29, %v5412_v52  ;;  %v5427_v42 = vshll.u32 %v13187_v62, %v5412_v52  ;;  %v4357_v13 = vand.u32 2147483647, %v4356_v20  ;;  %v4150_v1 = vsel %vm4149_vm3, 1, %v12925_v14 }
 0x3b8   : > { %v4359_v7 = vcvt.s32.f32 %v4352_v21  ;;  %v4505_v22 = vshll.u32 %v10270_v31, %v10412_v50  ;;  %v4511_v51 = vor.u32 4788187, %v4510_v34  ;;  %v4040_v16 = vshll.u32 %v10304_v44, %v4038_v25 }
 0x3b9   : > { %v4041_v18 = vshrl.u32 %v4023_v10, %v4039_v19  ;;  %v4045_v40 = vshll.u32 %v4044_v30, 23  ;;  %v4164_v55 = vshrl.u32 %v10394_v41, 16  ;;  %v4174_v0 = vadd.s32 %v4172_v12, %v4170_v5 }
 0x3ba   : > { %v5414_v35 = vshrl.u32 %v12936_v46, %v5413_v3  ;;  %v4507_v23 = vor.u32 %v4506_v56, %v4505_v22  ;;  %v4142_v52 = vshrl.u32 %v10404_v37, 16  ;;  %v4152_v49 = vadd.s32 %v4150_v1, %v4148_v53 }
 0x3bb   : > { %v5416_v20 = vshrl.u32 %v12929_v27, %v5413_v3  ;;  %v5419_v47 = vshrl.u32 %v12930_v26, %v5413_v3  ;;  %v5422_v31 = vshrl.u32 %v12931_v29, %v5413_v3  ;;  %v4360_v50 = vmul.f32 %v4359_v7, %v4357_v13  ;;  %v10483_v7 = vpop.permute.xlu2 %4718 }
 0x3bc   : > { %v5425_v25 = vshrl.u32 %v13187_v62, %v5413_v3  ;;  %v5428_v44 = vshrl.u32 %v13188_v24, %v5413_v3  ;;  %vm5430_vm9 = vcmp.lt.s32.totalorder %v10424_v60, 1  ;;  %vm5432_vm14 = vcmp.lt.s32.totalorder %v10424_v60, 3 }
 0x3bd   : > { %v4512_v41 = vand.u32 2147483647, %v4511_v51  ;;  %v4042_v12 = vor.u32 %v4041_v18, %v4040_v16  ;;  %v4046_v21 = vor.u32 4788187, %v4045_v40  ;;  %v4166_v37 = vshrl.u32 %v10417_v48, 16 }
 0x3be   : > { %v4175_v53 = vadd.s32 %v4174_v0, %v4164_v55  ;;  %v4514_v45 = vcvt.s32.f32 %v4507_v23  ;;  %v4100_v34 = vshrl.u32 %v12936_v46, %v13206_v38  ;;  %v4144_v10 = vshrl.u32 %v10421_v63, 16  ;;  %v13234_v38 = vld [vmem:[#allocation16_spill] sm:$0xff] }
 0x3bf   : > { %v4153_v19 = vadd.s32 %v4152_v49, %v4142_v52  ;;  %v5417_v30 = vor.u32 %v5416_v20, %v5415_v6  ;;  %vm5431_vm11 = vcmp.lt.s32.totalorder %v10424_v60, 2  ;;  %vm5433_vm15 = vcmp.lt.s32.totalorder %v10424_v60, 4 }
 0x3c0   : > { %v4361_v3 = vxor.u32 2147483648, %v4360_v50  ;;  %vm13233_vm12 = vcmp.lt.s32.totalorder %v13209_v11, 4  ;;  %v5423_v56 = vor.u32 %v5422_v31, %v5421_v36  ;;  %v5426_v13 = vor.u32 %v5425_v25, %v5424_v28 }
 0x3c1   : > { %v4121_v5 = vsel %vm13233_vm12, %v10312_v59, 2102212464  ;;  %v5429_v1 = vor.u32 %v5428_v44, %v5427_v42  ;;  %v4515_v22 = vmul.f32 %v4514_v45, %v4512_v41  ;;  %vm4241_vm10 = vcmp.lt.s32.totalorder %v13234_v38, 0  ;;  %v13239_v41 = vld [vmem:[#allocation17_spill] sm:$0xff] }
 0x3c2   : > { %v4047_v63 = vand.u32 2147483647, %v4046_v21  ;;  %v4049_v51 = vcvt.s32.f32 %v4042_v12  ;;  %v4176_v6 = vadd.s32 %v4175_v53, %v4166_v37  ;;  %v4120_v16 = vsel %vm4116_vm8, %v4100_v34, %v10308_v2 }
 0x3c3   : > { %v4122_v18 = vsel %vm4118_vm1, %v10310_v39, %v4121_v5  ;;  %v10492_v59 = vadd.s32 %v4153_v19, %v4144_v10  ;;  %v13235_v28 = vshll.u32 %v10417_v48, 16  ;;  %v5420_v42 = vor.u32 %v5419_v47, %v10446_v32 }
 0x3c4   : > { %v5435_v40 = vsel %vm5433_vm15, %v5423_v56, 2102212464  ;;  %v5568_v55 = vsub.s32 32, %v10434_v33  ;;  %v4362_v2 = vsel %vm4241_vm10, %v4361_v3, %v4360_v50  ;;  %v5439_v39 = vsel %vm5433_vm15, %v5426_v13, 920167782 }
 0x3c5   : > { %v10497_v36 = vadd.s32 %v10437_v8, %v13235_v28  ;;  %v5443_v0 = vsel %vm5433_vm15, %v5429_v1, 1326507024  ;;  %v10511_v48 = vshll.u32 %v12936_v46, %v10434_v33  ;;  %v6292_v8 = vld [vmem:[%s12624_s4 + $0x60] sm:$0xff]  ;;  %v4516_v32 = vxor.u32 2147483648, %v4515_v22  ;;  %v13246_v28 = vld [vmem:[#allocation21_spill] sm:$0xff] }
 0x3c6   : > { %4581 = vperm.xlu2 %6428, %v6292_v8   ;;  %v13236_v23 = vand.u32 2147483647, %v13234_v38  ;;  %v4050_v49 = vmul.f32 %v4049_v51, %v4047_v63  ;;  %v4123_v20 = vsel %vm4117_vm6, %v4120_v16, %v4122_v18  ;;  %v4180_v47 = vadd.s32 1, %v4176_v6  ;;  %v6242_v51 = vld [vmem:[%s12624_s4 + $0x48] sm:$0xff] }
 0x3c7   : > { %v5434_v31 = vsel %vm5430_vm9, %v5414_v35, %v5417_v30  ;;  %v5436_v50 = vsel %vm5432_vm14, %v5420_v42, %v5435_v40  ;;  %vm4179_vm1 = vc.u32 %v10492_v59, %v10497_v36  ;;  %v5438_v44 = vsel %vm5430_vm9, %v5417_v30, %v5420_v42  ;;  %3122 = vperm.xlu0 %6429, %v6242_v51  }
 0x3c8   : > { %vm10518_vm8 = vcmp.le.f32.partialorder %v13236_v23, 0.7853982  ;;  %v5440_v11 = vsel %vm5432_vm14, %v5423_v56, %v5439_v39  ;;  %v5573_v35 = vshll.u32 %v12929_v27, %v10434_v33  ;;  %vm4396_vm6 = vcmp.lt.s32.totalorder %v13239_v41, 0 }
 0x3c9   : > { %v10531_v25 = vsel %vm10518_vm8, %v13234_v38, %v4362_v2  ;;  %v5442_v12 = vsel %vm5430_vm9, %v5420_v42, %v5423_v56  ;;  %v5444_v21 = vsel %vm5432_vm14, %v5426_v13, %v5443_v0  ;;  %v4517_v37 = vsel %vm4396_vm6, %v4516_v32, %v4515_v22 }
 0x3ca   : > { %v4177_v53 = vmul.u32 %v10352_v54, %v4123_v20  ;;  %v10551_v45 = vsel %vm5431_vm11, %v5434_v31, %v5436_v50  ;;  %v10555_v34 = vmul.f32 %v10531_v25, %v10531_v25  ;;  %v4051_v10 = vxor.u32 2147483648, %v4050_v49  ;;  %v10565_v54 = vpop.permute.xlu2 %4687  ;;  %v13247_v50 = vld [vmem:[#allocation7_spill] sm:$0xff] }
 0x3cb   : > { %13240 = vst [vmem:[#allocation33_spill] sm:$0xff] %v10551_v45  ;;  %v4181_v19 = vsel %vm4179_vm1, %v4180_v47, %v4176_v6  ;;  %v10559_v30 = vsel %vm5431_vm11, %v5438_v44, %v5440_v11  ;;  %v10562_v3 = vshrl.u32 %v12936_v46, %v5568_v55  ;;  %v5571_v5 = vshrl.u32 %v12929_v27, %v5568_v55  ;;  %v6290_v6 = vld [vmem:[%s12624_s4 + $0x50] sm:$0xff] }
 0x3cc   : > { %13241 = vst [vmem:[#allocation29_spill] sm:$0xff] %v10559_v30  ;;  %v13242_v56 = vand.u32 2147483647, %v13239_v41  ;;  %v10575_v1 = vsel %vm5431_vm11, %v5442_v12, %v5444_v21  ;;  %v5582_v22 = vshll.u32 %v13187_v62, %v10434_v33  ;;  %v5583_v63 = vshrl.u32 %v13188_v24, %v5568_v55 }
 0x3cd   : > { %13245 = vst [vmem:[#allocation54_spill] sm:$0xff] %v10575_v1  ;;  %v5574_v18 = vshrl.u32 %v12930_v26, %v5568_v55  ;;  %vm3931_vm2 = vcmp.lt.s32.totalorder %v13246_v28, 0  ;;  %v10595_v42 = vadd.s32 %v4181_v19, %v4177_v53  ;;  %v5576_v40 = vshll.u32 %v12930_v26, %v10434_v33 }
 0x3ce   : > { %vm10569_vm13 = vcmp.le.f32.partialorder %v13242_v56, 0.7853982  ;;  %v5577_v2 = vshrl.u32 %v12931_v29, %v5568_v55  ;;  %4571 = vperm.xlu2 %6428, %v6290_v6   ;;  %v4375_v39 = vmul.f32 -0.00019511016, %v10555_v34  ;;  %v4052_v0 = vsel %vm3931_vm2, %v4051_v10, %v4050_v49 }
 0x3cf   : > { %v10589_v16 = vsel %vm10569_vm13, %v13239_v41, %v4517_v37  ;;  %v12843_v8 = vand.u32 65535, %v10575_v1  ;;  %v5579_v32 = vshll.u32 %v12931_v29, %v10434_v33  ;;  %v5580_v23 = vshrl.u32 %v13187_v62, %v5568_v55 }
 0x3d0   : > { %v10609_v20 = vmul.f32 %v10589_v16, %v10589_v16  ;;  %v5450_v47 = vshrl.u32 %v10575_v1, 16  ;;  %v5584_v31 = vor.u32 %v5583_v63, %v5582_v22  ;;  %v4731_v44 = vmul.f32 %v10483_v7, %v13247_v50  ;;  %v13251_v63 = vld [vmem:[#allocation28_spill] sm:$0xff] }
 0x3d1   : > { %v13248_v11 = vand.u32 2147483647, %v13246_v28  ;;  %vm5588_vm4 = vcmp.lt.s32.totalorder %v10432_v17, 4  ;;  %v4183_v12 = vadd.s32 536870912, %v10595_v42  ;;  %v5472_v21 = vshrl.u32 %v10559_v30, 16 }
 0x3d2   : > { %v5575_v37 = vor.u32 %v5574_v18, %v5573_v35  ;;  %v5578_v53 = vor.u32 %v5577_v2, %v5576_v40  ;;  %v4376_v10 = vadd.f32 0.008332121, %v4375_v39  ;;  %v5581_v19 = vor.u32 %v5580_v23, %v5579_v32  ;;  %v4758_v2 = vpop.permute.xlu2 %4757 }
 0x3d3   : > { %vm10616_vm5 = vcmp.le.f32.partialorder %v13248_v11, 0.7853982  ;;  %vm5585_vm7 = vcmp.lt.s32.totalorder %v10432_v17, 1  ;;  %vm5587_vm3 = vcmp.lt.s32.totalorder %v10432_v17, 3  ;;  %v4530_v56 = vmul.f32 -0.00019511016, %v10609_v20 }
 0x3d4   : > { %v10625_v55 = vsel %vm10616_vm5, %v13246_v28, %v4052_v0  ;;  %v5598_v22 = vsel %vm5588_vm4, %v5584_v31, 1326507024  ;;  %v4739_v51 = vadd.f32 %v4731_v44, %v13251_v63  ;;  %v4368_v6 = vmul.f32 -0.001358992, %v10555_v34 }
 0x3d5   : > { %v10638_v0 = vmul.f32 %v10625_v55, %v10625_v55  ;;  %v10643_v35 = vmul.u32 %v12843_v8, %v10407_v61  ;;  %v10646_v18 = vmul.u32 %v5450_v47, %v10407_v61  ;;  %v5572_v40 = vor.u32 %v5571_v5, %v10511_v48 }
 0x3d6   : > { %v10649_v39 = vshrl.u32 %v4183_v12, 30  ;;  %v10652_v32 = vmul.u32 %v5450_v47, %v10410_v9  ;;  %vm5586_vm9 = vcmp.lt.s32.totalorder %v10432_v17, 2  ;;  %v5590_v23 = vsel %vm5588_vm4, %v5578_v53, 2102212464 }
 0x3d7   : > { %13252 = vst [vmem:[#allocation60_spill] sm:$0xff] %v10643_v35  ;;  %v4377_v31 = vmul.f32 %v4376_v10, %v10555_v34  ;;  %v5594_v44 = vsel %vm5588_vm4, %v5581_v19, 920167782  ;;  %v5597_v11 = vsel %vm5585_vm7, %v5575_v37, %v5578_v53  ;;  %v5599_v48 = vsel %vm5587_vm3, %v5581_v19, %v5598_v22  ;;  %v13257_v10 = vld [vmem:[#allocation8_spill] sm:$0xff] }
 0x3d8   : > { %13253 = vst [vmem:[#allocation59_spill] sm:$0xff] %v10646_v18  ;;  %v4531_v5 = vadd.f32 0.008332121, %v4530_v56  ;;  %v10664_v12 = vadd.f32 %v4758_v2, %v4739_v51  ;;  %v4363_v47 = vsub.s32 4, %v10168_v58  ;;  %v4369_v63 = vadd.f32 0.041655596, %v4368_v6 }
 0x3d9   : > { %13254 = vst [vmem:[#allocation69_spill] sm:$0xff] %v10652_v32  ;;  %v4065_v60 = vmul.f32 -0.00019511016, %v10638_v0  ;;  %v10669_v33 = vmul.u32 %v5472_v21, %v10407_v61  ;;  %v4732_v8 = vmul.f32 %v10483_v7, %v13257_v10  ;;  %v4523_v45 = vmul.f32 -0.001358992, %v10609_v20  ;;  %v13259_v61 = vld [vmem:[#allocation31_spill] sm:$0xff] }
 0x3da   : > { %13255 = vst [vmem:[#allocation70_spill] sm:$0xff] %v10664_v12  ;;  %v4185_v43 = vshll.u32 %v10649_v39, 30  ;;  %v5589_v56 = vsel %vm5585_vm7, %v10562_v3, %v5572_v40  ;;  %v5593_v22 = vsel %vm5585_vm7, %v5572_v40, %v5575_v37  ;;  %v4378_v51 = vadd.f32 -0.16666654, %v4377_v31 }
 0x3db   : > { %13256 = vst [vmem:[#allocation65_spill] sm:$0xff] %v10669_v33  ;;  %v5591_v6 = vsel %vm5587_vm3, %v5575_v37, %v5590_v23  ;;  %v5595_v7 = vsel %vm5587_vm3, %v5578_v53, %v5594_v44  ;;  %v10687_v33 = vsel %vm5586_vm9, %v5597_v11, %v5599_v48  ;;  %v4532_v19 = vmul.f32 %v4531_v5, %v10609_v20 }
 0x3dc   : > { %13258 = vst [vmem:[#allocation16_spill] sm:$0xff] %v10687_v33  ;;  %v5091_v30 = vand.u32 2139095040, %v10664_v12  ;;  %v4364_v3 = vsel %vm4241_vm10, %v4363_v47, %v10168_v58  ;;  %v4370_v40 = vmul.f32 %v4369_v63, %v10555_v34  ;;  %v4066_v31 = vadd.f32 0.008332121, %v4065_v60 }
 0x3dd   : > { %v4740_v37 = vadd.f32 %v4732_v8, %v13259_v61  ;;  %v4524_v23 = vadd.f32 0.041655596, %v4523_v45  ;;  %v4058_v53 = vmul.f32 -0.001358992, %v10638_v0  ;;  %v10698_v44 = vsub.s32 %v10595_v42, %v4185_v43 }
 0x3de   : > { %v13260_v11 = vshll.u32 %v10646_v18, 16  ;;  %v10706_v5 = vmul.u32 %v5472_v21, %v10410_v9  ;;  %v10710_v58 = vsel %vm5586_vm9, %v5589_v56, %v5591_v6  ;;  %v4379_v61 = vmul.f32 %v4378_v51, %v10555_v34 }
 0x3df   : > { %13263 = vst [vmem:[#allocation7_spill] sm:$0xff] %v10710_v58  ;;  %v10715_v45 = vsel %vm5586_vm9, %v5593_v22, %v5595_v7  ;;  %v5605_v43 = vshrl.u32 %v10687_v33, 16  ;;  %v4518_v60 = vsub.s32 4, %v10216_v15  ;;  %v4533_v42 = vadd.f32 -0.16666654, %v4532_v19 }
 0x3e0   : > { %v10703_v48 = vadd.s32 %v13260_v11, %v10643_v35  ;;  %13262 = vst [vmem:[#allocation21_spill] sm:$0xff] %v10706_v5  ;;  %v5092_v8 = vshrl.u32 %v5091_v30, 23  ;;  %v4366_v21 = vsel %vm10518_vm8, 0, %v4364_v3  ;;  %v4371_v47 = vadd.f32 -0.4999988, %v4370_v40  ;;  %v10728_v11 = vpop.f32.mrf.mxu2 }
 0x3e1   : > { %13264 = vst [vmem:[#allocation28_spill] sm:$0xff] %v10715_v45  ;;  %v4067_v63 = vmul.f32 %v4066_v31, %v10638_v0  ;;  %v10722_v56 = vadd.f32 %v4758_v2, %v4740_v37  ;;  %v4525_v51 = vmul.f32 %v4524_v23, %v10609_v20  ;;  %v4059_v6 = vadd.f32 0.041655596, %v4058_v53 }
 0x3e2   : > { %13261 = vst [vmem:[#allocation17_spill] sm:$0xff] %v10703_v48  ;;  %v4188_v17 = vsub.s32 0, %v10698_v44  ;;  %v4380_v30 = vadd.f32 1.0, %v4379_v61  ;;  %vm4187_vm14 = vcmp.lt.s32.totalorder %v10698_v44, 0  ;;  %v10732_v52 = vmul.u32 %v5605_v43, %v10427_v57 }
 0x3e3   : > { %13265 = vst [vmem:[#allocation8_spill] sm:$0xff] %v10722_v56  ;;  %v4383_v19 = vadd.s32 3, %v4366_v21  ;;  %v4519_v2 = vsel %vm4396_vm6, %v4518_v60, %v10216_v15  ;;  %v4534_v3 = vmul.f32 %v4533_v42, %v10609_v20  ;;  %v6320_v40 = vadd.s32 4294967169, %v5092_v8 }
 0x3e4   : > { %13266 = vst [vmem:[#allocation31_spill] sm:$0xff] %v10728_v11  ;;  %v4372_v31 = vmul.f32 %v4371_v47, %v10555_v34  ;;  %v4053_v37 = vsub.s32 4, %v10254_v4  ;;  %v4068_v23 = vadd.f32 -0.16666654, %v4067_v63  ;;  %v5246_v53 = vand.u32 2139095040, %v10722_v56 }
 0x3e5   : > { %13267 = vst [vmem:[#allocation89_spill] sm:$0xff] %v10732_v52  ;;  %v4526_v61 = vadd.f32 -0.4999988, %v4525_v51  ;;  %v4060_v7 = vmul.f32 %v4059_v6, %v10638_v0  ;;  %v4189_v22 = vsel %vm4187_vm14, %v4188_v17, %v10698_v44  ;;  %v13268_v21 = vand.u32 65535, %v10687_v33 }
 0x3e6   : > { %v5627_v15 = vshrl.u32 %v10715_v45, 16  ;;  %v4381_v42 = vmul.f32 %v4380_v30, %v10531_v25  ;;  %v12853_v8 = vshll.u32 %v10732_v52, 16  ;;  %v4384_v47 = vand.u32 3, %v4383_v19  ;;  %v6027_v45 = vld [vmem:[%s12626_s6] sm:$0x7]  ;;  %v13272_v19 = vld [vmem:[#allocation12_spill] sm:$0xff] }
 0x3e7   : > { %v10746_v5 = vmul.u32 %v13268_v21, %v10427_v57  ;;  %v4521_v63 = vsel %vm10569_vm13, 0, %v4519_v2  ;;  %v4535_v51 = vadd.f32 1.0, %v4534_v3  ;;  %v5098_v6 = vadd.s32 1, %v6320_v40  ;;  %6030 = vperm.xlu2 %6428, %v6027_v45  }
 0x3e8   : > { %v4373_v17 = vadd.f32 1.0, %v4372_v31  ;;  %v4069_v33 = vmul.f32 %v4068_v23, %v10638_v0  ;;  %v4190_v21 = vclz %v4189_v22  ;;  %v5247_v48 = vshrl.u32 %v5246_v53, 23  ;;  %v10777_v31 = vpop.f32.mrf.mxu3 }
 0x3e9   : > { %13269 = vst [vmem:[#allocation90_spill] sm:$0xff] %v10746_v5  ;;  %v4527_v34 = vmul.f32 %v4526_v61, %v10609_v20  ;;  %v4054_v25 = vsel %vm3931_vm2, %v4053_v37, %v10254_v4  ;;  %v4061_v30 = vadd.f32 -0.4999988, %v4060_v7  ;;  %v10764_v13 = vmul.u32 %v5627_v15, %v10427_v57  ;;  %v10780_v7 = vpop.f32.mrf.mxu2  ;;  %v13291_v57 = vld [vmem:[#allocation61_spill] sm:$0xff] }
 0x3ea   : > { %v10767_v2 = vmul.u32 %v5627_v15, %v13272_v19  ;;  %v4387_v22 = vxor.u32 2147483648, %v4381_v42  ;;  %v4538_v3 = vadd.s32 3, %v4521_v63  ;;  %v10770_v40 = vmul.u32 %v5605_v43, %v13272_v19  ;;  %13276 = vst [vmem:[#allocation95_spill] sm:$0xff] %v10777_v31 }
 0x3eb   : > { %13271 = vst [vmem:[#allocation91_spill] sm:$0xff] %v10764_v13  ;;  %v10775_v20 = vadd.s32 %v12853_v8, %v10746_v5  ;;  %vm4386_vm11 = vcmp.eq.s32.totalorder %v4384_v47, 0  ;;  %v4536_v4 = vmul.f32 %v4535_v51, %v10589_v16  ;;  %vm5099_vm15 = vcmp.gt.s32.totalorder %v5098_v6, 0 }
 0x3ec   : > { %13273 = vst [vmem:[#allocation92_spill] sm:$0xff] %v10767_v2  ;;  %v4056_v45 = vsel %vm10616_vm5, 0, %v4054_v25  ;;  %v4070_v37 = vadd.f32 1.0, %v4069_v33  ;;  %v6277_v23 = vadd.s32 4294967294, %v4190_v21  ;;  %v6323_v43 = vadd.s32 4294967169, %v5247_v48 }
 0x3ed   : > { %13274 = vst [vmem:[#allocation93_spill] sm:$0xff] %v10770_v40  ;;  %v4390_v53 = vxor.u32 2147483648, %v4373_v17  ;;  %v4528_v61 = vadd.f32 1.0, %v4527_v34  ;;  %v4062_v15 = vmul.f32 %v4061_v30, %v10638_v0  ;;  %v12856_v63 = vand.u32 2147483647, %v10664_v12 }
 0x3ee   : > { %13275 = vst [vmem:[#allocation94_spill] sm:$0xff] %v10775_v20  ;;  %vm4382_vm12 = vweird.f32 %v13234_v38  ;;  %v4388_v8 = vsel %vm4386_vm11, %v4373_v17, %v4387_v22  ;;  %v4539_v31 = vand.u32 3, %v4538_v3  ;;  %v5100_v16 = vsel %vm5099_vm15, %v5098_v6, 0  ;;  %v13292_v20 = vld [vmem:[#allocation79_spill] sm:$0xff] }
 0x3ef   : > { %13277 = vst [vmem:[#allocation96_spill] sm:$0xff] %v10780_v7  ;;  %v12855_v51 = vand.u32 2147483647, %v10722_v56  ;;  %v4542_v58 = vxor.u32 2147483648, %v4536_v4  ;;  %v4073_v60 = vadd.s32 3, %v4056_v45  ;;  %vm4385_vm10 = vcmp.lt.s32.totalorder %v4384_v47, 2 }
 0x3f0   : > { %vm4389_vm8 = vcmp.eq.s32.totalorder %v4384_v47, 2  ;;  %v4071_v49 = vmul.f32 %v4070_v37, %v10625_v55  ;;  %vm6278_vm1 = vcmp.lt.s32.totalorder %v6277_v23, 0  ;;  %v5253_v33 = vadd.s32 1, %v6323_v43  ;;  %v10793_v30 = vpop.f32.mrf.mxu3 }
 0x3f1   : > { %v4391_v48 = vsel %vm4389_vm8, %v4390_v53, %v4381_v42  ;;  %v4545_v34 = vxor.u32 2147483648, %v4528_v61  ;;  %v4063_v0 = vadd.f32 1.0, %v4062_v15  ;;  %v5095_v21 = vand.u32 8388607, %v12856_v63  ;;  %13278 = vst [vmem:[#allocation97_spill] sm:$0xff] %v10793_v30  ;;  %v3163_v53 = vpop.f32.mrf.mxu2 }
 0x3f2   : > { %v5102_v25 = vand.u32 31, %v5100_v16  ;;  %v4392_v17 = vsel %vm4385_vm10, %v4388_v8, %v4391_v48  ;;  %vm4541_vm6 = vcmp.eq.s32.totalorder %v4539_v31, 0  ;;  %v5250_v6 = vand.u32 8388607, %v12855_v51  ;;  %v13279_v48 = vld [vmem:[#allocation5_spill] sm:$0xff] }
 0x3f3   : > { %v4543_v22 = vsel %vm4541_vm6, %v4528_v61, %v4542_v58  ;;  %v4074_v47 = vand.u32 3, %v4073_v60  ;;  %v4193_v3 = vsel %vm6278_vm1, 0, %v6277_v23  ;;  %vm4537_vm13 = vweird.f32 %v13239_v41 }
 0x3f4   : > { %vm4540_vm2 = vcmp.lt.s32.totalorder %v4539_v31, 2  ;;  %vm4544_vm5 = vcmp.eq.s32.totalorder %v4539_v31, 2  ;;  %v4077_v55 = vxor.u32 2147483648, %v4071_v49  ;;  %vm5254_vm4 = vcmp.gt.s32.totalorder %v5253_v33, 0 }
 0x3f5   : > { %v10798_v42 = vsel %vm4382_vm12, nan, %v4392_v17  ;;  %v4546_v8 = vsel %vm4544_vm5, %v4545_v34, %v4536_v4  ;;  %v4080_v45 = vxor.u32 2147483648, %v4063_v0  ;;  %v5096_v37 = vor.u32 8388608, %v5095_v21  ;;  %v13280_v34 = vld [vmem:[#allocation6_spill] sm:$0xff] }
 0x3f6   : > { %v5103_v43 = vsub.s32 32, %v5102_v25  ;;  %v4547_v15 = vsel %vm4540_vm2, %v4543_v22, %v4546_v8  ;;  %vm4072_vm7 = vweird.f32 %v13246_v28  ;;  %v4198_v58 = vsub.s32 4294967266, %v4193_v3 }
 0x3f7   : > { %v5251_v60 = vor.u32 8388608, %v5250_v6  ;;  %vm4075_vm3 = vcmp.lt.s32.totalorder %v4074_v47, 2  ;;  %vm4076_vm9 = vcmp.eq.s32.totalorder %v4074_v47, 0  ;;  %vm4079_vm14 = vcmp.eq.s32.totalorder %v4074_v47, 2 }
 0x3f8   : > { %v5255_v31 = vsel %vm5254_vm4, %v5253_v33, 0  ;;  %v4078_v23 = vsel %vm4076_vm9, %v4063_v0, %v4077_v55  ;;  %v4178_v38 = vadd.s32 %v10497_v36, %v10492_v59  ;;  %v4194_v61 = vsub.s32 32, %v4193_v3 }
 0x3f9   : > { %v10805_v4 = vmul.f32 %v10565_v54, %v13279_v48  ;;  %v10809_v21 = vmul.f32 %v10565_v54, %v13280_v34  ;;  %v4548_v17 = vsel %vm4537_vm13, nan, %v4547_v15  ;;  %v4081_v6 = vsel %vm4079_vm14, %v4080_v45, %v4071_v49  ;;  %v10823_v48 = vpop.f32.mrf.mxu3 }
 0x3fa   : > { %v5117_v22 = vshll.u32 %v13187_v62, %v5102_v25  ;;  %v5118_v33 = vshrl.u32 %v13188_v24, %v5103_v43  ;;  %v10815_v0 = vshll.u32 %v5096_v37, 8  ;;  %v4199_v59 = vadd.s32 127, %v4198_v58 }
 0x3fb   : > { %13281 = vst [vmem:[#allocation5_spill] sm:$0xff] %v10809_v21  ;;  %v10817_v36 = vshrl.u32 %v5100_v16, 5  ;;  %v10819_v55 = vand.u32 31, %v5255_v31  ;;  %v10821_v8 = vshll.u32 %v5251_v60, 8  ;;  %v4082_v54 = vsel %vm4075_vm3, %v4078_v23, %v4081_v6 }
 0x3fc   : > { %13282 = vst [vmem:[#allocation6_spill] sm:$0xff] %v10815_v0  ;;  %v5108_v41 = vshll.u32 %v12929_v27, %v5102_v25  ;;  %v5111_v49 = vshll.u32 %v12930_v26, %v5102_v25  ;;  %v4195_v45 = vshll.u32 %v10698_v44, %v4193_v3  ;;  %v4196_v15 = vshrl.u32 %v4178_v38, %v4194_v61  ;;  %v13285_v38 = vld [vmem:[#allocation25_spill] sm:$0xff] }
 0x3fd   : > { %13283 = vst [vmem:[#allocation98_spill] sm:$0xff] %v10821_v8  ;;  %v5109_v37 = vshrl.u32 %v12930_v26, %v5103_v43  ;;  %v5112_v16 = vshrl.u32 %v12931_v29, %v5103_v43  ;;  %v5114_v58 = vshll.u32 %v12931_v29, %v5102_v25  ;;  %v5115_v60 = vshrl.u32 %v13187_v62, %v5103_v43 }
 0x3fe   : > { %v5105_v34 = vshll.u32 %v12936_v46, %v5102_v25  ;;  %v5106_v47 = vshrl.u32 %v12929_v27, %v5103_v43  ;;  %v5119_v23 = vor.u32 %v5118_v33, %v5117_v22  ;;  %v4200_v6 = vshll.u32 %v4199_v59, 23  ;;  %v3166_v25 = vpop.f32.mrf.mxu2 }
 0x3ff   : > { %vm5123_vm11 = vcmp.lt.s32.totalorder %v10817_v36, 4  ;;  %v10837_v51 = vand.u32 65535, %v10815_v0  ;;  %v10839_v44 = vshrl.u32 %v5255_v31, 5  ;;  %v4083_v3 = vsel %vm4072_vm7, nan, %v4082_v54 }
 0x400   : > { %vm4086_vm15 = vcmp.lt.s32.totalorder %v13285_v38, 0  ;;  %v5104_v61 = vshrl.u32 %v12936_v46, %v5103_v43  ;;  %vm5120_vm12 = vcmp.lt.s32.totalorder %v10817_v36, 1  ;;  %vm5121_vm10 = vcmp.lt.s32.totalorder %v10817_v36, 2 }
 0x401   : > { %13284 = vst [vmem:[#allocation99_spill] sm:$0xff] %v10837_v51  ;;  %v4197_v22 = vor.u32 %v4196_v15, %v4195_v45  ;;  %v5110_v33 = vor.u32 %v5109_v37, %v5108_v41  ;;  %v5113_v59 = vor.u32 %v5112_v16, %v5111_v49  ;;  %v5116_v63 = vor.u32 %v5115_v60, %v5114_v58  ;;  %v13289_v45 = vld [vmem:[#allocation86_spill] sm:$0xff]  ;;  %v3198_v58 = vpop.f32.mrf.mxu3 }
 0x402   : > { %vm5122_vm8 = vcmp.lt.s32.totalorder %v10817_v36, 3  ;;  %v5107_v31 = vor.u32 %v5106_v47, %v5105_v34  ;;  %v5133_v28 = vsel %vm5123_vm11, %v5119_v23, 1326507024  ;;  %v10851_v54 = vsub.s32 32, %v10819_v55  ;;  %v13290_v37 = vld [vmem:[#allocation62_spill] sm:$0xff] }
 0x403   : > { %v13286_v43 = vand.u32 2147483647, %v13285_v38  ;;  %v4201_v12 = vor.u32 4788187, %v4200_v6  ;;  %v10861_v41 = vshll.u32 %v12936_v46, %v10819_v55  ;;  %v10865_v49 = vshll.u32 %v12929_v27, %v10819_v55 }
 0x404   : > { %v3164_v15 = vadd.f32 %v3163_v53, %v13289_v45  ;;  %v3167_v16 = vadd.f32 %v3166_v25, %v13290_v37  ;;  %v10871_v60 = vsel %vm5120_vm12, %v5104_v61, %v5107_v31  ;;  %v5125_v34 = vsel %vm5123_vm11, %v5113_v59, 2102212464 }
 0x405   : > { %vm10855_vm1 = vcmp.le.f32.partialorder %v13286_v43, 0.7853982  ;;  %v3199_v47 = vadd.f32 %v3198_v58, %v13290_v37  ;;  %v4204_v23 = vcvt.s32.f32 %v4197_v22  ;;  %v5129_v6 = vsel %vm5123_vm11, %v5116_v63, 920167782 }
 0x406   : > { %v5132_v43 = vsel %vm5120_vm12, %v5110_v33, %v5113_v59  ;;  %v5134_v53 = vsel %vm5122_vm8, %v5116_v63, %v5133_v28  ;;  %v4555_v25 = vmul.f32 %v10798_v42, %v3167_v16  ;;  %v4202_v61 = vand.u32 2147483647, %v4201_v12 }
 0x407   : > { %v4556_v2 = vmul.f32 %v4548_v17, %v3199_v47  ;;  %v4208_v13 = vsub.s32 4, %v10649_v39  ;;  %v12863_v40 = vand.u32 2147483647, %v13291_v57  ;;  %v10887_v22 = vsel %vm5122_vm8, %v5110_v33, %v5125_v34 }
 0x408   : > { %v10891_v37 = vsel %vm5120_vm12, %v5107_v31, %v5110_v33  ;;  %4621 = vmatpush.msrb.mxu0 %v4555_v25  ;;  %v4553_v58 = vmul.f32 %v4083_v3, %v3164_v15  ;;  %v3636_v63 = vshll.u32 %v12936_v46, %v13292_v20  ;;  %v10897_v12 = vsel %vm5122_vm8, %v5113_v59, %v5129_v6  ;;  %v13294_v59 = vld [vmem:[#allocation82_spill] sm:$0xff] }
 0x409   : > { %v10901_v42 = vshrl.u32 %v12929_v27, %v10851_v54  ;;  %4653 = vmatpush.msrb.mxu1 %v4556_v2  ;;  %v4205_v17 = vmul.f32 %v4204_v23, %v4202_v61  ;;  %v3626_v28 = vand.u32 8388607, %v12863_v40  ;;  %v10907_v33 = vsel %vm5121_vm10, %v5132_v43, %v5134_v53  ;;  %v13295_v40 = vld [vmem:[#allocation78_spill] sm:$0xff] }
 0x40a   : > { %13293 = vst [vmem:[#allocation25_spill] sm:$0xff] %v10907_v33  ;;  %v10911_v3 = vshrl.u32 %v12930_v26, %v10851_v54  ;;  %4622 = vmatpush.msrb.mxu0 %v4553_v58  ;;  %v3637_v31 = vshrl.u32 %v12929_v27, %v13294_v59  ;;  %v3639_v15 = vshll.u32 %v12929_v27, %v13292_v20  ;;  %vm3651_vm6 = vcmp.lt.s32.totalorder %v13295_v40, 1 }
 0x40b   : > { %v10919_v2 = vshll.u32 %v12930_v26, %v10819_v55  ;;  %v5269_v16 = vshll.u32 %v12931_v29, %v10819_v55  ;;  %v4206_v34 = vxor.u32 2147483648, %v4205_v17  ;;  %v4209_v47 = vsel %vm4086_vm15, %v4208_v13, %v10649_v39 }
 0x40c   : > { %v3627_v23 = vor.u32 8388608, %v3626_v28  ;;  %v10926_v6 = vor.u32 %v3637_v31, %v3636_v63  ;;  %v3640_v43 = vshrl.u32 %v12930_v26, %v13294_v59  ;;  %v3642_v53 = vshll.u32 %v12930_v26, %v13292_v20 }
 0x40d   : > { %v5270_v25 = vshrl.u32 %v13187_v62, %v10851_v54  ;;  %v4207_v61 = vsel %vm4086_vm15, %v4206_v34, %v4205_v17  ;;  %v3643_v58 = vshrl.u32 %v12931_v29, %v13294_v59  ;;  %v4211_v13 = vsel %vm10855_vm1, 0, %v4209_v47  ;;  %v13297_v47 = vld [vmem:[#allocation18_spill] sm:$0xff] }
 0x40e   : > { %v4210_v39 = vsel %vm10855_vm1, %v13285_v38, %v4207_v61  ;;  %v10944_v63 = vor.u32 %v3640_v43, %v3639_v15  ;;  %vm3653_vm13 = vcmp.lt.s32.totalorder %v13295_v40, 3  ;;  %vm3652_vm2 = vcmp.lt.s32.totalorder %v13295_v40, 2  ;;  %v13296_v15 = vld [vmem:[#allocation27_spill] sm:$0xff] }
 0x40f   : > { %v4212_v20 = vmul.f32 %v4210_v39, %v4210_v39  ;;  %v3644_v28 = vor.u32 %v3643_v58, %v3642_v53  ;;  %v10948_v17 = vshll.u32 %v3627_v23, 8  ;;  %v10952_v31 = vshrl.u32 %v12931_v29, %v10851_v54  ;;  %v13298_v58 = vld [vmem:[#allocation13_spill] sm:$0xff] }
 0x410   : > { %v10956_v34 = vshll.u32 %v13187_v62, %v10819_v55  ;;  %v3659_v56 = vsel %vm3651_vm6, %v10926_v6, %v10944_v63  ;;  %v3665_v43 = vsel %vm3653_vm13, %v13297_v47, %v13296_v15  ;;  %v4228_v61 = vadd.s32 3, %v4211_v13 }
 0x411   : > { %v4213_v23 = vmul.f32 -0.001358992, %v4212_v20  ;;  %v4220_v53 = vmul.f32 -0.00019511016, %v4212_v20  ;;  %v3661_v19 = vsel %vm3653_vm13, %v3644_v28, %v13298_v58  ;;  %v10971_v55 = vshrl.u32 %v13188_v24, %v10851_v54 }
 0x412   : > { %v3662_v62 = vsel %vm3652_vm2, %v3659_v56, %v3661_v19  ;;  %v3663_v32 = vsel %vm3651_vm6, %v10944_v63, %v3644_v28  ;;  %v3668_v15 = vand.u32 65535, %v10948_v17  ;;  %v10979_v47 = vor.u32 %v5270_v25, %v5269_v16 }
 0x413   : > { %v4214_v13 = vadd.f32 0.041655596, %v4213_v23  ;;  %v4221_v5 = vadd.f32 0.008332121, %v4220_v53  ;;  %v3666_v58 = vsel %vm3652_vm2, %v3663_v32, %v3665_v43  ;;  %v3669_v52 = vshrl.u32 %v10948_v17, 16 }
 0x414   : > { %v3670_v24 = vand.u32 65535, %v3666_v58  ;;  %v3671_v1 = vshrl.u32 %v3666_v58, 16  ;;  %v3692_v9 = vand.u32 65535, %v3662_v62  ;;  %v4229_v56 = vand.u32 3, %v4228_v61 }
 0x415   : > { %v4215_v35 = vmul.f32 %v4214_v13, %v4212_v20  ;;  %v4222_v19 = vmul.f32 %v4221_v5, %v4212_v20  ;;  %v3693_v18 = vshrl.u32 %v3662_v62, 16  ;;  %v3196_v30 = vadd.f32 %v10823_v48, %v13289_v45 }
 0x416   : > { %v3672_v7 = vmul.u32 %v3670_v24, %v3668_v15  ;;  %v3673_v16 = vmul.u32 %v3671_v1, %v3668_v15  ;;  %v3674_v25 = vmul.u32 %v3670_v24, %v3669_v52  ;;  %v3635_v32 = vshrl.u32 %v12936_v46, %v13294_v59 }
 0x417   : > { %v4216_v23 = vadd.f32 -0.4999988, %v4215_v35  ;;  %v4223_v53 = vadd.f32 -0.16666654, %v4222_v19  ;;  %v3695_v43 = vmul.u32 %v3693_v18, %v3668_v15  ;;  %v3675_v57 = vmul.u32 %v3671_v1, %v3669_v52 }
 0x418   : > { %v3676_v29 = vshll.u32 %v3673_v16, 16  ;;  %v3678_v58 = vshll.u32 %v3674_v25, 16  ;;  %v3694_v26 = vmul.u32 %v3692_v9, %v3668_v15  ;;  %vm4230_vm5 = vcmp.lt.s32.totalorder %v4229_v56, 2 }
 0x419   : > { %v4217_v13 = vmul.f32 %v4216_v23, %v4212_v20  ;;  %v4224_v5 = vmul.f32 %v4223_v53, %v4212_v20  ;;  %v3696_v62 = vmul.u32 %v3692_v9, %v3669_v52  ;;  %v3697_v48 = vmul.u32 %v3693_v18, %v3669_v52 }
 0x41a   : > { %vm3680_vm4 = vc.u32 %v3672_v7, %v3676_v29  ;;  %v3682_v61 = vadd.s32 %v3676_v29, %v3672_v7  ;;  %v3698_v45 = vshll.u32 %v3695_v43, 16  ;;  %v3677_v35 = vshrl.u32 %v3673_v16, 16 }
 0x41b   : > { %v4218_v27 = vadd.f32 1.0, %v4217_v13  ;;  %v4225_v24 = vadd.f32 1.0, %v4224_v5  ;;  %v3681_v19 = vsel %vm3680_vm4, 1, %v12925_v14  ;;  %v3700_v59 = vshll.u32 %v3696_v62, 16 }
 0x41c   : > { %v3683_v21 = vadd.s32 %v3681_v19, %v3675_v57  ;;  %vm3684_vm7 = vc.u32 %v3682_v61, %v3678_v58  ;;  %vm3702_vm3 = vc.u32 %v3694_v26, %v3698_v45  ;;  %vm13299_vm9 = vcmp.lt.s32.totalorder %v13295_v40, 4 }
 0x41d   : > { %v4226_v1 = vmul.f32 %v4225_v24, %v4210_v39  ;;  %v4235_v11 = vxor.u32 2147483648, %v4218_v27  ;;  %v3685_v15 = vsel %vm3684_vm7, 1, %v12925_v14  ;;  %v3703_v20 = vsel %vm3702_vm3, 1, %v12925_v14 }
 0x41e   : > { %v3656_v29 = vsel %vm13299_vm9, %v3644_v28, 2102212464  ;;  %v3687_v9 = vadd.s32 %v3685_v15, %v3683_v21  ;;  %v3704_v18 = vadd.s32 %v3698_v45, %v3694_v26  ;;  %v3705_v52 = vadd.s32 %v3703_v20, %v3697_v48 }
 0x41f   : > { %vm4231_vm14 = vcmp.eq.s32.totalorder %v4229_v56, 0  ;;  %v4232_v7 = vxor.u32 2147483648, %v4226_v1  ;;  %vm4234_vm11 = vcmp.eq.s32.totalorder %v4229_v56, 2  ;;  %v3679_v16 = vshrl.u32 %v3674_v25, 16 }
 0x420   : > { %v3655_v57 = vsel %vm3651_vm6, %v3635_v32, %v10926_v6  ;;  %v3688_v39 = vadd.s32 %v3687_v9, %v3677_v35  ;;  %v3699_v23 = vshrl.u32 %v3695_v43, 16  ;;  %vm3706_vm15 = vc.u32 %v3704_v18, %v3700_v59 }
 0x421   : > { %v4233_v53 = vsel %vm4231_vm14, %v4218_v27, %v4232_v7  ;;  %v4236_v58 = vsel %vm4234_vm11, %v4235_v11, %v4226_v1  ;;  %v3657_v28 = vsel %vm3653_vm13, %v10944_v63, %v3656_v29  ;;  %v3707_v26 = vsel %vm3706_vm15, 1, %v12925_v14 }
 0x422   : > { %vm4227_vm12 = vweird.f32 %v13285_v38  ;;  %v4237_v21 = vsel %vm4230_vm5, %v4233_v53, %v4236_v58  ;;  %v3701_v25 = vshrl.u32 %v3696_v62, 16  ;;  %v3709_v13 = vadd.s32 %v3707_v26, %v3705_v52 }
 0x423   : > { %vm5278_vm8 = vcmp.lt.s32.totalorder %v10839_v44, 4  ;;  %v4238_v6 = vsel %vm4227_vm12, nan, %v4237_v21  ;;  %v11003_v32 = vadd.s32 %v3688_v39, %v3679_v16  ;;  %v11005_v43 = vadd.s32 %v3704_v18, %v3700_v59  ;;  %v13314_v21 = vld [vmem:[#allocation84_spill] sm:$0xff] }
 0x424   : > { %v5140_v27 = vshrl.u32 %v10907_v33, 16  ;;  %v4554_v11 = vmul.f32 %v4238_v6, %v3196_v30  ;;  %v3658_v63 = vsel %vm3652_vm2, %v3655_v57, %v3657_v28  ;;  %v3710_v5 = vadd.s32 %v3709_v13, %v3699_v23  ;;  %v4715_v30 = vpop.permute.xlu0 %4714 }
 0x425   : > { %v5262_v38 = vor.u32 %v10901_v42, %v10861_v41  ;;  %v5265_v56 = vor.u32 %v10911_v3, %v10865_v49  ;;  %v5268_v62 = vor.u32 %v10952_v31, %v10919_v2  ;;  %v5274_v61 = vor.u32 %v10971_v55, %v10956_v34 }
 0x426   : > { %vm5275_vm1 = vcmp.lt.s32.totalorder %v10839_v44, 1  ;;  %vm5277_vm6 = vcmp.lt.s32.totalorder %v10839_v44, 3  ;;  %v5284_v40 = vsel %vm5278_vm8, %v10979_v47, 920167782  ;;  %4654 = vmatpush.msrb.mxu1 %v4554_v11  ;;  %v3711_v41 = vadd.s32 %v3710_v5, %v3701_v25  ;;  %v13315_v25 = vld [vmem:[#allocation31_spill] sm:$0xff]  ;;  %v13334_v11 = vld [vmem:[#allocation61_spill] sm:$0xff] }
 0x427   : > { %v11027_v49 = vsel %vm5121_vm10, %v10891_v37, %v10897_v12  ;;  %v5259_v42 = vshrl.u32 %v12936_v46, %v10851_v54  ;;  %v3712_v3 = vmul.u32 %v10948_v17, %v3658_v63  ;;  %vm3714_vm13 = vc.u32 %v11003_v32, %v11005_v43  ;;  %v13316_v63 = vld [vmem:[#allocation5_spill] sm:$0xff] }
 0x428   : > { %13300 = vst [vmem:[#allocation86_spill] sm:$0xff] %v11027_v49  ;;  %v12882_v2 = vand.u32 65535, %v10907_v33  ;;  %v11036_v31 = vmul.u32 %v5140_v27, %v10837_v51  ;;  %v5280_v34 = vsel %vm5278_vm8, %v5268_v62, 2102212464  ;;  %v3715_v55 = vadd.s32 1, %v3711_v41 }
 0x429   : > { %vm5276_vm2 = vcmp.lt.s32.totalorder %v10839_v44, 2  ;;  %v5283_v37 = vsel %vm5275_vm1, %v5262_v38, %v5265_v56  ;;  %v5285_v54 = vsel %vm5277_vm6, %v5268_v62, %v5284_v40  ;;  %v5288_v12 = vsel %vm5278_vm8, %v5274_v61, 1326507024 }
 0x42a   : > { %13301 = vst [vmem:[#allocation62_spill] sm:$0xff] %v11036_v31  ;;  %v11048_v17 = vshrl.u32 %v10815_v0, 16  ;;  %v11051_v48 = vand.u32 65535, %v10821_v8  ;;  %v4729_v45 = vmul.f32 %v4715_v30, %v13247_v50  ;;  %v3716_v24 = vsel %vm3714_vm13, %v3715_v55, %v3711_v41  ;;  %v13323_v55 = vld [vmem:[#allocation83_spill] sm:$0xff] }
 0x42b   : > { %v11058_v35 = vsel %vm5121_vm10, %v10871_v60, %v10887_v22  ;;  %v5279_v19 = vsel %vm5275_vm1, %v5259_v42, %v5262_v38  ;;  %v5281_v59 = vsel %vm5277_vm6, %v5265_v56, %v5280_v34  ;;  %v3717_v1 = vadd.s32 %v3716_v24, %v3712_v3  ;;  %v13317_v38 = vld [vmem:[#allocation63_spill] sm:$0xff]  ;;  %v13322_v3 = vld [vmem:[#allocation81_spill] sm:$0xff] }
 0x42c   : > { %13302 = vst [vmem:[#allocation79_spill] sm:$0xff] %v11048_v17  ;;  %v5162_v15 = vshrl.u32 %v11027_v49, 16  ;;  %v11067_v20 = vsel %vm5276_vm2, %v5283_v37, %v5285_v54  ;;  %v5287_v50 = vsel %vm5275_vm1, %v5265_v56, %v5268_v62  ;;  %v5289_v36 = vsel %vm5277_vm6, %v10979_v47, %v5288_v12  ;;  %v4753_v26 = vpop.permute.xlu0 %4752 }
 0x42d   : > { %13303 = vst [vmem:[#allocation82_spill] sm:$0xff] %v11051_v48  ;;  %v11077_v60 = vmul.u32 %v12882_v2, %v10837_v51  ;;  %v12881_v22 = vshll.u32 %v11036_v31, 16  ;;  %v11081_v29 = vshrl.u32 %v10821_v8, 16  ;;  %v3718_v9 = vadd.s32 536870912, %v3717_v1 }
 0x42e   : > { %13304 = vst [vmem:[#allocation78_spill] sm:$0xff] %v11058_v35  ;;  %v11088_v7 = vsel %vm5276_vm2, %v5279_v19, %v5281_v59  ;;  %v4730_v47 = vmul.f32 %v4715_v30, %v13257_v10  ;;  %v11093_v16 = vsel %vm5276_vm2, %v5287_v50, %v5289_v36  ;;  %v5317_v57 = vshrl.u32 %v11067_v20, 16 }
 0x42f   : > { %13305 = vst [vmem:[#allocation27_spill] sm:$0xff] %v11067_v20  ;;  %v4737_v39 = vadd.f32 %v4729_v45, %v10805_v4  ;;  %v3719_v23 = vshrl.u32 %v3718_v9, 30  ;;  %v11098_v53 = vmul.u32 %v5140_v27, %v11048_v17  ;;  %v11101_v58 = vmul.u32 %v5162_v15, %v10837_v51  ;;  %v13450_v51 = vld [vmem:[#allocation49_spill] sm:$0xff] }
 0x430   : > { %13306 = vst [vmem:[#allocation18_spill] sm:$0xff] %v11077_v60  ;;  %v11104_v28 = vmul.u32 %v5162_v15, %v11048_v17  ;;  %v12880_v10 = vand.u32 65535, %v11093_v16  ;;  %v11110_v44 = vadd.s32 %v12881_v22, %v11077_v60  ;;  %v11115_v13 = vadd.f32 %v13315_v25, %v13314_v21 }
 0x431   : > { %13307 = vst [vmem:[#allocation13_spill] sm:$0xff] %v11081_v29  ;;  %v3720_v6 = vshll.u32 %v3719_v23, 30  ;;  %v5295_v27 = vshrl.u32 %v11093_v16, 16  ;;  %v4738_v5 = vadd.f32 %v4730_v47, %v13316_v63  ;;  %v12883_v56 = vand.u32 2147483647, %v13317_v38 }
 0x432   : > { %13308 = vst [vmem:[#allocation100_spill] sm:$0xff] %v11088_v7  ;;  %v11123_v62 = vmul.u32 %v5317_v57, %v11051_v48  ;;  %v11126_v61 = vmul.u32 %v5317_v57, %v11081_v29  ;;  %v11128_v40 = vadd.f32 %v4753_v26, %v4737_v39  ;;  %v11133_v41 = vmul.u32 %v12880_v10, %v11051_v48  ;;  %v13327_v57 = vld [vmem:[#allocation80_spill] sm:$0xff] }
 0x433   : > { %13309 = vst [vmem:[#allocation101_spill] sm:$0xff] %v11093_v16  ;;  %v3721_v30 = vsub.s32 %v3717_v1, %v3720_v6  ;;  %v3781_v42 = vand.u32 8388607, %v12883_v56  ;;  %v3791_v34 = vshll.u32 %v12936_v46, %v13322_v3  ;;  %v13324_v37 = vmov 2475754826  }
 0x434   : > { %13310 = vst [vmem:[#allocation102_spill] sm:$0xff] %v11098_v53  ;;  %v3792_v54 = vshrl.u32 %v13324_v37, %v13323_v55  ;;  %v3794_v45 = vshll.u32 %v13324_v37, %v13322_v3  ;;  %v13325_v24 = vmov 2131351028   ;;  %v13326_v50 = vmov 2102212464  }
 0x435   : > { %13311 = vst [vmem:[#allocation103_spill] sm:$0xff] %v11101_v58  ;;  %vm3722_vm10 = vcmp.lt.s32.totalorder %v3721_v30, 0  ;;  %v3723_v12 = vsub.s32 0, %v3721_v30  ;;  %v3795_v19 = vshrl.u32 %v13325_v24, %v13323_v55  ;;  %v3782_v59 = vor.u32 8388608, %v3781_v42  ;;  %v13449_v58 = vld [vmem:[#allocation39_spill] sm:$0xff] }
 0x436   : > { %13312 = vst [vmem:[#allocation104_spill] sm:$0xff] %v11104_v28  ;;  %v11145_v1 = vor.u32 %v3792_v54, %v3791_v34  ;;  %v3797_v15 = vshll.u32 %v13325_v24, %v13322_v3  ;;  %v3798_v36 = vshrl.u32 %v13326_v50, %v13323_v55  ;;  %vm3806_vm5 = vcmp.lt.s32.totalorder %v13327_v57, 1  ;;  %v13329_v34 = vld [vmem:[#allocation30_spill] sm:$0xff]  ;;  %v13330_v54 = vld [vmem:[#allocation20_spill] sm:$0xff] }
 0x437   : > { %13313 = vst [vmem:[#allocation105_spill] sm:$0xff] %v11110_v44  ;;  %v3724_v9 = vsel %vm3722_vm10, %v3723_v12, %v3721_v30  ;;  %v3796_v47 = vor.u32 %v3795_v19, %v3794_v45  ;;  %vm3808_vm4 = vcmp.lt.s32.totalorder %v13327_v57, 3  ;;  %vm3807_vm7 = vcmp.lt.s32.totalorder %v13327_v57, 2  ;;  %v13342_v28 = vld [vmem:[#allocation76_spill] sm:$0xff] }
 0x438   : > { %13318 = vst [vmem:[#allocation84_spill] sm:$0xff] %v11123_v62  ;;  %v3725_v39 = vclz %v3724_v9  ;;  %v3799_v25 = vor.u32 %v3798_v36, %v3797_v15  ;;  %v11154_v6 = vshll.u32 %v3782_v59, 8  ;;  %v11157_v63 = vmul.u32 %v5295_v27, %v11051_v48  ;;  %v13332_v15 = vld [vmem:[#allocation72_spill] sm:$0xff] }
 0x439   : > { %13319 = vst [vmem:[#allocation31_spill] sm:$0xff] %v11126_v61  ;;  %v3743_v42 = vsub.s32 4, %v3719_v23  ;;  %v3814_v3 = vsel %vm3806_vm5, %v11145_v1, %v3796_v47  ;;  %v3820_v12 = vsel %vm3808_vm4, %v13330_v54, %v13329_v34  ;;  %v11167_v45 = vmul.u32 %v5295_v27, %v11081_v29 }
 0x43a   : > { %13320 = vst [vmem:[#allocation5_spill] sm:$0xff] %v11128_v40  ;;  %v6268_v19 = vadd.s32 4294967294, %v3725_v39  ;;  %v3816_v59 = vsel %vm3808_vm4, %v3799_v25, %v13332_v15  ;;  %v3818_v36 = vsel %vm3806_vm5, %v3796_v47, %v3799_v25  ;;  %v11174_v9 = vadd.f32 %v4753_v26, %v4738_v5 }
 0x43b   : > { %13321 = vst [vmem:[#allocation63_spill] sm:$0xff] %v11133_v41  ;;  %vm3621_vm3 = vcmp.lt.s32.totalorder %v13334_v11, 0  ;;  %v3821_v52 = vsel %vm3807_vm7, %v3818_v36, %v3820_v12  ;;  %v3823_v34 = vand.u32 65535, %v11154_v6  ;;  %v3713_v27 = vadd.s32 %v11005_v43, %v11003_v32  ;;  %v13335_v36 = vld [vmem:[#allocation51_spill] sm:$0xff] }
 0x43c   : > { %13328 = vst [vmem:[#allocation81_spill] sm:$0xff] %v11157_v63  ;;  %vm6269_vm9 = vcmp.lt.s32.totalorder %v6268_v19, 0  ;;  %v3817_v39 = vsel %vm3807_vm7, %v3814_v3, %v3816_v59  ;;  %v3824_v54 = vshrl.u32 %v11154_v6, 16  ;;  %v3744_v26 = vsel %vm3621_vm3, %v3743_v42, %v3719_v23 }
 0x43d   : > { %13331 = vst [vmem:[#allocation83_spill] sm:$0xff] %v11167_v45  ;;  %v3728_v15 = vsel %vm6269_vm9, 0, %v6268_v19  ;;  %v3825_v5 = vand.u32 65535, %v3821_v52  ;;  %v3826_v10 = vshrl.u32 %v3821_v52, 16  ;;  %v3848_v43 = vshrl.u32 %v3817_v39, 16 }
 0x43e   : > { %13333 = vst [vmem:[#allocation80_spill] sm:$0xff] %v11174_v9  ;;  %v3729_v22 = vsub.s32 32, %v3728_v15  ;;  %v3730_v2 = vshll.u32 %v3721_v30, %v3728_v15  ;;  %v3733_v12 = vsub.s32 4294967266, %v3728_v15  ;;  %v13336_v7 = vand.u32 2147483647, %v13334_v11  ;;  %v13339_v15 = vld [vmem:[#allocation71_spill] sm:$0xff] }
 0x43f   : > { %v3827_v18 = vmul.u32 %v3825_v5, %v3823_v34  ;;  %v3828_v56 = vmul.u32 %v3826_v10, %v3823_v34  ;;  %v3829_v32 = vmul.u32 %v3825_v5, %v3824_v54  ;;  %v3847_v23 = vand.u32 65535, %v3817_v39 }
 0x440   : > { %vm11190_vm14 = vcmp.le.f32.partialorder %v13336_v7, 0.7853982  ;;  %v3731_v19 = vshrl.u32 %v3713_v27, %v3729_v22  ;;  %v3734_v59 = vadd.s32 127, %v3733_v12  ;;  %v3326_v4 = vshll.u32 %v12936_v46, %v13339_v15 }
 0x441   : > { %v3746_v30 = vsel %vm11190_vm14, 0, %v3744_v26  ;;  %v3831_v42 = vshll.u32 %v3828_v56, 16  ;;  %v3850_v35 = vmul.u32 %v3848_v43, %v3823_v34  ;;  %v13340_v7 = vand.u32 2147483647, %v13335_v36 }
 0x442   : > { %v3732_v5 = vor.u32 %v3731_v19, %v3730_v2  ;;  %v3735_v8 = vshll.u32 %v3734_v59, 23  ;;  %v3830_v61 = vmul.u32 %v3826_v10, %v3824_v54  ;;  %v3833_v22 = vshll.u32 %v3829_v32, 16 }
 0x443   : > { %v11201_v0 = vand.u32 8388607, %v13340_v7  ;;  %vm3835_vm11 = vc.u32 %v3827_v18, %v3831_v42  ;;  %v3837_v27 = vadd.s32 %v3831_v42, %v3827_v18  ;;  %v3851_v26 = vmul.u32 %v3847_v23, %v3824_v54 }
 0x444   : > { %v3736_v39 = vor.u32 4788187, %v3735_v8  ;;  %v3739_v12 = vcvt.s32.f32 %v3732_v5  ;;  %v3836_v52 = vsel %vm3835_vm11, 1, %v12925_v14  ;;  %v3790_v62 = vshrl.u32 %v12936_v46, %v13323_v55 }
 0x445   : > { %vm13341_vm15 = vcmp.lt.s32.totalorder %v13327_v57, 4  ;;  %v3849_v19 = vmul.u32 %v3847_v23, %v3823_v34  ;;  %v3853_v59 = vshll.u32 %v3850_v35, 16  ;;  %v3852_v7 = vmul.u32 %v3848_v43, %v3824_v54 }
 0x446   : > { %v3811_v2 = vsel %vm13341_vm15, %v3799_v25, 2102212464  ;;  %v3737_v45 = vand.u32 2147483647, %v3736_v39  ;;  %v3327_v8 = vshrl.u32 %v13324_v37, %v13342_v28  ;;  %v3810_v18 = vsel %vm3806_vm5, %v3790_v62, %v11145_v1 }
 0x447   : > { %v3812_v10 = vsel %vm3808_vm4, %v3796_v47, %v3811_v2  ;;  %v3832_v42 = vshrl.u32 %v3828_v56, 16  ;;  %v3838_v5 = vadd.s32 %v3836_v52, %v3830_v61  ;;  %vm3839_vm12 = vc.u32 %v3837_v27, %v3833_v22 }
 0x448   : > { %v3740_v55 = vmul.f32 %v3739_v12, %v3737_v45  ;;  %v3763_v16 = vadd.s32 3, %v3746_v30  ;;  %v3840_v25 = vsel %vm3839_vm12, 1, %v12925_v14  ;;  %v3855_v34 = vshll.u32 %v3851_v26, 16 }
 0x449   : > { %v3834_v23 = vshrl.u32 %v3829_v32, 16  ;;  %v3842_v39 = vadd.s32 %v3840_v25, %v3838_v5  ;;  %vm3857_vm8 = vc.u32 %v3849_v19, %v3853_v59  ;;  %v3859_v47 = vadd.s32 %v3853_v59, %v3849_v19  ;;  %v13343_v59 = vld [vmem:[#allocation74_spill] sm:$0xff] }
 0x44a   : > { %v3741_v54 = vxor.u32 2147483648, %v3740_v55  ;;  %v3813_v43 = vsel %vm3807_vm7, %v3810_v18, %v3812_v10  ;;  %v3854_v2 = vshrl.u32 %v3850_v35, 16  ;;  %v3858_v29 = vsel %vm3857_vm8, 1, %v12925_v14 }
 0x44b   : > { %v3843_v62 = vadd.s32 %v3842_v39, %v3832_v42  ;;  %v3856_v56 = vshrl.u32 %v3851_v26, 16  ;;  %v3860_v61 = vadd.s32 %v3858_v29, %v3852_v7  ;;  %vm3861_vm1 = vc.u32 %v3859_v47, %v3855_v34  ;;  %v13345_v39 = vld [vmem:[#allocation67_spill] sm:$0xff] }
 0x44c   : > { %v3742_v1 = vsel %vm3621_vm3, %v3741_v54, %v3740_v55  ;;  %v3862_v45 = vsel %vm3861_vm1, 1, %v12925_v14  ;;  %v11222_v32 = vadd.s32 %v3859_v47, %v3855_v34  ;;  %v3328_v52 = vor.u32 %v3327_v8, %v3326_v4  ;;  %v13344_v34 = vld [vmem:[#allocation24_spill] sm:$0xff] }
 0x44d   : > { %v3745_v57 = vsel %vm11190_vm14, %v13334_v11, %v3742_v1  ;;  %v11227_v30 = vadd.s32 %v3843_v62, %v3834_v23  ;;  %v3864_v35 = vadd.s32 %v3862_v45, %v3860_v61  ;;  %v3329_v22 = vshll.u32 %v13324_v37, %v13339_v15  ;;  %v13346_v47 = vld [vmem:[#allocation96_spill] sm:$0xff]  ;;  %v13347_v1 = vld [vmem:[#allocation26_spill] sm:$0xff]  ;;  %v13348_v45 = vld [vmem:[#allocation85_spill] sm:$0xff] }
 0x44e   : > { %v3747_v29 = vmul.f32 %v3745_v57, %v3745_v57  ;;  %v3330_v27 = vshrl.u32 %v13325_v24, %v13342_v28  ;;  %v3332_v12 = vshll.u32 %v13325_v24, %v13339_v15  ;;  %v3333_v4 = vshrl.u32 %v13326_v50, %v13342_v28 }
 0x44f   : > { %v11237_v26 = vand.u32 3, %v3763_v16  ;;  %v3865_v3 = vadd.s32 %v3864_v35, %v3854_v2  ;;  %v3867_v19 = vmul.u32 %v11154_v6, %v3813_v43  ;;  %vm3341_vm6 = vcmp.lt.s32.totalorder %v13343_v59, 1 }
 0x450   : > { %v3748_v10 = vmul.f32 -0.001358992, %v3747_v29  ;;  %v3755_v7 = vmul.f32 -0.00019511016, %v3747_v29  ;;  %v11241_v8 = vor.u32 %v3330_v27, %v3329_v22  ;;  %v3334_v18 = vor.u32 %v3333_v4, %v3332_v12 }
 0x451   : > { %v3866_v42 = vadd.s32 %v3865_v3, %v3856_v56  ;;  %vm3869_vm13 = vc.u32 %v11227_v30, %v11222_v32  ;;  %v3317_v15 = vor.u32 8388608, %v11201_v0  ;;  %vm3343_vm2 = vcmp.lt.s32.totalorder %v13343_v59, 3 }
 0x452   : > { %v3749_v16 = vadd.f32 0.041655596, %v3748_v10  ;;  %v3756_v5 = vadd.f32 0.008332121, %v3755_v7  ;;  %vm3342_vm10 = vcmp.lt.s32.totalorder %v13343_v59, 2  ;;  %v3349_v6 = vsel %vm3341_vm6, %v3328_v52, %v11241_v8 }
 0x453   : > { %v3870_v25 = vadd.s32 1, %v3866_v42  ;;  %v3351_v23 = vsel %vm3343_vm2, %v3334_v18, %v13344_v34  ;;  %v3353_v0 = vsel %vm3341_vm6, %v11241_v8, %v3334_v18  ;;  %v3161_v54 = vadd.f32 %v13346_v47, %v13345_v39 }
 0x454   : > { %v3750_v43 = vmul.f32 %v3749_v16, %v3747_v29  ;;  %v3757_v2 = vmul.f32 %v3756_v5, %v3747_v29  ;;  %v3325_v62 = vshrl.u32 %v12936_v46, %v13342_v28  ;;  %v3352_v61 = vsel %vm3342_vm10, %v3349_v6, %v3351_v23 }
 0x455   : > { %v3871_v56 = vsel %vm3869_vm13, %v3870_v25, %v3866_v42  ;;  %v3355_v35 = vsel %vm3343_vm2, %v13348_v45, %v13347_v1  ;;  %v11268_v22 = vshll.u32 %v3317_v15, 8  ;;  %vm3765_vm5 = vcmp.lt.s32.totalorder %v11237_v26, 2 }
 0x456   : > { %v3751_v27 = vadd.f32 -0.4999988, %v3750_v43  ;;  %v3758_v12 = vadd.f32 -0.16666654, %v3757_v2  ;;  %v3872_v4 = vadd.s32 %v3871_v56, %v3867_v19  ;;  %v3356_v3 = vsel %vm3342_vm10, %v3353_v0, %v3355_v35 }
 0x457   : > { %vm3762_vm4 = vweird.f32 %v13334_v11  ;;  %v3358_v28 = vand.u32 65535, %v11268_v22  ;;  %v3359_v10 = vshrl.u32 %v11268_v22, 16  ;;  %v3360_v7 = vand.u32 65535, %v3356_v3 }
 0x458   : > { %v3361_v42 = vshrl.u32 %v3356_v3, 16  ;;  %v3752_v16 = vmul.f32 %v3751_v27, %v3747_v29  ;;  %v3759_v5 = vmul.f32 %v3758_v12, %v3747_v29  ;;  %vm3766_vm7 = vcmp.eq.s32.totalorder %v11237_v26, 0 }
 0x459   : > { %v3873_v15 = vadd.s32 536870912, %v3872_v4  ;;  %v3362_v6 = vmul.u32 %v3360_v7, %v3358_v28  ;;  %v3364_v34 = vmul.u32 %v3360_v7, %v3359_v10  ;;  %v3383_v19 = vshrl.u32 %v3352_v61, 16 }
 0x45a   : > { %v3363_v25 = vmul.u32 %v3361_v42, %v3358_v28  ;;  %v3753_v23 = vadd.f32 1.0, %v3752_v16  ;;  %v3760_v47 = vadd.f32 1.0, %v3759_v5  ;;  %v3382_v43 = vand.u32 65535, %v3352_v61 }
 0x45b   : > { %v11277_v0 = vshrl.u32 %v3873_v15, 30  ;;  %vm3769_vm3 = vcmp.eq.s32.totalorder %v11237_v26, 2  ;;  %v3345_v2 = vsel %vm3341_vm6, %v3325_v62, %v3328_v52  ;;  %v3368_v1 = vshll.u32 %v3364_v34, 16 }
 0x45c   : > { %v3366_v56 = vshll.u32 %v3363_v25, 16  ;;  %v3761_v29 = vmul.f32 %v3760_v47, %v3745_v57  ;;  %v3770_v45 = vxor.u32 2147483648, %v3753_v23  ;;  %v3365_v27 = vmul.u32 %v3361_v42, %v3359_v10 }
 0x45d   : > { %v3875_v35 = vshll.u32 %v11277_v0, 30  ;;  %vm13349_vm9 = vcmp.lt.s32.totalorder %v13343_v59, 4  ;;  %v3385_v7 = vmul.u32 %v3383_v19, %v3358_v28  ;;  %v3386_v15 = vmul.u32 %v3382_v43, %v3359_v10 }
 0x45e   : > { %v3346_v12 = vsel %vm13349_vm9, %v3334_v18, 2102212464  ;;  %vm3370_vm14 = vc.u32 %v3362_v6, %v3366_v56  ;;  %v3372_v3 = vadd.s32 %v3366_v56, %v3362_v6  ;;  %v3767_v16 = vxor.u32 2147483648, %v3761_v29 }
 0x45f   : > { %v3771_v61 = vsel %vm3769_vm3, %v3770_v45, %v3761_v29  ;;  %v3876_v5 = vsub.s32 %v3872_v4, %v3875_v35  ;;  %v3367_v55 = vshrl.u32 %v3363_v25, 16  ;;  %v3371_v52 = vsel %vm3370_vm14, 1, %v12925_v14 }
 0x460   : > { %vm3374_vm11 = vc.u32 %v3372_v3, %v3368_v1  ;;  %v3384_v62 = vmul.u32 %v3382_v43, %v3358_v28  ;;  %v3768_v57 = vsel %vm3766_vm7, %v3753_v23, %v3767_v16  ;;  %v3373_v47 = vadd.s32 %v3371_v52, %v3365_v27 }
 0x461   : > { %vm3877_vm15 = vcmp.lt.s32.totalorder %v3876_v5, 0  ;;  %v3878_v42 = vsub.s32 0, %v3876_v5  ;;  %v3772_v18 = vsel %vm3765_vm5, %v3768_v57, %v3771_v61  ;;  %v3375_v6 = vsel %vm3374_vm11, 1, %v12925_v14 }
 0x462   : > { %v3387_v56 = vmul.u32 %v3383_v19, %v3359_v10  ;;  %v3388_v29 = vshll.u32 %v3385_v7, 16  ;;  %v3773_v4 = vsel %vm3762_vm4, nan, %v3772_v18  ;;  %v3377_v45 = vadd.s32 %v3375_v6, %v3373_v47 }
 0x463   : > { %v3879_v25 = vsel %vm3877_vm15, %v3878_v42, %v3876_v5  ;;  %v3390_v1 = vshll.u32 %v3386_v15, 16  ;;  %v4551_v28 = vmul.f32 %v3773_v4, %v3161_v54  ;;  %v3347_v23 = vsel %vm3343_vm2, %v11241_v8, %v3346_v12  ;;  %v13350_v12 = vld [vmem:[#allocation58_spill] sm:$0xff] }
 0x464   : > { %v3880_v43 = vclz %v3879_v25  ;;  %vm3392_vm12 = vc.u32 %v3384_v62, %v3388_v29  ;;  %v3369_v35 = vshrl.u32 %v3364_v34, 16  ;;  %v3378_v26 = vadd.s32 %v3377_v45, %v3367_v55  ;;  %v13354_v25 = vld [vmem:[#allocation77_spill] sm:$0xff] }
 0x465   : > { %v3393_v27 = vsel %vm3392_vm12, 1, %v12925_v14  ;;  %v3394_v3 = vadd.s32 %v3388_v29, %v3384_v62  ;;  %4623 = vmatpush.msrb.mxu0 %v4551_v28  ;;  %v3868_v11 = vadd.s32 %v11222_v32, %v11227_v30  ;;  %v3898_v54 = vsub.s32 4, %v11277_v0 }
 0x466   : > { %v6271_v19 = vadd.s32 4294967294, %v3880_v43  ;;  %v3395_v16 = vadd.s32 %v3393_v27, %v3387_v56  ;;  %v3348_v61 = vsel %vm3342_vm10, %v3345_v2, %v3347_v23  ;;  %v3389_v8 = vshrl.u32 %v3385_v7, 16 }
 0x467   : > { %vm3396_vm8 = vc.u32 %v3394_v3, %v3390_v1  ;;  %v3391_v55 = vshrl.u32 %v3386_v15, 16  ;;  %v12892_v52 = vand.u32 2147483647, %v13350_v12  ;;  %v3379_v57 = vadd.s32 %v3378_v26, %v3369_v35  ;;  %v13355_v35 = vld [vmem:[#allocation19_spill] sm:$0xff] }
 0x468   : > { %vm6272_vm1 = vcmp.lt.s32.totalorder %v6271_v19, 0  ;;  %v3397_v34 = vsel %vm3396_vm8, 1, %v12925_v14  ;;  %v3398_v42 = vadd.s32 %v3394_v3, %v3390_v1  ;;  %vm3776_vm6 = vcmp.lt.s32.totalorder %v13317_v38, 0 }
 0x469   : > { %v3883_v62 = vsel %vm6272_vm1, 0, %v6271_v19  ;;  %v3399_v47 = vadd.s32 %v3397_v34, %v3395_v16  ;;  %v13351_v2 = vand.u32 2147483647, %v13317_v38  ;;  %v3899_v15 = vsel %vm3776_vm6, %v3898_v54, %v11277_v0 }
 0x46a   : > { %v3884_v32 = vsub.s32 32, %v3883_v62  ;;  %v3885_v30 = vshll.u32 %v3876_v5, %v3883_v62  ;;  %v3888_v18 = vsub.s32 4294967266, %v3883_v62  ;;  %v3402_v4 = vmul.u32 %v11268_v22, %v3348_v61 }
 0x46b   : > { %vm11309_vm13 = vcmp.le.f32.partialorder %v13351_v2, 0.7853982  ;;  %v3400_v6 = vadd.s32 %v3399_v47, %v3389_v8  ;;  %v3484_v5 = vshll.u32 %v13324_v37, %v13354_v25  ;;  %vm3404_vm2 = vc.u32 %v3379_v57, %v3398_v42 }
 0x46c   : > { %v3886_v56 = vshrl.u32 %v3868_v11, %v3884_v32  ;;  %v3889_v29 = vadd.s32 127, %v3888_v18  ;;  %v3471_v1 = vand.u32 8388607, %v12892_v52  ;;  %v3481_v28 = vshll.u32 %v12936_v46, %v13354_v25  ;;  %v13356_v11 = vld [vmem:[#allocation75_spill] sm:$0xff] }
 0x46d   : > { %v3401_v45 = vadd.s32 %v3400_v6, %v3391_v55  ;;  %v3485_v0 = vshrl.u32 %v13325_v24, %v13355_v35  ;;  %v3487_v26 = vshll.u32 %v13325_v24, %v13354_v25  ;;  %v3482_v27 = vshrl.u32 %v13324_v37, %v13355_v35  ;;  %v13360_v25 = vld [vmem:[#allocation97_spill] sm:$0xff] }
 0x46e   : > { %v3887_v43 = vor.u32 %v3886_v56, %v3885_v30  ;;  %v3890_v23 = vshll.u32 %v3889_v29, 23  ;;  %v3488_v3 = vshrl.u32 %v13326_v50, %v13355_v35  ;;  %vm3496_vm10 = vcmp.lt.s32.totalorder %v13356_v11, 1  ;;  %v13358_v56 = vld [vmem:[#allocation22_spill] sm:$0xff] }
 0x46f   : > { %v3405_v22 = vadd.s32 1, %v3401_v45  ;;  %v3486_v54 = vor.u32 %v3485_v0, %v3484_v5  ;;  %vm3498_vm5 = vcmp.lt.s32.totalorder %v13356_v11, 3  ;;  %v3901_v61 = vsel %vm11309_vm13, 0, %v3899_v15  ;;  %v13359_v15 = vld [vmem:[#allocation38_spill] sm:$0xff] }
 0x470   : > { %v3891_v19 = vor.u32 4788187, %v3890_v23  ;;  %v3894_v16 = vcvt.s32.f32 %v3887_v43  ;;  %v3472_v55 = vor.u32 8388608, %v3471_v1  ;;  %v3489_v34 = vor.u32 %v3488_v3, %v3487_v26 }
 0x471   : > { %v3406_v8 = vsel %vm3404_vm2, %v3405_v22, %v3401_v45  ;;  %v4936_v62 = vand.u32 2139095040, %v11174_v9  ;;  %vm3497_vm4 = vcmp.lt.s32.totalorder %v13356_v11, 2  ;;  %v13357_v30 = vand.u32 2139095040, %v11128_v40 }
 0x472   : > { %v3892_v47 = vand.u32 2147483647, %v3891_v19  ;;  %v3407_v32 = vadd.s32 %v3406_v8, %v3402_v4  ;;  %v3483_v2 = vor.u32 %v3482_v27, %v3481_v28  ;;  %v3508_v6 = vsel %vm3496_vm10, %v3486_v54, %v3489_v34  ;;  %v13361_v19 = vld [vmem:[#allocation73_spill] sm:$0xff] }
 0x473   : > { %v11340_v18 = vshrl.u32 %v13357_v30, 23  ;;  %v3510_v29 = vsel %vm3498_vm5, %v13359_v15, %v13358_v56  ;;  %v11350_v5 = vadd.f32 %v13360_v25, %v13345_v39  ;;  %v3918_v45 = vadd.s32 3, %v3901_v61 }
 0x474   : > { %v3895_v4 = vmul.f32 %v3894_v16, %v3892_v47  ;;  %v3408_v1 = vadd.s32 536870912, %v3407_v32  ;;  %v11352_v43 = vadd.s32 %v3398_v42, %v3379_v57  ;;  %v3480_v28 = vshrl.u32 %v12936_v46, %v13355_v35 }
 0x475   : > { %v3511_v23 = vsel %vm3497_vm4, %v3508_v6, %v3510_v29  ;;  %v11358_v0 = vshll.u32 %v3472_v55, 8  ;;  %v3504_v39 = vsel %vm3496_vm10, %v3483_v2, %v3486_v54  ;;  %v3506_v57 = vsel %vm3498_vm5, %v3489_v34, %v13361_v19 }
 0x476   : > { %v3896_v26 = vxor.u32 2147483648, %v3895_v4  ;;  %v11360_v22 = vshrl.u32 %v3408_v1, 30  ;;  %v3515_v27 = vand.u32 65535, %v3511_v23  ;;  %v3516_v3 = vshrl.u32 %v3511_v23, 16 }
 0x477   : > { %v3513_v42 = vand.u32 65535, %v11358_v0  ;;  %v11369_v35 = vshrl.u32 %v11358_v0, 16  ;;  %v11373_v61 = vand.u32 3, %v3918_v45  ;;  %vm13362_vm7 = vcmp.lt.s32.totalorder %v13356_v11, 4 }
 0x478   : > { %v3897_v16 = vsel %vm3776_vm6, %v3896_v26, %v3895_v4  ;;  %v3410_v8 = vshll.u32 %v11360_v22, 30  ;;  %v3501_v55 = vsel %vm13362_vm7, %v3489_v34, 2102212464  ;;  %v3500_v25 = vsel %vm3496_vm10, %v3480_v28, %v3483_v2 }
 0x479   : > { %v11381_v47 = vsel %vm11309_vm13, %v13317_v38, %v3897_v16  ;;  %v3517_v30 = vmul.u32 %v3515_v27, %v3513_v42  ;;  %v3518_v6 = vmul.u32 %v3516_v3, %v3513_v42  ;;  %v3519_v56 = vmul.u32 %v3515_v27, %v11369_v35 }
 0x47a   : > { %v3902_v15 = vmul.f32 %v11381_v47, %v11381_v47  ;;  %v11386_v29 = vsub.s32 %v3407_v32, %v3410_v8  ;;  %v3507_v34 = vsel %vm3497_vm4, %v3504_v39, %v3506_v57  ;;  %v3502_v7 = vsel %vm3498_vm5, %v3486_v54, %v3501_v55 }
 0x47b   : > { %v3520_v4 = vmul.u32 %v3516_v3, %v11369_v35  ;;  %v3521_v45 = vshll.u32 %v3518_v6, 16  ;;  %v3523_v1 = vshll.u32 %v3519_v56, 16  ;;  %v3537_v19 = vand.u32 65535, %v3507_v34 }
 0x47c   : > { %v3903_v23 = vmul.f32 -0.001358992, %v3902_v15  ;;  %v3910_v26 = vmul.f32 -0.00019511016, %v3902_v15  ;;  %vm3412_vm3 = vcmp.lt.s32.totalorder %v11386_v29, 0  ;;  %v3413_v32 = vsub.s32 0, %v11386_v29 }
 0x47d   : > { %vm3525_vm9 = vc.u32 %v3517_v30, %v3521_v45  ;;  %v3527_v27 = vadd.s32 %v3521_v45, %v3517_v30  ;;  %v3538_v2 = vshrl.u32 %v3507_v34, 16  ;;  %v3522_v3 = vshrl.u32 %v3518_v6, 16 }
 0x47e   : > { %v3904_v28 = vadd.f32 0.041655596, %v3903_v23  ;;  %v3911_v16 = vadd.f32 0.008332121, %v3910_v26  ;;  %v3414_v39 = vsel %vm3412_vm3, %v3413_v32, %v11386_v29  ;;  %v3526_v54 = vsel %vm3525_vm9, 1, %v12925_v14 }
 0x47f   : > { %v3415_v57 = vclz %v3414_v39  ;;  %v3528_v8 = vadd.s32 %v3526_v54, %v3520_v4  ;;  %vm3529_vm14 = vc.u32 %v3527_v27, %v3523_v1  ;;  %vm3924_vm11 = vcmp.eq.s32.totalorder %v11373_v61, 2 }
 0x480   : > { %v3905_v55 = vmul.f32 %v3904_v28, %v3902_v15  ;;  %v3912_v10 = vmul.f32 %v3911_v16, %v3902_v15  ;;  %v3530_v52 = vsel %vm3529_vm14, 1, %v12925_v14  ;;  %vm3921_vm15 = vcmp.eq.s32.totalorder %v11373_v61, 0  ;;  %v13363_v28 = vld [vmem:[#allocation59_spill] sm:$0xff] }
 0x481   : > { %vm3311_vm12 = vcmp.lt.s32.totalorder %v13335_v36, 0  ;;  %v6262_v30 = vadd.s32 4294967294, %v3415_v57  ;;  %v3532_v34 = vadd.s32 %v3530_v52, %v3528_v8  ;;  %v3540_v45 = vmul.u32 %v3538_v2, %v3513_v42  ;;  %v13365_v52 = vld [vmem:[#allocation60_spill] sm:$0xff] }
 0x482   : > { %v3906_v23 = vadd.f32 -0.4999988, %v3905_v55  ;;  %v3913_v26 = vadd.f32 -0.16666654, %v3912_v10  ;;  %vm3920_vm8 = vcmp.lt.s32.totalorder %v11373_v61, 2  ;;  %v3433_v6 = vsub.s32 4, %v11360_v22 }
 0x483   : > { %v11407_v4 = vsel %vm3497_vm4, %v3500_v25, %v3502_v7  ;;  %vm3917_vm1 = vweird.f32 %v13317_v38  ;;  %vm6263_vm6 = vcmp.lt.s32.totalorder %v6262_v30, 0  ;;  %v3524_v1 = vshrl.u32 %v3519_v56, 16 }
 0x484   : > { %v3533_v32 = vadd.s32 %v3532_v34, %v3522_v3  ;;  %v3539_v27 = vmul.u32 %v3537_v19, %v3513_v42  ;;  %v13364_v16 = vshll.u32 %v13363_v28, 16  ;;  %v3907_v10 = vmul.f32 %v3906_v23, %v3902_v15 }
 0x485   : > { %v3914_v54 = vmul.f32 %v3913_v26, %v3902_v15  ;;  %v3418_v57 = vsel %vm6263_vm6, 0, %v6262_v30  ;;  %v3541_v11 = vmul.u32 %v3537_v19, %v11369_v35  ;;  %v13368_v25 = vand.u32 2147483647, %v13335_v36 }
 0x486   : > { %vm11413_vm13 = vc.u32 %v13365_v52, %v13364_v16  ;;  %v3419_v56 = vsub.s32 32, %v3418_v57  ;;  %v3420_v42 = vshll.u32 %v11386_v29, %v3418_v57  ;;  %v3423_v3 = vsub.s32 4294967266, %v3418_v57 }
 0x487   : > { %vm11420_vm2 = vcmp.le.f32.partialorder %v13368_v25, 0.7853982  ;;  %v3543_v8 = vshll.u32 %v3540_v45, 16  ;;  %v3908_v55 = vadd.f32 1.0, %v3907_v10  ;;  %v3915_v34 = vadd.f32 1.0, %v3914_v54 }
 0x488   : > { %v11428_v15 = vsel %vm3311_vm12, %v3433_v6, %v11360_v22  ;;  %v3557_v19 = vmul.u32 %v11358_v0, %v11407_v4  ;;  %v3421_v30 = vshrl.u32 %v11352_v43, %v3419_v56  ;;  %v3424_v23 = vadd.s32 127, %v3423_v3  ;;  %v13371_v56 = vld [vmem:[#allocation23_spill] sm:$0xff] }
 0x489   : > { %v11433_v26 = vadd.s32 %v3533_v32, %v3524_v1  ;;  %v3542_v16 = vmul.u32 %v3538_v2, %v11369_v35  ;;  %v3916_v29 = vmul.f32 %v3915_v34, %v11381_v47  ;;  %v3925_v52 = vxor.u32 2147483648, %v3908_v55  ;;  %v13372_v1 = vld [vmem:[#allocation54_spill] sm:$0xff] }
 0x48a   : > { %v3544_v10 = vshrl.u32 %v3540_v45, 16  ;;  %v3545_v54 = vshll.u32 %v3541_v11, 16  ;;  %v3422_v57 = vor.u32 %v3421_v30, %v3420_v42  ;;  %v3425_v25 = vshll.u32 %v3424_v23, 23 }
 0x48b   : > { %vm3547_vm10 = vc.u32 %v3539_v27, %v3543_v8  ;;  %v3549_v22 = vadd.s32 %v3543_v8, %v3539_v27  ;;  %v3922_v6 = vxor.u32 2147483648, %v3916_v29  ;;  %v3926_v59 = vsel %vm3924_vm11, %v3925_v52, %v3916_v29  ;;  %v13374_v52 = vld [vmem:[#allocation89_spill] sm:$0xff] }
 0x48c   : > { %v3548_v43 = vsel %vm3547_vm10, 1, %v12925_v14  ;;  %v13373_v32 = vand.u32 65535, %v13372_v1  ;;  %v3426_v35 = vor.u32 4788187, %v3425_v25  ;;  %v3429_v2 = vcvt.s32.f32 %v3422_v57  ;;  %v13376_v25 = vld [vmem:[#allocation90_spill] sm:$0xff] }
 0x48d   : > { %v3550_v47 = vadd.s32 %v3548_v43, %v3542_v16  ;;  %vm3551_vm5 = vc.u32 %v3549_v22, %v3545_v54  ;;  %v3923_v45 = vsel %vm3921_vm15, %v3908_v55, %v3922_v6  ;;  %v3546_v42 = vshrl.u32 %v3541_v11, 16  ;;  %v13379_v6 = vld [vmem:[#allocation69_spill] sm:$0xff] }
 0x48e   : > { %v5453_v3 = vmul.u32 %v13373_v32, %v13371_v56  ;;  %v3552_v27 = vsel %vm3551_vm5, 1, %v12925_v14  ;;  %v11446_v8 = vadd.s32 %v3549_v22, %v3545_v54  ;;  %v3927_v34 = vsel %vm3920_vm8, %v3923_v45, %v3926_v59  ;;  %v13380_v43 = vld [vmem:[#allocation17_spill] sm:$0xff]  ;;  %v13381_v32 = vld [vmem:[#allocation43_spill] sm:$0xff] }
 0x48f   : > { %v3427_v30 = vand.u32 2147483647, %v3426_v35  ;;  %v3554_v23 = vadd.s32 %v3552_v27, %v3550_v47  ;;  %v13375_v1 = vshll.u32 %v13374_v52, 16  ;;  %v3928_v11 = vsel %vm3917_vm1, nan, %v3927_v34  ;;  %v13382_v35 = vld [vmem:[#allocation29_spill] sm:$0xff] }
 0x490   : > { %v5457_v29 = vshll.u32 %v5453_v3, 16  ;;  %v3436_v55 = vsel %vm11420_vm2, 0, %v11428_v15  ;;  %vm3559_vm7 = vc.u32 %v11433_v26, %v11446_v8  ;;  %v5456_v59 = vshrl.u32 %v13363_v28, 16  ;;  %v13385_v27 = vld [vmem:[#allocation65_spill] sm:$0xff] }
 0x491   : > { %vm11453_vm4 = vc.u32 %v13376_v25, %v13375_v1  ;;  %v4552_v61 = vmul.f32 %v3928_v11, %v11350_v5  ;;  %v3430_v54 = vmul.f32 %v3429_v2, %v3427_v30  ;;  %v3555_v57 = vadd.s32 %v3554_v23, %v3544_v10 }
 0x492   : > { %v5460_v22 = vsel %vm11413_vm13, 1, %v12925_v14  ;;  %vm5463_vm3 = vc.u32 %v13380_v43, %v5457_v29  ;;  %v13383_v15 = vand.u32 65535, %v13382_v35  ;;  %v5477_v39 = vshll.u32 %v13385_v27, 16  ;;  %v13389_v43 = vld [vmem:[#allocation21_spill] sm:$0xff] }
 0x493   : > { %v5462_v38 = vadd.s32 %v5460_v22, %v13379_v6  ;;  %4655 = vmatpush.msrb.mxu1 %v4552_v61  ;;  %v3431_v5 = vxor.u32 2147483648, %v3430_v54  ;;  %v3556_v2 = vadd.s32 %v3555_v57, %v3546_v42  ;;  %v5464_v10 = vsel %vm5463_vm3, 1, %v12925_v14  ;;  %v13386_v57 = vld [vmem:[#allocation12_spill] sm:$0xff] }
 0x494   : > { %v5473_v47 = vmul.u32 %v13383_v15, %v13381_v32  ;;  %v13384_v45 = vmov %v13383_v15  ;;  %v5458_v34 = vshrl.u32 %v5453_v3, 16  ;;  %v5478_v23 = vshrl.u32 %v13385_v27, 16  ;;  %v13387_v22 = vld [vmem:[#allocation16_spill] sm:$0xff] }
 0x495   : > { %v5475_v28 = vmul.u32 %v13384_v45, %v13371_v56  ;;  %v5466_v30 = vadd.s32 %v5464_v10, %v5462_v38  ;;  %v3432_v1 = vsel %vm3311_vm12, %v3431_v5, %v3430_v54  ;;  %v3560_v25 = vadd.s32 1, %v3556_v2 }
 0x496   : > { %vm5481_vm9 = vc.u32 %v5473_v47, %v5477_v39  ;;  %v5483_v11 = vadd.s32 %v5477_v39, %v5473_v47  ;;  %v3435_v56 = vsel %vm11420_vm2, %v13335_v36, %v3432_v1  ;;  %v13388_v3 = vand.u32 65535, %v13387_v22  ;;  %v13392_v22 = vld [vmem:[#allocation94_spill] sm:$0xff] }
 0x497   : > { %v5479_v29 = vshll.u32 %v5475_v28, 16  ;;  %v5467_v42 = vadd.s32 %v5466_v30, %v5456_v59  ;;  %v5482_v61 = vsel %vm5481_vm9, 1, %v12925_v14  ;;  %v3437_v38 = vmul.f32 %v3435_v56, %v3435_v56 }
 0x498   : > { %v11489_v6 = vmul.u32 %v13388_v3, %v13386_v57  ;;  %v3561_v54 = vsel %vm3559_vm7, %v3560_v25, %v3556_v2  ;;  %v5484_v32 = vadd.s32 %v5482_v61, %v13389_v43  ;;  %v13390_v35 = vand.u32 2147483647, %v11128_v40  ;;  %v13437_v40 = vld [vmem:[#allocation40_spill] sm:$0xff] }
 0x499   : > { %vm5485_vm14 = vc.u32 %v5483_v11, %v5479_v29  ;;  %v3453_v59 = vadd.s32 3, %v3436_v55  ;;  %v3562_v15 = vadd.s32 %v3561_v54, %v3557_v19  ;;  %v3438_v45 = vmul.f32 -0.001358992, %v3437_v38 }
 0x49a   : > { %v11497_v7 = vand.u32 8388607, %v13390_v35  ;;  %v5486_v47 = vsel %vm5485_vm14, 1, %v12925_v14  ;;  %v3445_v5 = vmul.f32 -0.00019511016, %v3437_v38  ;;  %v5480_v10 = vshrl.u32 %v5475_v28, 16 }
 0x49b   : > { %v5488_v27 = vadd.s32 %v5486_v47, %v5484_v32  ;;  %v3563_v39 = vadd.s32 536870912, %v3562_v15  ;;  %v11503_v2 = vadd.s32 %v5467_v42, %v5458_v34  ;;  %v11505_v30 = vadd.s32 %v5483_v11, %v5479_v29  ;;  %v13394_v35 = vld [vmem:[#allocation35_spill] sm:$0xff]  ;;  %v13395_v47 = vld [vmem:[#allocation28_spill] sm:$0xff] }
 0x49c   : > { %v5612_v1 = vshll.u32 %v11489_v6, 16  ;;  %v3439_v25 = vadd.f32 0.041655596, %v3438_v45  ;;  %v3446_v61 = vadd.f32 0.008332121, %v3445_v5  ;;  %v5615_v0 = vsel %vm11453_vm4, 1, %v12925_v14 }
 0x49d   : > { %v5489_v55 = vadd.s32 %v5488_v27, %v5478_v23  ;;  %v11512_v4 = vadd.s32 4294967169, %v11340_v18  ;;  %v11516_v19 = vshrl.u32 %v4936_v62, 23  ;;  %v13391_v28 = vand.u32 2147483647, %v11174_v9  ;;  %v13393_v18 = vld [vmem:[#allocation93_spill] sm:$0xff]  ;;  %v13409_v9 = vld [vmem:[#allocation14_spill] sm:$0xff] }
 0x49e   : > { %v11522_v29 = vshrl.u32 %v3563_v39, 30  ;;  %v3440_v11 = vmul.f32 %v3439_v25, %v3437_v38  ;;  %v3447_v42 = vmul.f32 %v3446_v61, %v3437_v38  ;;  %vm5618_vm11 = vc.u32 %v13392_v22, %v5612_v1  ;;  %v13398_v1 = vld [vmem:[#allocation91_spill] sm:$0xff] }
 0x49f   : > { %v11520_v34 = vand.u32 8388607, %v13391_v28  ;;  %v5490_v23 = vadd.s32 %v5489_v55, %v5480_v10  ;;  %v3454_v16 = vand.u32 3, %v3453_v59  ;;  %vm5493_vm15 = vc.u32 %v11503_v2, %v11505_v30  ;;  %v13399_v28 = vld [vmem:[#allocation66_spill] sm:$0xff] }
 0x4a0   : > { %v3565_v3 = vshll.u32 %v11522_v29, 30  ;;  %v5617_v62 = vadd.s32 %v5615_v0, %v13393_v18  ;;  %v3441_v54 = vadd.f32 -0.4999988, %v3440_v11  ;;  %v3448_v43 = vadd.f32 -0.16666654, %v3447_v42  ;;  %v13400_v11 = vld [vmem:[#allocation33_spill] sm:$0xff] }
 0x4a1   : > { %v5494_v32 = vadd.s32 1, %v5490_v23  ;;  %v13396_v45 = vand.u32 65535, %v13395_v47  ;;  %v5619_v10 = vsel %vm5618_vm11, 1, %v12925_v14  ;;  %v5632_v25 = vshll.u32 %v13398_v1, 16  ;;  %v13404_v47 = vld [vmem:[#allocation45_spill] sm:$0xff] }
 0x4a2   : > { %v11532_v27 = vsub.s32 %v3562_v15, %v3565_v3  ;;  %v3442_v61 = vmul.f32 %v3441_v54, %v3437_v38  ;;  %v3449_v55 = vmul.f32 %v3448_v43, %v3437_v38  ;;  %vm3452_vm12 = vweird.f32 %v13335_v36 }
 0x4a3   : > { %v5628_v5 = vmul.u32 %v13396_v45, %v13394_v35  ;;  %v13397_v59 = vmov %v13396_v45  ;;  %v5495_v0 = vsel %vm5493_vm15, %v5494_v32, %v5490_v23  ;;  %vm3459_vm8 = vcmp.eq.s32.totalorder %v3454_v16, 2  ;;  %v13402_v23 = vld [vmem:[#allocation87_spill] sm:$0xff] }
 0x4a4   : > { %v11538_v39 = vmul.u32 %v13397_v59, %v13386_v57  ;;  %vm3567_vm1 = vcmp.lt.s32.totalorder %v11532_v27, 0  ;;  %v3568_v15 = vsub.s32 0, %v11532_v27  ;;  %v13401_v42 = vmul.u32 %v13399_v28, %v13400_v11 }
 0x4a5   : > { %v3443_v3 = vadd.f32 1.0, %v3442_v61  ;;  %v3450_v18 = vadd.f32 1.0, %v3449_v55  ;;  %v5611_v57 = vshrl.u32 %v13374_v52, 16  ;;  %v5621_v35 = vadd.s32 %v5619_v10, %v5617_v62 }
 0x4a6   : > { %v5496_v22 = vadd.s32 %v5495_v0, %v13401_v42  ;;  %v3569_v54 = vsel %vm3567_vm1, %v3568_v15, %v11532_v27  ;;  %v5634_v43 = vshll.u32 %v11538_v39, 16  ;;  %vm5636_vm6 = vc.u32 %v5628_v5, %v5632_v25 }
 0x4a7   : > { %v13403_v32 = vshll.u32 %v13402_v23, 16  ;;  %v3451_v59 = vmul.f32 %v3450_v18, %v3435_v56  ;;  %vm3455_vm2 = vcmp.lt.s32.totalorder %v3454_v16, 2  ;;  %v3460_v61 = vxor.u32 2147483648, %v3443_v3 }
 0x4a8   : > { %v5497_v38 = vadd.s32 536870912, %v5496_v22  ;;  %v3570_v55 = vclz %v3569_v54  ;;  %vm3456_vm10 = vcmp.eq.s32.totalorder %v3454_v16, 0  ;;  %v5637_v62 = vsel %vm5636_vm6, 1, %v12925_v14 }
 0x4a9   : > { %vm11553_vm13 = vc.u32 %v13404_v47, %v13403_v32  ;;  %v5638_v10 = vadd.s32 %v5632_v25, %v5628_v5  ;;  %v3457_v0 = vxor.u32 2147483648, %v3451_v59  ;;  %v3461_v15 = vsel %vm3459_vm8, %v3460_v61, %v3451_v59  ;;  %v13408_v47 = vld [vmem:[#allocation32_spill] sm:$0xff] }
 0x4aa   : > { %v11557_v52 = vshrl.u32 %v5497_v38, 30  ;;  %v3558_v28 = vadd.s32 %v11446_v8, %v11433_v26  ;;  %v6265_v11 = vadd.s32 4294967294, %v3570_v55  ;;  %v5613_v56 = vshrl.u32 %v11489_v6, 16  ;;  %v13407_v38 = vld [vmem:[#allocation92_spill] sm:$0xff] }
 0x4ab   : > { %v5622_v18 = vadd.s32 %v5621_v35, %v5611_v57  ;;  %vm5640_vm5 = vc.u32 %v5638_v10, %v5634_v43  ;;  %v3458_v54 = vsel %vm3456_vm10, %v3443_v3, %v3457_v0  ;;  %v5639_v32 = vadd.s32 %v5637_v62, %v13407_v38 }
 0x4ac   : > { %v5499_v42 = vshll.u32 %v11557_v52, 30  ;;  %vm6266_vm4 = vcmp.lt.s32.totalorder %v6265_v11, 0  ;;  %v13410_v5 = vand.u32 65535, %v13409_v9  ;;  %v3462_v59 = vsel %vm3455_vm2, %v3458_v54, %v3461_v15 }
 0x4ad   : > { %v3573_v61 = vsel %vm6266_vm4, 0, %v6265_v11  ;;  %v5641_v8 = vsel %vm5640_vm5, 1, %v12925_v14  ;;  %v3463_v6 = vsel %vm3452_vm12, nan, %v3462_v59  ;;  %v4786_v55 = vor.u32 8388608, %v11497_v7  ;;  %v13413_v59 = vld [vmem:[#allocation34_spill] sm:$0xff] }
 0x4ae   : > { %v11569_v25 = vmul.u32 %v13410_v5, %v13408_v47  ;;  %v11572_v26 = vsub.s32 %v5496_v22, %v5499_v42  ;;  %v3574_v57 = vsub.s32 32, %v3573_v61  ;;  %v3575_v3 = vshll.u32 %v11532_v27, %v3573_v61  ;;  %v13412_v5 = vld [vmem:[#allocation41_spill] sm:$0xff] }
 0x4af   : > { %v3578_v35 = vsub.s32 4294967266, %v3573_v61  ;;  %v6317_v9 = vadd.s32 4294967169, %v11516_v19  ;;  %v4549_v62 = vmul.f32 %v3463_v6, %v11115_v13  ;;  %v5633_v16 = vshrl.u32 %v13398_v1, 16 }
 0x4b0   : > { %v3576_v0 = vshrl.u32 %v3558_v28, %v3574_v57  ;;  %vm5501_vm7 = vcmp.lt.s32.totalorder %v11572_v26, 0  ;;  %v11583_v15 = vadd.s32 %v5622_v18, %v5613_v56  ;;  %v5502_v36 = vsub.s32 0, %v11572_v26  ;;  %v13415_v57 = vld [vmem:[#allocation52_spill] sm:$0xff] }
 0x4b1   : > { %v3579_v22 = vadd.s32 127, %v3578_v35  ;;  %4624 = vmatpush.msrb.mxu0 %v4549_v62  ;;  %v5635_v27 = vshrl.u32 %v11538_v39, 16  ;;  %v11587_v11 = vadd.s32 %v5638_v10, %v5634_v43  ;;  %v5643_v7 = vadd.s32 %v5641_v8, %v5639_v32  ;;  %v13416_v35 = vld [vmem:[#allocation47_spill] sm:$0xff] }
 0x4b2   : > { %v4941_v19 = vor.u32 8388608, %v11520_v34  ;;  %v3577_v42 = vor.u32 %v3576_v0, %v3575_v3  ;;  %v5767_v1 = vshll.u32 %v11569_v25, 16  ;;  %v11592_v28 = vadd.s32 1, %v11512_v4  ;;  %v11602_v34 = vld [vmem:[%s12623_s3 + $0x50] sm:$0xff] }
 0x4b3   : > { %v3580_v13 = vshll.u32 %v3579_v22, 23  ;;  %v5503_v56 = vsel %vm5501_vm7, %v5502_v36, %v11572_v26  ;;  %v5644_v18 = vadd.s32 %v5643_v7, %v5633_v16  ;;  %v5770_v54 = vsel %vm11553_vm13, 1, %v12925_v14  ;;  %v13411_v4 = vld [vmem:[#allocation37_spill] sm:$0xff]  ;;  %6295 = vmatmul.msk.f32.vlgmr.msrb.gmra.mxu0 %vm1664_vm0, %v11602_v34 }
 0x4b4   : > { %v3584_v43 = vcvt.s32.f32 %v3577_v42  ;;  %v3588_v10 = vsub.s32 4, %v11522_v29  ;;  %v5504_v38 = vclz %v5503_v56  ;;  %vm5648_vm3 = vc.u32 %v11583_v15, %v11587_v11 }
 0x4b5   : > { %v3581_v39 = vor.u32 4788187, %v3580_v13  ;;  %v5645_v32 = vadd.s32 %v5644_v18, %v5635_v27  ;;  %vm5773_vm9 = vc.u32 %v13411_v4, %v5767_v1  ;;  %v13414_v45 = vand.u32 65535, %v13413_v59  ;;  %v13422_v4 = vld [vmem:[#allocation7_spill] sm:$0xff] }
 0x4b6   : > { %v6327_v6 = vadd.s32 4294967294, %v5504_v38  ;;  %v5772_v3 = vadd.s32 %v5770_v54, %v13415_v57  ;;  %v5787_v62 = vshll.u32 %v13416_v35, 16  ;;  %v11614_v16 = vshll.u32 %v4786_v55, 8  ;;  %v13421_v38 = vld [vmem:[#allocation88_spill] sm:$0xff] }
 0x4b7   : > { %v5783_v61 = vmul.u32 %v13414_v45, %v13412_v5  ;;  %v3582_v8 = vand.u32 2147483647, %v3581_v39  ;;  %v5649_v0 = vadd.s32 1, %v5645_v32  ;;  %v5774_v22 = vsel %vm5773_vm9, 1, %v12925_v14  ;;  %v11639_v39 = vld [vmem:[%s12623_s3 + $0x58] sm:$0xff] }
 0x4b8   : > { %v13417_v36 = vmov %v13414_v45  ;;  %v11622_v7 = vadd.s32 1, %v6317_v9  ;;  %vm6328_vm14 = vcmp.lt.s32.totalorder %v6327_v6, 0  ;;  %v13418_v13 = vand.u32 2147483647, %v13350_v12 }
 0x4b9   : > { %v11620_v27 = vmul.u32 %v13417_v36, %v13408_v47  ;;  %v3585_v42 = vmul.f32 %v3584_v43, %v3582_v8  ;;  %vm5791_vm11 = vc.u32 %v5783_v61, %v5787_v62  ;;  %vm3466_vm12 = vcmp.lt.s32.totalorder %v13350_v12, 0 }
 0x4ba   : > { %vm11626_vm15 = vcmp.le.f32.partialorder %v13418_v13, 0.7853982  ;;  %v5507_v55 = vsel %vm6328_vm14, 0, %v6327_v6  ;;  %v5650_v56 = vsel %vm5648_vm3, %v5649_v0, %v5645_v32  ;;  %v3589_v9 = vsel %vm3466_vm12, %v3588_v10, %v11522_v29 }
 0x4bb   : > { %v3586_v47 = vxor.u32 2147483648, %v3585_v42  ;;  %v5766_v18 = vshrl.u32 %v13402_v23, 16  ;;  %v5776_v54 = vadd.s32 %v5774_v22, %v5772_v3  ;;  %v5512_v43 = vsub.s32 4294967266, %v5507_v55  ;;  %6296 = vmatmul.msk.f32.gmra.mxu0 %vm1664_vm0, %v11639_v39 }
 0x4bc   : > { %v13423_v5 = vmul.u32 %v13421_v38, %v13422_v4  ;;  %v5789_v45 = vshll.u32 %v11620_v27, 16  ;;  %v5792_v32 = vsel %vm5791_vm11, 1, %v12925_v14  ;;  %vm4789_vm8 = vcmp.gt.s32.totalorder %v11592_v28, 0  ;;  %v11675_v4 = vld [vmem:[%s12623_s3 + $0x60] sm:$0xff] }
 0x4bd   : > { %v11647_v29 = vshll.u32 %v4941_v19, 8  ;;  %v3587_v23 = vsel %vm3466_vm12, %v3586_v47, %v3585_v42  ;;  %v5492_v10 = vadd.s32 %v11505_v30, %v11503_v2  ;;  %v3591_v6 = vsel %vm11626_vm15, 0, %v3589_v9  ;;  %v13425_v2 = vld [vmem:[#allocation44_spill] sm:$0xff] }
 0x4be   : > { %v5651_v59 = vadd.s32 %v5650_v56, %v13423_v5  ;;  %v11654_v8 = vsel %vm11626_vm15, %v13350_v12, %v3587_v23  ;;  %v5793_v3 = vadd.s32 %v5787_v62, %v5783_v61  ;;  %v5768_v19 = vshrl.u32 %v11569_v25, 16 }
 0x4bf   : > { %13424 = vst [vmem:[#allocation30_spill] sm:$0xff] %v11647_v29  ;;  %v3592_v0 = vmul.f32 %v11654_v8, %v11654_v8  ;;  %v5777_v22 = vadd.s32 %v5776_v54, %v5766_v18  ;;  %v5794_v30 = vadd.s32 %v5792_v32, %v13425_v2  ;;  %v5508_v36 = vsub.s32 32, %v5507_v55 }
 0x4c0   : > { %v5652_v57 = vadd.s32 536870912, %v5651_v59  ;;  %v5513_v42 = vadd.s32 127, %v5512_v43  ;;  %vm5795_vm1 = vc.u32 %v5793_v3, %v5789_v45  ;;  %vm4944_vm6 = vcmp.gt.s32.totalorder %v11622_v7, 0 }
 0x4c1   : > { %v3593_v1 = vmul.f32 -0.001358992, %v3592_v0  ;;  %v3600_v61 = vmul.f32 -0.00019511016, %v3592_v0  ;;  %v5788_v62 = vshrl.u32 %v13416_v35, 16  ;;  %v3608_v56 = vadd.s32 3, %v3591_v6 }
 0x4c2   : > { %v11664_v13 = vshrl.u32 %v5652_v57, 30  ;;  %v5790_v9 = vshrl.u32 %v11620_v27, 16  ;;  %v5796_v25 = vsel %vm5795_vm1, 1, %v12925_v14  ;;  %v5509_v43 = vshll.u32 %v11572_v26, %v5507_v55 }
 0x4c3   : > { %v3594_v18 = vadd.f32 0.041655596, %v3593_v1  ;;  %v3601_v54 = vadd.f32 0.008332121, %v3600_v61  ;;  %v5798_v38 = vadd.s32 %v5796_v25, %v5794_v30  ;;  %v5510_v5 = vshrl.u32 %v5492_v10, %v5508_v36  ;;  %6297 = vmatmul.msk.f32.gmra.mxu0 %vm1664_vm0, %v11675_v4 }
 0x4c4   : > { %v5654_v47 = vshll.u32 %v11664_v13, 30  ;;  %v5514_v32 = vshll.u32 %v5513_v42, 23  ;;  %v11677_v35 = vadd.s32 %v5777_v22, %v5768_v19  ;;  %v11679_v23 = vadd.s32 %v5793_v3, %v5789_v45 }
 0x4c5   : > { %v3595_v6 = vmul.f32 %v3594_v18, %v3592_v0  ;;  %v3602_v27 = vmul.f32 %v3601_v54, %v3592_v0  ;;  %v5799_v2 = vadd.s32 %v5798_v38, %v5788_v62  ;;  %v13426_v26 = vshll.u32 %v11157_v63, 16  ;;  %v13429_v54 = vld [vmem:[#allocation48_spill] sm:$0xff] }
 0x4c6   : > { %v11681_v57 = vsub.s32 %v5651_v59, %v5654_v47  ;;  %v4790_v30 = vsel %vm4789_vm8, %v11592_v28, 0  ;;  %v11692_v10 = vand.u32 65535, %v11614_v16  ;;  %v11695_v45 = vshrl.u32 %v11614_v16, 16 }
 0x4c7   : > { %v11686_v55 = vadd.s32 %v13426_v26, %v11133_v41  ;;  %v11698_v3 = vand.u32 65535, %v11647_v29  ;;  %v3596_v59 = vadd.f32 -0.4999988, %v3595_v6  ;;  %v3603_v19 = vadd.f32 -0.16666654, %v3602_v27 }
 0x4c8   : > { %v5800_v22 = vadd.s32 %v5799_v2, %v5790_v9  ;;  %v4945_v36 = vsel %vm4944_vm6, %v11622_v7, 0  ;;  %v3609_v28 = vand.u32 3, %v3608_v56  ;;  %v5511_v42 = vor.u32 %v5510_v5, %v5509_v43  ;;  %v13431_v7 = vld [vmem:[#allocation53_spill] sm:$0xff]  ;;  %v11728_v2 = vld [vmem:[%s12623_s3 + $0x68] sm:$0xff] }
 0x4c9   : > { %13427 = vst [vmem:[#allocation20_spill] sm:$0xff] %v11686_v55  ;;  %v5515_v1 = vor.u32 4788187, %v5514_v32  ;;  %v3597_v61 = vmul.f32 %v3596_v59, %v3592_v0  ;;  %v3604_v62 = vmul.f32 %v3603_v19, %v3592_v0  ;;  %v5657_v47 = vsub.s32 0, %v11681_v57  ;;  %v13434_v0 = vld [vmem:[#allocation95_spill] sm:$0xff] }
 0x4ca   : > { %vm5803_vm13 = vc.u32 %v11677_v35, %v11679_v23  ;;  %v4792_v25 = vand.u32 31, %v4790_v30  ;;  %v11709_v18 = vshrl.u32 %v11647_v29, 16  ;;  %vm5656_vm2 = vcmp.lt.s32.totalorder %v11681_v57, 0 }
 0x4cb   : > { %v5804_v9 = vadd.s32 1, %v5800_v22  ;;  %v13430_v38 = vshll.u32 %v13429_v54, 16  ;;  %v3190_v43 = vadd.f32 %v13434_v0, %v13314_v21  ;;  %v11721_v5 = vshrl.u32 %v4790_v30, 5  ;;  %v13435_v30 = vld [vmem:[#allocation50_spill] sm:$0xff]  ;;  %v13436_v0 = vld [vmem:[#allocation36_spill] sm:$0xff]  ;;  %6298 = vmatmul.msk.f32.gmra.mxu0 %vm1664_vm0, %v11728_v2 }
 0x4cc   : > { %13428 = vst [vmem:[#allocation72_spill] sm:$0xff] %v11709_v18  ;;  %v3598_v32 = vadd.f32 1.0, %v3597_v61  ;;  %v3605_v6 = vadd.f32 1.0, %v3604_v62  ;;  %v11723_v27 = vand.u32 31, %v4945_v36  ;;  %vm3614_vm5 = vcmp.eq.s32.totalorder %v3609_v28, 2 }
 0x4cd   : > { %vm11715_vm10 = vc.u32 %v13431_v7, %v13430_v38  ;;  %v5518_v26 = vcvt.s32.f32 %v5511_v42  ;;  %v5805_v59 = vsel %vm5803_vm13, %v5804_v9, %v5800_v22  ;;  %v5516_v7 = vand.u32 2147483647, %v5515_v1  ;;  %v13440_v22 = vld [vmem:[#allocation57_spill] sm:$0xff] }
 0x4ce   : > { %v3606_v19 = vmul.f32 %v3605_v6, %v11654_v8  ;;  %v3615_v38 = vxor.u32 2147483648, %v3598_v32  ;;  %v5658_v21 = vsel %vm5656_vm2, %v5657_v47, %v11681_v57  ;;  %vm5400_vm4 = vcmp.lt.s32.totalorder %v13435_v30, 0  ;;  %v13439_v8 = vld [vmem:[#allocation9_spill] sm:$0xff] }
 0x4cf   : > { %v4793_v61 = vsub.s32 32, %v4792_v25  ;;  %v4795_v62 = vshll.u32 %v12936_v46, %v4792_v25  ;;  %vm3611_vm7 = vcmp.eq.s32.totalorder %v3609_v28, 0  ;;  %v13438_v55 = vmul.u32 %v13436_v0, %v13437_v40 }
 0x4d0   : > { %vm3610_vm3 = vcmp.lt.s32.totalorder %v3609_v28, 2  ;;  %v3612_v53 = vxor.u32 2147483648, %v3606_v19  ;;  %v3616_v42 = vsel %vm3614_vm5, %v3615_v38, %v3606_v19  ;;  %v13441_v1 = vand.u32 65535, %v13440_v22 }
 0x4d1   : > { %v5806_v44 = vadd.s32 %v5805_v59, %v13438_v55  ;;  %v4798_v9 = vshll.u32 %v13324_v37, %v4792_v25  ;;  %vm3607_vm9 = vweird.f32 %v13350_v12  ;;  %v5659_v6 = vclz %v5658_v21 }
 0x4d2   : > { %v11742_v47 = vmul.u32 %v13441_v1, %v13439_v8  ;;  %v4801_v40 = vshll.u32 %v13325_v24, %v4792_v25  ;;  %v4804_v55 = vshll.u32 %v13326_v50, %v4792_v25  ;;  %v3613_v59 = vsel %vm3611_vm7, %v3598_v32, %v3612_v53  ;;  %v11763_v32 = vld [vmem:[%s12623_s3 + $0x70] sm:$0xff] }
 0x4d3   : > { %v5807_v41 = vadd.s32 536870912, %v5806_v44  ;;  %v5519_v19 = vmul.f32 %v5518_v26, %v5516_v7  ;;  %v4796_v38 = vshrl.u32 %v13324_v37, %v4793_v61  ;;  %v4799_v0 = vshrl.u32 %v13325_v24, %v4793_v61  ;;  %6299 = vmatmul.msk.f32.gmra.mxu0 %vm1664_vm0, %v11763_v32 }
 0x4d4   : > { %v13442_v22 = vmov 920167782   ;;  %v3617_v63 = vsel %vm3610_vm3, %v3613_v59, %v3616_v42  ;;  %v4802_v12 = vshrl.u32 %v13326_v50, %v4793_v61  ;;  %v5922_v31 = vshll.u32 %v11742_v47, 16 }
 0x4d5   : > { %v11751_v1 = vshll.u32 %v13442_v22, %v4792_v25  ;;  %v4805_v21 = vshrl.u32 %v13442_v22, %v4793_v61  ;;  %v3618_v60 = vsel %vm3607_vm9, nan, %v3617_v63  ;;  %v13443_v33 = vmov 1326507024  }
 0x4d6   : > { %v11758_v20 = vshrl.u32 %v13443_v33, %v4793_v61  ;;  %v4550_v53 = vmul.f32 %v3618_v60, %v3190_v43  ;;  %v6330_v25 = vadd.s32 4294967294, %v5659_v6  ;;  %v11766_v28 = vshrl.u32 %v5807_v41, 30  ;;  %v3201_v6 = vpop.f32.mrf.mxu3 }
 0x4d7   : > { %v4794_v26 = vshrl.u32 %v12936_v46, %v4793_v61  ;;  %vm4810_vm14 = vcmp.lt.s32.totalorder %v11721_v5, 1  ;;  %v11770_v63 = vshrl.u32 %v4945_v36, 5  ;;  %v5520_v7 = vxor.u32 2147483648, %v5519_v19  ;;  %v13444_v36 = vld [vmem:[#allocation42_spill] sm:$0xff] }
 0x4d8   : > { %v4797_v42 = vor.u32 %v4796_v38, %v4795_v62  ;;  %v11772_v59 = vor.u32 %v4799_v0, %v4798_v9  ;;  %vm4813_vm11 = vcmp.lt.s32.totalorder %v11721_v5, 4  ;;  %4656 = vmatpush.msrb.mxu1 %v4550_v53  ;;  %v5925_v60 = vsel %vm11715_vm10, 1, %v12925_v14  ;;  %v3123_v9 = vpop.permute.xlu0 %3122 }
 0x4d9   : > { %v11778_v43 = vor.u32 %v4802_v12, %v4801_v40  ;;  %v11780_v41 = vor.u32 %v4805_v21, %v4804_v55  ;;  %v11783_v61 = vsub.s32 32, %v11723_v27  ;;  %6300 = vmatmul.msk.f32.vlgmr.msrb.gmra.mxu1 %vm1664_vm0, %v11602_v34  ;;  %vm5928_vm15 = vc.u32 %v13444_v36, %v5922_v31  ;;  %v3169_v55 = vpop.f32.mrf.mxu2  ;;  %v13448_v12 = vld [vmem:[#allocation56_spill] sm:$0xff] }
 0x4da   : > { %v11796_v62 = vshll.u32 %v12936_v46, %v11723_v27  ;;  %vm6331_vm12 = vcmp.lt.s32.totalorder %v6330_v25, 0  ;;  %v5809_v40 = vshll.u32 %v11766_v28, 30  ;;  %v3202_v34 = vadd.f32 %v3201_v6, %v3123_v9 }
 0x4db   : > { %v13445_v38 = vand.u32 2147483647, %v13435_v30  ;;  %v5521_v31 = vsel %vm5400_vm4, %v5520_v7, %v5519_v19  ;;  %v5927_v21 = vadd.s32 %v5925_v60, %v13448_v12  ;;  %v3170_v53 = vadd.f32 %v3169_v55, %v3123_v9  ;;  %v13453_v7 = vld [vmem:[#allocation68_spill] sm:$0xff] }
 0x4dc   : > { %vm3207_vm1 = vcmask 1043456   ;;  %v11808_v36 = vsub.s32 %v5806_v44, %v5809_v40  ;;  %v5929_v56 = vsel %vm5928_vm15, 1, %v12925_v14  ;;  %v3206_v48 = vrot.slane %v3202_v34, 4 }
 0x4dd   : > { %vm11801_vm8 = vcmp.le.f32.partialorder %v13445_v38, 0.7853982  ;;  %v11811_v6 = vsel %vm6331_vm12, 0, %v6330_v25  ;;  %v13451_v38 = vand.u32 65535, %v13450_v51  ;;  %v11823_v19 = vshll.u32 %v13324_v37, %v11723_v27 }
 0x4de   : > { %vm5811_vm6 = vcmp.lt.s32.totalorder %v11808_v36, 0  ;;  %v5812_v44 = vsub.s32 0, %v11808_v36  ;;  %v5942_v25 = vshll.u32 %v13453_v7, 16  ;;  %vm4812_vm13 = vcmp.lt.s32.totalorder %v11721_v5, 3 }
 0x4df   : > { %v5938_v49 = vmul.u32 %v13451_v38, %v13449_v58  ;;  %v13452_v17 = vmov %v13451_v38  ;;  %v4814_v58 = vsel %vm4810_vm14, %v4794_v26, %v4797_v42  ;;  %v3208_v60 = vsel %vm3207_vm1, %v3170_v53, %v3206_v48 }
 0x4e0   : > { %v11819_v29 = vmul.u32 %v13452_v17, %v13439_v8  ;;  %v11835_v51 = vsel %vm11801_vm8, %v13435_v30, %v5521_v31  ;;  %v5921_v17 = vshrl.u32 %v13429_v54, 16  ;;  %3210 = vst [vmem:[%s11838_s20] sm:$0x77] %v3208_v60  ;;  %v5667_v8 = vsub.s32 4294967266, %v11811_v6 }
 0x4e1   : > { %v5813_v9 = vsel %vm5811_vm6, %v5812_v44, %v11808_v36  ;;  %v5931_v40 = vadd.s32 %v5929_v56, %v5927_v21  ;;  %v4815_v48 = vsel %vm4813_vm11, %v11778_v43, 2102212464  ;;  %6301 = vmatmul.msk.f32.gmra.mxu1 %vm1664_vm0, %v11639_v39  ;;  %v5647_v54 = vadd.s32 %v11587_v11, %v11583_v15  ;;  %v13454_v21 = vld [vmem:[#allocation64_spill] sm:$0xff] }
 0x4e2   : > { %v5944_v26 = vshll.u32 %v11819_v29, 16  ;;  %v5814_v34 = vclz %v5813_v9  ;;  %vm5946_vm2 = vc.u32 %v5938_v49, %v5942_v25  ;;  %v11853_v55 = vmul.f32 %v11835_v51, %v11835_v51 }
 0x4e3   : > { %v5663_v56 = vsub.s32 32, %v11811_v6  ;;  %v5947_v31 = vsel %vm5946_vm2, 1, %v12925_v14  ;;  %v5948_v12 = vadd.s32 %v5942_v25, %v5938_v49  ;;  %vm4811_vm10 = vcmp.lt.s32.totalorder %v11721_v5, 2 }
 0x4e4   : > { %v4818_v39 = vsel %vm4810_vm14, %v4797_v42, %v11772_v59  ;;  %v4819_v15 = vsel %vm4813_vm11, %v11780_v41, 920167782  ;;  %v6333_v11 = vadd.s32 4294967294, %v5814_v34  ;;  %v5949_v53 = vadd.s32 %v5947_v31, %v13454_v21 }
 0x4e5   : > { %v5668_v38 = vadd.s32 127, %v5667_v8  ;;  %v5923_v44 = vshrl.u32 %v11742_v47, 16  ;;  %v5932_v60 = vadd.s32 %v5931_v40, %v5921_v17  ;;  %vm5950_vm5 = vc.u32 %v5948_v12, %v5944_v26 }
 0x4e6   : > { %v5802_v49 = vadd.s32 %v11679_v23, %v11677_v35  ;;  %vm6334_vm7 = vcmp.lt.s32.totalorder %v6333_v11, 0  ;;  %v5943_v25 = vshrl.u32 %v13453_v7, 16  ;;  %v5951_v42 = vsel %vm5950_vm5, 1, %v12925_v14 }
 0x4e7   : > { %v5534_v9 = vmul.f32 -0.00019511016, %v11853_v55  ;;  %v5664_v34 = vshll.u32 %v11681_v57, %v11811_v6  ;;  %v5665_v18 = vshrl.u32 %v5647_v54, %v5663_v56  ;;  %v5817_v31 = vsel %vm6334_vm7, 0, %v6333_v11 }
 0x4e8   : > { %v5818_v8 = vsub.s32 32, %v5817_v31  ;;  %v5822_v21 = vsub.s32 4294967266, %v5817_v31  ;;  %v5945_v47 = vshrl.u32 %v11819_v29, 16  ;;  %v5953_v17 = vadd.s32 %v5951_v42, %v5949_v53 }
 0x4e9   : > { %v5669_v40 = vshll.u32 %v5668_v38, 23  ;;  %v5819_v35 = vshll.u32 %v11808_v36, %v5817_v31  ;;  %v11875_v23 = vadd.s32 %v5932_v60, %v5923_v44  ;;  %v11877_v7 = vadd.s32 %v5948_v12, %v5944_v26  ;;  %6302 = vmatmul.msk.f32.gmra.mxu1 %vm1664_vm0, %v11675_v4 }
 0x4ea   : > { %v4822_v14 = vsel %vm4810_vm14, %v11772_v59, %v11778_v43  ;;  %v5820_v57 = vshrl.u32 %v5802_v49, %v5818_v8  ;;  %v5823_v6 = vadd.s32 127, %v5822_v21  ;;  %v5954_v54 = vadd.s32 %v5953_v17, %v5943_v25  ;;  %v13456_v8 = vld [vmem:[#allocation11_spill] sm:$0xff]  ;;  %v13459_v17 = vld [vmem:[#allocation10_spill] sm:$0xff] }
 0x4eb   : > { %v4816_v29 = vsel %vm4812_vm13, %v11772_v59, %v4815_v48  ;;  %v4820_v36 = vsel %vm4812_vm13, %v11778_v43, %v4819_v15  ;;  %v13455_v26 = vor.u32 %v11758_v20, %v11751_v1  ;;  %v5527_v12 = vmul.f32 -0.001358992, %v11853_v55 }
 0x4ec   : > { %v5535_v4 = vadd.f32 0.008332121, %v5534_v9  ;;  %v5666_v11 = vor.u32 %v5665_v18, %v5664_v34  ;;  %v5824_v53 = vshll.u32 %v5823_v6, 23  ;;  %v5955_v38 = vadd.s32 %v5954_v54, %v5945_v47 }
 0x4ed   : > { %v4823_v56 = vsel %vm4813_vm11, %v13455_v26, 1326507024  ;;  %v11899_v44 = vshrl.u32 %v12936_v46, %v11783_v61  ;;  %v5670_v59 = vor.u32 4788187, %v5669_v40  ;;  %v5821_v48 = vor.u32 %v5820_v57, %v5819_v35 }
 0x4ee   : > { %vm5958_vm3 = vc.u32 %v11875_v23, %v11877_v7  ;;  %v11905_v20 = vsel %vm4811_vm10, %v4814_v58, %v4816_v29  ;;  %v4824_v1 = vsel %vm4812_vm13, %v11780_v41, %v4823_v56  ;;  %v5825_v18 = vor.u32 4788187, %v5824_v53 }
 0x4ef   : > { %v5959_v43 = vadd.s32 1, %v5955_v38  ;;  %v11912_v15 = vsel %vm4811_vm10, %v4818_v39, %v4820_v36  ;;  %v4951_v46 = vshrl.u32 %v13324_v37, %v11783_v61  ;;  %v4962_v60 = vshll.u32 %v13442_v22, %v11723_v27  ;;  %v13457_v39 = vld [vmem:[#allocation55_spill] sm:$0xff]  ;;  %v13460_v37 = vld [vmem:[#allocation46_spill] sm:$0xff] }
 0x4f0   : > { %v5528_v49 = vadd.f32 0.041655596, %v5527_v12  ;;  %v4963_v58 = vshrl.u32 %v13443_v33, %v11783_v61  ;;  %v5536_v25 = vmul.f32 %v5535_v4, %v11853_v55  ;;  %v5673_v42 = vcvt.s32.f32 %v5666_v11 }
 0x4f1   : > { %v5960_v41 = vsel %vm5958_vm3, %v5959_v43, %v5955_v38  ;;  %v5671_v9 = vand.u32 2147483647, %v5670_v59  ;;  %v5826_v34 = vand.u32 2147483647, %v5825_v18  ;;  %v5828_v31 = vcvt.s32.f32 %v5821_v48  ;;  %6303 = vmatmul.msk.f32.gmra.mxu1 %vm1664_vm0, %v11728_v2 }
 0x4f2   : > { %v13458_v21 = vmul.u32 %v13456_v8, %v13457_v39  ;;  %vm5710_vm9 = vcmp.lt.s32.totalorder %v13459_v17, 0  ;;  %vm5555_vm14 = vcmp.lt.s32.totalorder %v13460_v37, 0  ;;  %v11928_v40 = vsel %vm4811_vm10, %v4822_v14, %v4824_v1 }
 0x4f3   : > { %v4954_v33 = vshrl.u32 %v13325_v24, %v11783_v61  ;;  %v4956_v35 = vshll.u32 %v13325_v24, %v11723_v27  ;;  %v4957_v57 = vshrl.u32 %v13326_v50, %v11783_v61  ;;  %v5522_v54 = vsub.s32 4, %v11557_v52 }
 0x4f4   : > { %v5961_v47 = vadd.s32 %v5960_v41, %v13458_v21  ;;  %v5529_v14 = vmul.f32 %v5528_v49, %v11853_v55  ;;  %v4959_v29 = vshll.u32 %v13326_v50, %v11723_v27  ;;  %v4960_v24 = vshrl.u32 %v13442_v22, %v11783_v61 }
 0x4f5   : > { %v4964_v36 = vor.u32 %v4963_v58, %v4962_v60  ;;  %v5537_v26 = vadd.f32 -0.16666654, %v5536_v25  ;;  %vm4968_vm11 = vcmp.lt.s32.totalorder %v11770_v63, 4  ;;  %v5674_v56 = vmul.f32 %v5673_v42, %v5671_v9 }
 0x4f6   : > { %v5962_v5 = vadd.s32 536870912, %v5961_v47  ;;  %v5829_v2 = vmul.f32 %v5828_v31, %v5826_v34  ;;  %v4829_v4 = vand.u32 65535, %v11928_v40  ;;  %v4830_v11 = vshrl.u32 %v11928_v40, 16 }
 0x4f7   : > { %v4955_v53 = vor.u32 %v4954_v33, %v11823_v19  ;;  %v4958_v38 = vor.u32 %v4957_v57, %v4956_v35  ;;  %vm4965_vm15 = vcmp.lt.s32.totalorder %v11770_v63, 1  ;;  %v5523_v50 = vsel %vm5400_vm4, %v5522_v54, %v11557_v52 }
 0x4f8   : > { %v11947_v12 = vshrl.u32 %v5962_v5, 30  ;;  %v5530_v27 = vadd.f32 -0.4999988, %v5529_v14  ;;  %v4961_v61 = vor.u32 %v4960_v24, %v4959_v29  ;;  %vm4967_vm12 = vcmp.lt.s32.totalorder %v11770_v63, 3 }
 0x4f9   : > { %v4978_v59 = vsel %vm4968_vm11, %v4964_v36, 1326507024  ;;  %v5538_v48 = vmul.f32 %v5537_v26, %v11853_v55  ;;  %v4851_v19 = vand.u32 65535, %v11912_v15  ;;  %v4852_v1 = vshrl.u32 %v11912_v15, 16  ;;  %6304 = vmatmul.msk.f32.gmra.mxu1 %vm1664_vm0, %v11763_v32 }
 0x4fa   : > { %v5964_v22 = vshll.u32 %v11947_v12, 30  ;;  %v5675_v18 = vxor.u32 2147483648, %v5674_v56  ;;  %v5830_v43 = vxor.u32 2147483648, %v5829_v2  ;;  %v11966_v52 = vmul.u32 %v4829_v4, %v11692_v10 }
 0x4fb   : > { %v4952_v60 = vor.u32 %v4951_v46, %v11796_v62  ;;  %v5525_v49 = vsel %vm11801_vm8, 0, %v5523_v50  ;;  %vm4966_vm4 = vcmp.lt.s32.totalorder %v11770_v63, 2  ;;  %v4977_v25 = vsel %vm4965_vm15, %v4955_v53, %v4958_v38 }
 0x4fc   : > { %v11973_v58 = vsub.s32 %v5961_v47, %v5964_v22  ;;  %v4979_v42 = vsel %vm4967_vm12, %v4961_v61, %v4978_v59  ;;  %v5531_v41 = vmul.f32 %v5530_v27, %v11853_v55  ;;  %v11982_v62 = vmul.u32 %v4830_v11, %v11692_v10 }
 0x4fd   : > { %v4974_v32 = vsel %vm4968_vm11, %v4961_v61, 920167782  ;;  %v5539_v0 = vadd.f32 1.0, %v5538_v48  ;;  %v13461_v46 = vand.u32 2147483647, %v13460_v37  ;;  %v5542_v34 = vadd.s32 3, %v5525_v49 }
 0x4fe   : > { %v5676_v31 = vsel %vm5555_vm14, %v5675_v18, %v5674_v56  ;;  %v13464_v8 = vand.u32 2147483647, %v13459_v17  ;;  %v5831_v39 = vsel %vm5710_vm9, %v5830_v43, %v5829_v2  ;;  %v4970_v21 = vsel %vm4968_vm11, %v4958_v38, 2102212464 }
 0x4ff   : > { %vm11988_vm8 = vcmp.le.f32.partialorder %v13461_v46, 0.7853982  ;;  %v4973_v47 = vsel %vm4965_vm15, %v4952_v60, %v4955_v53  ;;  %v12008_v33 = vsel %vm4966_vm4, %v4977_v25, %v4979_v42  ;;  %v5967_v35 = vsub.s32 0, %v11973_v58 }
 0x500   : > { %vm11996_vm6 = vcmp.le.f32.partialorder %v13464_v8, 0.7853982  ;;  %v4975_v57 = vsel %vm4967_vm12, %v4958_v38, %v4974_v32  ;;  %v5532_v54 = vadd.f32 1.0, %v5531_v41  ;;  %v5677_v14 = vsub.s32 4, %v11664_v13 }
 0x501   : > { %vm5966_vm13 = vcmp.lt.s32.totalorder %v11973_v58, 0  ;;  %v5540_v5 = vmul.f32 %v5539_v0, %v11835_v51  ;;  %v12019_v29 = vsel %vm11988_vm8, %v13460_v37, %v5676_v31  ;;  %v5832_v24 = vsub.s32 4, %v11766_v28 }
 0x502   : > { %v12025_v36 = vsel %vm11996_vm6, %v13459_v17, %v5831_v39  ;;  %v12028_v26 = vmul.u32 %v4830_v11, %v11695_v45  ;;  %v12031_v56 = vmul.u32 %v4852_v1, %v11692_v10  ;;  %v4985_v51 = vshrl.u32 %v12008_v33, 16 }
 0x503   : > { %v5543_v2 = vand.u32 3, %v5542_v34  ;;  %v4835_v38 = vshll.u32 %v11982_v62, 16  ;;  %v4969_v50 = vsel %vm4965_vm15, %v11899_v44, %v4952_v60  ;;  %v4971_v27 = vsel %vm4967_vm12, %v4955_v53, %v4970_v21 }
 0x504   : > { %v5968_v22 = vsel %vm5966_vm13, %v5967_v35, %v11973_v58  ;;  %v12043_v11 = vsel %vm4966_vm4, %v4973_v47, %v4975_v57  ;;  %v5678_v61 = vsel %vm5555_vm14, %v5677_v14, %v11664_v13  ;;  %v12050_v59 = vmul.f32 %v12019_v29, %v12019_v29 }
 0x505   : > { %v12054_v44 = vmul.f32 %v12025_v36, %v12025_v36  ;;  %v4984_v53 = vand.u32 65535, %v12008_v33  ;;  %v5546_v48 = vxor.u32 2147483648, %v5540_v5  ;;  %v5549_v18 = vxor.u32 2147483648, %v5532_v54 }
 0x506   : > { %v5833_v43 = vsel %vm5710_vm9, %v5832_v24, %v11766_v28  ;;  %v12061_v60 = vmul.u32 %v4985_v51, %v11698_v3  ;;  %vm5545_vm2 = vcmp.eq.s32.totalorder %v5543_v2, 0  ;;  %vm5548_vm10 = vcmp.eq.s32.totalorder %v5543_v2, 2 }
 0x507   : > { %v5969_v13 = vclz %v5968_v22  ;;  %v12064_v49 = vadd.s32 %v4835_v38, %v11966_v52  ;;  %v4856_v25 = vmul.u32 %v4852_v1, %v11695_v45  ;;  %v5680_v42 = vsel %vm11988_vm8, 0, %v5678_v61  ;;  %v13473_v61 = vld [vmem:[#allocation79_spill] sm:$0xff] }
 0x508   : > { %v5682_v41 = vmul.f32 -0.001358992, %v12050_v59  ;;  %v12072_v32 = vsel %vm4966_vm4, %v4969_v50, %v4971_v27  ;;  %v5689_v28 = vmul.f32 -0.00019511016, %v12050_v59  ;;  %v5835_v0 = vsel %vm11996_vm6, 0, %v5833_v43 }
 0x509   : > { %v5844_v46 = vmul.f32 -0.00019511016, %v12054_v44  ;;  %v5007_v34 = vshrl.u32 %v12043_v11, 16  ;;  %vm5544_vm5 = vcmp.lt.s32.totalorder %v5543_v2, 2  ;;  %v5547_v1 = vsel %vm5545_vm2, %v5532_v54, %v5546_v48  ;;  %v13474_v48 = vld [vmem:[#allocation86_spill] sm:$0xff] }
 0x50a   : > { %v5550_v31 = vsel %vm5548_vm10, %v5549_v18, %v5540_v5  ;;  %v4986_v9 = vmul.u32 %v4984_v53, %v11698_v3  ;;  %v4990_v8 = vshll.u32 %v12061_v60, 16  ;;  %v5697_v39 = vadd.s32 3, %v5680_v42  ;;  %v13469_v5 = vld [vmem:[#allocation72_spill] sm:$0xff] }
 0x50b   : > { %v6336_v63 = vadd.s32 4294967294, %v5969_v13  ;;  %vm12082_vm7 = vc.u32 %v11966_v52, %v4835_v38  ;;  %v5006_v55 = vand.u32 65535, %v12043_v11  ;;  %vm5541_vm3 = vweird.f32 %v13435_v30  ;;  %v13470_v38 = vld [vmem:[#allocation30_spill] sm:$0xff]  ;;  %v13476_v30 = vld [vmem:[#allocation99_spill] sm:$0xff] }
 0x50c   : > { %v5683_v47 = vadd.f32 0.041655596, %v5682_v41  ;;  %v5852_v33 = vadd.s32 3, %v5835_v0  ;;  %v5551_v35 = vsel %vm5544_vm5, %v5547_v1, %v5550_v31  ;;  %v5690_v57 = vadd.f32 0.008332121, %v5689_v28  ;;  %v13478_v31 = vld [vmem:[#allocation103_spill] sm:$0xff] }
 0x50d   : > { %v5837_v54 = vmul.f32 -0.001358992, %v12054_v44  ;;  %v5845_v14 = vadd.f32 0.008332121, %v5844_v46  ;;  %v4989_v24 = vmul.u32 %v4985_v51, %v13469_v5  ;;  %v12091_v2 = vmul.u32 %v5007_v34, %v11698_v3 }
 0x50e   : > { %v12094_v52 = vmul.u32 %v5007_v34, %v13469_v5  ;;  %vm12098_vm9 = vc.u32 %v4986_v9, %v4990_v8  ;;  %v4996_v22 = vadd.s32 %v4990_v8, %v4986_v9  ;;  %v12102_v11 = vand.u32 3, %v5697_v39  ;;  %v13479_v8 = vld [vmem:[#allocation82_spill] sm:$0xff]  ;;  %v13480_v39 = vld [vmem:[#allocation27_spill] sm:$0xff] }
 0x50f   : > { %vm6337_vm14 = vcmp.lt.s32.totalorder %v6336_v63, 0  ;;  %v13475_v51 = vand.u32 65535, %v13474_v48  ;;  %v12111_v43 = vsel %vm5541_vm3, nan, %v5551_v35  ;;  %v12114_v13 = vmul.f32 %v5683_v47, %v12050_v59 }
 0x510   : > { %v12116_v42 = vand.u32 3, %v5852_v33  ;;  %v12119_v41 = vmul.f32 %v5690_v57, %v12050_v59  ;;  %v12121_v28 = vadd.f32 0.041655596, %v5837_v54  ;;  %v12124_v0 = vmul.f32 %v5845_v14, %v12054_v44  ;;  %v13482_v54 = vld [vmem:[#allocation25_spill] sm:$0xff] }
 0x511   : > { %v12107_v18 = vmul.u32 %v13475_v51, %v13473_v61  ;;  %v12128_v46 = vadd.s32 %v11877_v7, %v11875_v23  ;;  %v13477_v34 = vmov %v13475_v51  ;;  %v5167_v9 = vshll.u32 %v13478_v31, 16 }
 0x512   : > { %v5163_v1 = vmul.u32 %v13477_v34, %v13476_v30  ;;  %v13481_v47 = vand.u32 65535, %v13480_v39  ;;  %v12139_v35 = vsel %vm6337_vm14, 0, %v6336_v63  ;;  %v4853_v57 = vmul.u32 %v4851_v19, %v11692_v10 }
 0x513   : > { %v4855_v23 = vmul.u32 %v4851_v19, %v11695_v45  ;;  %v4857_v7 = vshll.u32 %v12031_v56, 16  ;;  %v13483_v14 = vand.u32 65535, %v13482_v54  ;;  %v4833_v63 = vmul.u32 %v4829_v4, %v11695_v45 }
 0x514   : > { %v12137_v33 = vmul.u32 %v13481_v47, %v13479_v8  ;;  %v4988_v51 = vmul.u32 %v4984_v53, %v13469_v5  ;;  %v5008_v30 = vmul.u32 %v5006_v55, %v11698_v3  ;;  %v12160_v19 = vmul.u32 %v5006_v55, %v13469_v5  ;;  %v13484_v8 = vld [vmem:[#allocation62_spill] sm:$0xff] }
 0x515   : > { %v12151_v48 = vmul.u32 %v13483_v14, %v13473_v61  ;;  %v4859_v34 = vshll.u32 %v4855_v23, 16  ;;  %vm4861_vm11 = vc.u32 %v4853_v57, %v4857_v7  ;;  %v4863_v15 = vadd.s32 %v4857_v7, %v4853_v57  ;;  %v13486_v61 = vld [vmem:[#allocation18_spill] sm:$0xff] }
 0x516   : > { %v13485_v47 = vshll.u32 %v13484_v8, 16  ;;  %v4837_v45 = vshll.u32 %v4833_v63, 16  ;;  %v13489_v40 = vmov 0   ;;  %v4992_v53 = vshll.u32 %v4988_v51, 16 }
 0x517   : > { %v4862_v4 = vsel %vm4861_vm11, 1, %v13489_v40  ;;  %v5012_v3 = vshll.u32 %v12091_v2, 16  ;;  %v4840_v57 = vsel %vm12082_vm7, 1, %v13489_v40  ;;  %vm4865_vm12 = vc.u32 %v4863_v15, %v4859_v34 }
 0x518   : > { %vm12165_vm15 = vc.u32 %v13486_v61, %v13485_v47  ;;  %v4864_v7 = vadd.s32 %v4862_v4, %v4856_v25  ;;  %v4995_v55 = vsel %vm12098_vm9, 1, %v13489_v40  ;;  %v4842_v5 = vadd.s32 %v4840_v57, %v12028_v26 }
 0x519   : > { %vm4843_vm4 = vc.u32 %v12064_v49, %v4837_v45  ;;  %v4866_v14 = vsel %vm4865_vm12, 1, %v13489_v40  ;;  %v4997_v47 = vadd.s32 %v4995_v55, %v4989_v24  ;;  %v4858_v50 = vshrl.u32 %v12031_v56, 16  ;;  %v13492_v55 = vld [vmem:[#allocation81_spill] sm:$0xff]  ;;  %v13494_v56 = vld [vmem:[#allocation63_spill] sm:$0xff] }
 0x51a   : > { %v4844_v61 = vsel %vm4843_vm4, 1, %v13489_v40  ;;  %v4868_v10 = vadd.s32 %v4866_v14, %v4864_v7  ;;  %vm4998_vm8 = vc.u32 %v4996_v22, %v4992_v53  ;;  %vm12182_vm6 = vc.u32 %v5163_v1, %v5167_v9 }
 0x51b   : > { %v4836_v21 = vshrl.u32 %v11982_v62, 16  ;;  %v4838_v27 = vshrl.u32 %v4833_v63, 16  ;;  %v4846_v4 = vadd.s32 %v4844_v61, %v4842_v5  ;;  %v5173_v26 = vadd.s32 %v5167_v9, %v5163_v1 }
 0x51c   : > { %v4860_v57 = vshrl.u32 %v4855_v23, 16  ;;  %v4869_v49 = vadd.s32 %v4868_v10, %v4858_v50  ;;  %v4991_v45 = vshrl.u32 %v12061_v60, 16  ;;  %v5147_v24 = vshll.u32 %v12151_v48, 16 }
 0x51d   : > { %v13493_v6 = vshll.u32 %v13492_v55, 16  ;;  %v4847_v53 = vadd.s32 %v4846_v4, %v4836_v21  ;;  %v12196_v7 = vadd.s32 %v4863_v15, %v4859_v34  ;;  %v4999_v62 = vsel %vm4998_vm8, 1, %v13489_v40 }
 0x51e   : > { %v5014_v1 = vshll.u32 %v12160_v19, 16  ;;  %v4870_v9 = vadd.s32 %v4869_v49, %v4860_v57  ;;  %v4993_v50 = vshrl.u32 %v4988_v51, 16  ;;  %v5001_v23 = vadd.s32 %v4999_v62, %v4997_v47  ;;  %v13499_v57 = vld [vmem:[#allocation105_spill] sm:$0xff] }
 0x51f   : > { %vm12192_vm13 = vc.u32 %v13494_v56, %v13493_v6  ;;  %vm5016_vm2 = vc.u32 %v5008_v30, %v5012_v3  ;;  %v12200_v60 = vadd.s32 %v4847_v53, %v4838_v27  ;;  %v5013_v63 = vshrl.u32 %v12091_v2, 16  ;;  %v13498_v27 = vld [vmem:[#allocation102_spill] sm:$0xff]  ;;  %v13501_v56 = vld [vmem:[#allocation101_spill] sm:$0xff] }
 0x520   : > { %v5017_v6 = vsel %vm5016_vm2, 1, %v13489_v40  ;;  %v5018_v10 = vadd.s32 %v5012_v3, %v5008_v30  ;;  %v4874_v5 = vadd.s32 1, %v4870_v9  ;;  %v5002_v14 = vadd.s32 %v5001_v23, %v4991_v45  ;;  %v13500_v45 = vld [vmem:[#allocation13_spill] sm:$0xff] }
 0x521   : > { %v5015_v34 = vshrl.u32 %v12160_v19, 16  ;;  %v5019_v15 = vadd.s32 %v5017_v6, %v12094_v52  ;;  %vm4873_vm10 = vc.u32 %v12200_v60, %v12196_v7  ;;  %v5146_v47 = vshrl.u32 %v13484_v8, 16 }
 0x522   : > { %vm5020_vm5 = vc.u32 %v5018_v10, %v5014_v1  ;;  %v12208_v51 = vadd.s32 %v5018_v10, %v5014_v1  ;;  %v4875_v61 = vsel %vm4873_vm10, %v4874_v5, %v4870_v9  ;;  %v12211_v21 = vadd.s32 %v5002_v14, %v4993_v50  ;;  %v13504_v50 = vld [vmem:[#allocation104_spill] sm:$0xff] }
 0x523   : > { %v5021_v2 = vsel %vm5020_vm5, 1, %v13489_v40  ;;  %v5150_v30 = vsel %vm12165_vm15, 1, %v13489_v40  ;;  %v13497_v52 = vmul.u32 %v11614_v16, %v11905_v20  ;;  %vm5153_vm7 = vc.u32 %v13499_v57, %v5147_v24  ;;  %v13509_v57 = vld [vmem:[#allocation84_spill] sm:$0xff] }
 0x524   : > { %v5023_v3 = vadd.s32 %v5021_v2, %v5019_v15  ;;  %v5152_v4 = vadd.s32 %v5150_v30, %v13498_v27  ;;  %v5148_v8 = vshrl.u32 %v12151_v48, 16  ;;  %v5154_v49 = vsel %vm5153_vm7, 1, %v13489_v40 }
 0x525   : > { %v4876_v19 = vadd.s32 %v4875_v61, %v13497_v52  ;;  %v13502_v53 = vand.u32 65535, %v13501_v56  ;;  %v13503_v54 = vand.u32 65535, %v13480_v39  ;;  %v5172_v24 = vsel %vm12182_vm6, 1, %v13489_v40 }
 0x526   : > { %v5024_v20 = vadd.s32 %v5023_v3, %v5013_v63  ;;  %v5156_v9 = vadd.s32 %v5154_v49, %v5152_v4  ;;  %vm5028_vm3 = vc.u32 %v12211_v21, %v12208_v51  ;;  %v5168_v48 = vshrl.u32 %v13478_v31, 16  ;;  %v13507_v3 = vld [vmem:[#allocation83_spill] sm:$0xff]  ;;  %v13508_v4 = vld [vmem:[#allocation20_spill] sm:$0xff] }
 0x527   : > { %v12227_v62 = vmul.u32 %v13502_v53, %v13500_v45  ;;  %v12232_v1 = vmul.u32 %v13503_v54, %v13500_v45  ;;  %v4877_v16 = vadd.s32 536870912, %v4876_v19  ;;  %v5174_v23 = vadd.s32 %v5172_v24, %v13504_v50 }
 0x528   : > { %v13505_v6 = vshll.u32 %v12107_v18, 16  ;;  %v5025_v10 = vadd.s32 %v5024_v20, %v5015_v34  ;;  %v5157_v5 = vadd.s32 %v5156_v9, %v5146_v47  ;;  %v5170_v14 = vshrl.u32 %v12107_v18, 16 }
 0x529   : > { %v12243_v39 = vshrl.u32 %v4877_v16, 30  ;;  %v5302_v15 = vshll.u32 %v12227_v62, 16  ;;  %v5305_v31 = vsel %vm12192_vm13, 1, %v13489_v40  ;;  %v5322_v49 = vshll.u32 %v13509_v57, 16 }
 0x52a   : > { %vm5175_vm9 = vc.u32 %v5173_v26, %v13505_v6  ;;  %v5029_v2 = vadd.s32 1, %v5025_v10  ;;  %v12252_v30 = vadd.s32 %v5157_v5, %v5148_v8  ;;  %v13506_v52 = vmov %v13505_v6  ;;  %v13511_v5 = vld [vmem:[#allocation31_spill] sm:$0xff] }
 0x52b   : > { %v5176_v63 = vsel %vm5175_vm9, 1, %v13489_v40  ;;  %v4879_v61 = vshll.u32 %v12243_v39, 30  ;;  %v12256_v34 = vadd.s32 %v5173_v26, %v13506_v52  ;;  %v5307_v27 = vadd.s32 %v5305_v31, %v13507_v3 }
 0x52c   : > { %v5178_v25 = vadd.s32 %v5176_v63, %v5174_v23  ;;  %vm5308_vm14 = vc.u32 %v13508_v4, %v5302_v15  ;;  %v5030_v22 = vsel %vm5028_vm3, %v5029_v2, %v5025_v10  ;;  %v5973_v56 = vsub.s32 32, %v12139_v35 }
 0x52d   : > { %v4880_v45 = vsub.s32 %v4876_v19, %v4879_v61  ;;  %v5977_v8 = vsub.s32 4294967266, %v12139_v35  ;;  %v13510_v18 = vmul.u32 %v13470_v38, %v12072_v32  ;;  %v5301_v54 = vshrl.u32 %v13492_v55, 16 }
 0x52e   : > { %v5179_v47 = vadd.s32 %v5178_v25, %v5168_v48  ;;  %v5309_v16 = vsel %vm5308_vm14, 1, %v13489_v40  ;;  %vm5183_vm15 = vc.u32 %v12252_v30, %v12256_v34  ;;  %v5324_v19 = vshll.u32 %v12232_v1, 16  ;;  %v13513_v25 = vld [vmem:[#allocation78_spill] sm:$0xff] }
 0x52f   : > { %v5031_v26 = vadd.s32 %v5030_v22, %v13510_v18  ;;  %vm4881_vm11 = vcmp.lt.s32.totalorder %v4880_v45, 0  ;;  %v4882_v20 = vsub.s32 0, %v4880_v45  ;;  %v5311_v48 = vadd.s32 %v5309_v16, %v5307_v27 }
 0x530   : > { %v5180_v53 = vadd.s32 %v5179_v47, %v5170_v14  ;;  %vm5326_vm12 = vc.u32 %v12137_v33, %v5322_v49  ;;  %v5328_v38 = vadd.s32 %v5322_v49, %v12137_v33  ;;  %v5978_v55 = vadd.s32 127, %v5977_v8  ;;  %v13512_v14 = vld [vmem:[#allocation6_spill] sm:$0xff] }
 0x531   : > { %v5032_v9 = vadd.s32 536870912, %v5031_v26  ;;  %v4883_v50 = vsel %vm4881_vm11, %v4882_v20, %v4880_v45  ;;  %v5327_v32 = vsel %vm5326_vm12, 1, %v13489_v40  ;;  %v13514_v15 = vmul.u32 %v13512_v14, %v13513_v25 }
 0x532   : > { %v5184_v24 = vadd.s32 1, %v5180_v53  ;;  %v4884_v23 = vclz %v4883_v50  ;;  %v5329_v63 = vadd.s32 %v5327_v32, %v13511_v5  ;;  %v5303_v61 = vshrl.u32 %v12227_v62, 16 }
 0x533   : > { %v12277_v6 = vshrl.u32 %v5032_v9, 30  ;;  %v5323_v2 = vshrl.u32 %v13509_v57, 16  ;;  %vm5330_vm4 = vc.u32 %v5328_v38, %v5324_v19  ;;  %v5312_v33 = vadd.s32 %v5311_v48, %v5301_v54 }
 0x534   : > { %v5185_v10 = vsel %vm5183_vm15, %v5184_v24, %v5180_v53  ;;  %v6315_v52 = vadd.s32 4294967294, %v4884_v23  ;;  %v5331_v3 = vsel %vm5330_vm4, 1, %v13489_v40  ;;  %v5974_v49 = vshll.u32 %v11973_v58, %v12139_v35 }
 0x535   : > { %v5186_v31 = vadd.s32 %v5185_v10, %v13514_v15  ;;  %v5034_v47 = vshll.u32 %v12277_v6, 30  ;;  %v5333_v4 = vadd.s32 %v5331_v3, %v5329_v63  ;;  %v5975_v22 = vshrl.u32 %v12128_v46, %v5973_v56 }
 0x536   : > { %v4872_v8 = vadd.s32 %v12196_v7, %v12200_v60  ;;  %vm6316_vm8 = vcmp.lt.s32.totalorder %v6315_v52, 0  ;;  %v5979_v57 = vshll.u32 %v5978_v55, 23  ;;  %v5325_v54 = vshrl.u32 %v12232_v1, 16 }
 0x537   : > { %v5187_v27 = vadd.s32 536870912, %v5186_v31  ;;  %v12292_v62 = vsub.s32 %v5031_v26, %v5034_v47  ;;  %v4887_v18 = vsel %vm6316_vm8, 0, %v6315_v52  ;;  %v5334_v40 = vadd.s32 %v5333_v4, %v5323_v2  ;;  %v13515_v26 = vld [vmem:[#allocation5_spill] sm:$0xff] }
 0x538   : > { %v4888_v16 = vsub.s32 32, %v4887_v18  ;;  %v4889_v20 = vshll.u32 %v4880_v45, %v4887_v18  ;;  %v4892_v9 = vsub.s32 4294967266, %v4887_v18  ;;  %v12297_v24 = vadd.s32 %v5312_v33, %v5303_v61 }
 0x539   : > { %v12294_v53 = vshrl.u32 %v5187_v27, 30  ;;  %vm5036_vm6 = vcmp.lt.s32.totalorder %v12292_v62, 0  ;;  %v5037_v58 = vsub.s32 0, %v12292_v62  ;;  %v12302_v35 = vadd.s32 %v5328_v38, %v5324_v19 }
 0x53a   : > { %v4890_v7 = vshrl.u32 %v4872_v8, %v4888_v16  ;;  %v4893_v60 = vadd.s32 127, %v4892_v9  ;;  %v5692_v56 = vadd.f32 -0.16666654, %v12119_v41  ;;  %v5839_v1 = vmul.f32 %v12121_v28, %v12054_v44  ;;  %v13516_v8 = vld [vmem:[#allocation15_spill] sm:$0xff]  ;;  %v13520_v9 = vld [vmem:[#allocation98_spill] sm:$0xff] }
 0x53b   : > { %v5189_v46 = vshll.u32 %v12294_v53, 30  ;;  %vm4780_vm13 = vcmp.lt.s32.totalorder %v13515_v26, 0  ;;  %v5038_v45 = vsel %vm5036_vm6, %v5037_v58, %v12292_v62  ;;  %v5335_v50 = vadd.s32 %v5334_v40, %v5325_v54  ;;  %v13521_v58 = vld [vmem:[#allocation100_spill] sm:$0xff] }
 0x53c   : > { %v5847_v32 = vadd.f32 -0.16666654, %v12124_v0  ;;  %v4891_v55 = vor.u32 %v4890_v7, %v4889_v20  ;;  %v4894_v23 = vshll.u32 %v4893_v60, 23  ;;  %v5039_v19 = vclz %v5038_v45 }
 0x53d   : > { %v12309_v48 = vsub.s32 %v5186_v31, %v5189_v46  ;;  %v5976_v38 = vor.u32 %v5975_v22, %v5974_v49  ;;  %vm5338_vm10 = vc.u32 %v12297_v24, %v12302_v35  ;;  %v5685_v41 = vadd.f32 -0.4999988, %v12114_v13 }
 0x53e   : > { %v5980_v28 = vor.u32 4788187, %v5979_v57  ;;  %v4895_v10 = vor.u32 4788187, %v4894_v23  ;;  %v4898_v5 = vcvt.s32.f32 %v4891_v55  ;;  %v6318_v63 = vadd.s32 4294967294, %v5039_v19 }
 0x53f   : > { %vm5191_vm2 = vcmp.lt.s32.totalorder %v12309_v48, 0  ;;  %v5192_v14 = vsub.s32 0, %v12309_v48  ;;  %v5339_v25 = vadd.s32 1, %v5335_v50  ;;  %v5693_v0 = vmul.f32 %v5692_v56, %v12050_v59 }
 0x540   : > { %v5840_v15 = vadd.f32 -0.4999988, %v5839_v1  ;;  %v5848_v31 = vmul.f32 %v5847_v32, %v12054_v44  ;;  %v4896_v61 = vand.u32 2147483647, %v4895_v10  ;;  %v5027_v2 = vadd.s32 %v12208_v51, %v12211_v21 }
 0x541   : > { %vm6319_vm5 = vcmp.lt.s32.totalorder %v6318_v63, 0  ;;  %v5983_v52 = vcvt.s32.f32 %v5976_v38  ;;  %v5193_v13 = vsel %vm5191_vm2, %v5192_v14, %v12309_v48  ;;  %v5340_v33 = vsel %vm5338_vm10, %v5339_v25, %v5335_v50 }
 0x542   : > { %v5042_v47 = vsel %vm6319_vm5, 0, %v6318_v63  ;;  %v5981_v3 = vand.u32 2147483647, %v5980_v28  ;;  %v4899_v27 = vmul.f32 %v4898_v5, %v4896_v61  ;;  %vm5865_vm7 = vcmp.lt.s32.totalorder %v13516_v8, 0  ;;  %v13526_v63 = vld [vmem:[#allocation80_spill] sm:$0xff] }
 0x543   : > { %v5043_v4 = vsub.s32 32, %v5042_v47  ;;  %v5044_v49 = vshll.u32 %v12292_v62, %v5042_v47  ;;  %v5047_v22 = vsub.s32 4294967266, %v5042_v47  ;;  %v13517_v51 = vand.u32 2147483647, %v13515_v26 }
 0x544   : > { %v5194_v57 = vclz %v5193_v13  ;;  %v5686_v18 = vmul.f32 %v5685_v41, %v12050_v59  ;;  %v5694_v54 = vadd.f32 1.0, %v5693_v0  ;;  %v4900_v40 = vxor.u32 2147483648, %v4899_v27 }
 0x545   : > { %vm12331_vm3 = vcmp.le.f32.partialorder %v13517_v51, 0.7853982  ;;  %v5045_v16 = vshrl.u32 %v5027_v2, %v5043_v4  ;;  %v5048_v20 = vadd.s32 127, %v5047_v22  ;;  %v13522_v46 = vmul.u32 %v13520_v9, %v13521_v58 }
 0x546   : > { %v6321_v7 = vadd.s32 4294967294, %v5194_v57  ;;  %v5841_v60 = vmul.f32 %v5840_v15, %v12054_v44  ;;  %v5849_v56 = vadd.f32 1.0, %v5848_v31  ;;  %v5984_v1 = vmul.f32 %v5983_v52, %v5981_v3 }
 0x547   : > { %v5341_v62 = vadd.s32 %v5340_v33, %v13522_v46  ;;  %v4901_v45 = vsel %vm4780_vm13, %v4900_v40, %v4899_v27  ;;  %v5046_v50 = vor.u32 %v5045_v16, %v5044_v49  ;;  %v5049_v32 = vshll.u32 %v5048_v20, 23  ;;  %v12386_v46 = vpop.permute.xlu2 %4581 }
 0x548   : > { %v13523_v59 = vand.u32 2147483647, %v13516_v8  ;;  %v12351_v19 = vsel %vm12331_vm3, %v13515_v26, %v4901_v45  ;;  %vm6322_vm14 = vcmp.lt.s32.totalorder %v6321_v7, 0  ;;  %v5687_v44 = vadd.f32 1.0, %v5686_v18 }
 0x549   : > { %v5342_v55 = vadd.s32 536870912, %v5341_v62  ;;  %v5695_v38 = vmul.f32 %v5694_v54, %v12019_v29  ;;  %vm5700_vm11 = vcmp.eq.s32.totalorder %v12102_v11, 0  ;;  %vm5703_vm15 = vcmp.eq.s32.totalorder %v12102_v11, 2 }
 0x54a   : > { %vm12344_vm9 = vcmp.le.f32.partialorder %v13523_v59, 0.7853982  ;;  %v4902_v41 = vsub.s32 4, %v12243_v39  ;;  %v12359_v28 = vmul.f32 %v12351_v19, %v12351_v19  ;;  %v5050_v10 = vor.u32 4788187, %v5049_v32 }
 0x54b   : > { %v5053_v5 = vcvt.s32.f32 %v5046_v50  ;;  %vm4935_vm12 = vcmp.lt.s32.totalorder %v13526_v63, 0  ;;  %v5182_v14 = vadd.s32 %v12256_v34, %v12252_v30  ;;  %v5197_v25 = vsel %vm6322_vm14, 0, %v6321_v7 }
 0x54c   : > { %v12364_v0 = vshrl.u32 %v5342_v55, 30  ;;  %v5842_v29 = vadd.f32 1.0, %v5841_v60  ;;  %v4914_v15 = vmul.f32 -0.00019511016, %v12359_v28  ;;  %v5051_v31 = vand.u32 2147483647, %v5050_v10 }
 0x54d   : > { %v5850_v61 = vmul.f32 %v5849_v56, %v12025_v36  ;;  %vm5855_vm4 = vcmp.eq.s32.totalorder %v12116_v42, 0  ;;  %v5985_v2 = vxor.u32 2147483648, %v5984_v1  ;;  %v5198_v52 = vsub.s32 32, %v5197_v25  ;;  %v13527_v36 = vld [vmem:[#allocation70_spill] sm:$0xff] }
 0x54e   : > { %v5199_v47 = vshll.u32 %v12309_v48, %v5197_v25  ;;  %v5202_v13 = vsub.s32 4294967266, %v5197_v25  ;;  %v5344_v33 = vshll.u32 %v12364_v0, 30  ;;  %vm5699_vm8 = vcmp.lt.s32.totalorder %v12102_v11, 2 }
 0x54f   : > { %v4903_v30 = vsel %vm4780_vm13, %v4902_v41, %v12243_v39  ;;  %v4907_v34 = vmul.f32 -0.001358992, %v12359_v28  ;;  %v5054_v3 = vmul.f32 %v5053_v5, %v5051_v31  ;;  %vm5858_vm6 = vcmp.eq.s32.totalorder %v12116_v42, 2 }
 0x550   : > { %vm5090_vm2 = vcmp.lt.s32.totalorder %v13527_v36, 0  ;;  %v4915_v27 = vadd.f32 0.008332121, %v4914_v15  ;;  %v5200_v4 = vshrl.u32 %v5182_v14, %v5198_v52  ;;  %v5203_v49 = vadd.s32 127, %v5202_v13 }
 0x551   : > { %v12378_v48 = vsub.s32 %v5341_v62, %v5344_v33  ;;  %v5701_v22 = vxor.u32 2147483648, %v5695_v38  ;;  %v5704_v51 = vxor.u32 2147483648, %v5687_v44  ;;  %v5859_v57 = vxor.u32 2147483648, %v5842_v29  ;;  %v4626_v62 = vpop.f32.mrf.mxu0 }
 0x552   : > { %v5986_v18 = vsel %vm5865_vm7, %v5985_v2, %v5984_v1  ;;  %v5201_v54 = vor.u32 %v5200_v4, %v5199_v47  ;;  %v5204_v39 = vshll.u32 %v5203_v49, 23  ;;  %v5856_v16 = vxor.u32 2147483648, %v5850_v61  ;;  %v12443_v4 = vpop.permute.xlu1 %4586 }
 0x553   : > { %v5347_v40 = vsub.s32 0, %v12378_v48  ;;  %v4905_v20 = vsel %vm12331_vm3, 0, %v4903_v30  ;;  %v4908_v9 = vadd.f32 0.041655596, %v4907_v34  ;;  %v5055_v58 = vxor.u32 2147483648, %v5054_v3 }
 0x554   : > { %vm5346_vm13 = vcmp.lt.s32.totalorder %v12378_v48, 0  ;;  %v4916_v7 = vmul.f32 %v4915_v27, %v12359_v28  ;;  %v5205_v60 = vor.u32 4788187, %v5204_v39  ;;  %v5208_v56 = vcvt.s32.f32 %v5201_v54  ;;  %v12461_v39 = vpop.permute.xlu2 %4571 }
 0x555   : > { %v12392_v1 = vsel %vm12344_vm9, %v13516_v8, %v5986_v18  ;;  %v5212_v45 = vsub.s32 4, %v12294_v53  ;;  %v5702_v21 = vsel %vm5700_vm11, %v5687_v44, %v5701_v22  ;;  %v5705_v50 = vsel %vm5703_vm15, %v5704_v51, %v5695_v38 }
 0x556   : > { %vm5854_vm10 = vcmp.lt.s32.totalorder %v12116_v42, 2  ;;  %v4922_v32 = vadd.s32 3, %v4905_v20  ;;  %v5206_v55 = vand.u32 2147483647, %v5205_v60  ;;  %v5348_v59 = vsel %vm5346_vm13, %v5347_v40, %v12378_v48 }
 0x557   : > { %v5860_v41 = vsel %vm5858_vm6, %v5859_v57, %v5850_v61  ;;  %v4909_v10 = vmul.f32 %v4908_v9, %v12359_v28  ;;  %v13528_v5 = vand.u32 2147483647, %v13526_v63  ;;  %v5056_v44 = vsel %vm4935_vm12, %v5055_v58, %v5054_v3 }
 0x558   : > { %v12414_v38 = vmul.f32 %v12392_v1, %v12392_v1  ;;  %v4917_v25 = vadd.f32 -0.16666654, %v4916_v7  ;;  %v5209_v15 = vmul.f32 %v5208_v56, %v5206_v55  ;;  %v5349_v31 = vclz %v5348_v59 }
 0x559   : > { %vm12406_vm5 = vcmp.le.f32.partialorder %v13528_v5, 0.7853982  ;;  %v5857_v61 = vsel %vm5855_vm4, %v5842_v29, %v5856_v16  ;;  %v5213_v2 = vsel %vm5090_vm2, %v5212_v45, %v12294_v53  ;;  %v12423_v52 = vsel %vm5699_vm8, %v5702_v21, %v5705_v50  ;;  %v4629_v40 = vpop.f32.mrf.mxu0  ;;  %v13534_v5 = vld [vmem:[#allocation8_spill] sm:$0xff] }
 0x55a   : > { %vm5851_vm3 = vweird.f32 %v13459_v17  ;;  %v5992_v47 = vmul.f32 -0.001358992, %v12414_v38  ;;  %v12430_v13 = vsel %vm12406_vm5, %v13526_v63, %v5056_v44  ;;  %v13531_v33 = vand.u32 2147483647, %v13527_v36 }
 0x55b   : > { %v5210_v53 = vxor.u32 2147483648, %v5209_v15  ;;  %v6324_v30 = vadd.s32 4294967294, %v5349_v31  ;;  %v4910_v11 = vadd.f32 -0.4999988, %v4909_v10  ;;  %v12438_v34 = vand.u32 3, %v4922_v32 }
 0x55c   : > { %vm12434_vm14 = vcmp.le.f32.partialorder %v13531_v33, 0.7853982  ;;  %v5057_v3 = vsub.s32 4, %v12277_v6  ;;  %v5861_v27 = vsel %vm5854_vm10, %v5857_v61, %v5860_v41  ;;  %v4918_v49 = vmul.f32 %v4917_v25, %v12359_v28 }
 0x55d   : > { %v5211_v22 = vsel %vm5090_vm2, %v5210_v53, %v5209_v15  ;;  %v5215_v51 = vsel %vm12434_vm14, 0, %v5213_v2  ;;  %vm6325_vm11 = vcmp.lt.s32.totalorder %v6324_v30, 0  ;;  %v12452_v57 = vmul.f32 %v12430_v13, %v12430_v13 }
 0x55e   : > { %v12457_v42 = vsel %vm12434_vm14, %v13527_v36, %v5211_v22  ;;  %v5337_v18 = vadd.s32 %v12302_v35, %v12297_v24  ;;  %v5993_v54 = vadd.f32 0.041655596, %v5992_v47  ;;  %v5352_v20 = vsel %vm6325_vm11, 0, %v6324_v30  ;;  %v12474_v24 = vpop.f32.mrf.mxu1  ;;  %v12496_v30 = vpop.permute.xlu1 %4576 }
 0x55f   : > { %v5216_v16 = vmul.f32 %v12457_v42, %v12457_v42  ;;  %v12467_v9 = vsel %vm5851_vm3, nan, %v5861_v27  ;;  %v5987_v58 = vsub.s32 4, %v11947_v12  ;;  %v12471_v7 = vadd.f32 %v4626_v62, %v12461_v39 }
 0x560   : > { %v4911_v60 = vmul.f32 %v4910_v11, %v12359_v28  ;;  %v5232_v35 = vadd.s32 3, %v5215_v51  ;;  %v5353_v56 = vsub.s32 32, %v5352_v20  ;;  %v4919_v45 = vadd.f32 1.0, %v4918_v49 }
 0x561   : > { %v5058_v21 = vsel %vm4935_vm12, %v5057_v3, %v12277_v6  ;;  %v5217_v50 = vmul.f32 -0.001358992, %v5216_v16  ;;  %v5224_v17 = vmul.f32 -0.00019511016, %v5216_v16  ;;  %vm4928_vm15 = vcmp.eq.s32.totalorder %v12438_v34, 2 }
 0x562   : > { %v5069_v32 = vmul.f32 -0.00019511016, %v12452_v57  ;;  %v5354_v62 = vshll.u32 %v12378_v48, %v5352_v20  ;;  %v5355_v55 = vshrl.u32 %v5337_v18, %v5353_v56  ;;  %v5994_v28 = vmul.f32 %v5993_v54, %v12414_v38  ;;  %v4632_v56 = vpop.f32.mrf.mxu0 }
 0x563   : > { %vm4925_vm4 = vcmp.eq.s32.totalorder %v12438_v34, 0  ;;  %v5218_v59 = vadd.f32 0.041655596, %v5217_v50  ;;  %v5225_v41 = vadd.f32 0.008332121, %v5224_v17  ;;  %v5357_v10 = vsub.s32 4294967266, %v5352_v20 }
 0x564   : > { %v5988_v6 = vsel %vm5865_vm7, %v5987_v58, %v11947_v12  ;;  %vm5245_vm12 = vcmp.lt.s32.totalorder %v13534_v5, 0  ;;  %v4912_v44 = vadd.f32 1.0, %v4911_v60  ;;  %v5060_v25 = vsel %vm12406_vm5, 0, %v5058_v21 }
 0x565   : > { %v5062_v48 = vmul.f32 -0.001358992, %v12452_v57  ;;  %v12491_v15 = vand.u32 3, %v5232_v35  ;;  %v4920_v31 = vmul.f32 %v4919_v45, %v12351_v19  ;;  %v5219_v61 = vmul.f32 %v5218_v59, %v5216_v16 }
 0x566   : > { %v5226_v2 = vmul.f32 %v5225_v41, %v5216_v16  ;;  %v5358_v47 = vadd.s32 127, %v5357_v10  ;;  %vm4924_vm8 = vcmp.lt.s32.totalorder %v12438_v34, 2  ;;  %v5070_v33 = vadd.f32 0.008332121, %v5069_v32  ;;  %v12510_v51 = vpop.f32.mrf.mxu1 }
 0x567   : > { %v5356_v29 = vor.u32 %v5355_v55, %v5354_v62  ;;  %v5995_v12 = vadd.f32 -0.4999988, %v5994_v28  ;;  %v5999_v53 = vmul.f32 -0.00019511016, %v12414_v38  ;;  %v12498_v14 = vadd.s32 3, %v5060_v25 }
 0x568   : > { %v5220_v11 = vadd.f32 -0.4999988, %v5219_v61  ;;  %v5227_v3 = vadd.f32 -0.16666654, %v5226_v2  ;;  %v13535_v27 = vand.u32 2147483647, %v13534_v5  ;;  %v12507_v22 = vadd.f32 %v4629_v40, %v12496_v30 }
 0x569   : > { %v5359_v49 = vshll.u32 %v5358_v47, 23  ;;  %vm5235_vm6 = vcmp.eq.s32.totalorder %v12491_v15, 0  ;;  %v5367_v18 = vsub.s32 4, %v12364_v0  ;;  %v5990_v54 = vsel %vm12344_vm9, 0, %v5988_v6 }
 0x56a   : > { %vm12502_vm7 = vcmp.le.f32.partialorder %v13535_v27, 0.7853982  ;;  %v4926_v20 = vxor.u32 2147483648, %v4920_v31  ;;  %v4929_v58 = vxor.u32 2147483648, %v4912_v44  ;;  %v5221_v60 = vmul.f32 %v5220_v11, %v5216_v16 }
 0x56b   : > { %v5228_v35 = vmul.f32 %v5227_v3, %v5216_v16  ;;  %vm4921_vm2 = vweird.f32 %v13515_v26  ;;  %v5360_v45 = vor.u32 4788187, %v5359_v49  ;;  %v5363_v21 = vcvt.s32.f32 %v5356_v29  ;;  %v4635_v49 = vpop.f32.mrf.mxu0 }
 0x56c   : > { %v5996_v40 = vmul.f32 %v5995_v12, %v12414_v38  ;;  %v6000_v50 = vadd.f32 0.008332121, %v5999_v53  ;;  %v5063_v17 = vadd.f32 0.041655596, %v5062_v48  ;;  %v5071_v32 = vmul.f32 %v5070_v33, %v12452_v57 }
 0x56d   : > { %v5222_v62 = vadd.f32 1.0, %v5221_v60  ;;  %v5229_v55 = vadd.f32 1.0, %v5228_v35  ;;  %vm5231_vm13 = vweird.f32 %v13527_v36  ;;  %vm5238_vm9 = vcmp.eq.s32.totalorder %v12491_v15, 2 }
 0x56e   : > { %v5361_v23 = vand.u32 2147483647, %v5360_v45  ;;  %v6001_v16 = vmul.f32 %v6000_v50, %v12414_v38  ;;  %v6007_v28 = vadd.s32 3, %v5990_v54  ;;  %v4930_v59 = vsel %vm4928_vm15, %v4929_v58, %v4920_v31  ;;  %v4664_v53 = vpop.f32.mrf.mxu1 }
 0x56f   : > { %v5230_v41 = vmul.f32 %v5229_v55, %v12457_v42  ;;  %v5239_v10 = vxor.u32 2147483648, %v5222_v62  ;;  %v5368_v6 = vsel %vm5245_vm12, %v5367_v18, %v12364_v0  ;;  %v4927_v25 = vsel %vm4925_vm4, %v4912_v44, %v4926_v20 }
 0x570   : > { %v5364_v48 = vmul.f32 %v5363_v21, %v5361_v23  ;;  %v5997_v61 = vadd.f32 1.0, %v5996_v40  ;;  %v6002_v2 = vadd.f32 -0.16666654, %v6001_v16  ;;  %v5064_v47 = vmul.f32 %v5063_v17, %v12452_v57 }
 0x571   : > { %v5072_v33 = vadd.f32 -0.16666654, %v5071_v32  ;;  %v5236_v29 = vxor.u32 2147483648, %v5230_v41  ;;  %v6008_v12 = vand.u32 3, %v6007_v28  ;;  %vm5234_vm10 = vcmp.lt.s32.totalorder %v12491_v15, 2 }
 0x572   : > { %v5365_v31 = vxor.u32 2147483648, %v5364_v48  ;;  %v5370_v42 = vsel %vm12502_vm7, 0, %v5368_v6  ;;  %vm5696_vm5 = vweird.f32 %v13460_v37  ;;  %v6003_v0 = vmul.f32 %v6002_v2, %v12414_v38 }
 0x573   : > { %v4931_v44 = vsel %vm4924_vm8, %v4927_v25, %v4930_v59  ;;  %v5237_v11 = vsel %vm5235_vm6, %v5222_v62, %v5236_v29  ;;  %v5240_v3 = vsel %vm5238_vm9, %v5239_v10, %v5230_v41  ;;  %v4633_v27 = vadd.f32 %v4632_v56, %v12386_v46 }
 0x574   : > { %v5366_v18 = vsel %vm5245_vm12, %v5365_v31, %v5364_v48  ;;  %v4636_v54 = vadd.f32 %v4635_v49, %v12443_v4  ;;  %v6004_v20 = vadd.f32 1.0, %v6003_v0  ;;  %v6014_v58 = vxor.u32 2147483648, %v5997_v61  ;;  %v4592_v31 = vpop.permute.xlu1 %4591 }
 0x575   : > { %v5065_v38 = vadd.f32 -0.4999988, %v5064_v47  ;;  %v5073_v34 = vmul.f32 %v5072_v33, %v12452_v57  ;;  %v5369_v60 = vsel %vm12502_vm7, %v13534_v5, %v5366_v18  ;;  %vm6013_vm3 = vcmp.eq.s32.totalorder %v6008_v12, 2 }
 0x576   : > { %v5241_v35 = vsel %vm5234_vm10, %v5237_v11, %v5240_v3  ;;  %v5371_v56 = vmul.f32 %v5369_v60, %v5369_v60  ;;  %v6024_v45 = vmul.f32 %v12467_v9, %v4636_v54  ;;  %v6005_v21 = vmul.f32 %v6004_v20, %v12392_v1 }
 0x577   : > { %v4932_v40 = vsel %vm4921_vm2, nan, %v4931_v44  ;;  %v6022_v50 = vmul.f32 %v12111_v43, %v4633_v27  ;;  %vm6009_vm14 = vcmp.lt.s32.totalorder %v6008_v12, 2  ;;  %vm6010_vm11 = vcmp.eq.s32.totalorder %v6008_v12, 0  ;;  %v4667_v43 = vpop.f32.mrf.mxu1 }
 0x578   : > { %v5372_v17 = vmul.f32 -0.001358992, %v5371_v56  ;;  %v5379_v32 = vmul.f32 -0.00019511016, %v5371_v56  ;;  %v6011_v19 = vxor.u32 2147483648, %v6005_v21  ;;  %v6015_v62 = vsel %vm6013_vm3, %v6014_v58, %v6005_v21  ;;  %6048 = vmatpush.msra.mxu2 %v6024_v45 }
 0x579   : > { %v5066_v15 = vmul.f32 %v5065_v38, %v12452_v57  ;;  %v5074_v55 = vadd.f32 1.0, %v5073_v34  ;;  %v5242_v9 = vsel %vm5231_vm13, nan, %v5241_v35  ;;  %vm6006_vm15 = vweird.f32 %v13516_v8  ;;  %v6026_v8 = vld [vmem:[%s12625_s5] sm:$0x7] }
 0x57a   : > { %v6020_v26 = vmul.f32 %v5242_v9, %v12507_v22  ;;  %v5373_v1 = vadd.f32 0.041655596, %v5372_v17  ;;  %v5380_v23 = vadd.f32 0.008332121, %v5379_v32  ;;  %v6012_v16 = vsel %vm6010_vm11, %v5997_v61, %v6011_v19  ;;  %6049 = vmatpush.msra.mxu2 %v6022_v50 }
 0x57b   : > { %v5387_v28 = vadd.s32 3, %v5370_v42  ;;  %v4665_v59 = vadd.f32 %v4664_v53, %v12386_v46  ;;  %v4668_v41 = vadd.f32 %v4667_v43, %v12443_v4  ;;  %v6016_v57 = vsel %vm6009_vm14, %v6012_v16, %v6015_v62 }
 0x57c   : > { %v6018_v10 = vmul.f32 %v4932_v40, %v12471_v7  ;;  %v5374_v36 = vmul.f32 %v5373_v1, %v5371_v56  ;;  %v5381_v6 = vmul.f32 %v5380_v23, %v5371_v56  ;;  %v6017_v25 = vsel %vm6006_vm15, nan, %v6016_v57  ;;  %6050 = vmatpush.msra.mxu2 %v6020_v26 }
 0x57d   : > { %v5067_v22 = vadd.f32 1.0, %v5066_v15  ;;  %v5707_v48 = vsel %vm5696_vm5, nan, %v12423_v52  ;;  %v6025_v46 = vmul.f32 %v6017_v25, %v4668_v41  ;;  %v5075_v4 = vmul.f32 %v5074_v55, %v12430_v13  ;;  %v4638_v13 = vpop.f32.mrf.mxu0 }
 0x57e   : > { %v5078_v61 = vand.u32 3, %v12498_v14  ;;  %v5375_v2 = vadd.f32 -0.4999988, %v5374_v36  ;;  %v5382_v7 = vadd.f32 -0.16666654, %v5381_v6  ;;  %6051 = vmatpush.msra.mxu2 %v6018_v10  ;;  %v5388_v47 = vand.u32 3, %v5387_v28 }
 0x57f   : > { %v6023_v33 = vmul.f32 %v5707_v48, %v4665_v59  ;;  %6068 = vmatpush.msra.mxu3 %v6025_v46  ;;  %6338 = vmatmul.msk.f32.vlgmr.msra.gmra.mxu2 %vm1664_vm0, %v6026_v8  ;;  %v5084_v42 = vxor.u32 2147483648, %v5067_v22  ;;  %v5081_v37 = vxor.u32 2147483648, %v5075_v4  ;;  %v4670_v0 = vpop.f32.mrf.mxu1  ;;  %v4639_v27 = vadd.f32 %v4638_v13, %v4592_v31 }
 0x580   : > { %v5376_v29 = vmul.f32 %v5375_v2, %v5371_v56  ;;  %v5383_v12 = vmul.f32 %v5382_v7, %v5371_v56  ;;  %vm5083_vm4 = vcmp.eq.s32.totalorder %v5078_v61, 2  ;;  %vm5080_vm12 = vcmp.eq.s32.totalorder %v5078_v61, 0 }
 0x581   : > { %6069 = vmatpush.msra.mxu3 %v6023_v33  ;;  %vm5393_vm8 = vcmp.eq.s32.totalorder %v5388_v47, 2  ;;  %v4671_v14 = vadd.f32 %v4670_v0, %v4592_v31  ;;  %vm5079_vm7 = vcmp.lt.s32.totalorder %v5078_v61, 2  ;;  %v5085_v3 = vsel %vm5083_vm4, %v5084_v42, %v5075_v4 }
 0x582   : > { %v5377_v52 = vadd.f32 1.0, %v5376_v29  ;;  %v5384_v53 = vadd.f32 1.0, %v5383_v12  ;;  %vm5390_vm6 = vcmp.eq.s32.totalorder %v5388_v47, 0  ;;  %v5082_v18 = vsel %vm5080_vm12, %v5067_v22, %v5081_v37 }
 0x583   : > { %v4675_v49 = vrot.slane %v4671_v14, 4  ;;  %vm5389_vm2 = vcmp.lt.s32.totalorder %v5388_v47, 2  ;;  %v4662_v58 = vadd.f32 %v12510_v51, %v12496_v30  ;;  %vm5386_vm13 = vweird.f32 %v13534_v5 }
 0x584   : > { %v5385_v44 = vmul.f32 %v5384_v53, %v5369_v60  ;;  %v5394_v11 = vxor.u32 2147483648, %v5377_v52  ;;  %v4659_v60 = vadd.f32 %v12474_v24, %v12461_v39  ;;  %vm5076_vm9 = vweird.f32 %v13526_v63  ;;  %v6031_v39 = vpop.permute.xlu2 %6030 }
 0x585   : > { %v4676_v38 = vsel %vm3207_vm1, %v4639_v27, %v4675_v49  ;;  %v5086_v35 = vsel %vm5079_vm7, %v5082_v18, %v5085_v3 }
 0x586   : > { %v5391_v54 = vxor.u32 2147483648, %v5385_v44  ;;  %v5395_v20 = vsel %vm5393_vm8, %v5394_v11, %v5385_v44  ;;  %6305 = vst [vmem:[%s11838_s20 + $0x8] sm:$0x77] %v4676_v38  ;;  %v5087_v40 = vsel %vm5076_vm9, nan, %v5086_v35 }
 0x587   : > { %v6019_v30 = vmul.f32 %v5087_v40, %v4659_v60 }
 0x588   : > { %v5392_v34 = vsel %vm5390_vm6, %v5377_v52, %v5391_v54 }
 0x589   : > { %v5396_v56 = vsel %vm5389_vm2, %v5392_v34, %v5395_v20 }
 0x58a   : > { %v5397_v45 = vsel %vm5386_vm13, nan, %v5396_v56 }
 0x58b   : > { %v6021_v21 = vmul.f32 %v5397_v45, %v4662_v58 }
 0x58d   : > { %6070 = vmatpush.msra.mxu3 %v6021_v21 }
 0x58f   : > { %6071 = vmatpush.msra.mxu3 %v6019_v30 }
 0x590   : > { %6339 = vmatmul.msk.f32.vlgmr.msra.gmra.mxu3 %vm1664_vm0, %v6026_v8 }
 0x602   : > { %v6053_v63 = vpop.f32.mrf.mxu2 }
 0x603   : > { %v6054_v51 = vadd.f32 %v6053_v63, %v6031_v39 }
 0x613   : > { %v6073_v24 = vpop.f32.mrf.mxu3 }
 0x614   : > { %v6074_v5 = vadd.f32 %v6073_v24, %v6031_v39 }
 0x616   : > { %v6078_v50 = vrot.slane %v6074_v5, 4 }
 0x618   : > { %v6079_v17 = vsel %vm3207_vm1, %v6054_v51, %v6078_v50 }
 0x619   : > { %6340 = vst [vmem:[%s11838_s20 + $0x10] sm:$0x77] %v6079_v17 }
 0x61a   : > { %6458 = shalt.err (!%p6455_p3)
}
 0x61b   : > { %s6503_s18 = smov 128   ;;  %s6504_s20 = smov 512  }
 0x61c   : > { %s6505_s29 = smov 8  }
 0x61d   : > { %6355 = dma.vmem_to_hbm [thread:$0]  (%p6584_p5), %s6097_s13, 384, %s6099_s14, %s6084_s28, %s6503_s18, %s6504_s20, %s6505_s29  }
 0x61e PF: > { %p6361_p4 = scmp.ge.s32.totalorder %s6493_s27, 2  ;;  %s6113_s8 = sand.u32 1, %s6481_s24  }
 0x61f   : > { %s6114_s9 = scalar_lea.sflag [#allocation3], %s6113_s8 }
 0x620   : > { %p6358_p7 = pnand %p6361_p4, %p6588_p6 }
 0x622   : > { %p6359_p8 = pneg %p6358_p7 }
 0x624   : > { %6476 = dma.done.wait (%p6359_p8), %s6114_s9, 384  }
 0x625   : > { %6478 = vsyncadd (%p6359_p8), %s6114_s9, 4294966912  ;;  %p17_p9 = scmp.ge.s32.totalorder %s6571_s30, 6   ;;  %s13538_s24 = smov %s6485_s25 }
 0x626   : > { %s13539_s25 = smov %s6489_s26  ;;  %s13540_s26 = smov %s6582_s10 }
 0x627   : > { %s13541_s27 = smov %s6571_s30  ;;  %19 = sbr.rel (!%p17_p9) target bundleno = 3 (0x3), region = 95 }
 0x62c   :  { %6120 = vsyncpa [#allocation3], 1 }
 0x62d   :  { %6122 = vsyncpa [#allocation3 + $0x1], 1 }

</bundles_post_ra>
